<compile_context>
chip_gen: v6e
topology: v6e:2x2x1
jax: 0.10.0
libtpu: 0.0.40
codegen_flags: <defaults>
</compile_context>

<pallas_src>
import functools
import math

import jax
import jax.numpy as jnp
from jax.experimental import pallas as pl
from jax.experimental.pallas import tpu as pltpu


_EPS = 1e-5
_COMPILER_PARAMS = pltpu.CompilerParams(dimension_semantics=("parallel",))


# ----------------------------------------------------------------------------
# In-kernel helpers
# ----------------------------------------------------------------------------
def _ln(y, g, b, eps):
    mean = jnp.mean(y, axis=-1, keepdims=True)
    var = jnp.mean((y - mean) ** 2, axis=-1, keepdims=True)
    return (y - mean) * jax.lax.rsqrt(var + eps) * g + b


def _mha_heads(q, k, v, nhead):
    """q: (Lq, D) (already scaled via folded weights), k/v: (Lk, D).  Head-batched
    attention: one batched QK^T, one batched PV, softmax in f32."""
    lq, d = q.shape
    lk = k.shape[0]
    dh = d // nhead
    qh = q.reshape(lq, nhead, dh).astype(jnp.bfloat16)
    kh = k.reshape(lk, nhead, dh).astype(jnp.bfloat16)
    vh = v.reshape(lk, nhead, dh).astype(jnp.bfloat16)
    s = jnp.einsum("qhd,khd->hqk", qh, kh,
                   preferred_element_type=jnp.float32)           # (H, Lq, Lk) f32
    s = s - jnp.max(s, axis=-1, keepdims=True)
    p = jnp.exp(s)
    p = p / jnp.sum(p, axis=-1, keepdims=True)
    o = jnp.einsum("hqk,khd->qhd", p.astype(jnp.bfloat16), vh,
                   preferred_element_type=jnp.float32)           # (Lq, H, dh) f32
    return o.reshape(lq, d)


# ----------------------------------------------------------------------------
# Fused whole-stack kernels (one grid step == one batch element)
# ----------------------------------------------------------------------------
def _encoder_stack_kernel(src_ref, pos_ref, wqk_ref, wdd_ref, w1_ref, w2_ref,
                          bqk_ref, b1_ref, bD_ref, ln_ref, fnorm_ref, o_ref,
                          *, num_layers, nhead, eps):
    """Full encoder stack for one batch element.
    wdd[l]: [0]=W_v, [1]=W_o.  bD[l]: [0]=b_v, [1]=b_o, [2]=b2.
    ln[l]: [n1w, n1b, n2w, n2b]."""
    x = src_ref[...]                                 # (HW, D) f32
    pos = pos_ref[...]
    d = x.shape[1]
    for l in range(num_layers):
        # --- self-attention (q = k = x + pos, v = x) ---
        xp = (x + pos).astype(jnp.bfloat16)
        qk = jnp.dot(xp, wqk_ref[l],
                     preferred_element_type=jnp.float32) + bqk_ref[l:l + 1, :]
        v = jnp.dot(x.astype(jnp.bfloat16), wdd_ref[l, 0],
                    preferred_element_type=jnp.float32) + bD_ref[l, 0:1, :]
        attn = _mha_heads(qk[:, :d], qk[:, d:], v, nhead)
        attn = jnp.dot(attn.astype(jnp.bfloat16), wdd_ref[l, 1],
                       preferred_element_type=jnp.float32) + bD_ref[l, 1:2, :]
        x = _ln(x + attn, ln_ref[l, 0:1, :], ln_ref[l, 1:2, :], eps)
        # --- FFN ---
        h = jnp.maximum(
            jnp.dot(x.astype(jnp.bfloat16), w1_ref[l],
                    preferred_element_type=jnp.float32) + b1_ref[l:l + 1, :], 0.0)
        y = jnp.dot(h.astype(jnp.bfloat16), w2_ref[l],
                    preferred_element_type=jnp.float32) + bD_ref[l, 2:3, :]
        x = _ln(x + y, ln_ref[l, 2:3, :], ln_ref[l, 3:4, :], eps)
    o_ref[...] = _ln(x, fnorm_ref[0:1, :], fnorm_ref[1:2, :], eps)


def _decoder_stack_kernel(mem_ref, pos_ref, query_ref, sa_wqk_ref, wdd_ref,
                          w1_ref, w2_ref, sa_bqk_ref, b1_ref, bD_ref, ln_ref,
                          fnorm_ref, o_ref, *, num_layers, nhead, eps):
    """Full decoder stack for one batch element.
    wdd[l]: [0]=sa_Wv, [1]=sa_Wo, [2]=ca_Wq, [3]=ca_Wk, [4]=ca_Wv, [5]=ca_Wo.
    bD[l]:  [0]=sa_bv, [1]=sa_bo, [2]=ca_bq, [3]=ca_bk, [4]=ca_bv, [5]=ca_bo, [6]=b2.
    ln[l]:  [n1w, n1b, n2w, n2b, n3w, n3b]."""
    mem = mem_ref[...]                               # (HW, D) f32
    pos = pos_ref[...]
    qpos = query_ref[...]                            # (NQ, D) f32
    nq, d = qpos.shape
    mem_bf = mem.astype(jnp.bfloat16)                # cross-attn V input
    memp_bf = (mem + pos).astype(jnp.bfloat16)       # cross-attn K input (layer-invariant)
    x = jnp.zeros((nq, d), jnp.float32)              # tgt = zeros_like(query_embed)
    for l in range(num_layers):
        # --- self-attention (q = k = x + query_pos, v = x) ---
        xp = (x + qpos).astype(jnp.bfloat16)
        qk = jnp.dot(xp, sa_wqk_ref[l],
                     preferred_element_type=jnp.float32) + sa_bqk_ref[l:l + 1, :]
        v = jnp.dot(x.astype(jnp.bfloat16), wdd_ref[l, 0],
                    preferred_element_type=jnp.float32) + bD_ref[l, 0:1, :]
        attn = _mha_heads(qk[:, :d], qk[:, d:], v, nhead)
        attn = jnp.dot(attn.astype(jnp.bfloat16), wdd_ref[l, 1],
                       preferred_element_type=jnp.float32) + bD_ref[l, 1:2, :]
        x = _ln(x + attn, ln_ref[l, 0:1, :], ln_ref[l, 1:2, :], eps)
        # --- cross-attention (q = x + query_pos, k = memory + pos, v = memory) ---
        q_in = (x + qpos).astype(jnp.bfloat16)
        q = jnp.dot(q_in, wdd_ref[l, 2],
                    preferred_element_type=jnp.float32) + bD_ref[l, 2:3, :]
        k = jnp.dot(memp_bf, wdd_ref[l, 3],
                    preferred_element_type=jnp.float32) + bD_ref[l, 3:4, :]
        v = jnp.dot(mem_bf, wdd_ref[l, 4],
                    preferred_element_type=jnp.float32) + bD_ref[l, 4:5, :]
        attn = _mha_heads(q, k, v, nhead)
        attn = jnp.dot(attn.astype(jnp.bfloat16), wdd_ref[l, 5],
                       preferred_element_type=jnp.float32) + bD_ref[l, 5:6, :]
        x = _ln(x + attn, ln_ref[l, 2:3, :], ln_ref[l, 3:4, :], eps)
        # --- FFN ---
        h = jnp.maximum(
            jnp.dot(x.astype(jnp.bfloat16), w1_ref[l],
                    preferred_element_type=jnp.float32) + b1_ref[l:l + 1, :], 0.0)
        y = jnp.dot(h.astype(jnp.bfloat16), w2_ref[l],
                    preferred_element_type=jnp.float32) + bD_ref[l, 6:7, :]
        x = _ln(x + y, ln_ref[l, 4:5, :], ln_ref[l, 5:6, :], eps)
    o_ref[...] = _ln(x, fnorm_ref[0:1, :], fnorm_ref[1:2, :], eps)


# ----------------------------------------------------------------------------
# pallas_call wrappers
# ----------------------------------------------------------------------------
def _full_spec(a):
    n = a.ndim
    return pl.BlockSpec(a.shape, lambda b, _n=n: (0,) * _n)   # resident across the grid


def encoder_stack(src, pos, p, *, bs, hw, nhead, num_layers):
    n, d = src.shape
    tok = pl.BlockSpec((hw, d), lambda b: (b, 0))
    weights = [p["wqk"], p["wdd"], p["w1"], p["w2"],
               p["bqk"], p["b1"], p["bD"], p["ln"], p["fnorm"]]
    kern = functools.partial(_encoder_stack_kernel,
                             num_layers=num_layers, nhead=nhead, eps=_EPS)
    return pl.pallas_call(
        kern,
        grid=(bs,),
        in_specs=[tok, tok] + [_full_spec(w) for w in weights],
        out_specs=pl.BlockSpec((hw, d), lambda b: (b, 0)),
        out_shape=jax.ShapeDtypeStruct((n, d), jnp.float32),
        compiler_params=_COMPILER_PARAMS,
    )(src, pos, *weights)


def decoder_stack(memory, pos, jv_tokens, p, *, bs, hw, nq, nhead, num_layers):
    n, d = memory.shape
    tok = pl.BlockSpec((hw, d), lambda b: (b, 0))
    qspec = pl.BlockSpec((nq, d), lambda b: (0, 0))   # same query tokens for every batch
    weights = [p["sa_wqk"], p["wdd"], p["w1"], p["w2"],
               p["sa_bqk"], p["b1"], p["bD"], p["ln"], p["fnorm"]]
    kern = functools.partial(_decoder_stack_kernel,
                             num_layers=num_layers, nhead=nhead, eps=_EPS)
    return pl.pallas_call(
        kern,
        grid=(bs,),
        in_specs=[tok, tok, qspec] + [_full_spec(w) for w in weights],
        out_specs=pl.BlockSpec((nq, d), lambda b: (b, 0)),
        out_shape=jax.ShapeDtypeStruct((bs * nq, d), jnp.float32),
        compiler_params=_COMPILER_PARAMS,
    )(memory, pos, jv_tokens, *weights)


# ----------------------------------------------------------------------------
# Full Transformer_QS forward (internal layout: batch-major flat tokens (B*L, D))
# ----------------------------------------------------------------------------
def transformer_qs_forward(enc_p, dec_p, img_features, jv_tokens, pos_embed,
                           *, nhead, num_enc, num_dec):
    """img_features/pos_embed: (HW, B, C); jv_tokens: (NQ, C).
    Returns (hs.transpose(1,2), memory.transpose(0,1)) like the PyTorch module:
    shapes (1, B, NQ, C) and (B, HW, C).  key_padding_mask is all-False -> omitted."""
    hw, bs, c = img_features.shape
    nq = jv_tokens.shape[0]

    src = img_features.transpose(1, 0, 2).reshape(bs * hw, c)
    pos = pos_embed.transpose(1, 0, 2).reshape(bs * hw, c)

    memory = encoder_stack(src, pos, enc_p, bs=bs, hw=hw, nhead=nhead, num_layers=num_enc)
    hs_flat = decoder_stack(memory, pos, jv_tokens, dec_p,
                            bs=bs, hw=hw, nq=nq, nhead=nhead, num_layers=num_dec)

    hs = hs_flat.reshape(bs, nq, c)[None]            # (1, B, NQ, C)
    return hs, memory.reshape(bs, hw, c)             # (1,B,NQ,C), (B,HW,C)


# ----------------------------------------------------------------------------
# Parameter init (torch layout) + one-time prep into packed kernel layout
# (pre-transposed, bf16 matmul weights, scale folded into Q, stacked per-layer).
# ----------------------------------------------------------------------------
def _xavier(key, shape):
    fan_out, fan_in = shape
    a = math.sqrt(6.0 / (fan_in + fan_out))
    return jax.random.uniform(key, shape, jnp.float32, -a, a)


def _init_mha(key, d):
    k1, k2 = jax.random.split(key)
    return dict(
        in_proj_weight=_xavier(k1, (3 * d, d)),
        in_proj_bias=jnp.zeros((3 * d,), jnp.float32),
        out_proj_weight=_xavier(k2, (d, d)),
        out_proj_bias=jnp.zeros((d,), jnp.float32),
    )


def _init_enc_layer(key, d, ffn):
    ks = jax.random.split(key, 3)
    return dict(
        self_attn=_init_mha(ks[0], d),
        linear1_w=_xavier(ks[1], (ffn, d)), linear1_b=jnp.zeros((ffn,), jnp.float32),
        linear2_w=_xavier(ks[2], (d, ffn)), linear2_b=jnp.zeros((d,), jnp.float32),
        norm1_w=jnp.ones((d,), jnp.float32), norm1_b=jnp.zeros((d,), jnp.float32),
        norm2_w=jnp.ones((d,), jnp.float32), norm2_b=jnp.zeros((d,), jnp.float32),
    )


def _init_dec_layer(key, d, ffn):
    ks = jax.random.split(key, 4)
    return dict(
        self_attn=_init_mha(ks[0], d),
        cross_attn=_init_mha(ks[1], d),
        linear1_w=_xavier(ks[2], (ffn, d)), linear1_b=jnp.zeros((ffn,), jnp.float32),
        linear2_w=_xavier(ks[3], (d, ffn)), linear2_b=jnp.zeros((d,), jnp.float32),
        norm1_w=jnp.ones((d,), jnp.float32), norm1_b=jnp.zeros((d,), jnp.float32),
        norm2_w=jnp.ones((d,), jnp.float32), norm2_b=jnp.zeros((d,), jnp.float32),
        norm3_w=jnp.ones((d,), jnp.float32), norm3_b=jnp.zeros((d,), jnp.float32),
    )


def init_params(key, d, ffn, num_enc, num_dec):
    keys = jax.random.split(key, num_enc + num_dec)
    return dict(
        encoder_layers=[_init_enc_layer(keys[i], d, ffn) for i in range(num_enc)],
        decoder_layers=[_init_dec_layer(keys[num_enc + i], d, ffn) for i in range(num_dec)],
        encoder_norm_w=jnp.ones((d,), jnp.float32),
        encoder_norm_b=jnp.zeros((d,), jnp.float32),
        decoder_norm_w=jnp.ones((d,), jnp.float32),
        decoder_norm_b=jnp.zeros((d,), jnp.float32),
    )


def _prep_mha(sa, d, nhead):
    """torch MHA params -> (wq*scale, bq*scale, wk, bk, wv, bv, wo, bo) in x@W layout."""
    scale = 1.0 / math.sqrt(d // nhead)
    wt = sa["in_proj_weight"].T                      # (D, 3D)
    bi = sa["in_proj_bias"]
    return (wt[:, :d] * scale, bi[:d] * scale,
            wt[:, d:2 * d], bi[d:2 * d],
            wt[:, 2 * d:], bi[2 * d:],
            sa["out_proj_weight"].T, sa["out_proj_bias"])


def _bf16(xs):
    return jnp.stack(xs).astype(jnp.bfloat16)


def _f32(xs):
    return jnp.stack(xs).astype(jnp.float32)


def prepare_encoder_params(raw, d, nhead):
    wqk, wdd, w1, w2, bqk, b1, bD, ln = [], [], [], [], [], [], [], []
    for p in raw["encoder_layers"]:
        wq, bq, wk, bk, wv, bv, wo, bo = _prep_mha(p["self_attn"], d, nhead)
        wqk.append(jnp.concatenate([wq, wk], axis=1))
        bqk.append(jnp.concatenate([bq, bk]))
        wdd.append(jnp.stack([wv, wo]))
        w1.append(p["linear1_w"].T)
        b1.append(p["linear1_b"])
        w2.append(p["linear2_w"].T)
        bD.append(jnp.stack([bv, bo, p["linear2_b"]]))
        ln.append(jnp.stack([p["norm1_w"], p["norm1_b"], p["norm2_w"], p["norm2_b"]]))
    return dict(wqk=_bf16(wqk), wdd=_bf16(wdd), w1=_bf16(w1), w2=_bf16(w2),
                bqk=_f32(bqk), b1=_f32(b1), bD=_f32(bD), ln=_f32(ln),
                fnorm=jnp.stack([raw["encoder_norm_w"], raw["encoder_norm_b"]]))


def prepare_decoder_params(raw, d, nhead):
    sa_wqk, wdd, w1, w2, sa_bqk, b1, bD, ln = [], [], [], [], [], [], [], []
    for p in raw["decoder_layers"]:
        swq, sbq, swk, sbk, swv, sbv, swo, sbo = _prep_mha(p["self_attn"], d, nhead)
        cwq, cbq, cwk, cbk, cwv, cbv, cwo, cbo = _prep_mha(p["cross_attn"], d, nhead)
        sa_wqk.append(jnp.concatenate([swq, swk], axis=1))
        sa_bqk.append(jnp.concatenate([sbq, sbk]))
        wdd.append(jnp.stack([swv, swo, cwq, cwk, cwv, cwo]))
        w1.append(p["linear1_w"].T)
        b1.append(p["linear1_b"])
        w2.append(p["linear2_w"].T)
        bD.append(jnp.stack([sbv, sbo, cbq, cbk, cbv, cbo, p["linear2_b"]]))
        ln.append(jnp.stack([p["norm1_w"], p["norm1_b"], p["norm2_w"], p["norm2_b"],
                             p["norm3_w"], p["norm3_b"]]))
    return dict(sa_wqk=_bf16(sa_wqk), wdd=_bf16(wdd), w1=_bf16(w1), w2=_bf16(w2),
                sa_bqk=_f32(sa_bqk), b1=_f32(b1), bD=_f32(bD), ln=_f32(ln),
                fnorm=jnp.stack([raw["decoder_norm_w"], raw["decoder_norm_b"]]))


# ----------------------------------------------------------------------------
# Pure-JAX f32 reference (torch-faithful, seq-major) for a correctness check
# ----------------------------------------------------------------------------
def _ref_ln(x, g, b, eps=_EPS):
    m = x.mean(-1, keepdims=True)
    v = ((x - m) ** 2).mean(-1, keepdims=True)
    return (x - m) / jnp.sqrt(v + eps) * g + b


def _ref_mha(q, k, v, p, nhead):
    lq, b, d = q.shape
    lk = k.shape[0]
    dh = d // nhead
    w, bi = p["in_proj_weight"], p["in_proj_bias"]
    qp = q @ w[:d].T + bi[:d]
    kp = k @ w[d:2 * d].T + bi[d:2 * d]
    vp = v @ w[2 * d:].T + bi[2 * d:]
    split = lambda x, l: x.reshape(l, b * nhead, dh).transpose(1, 0, 2)
    qh, kh, vh = split(qp, lq), split(kp, lk), split(vp, lk)
    s = jnp.einsum("bqd,bkd->bqk", qh, kh) / math.sqrt(dh)
    o = jnp.einsum("bqk,bkd->bqd", jax.nn.softmax(s, axis=-1), vh)
    o = o.transpose(1, 0, 2).reshape(lq, b, d)
    return o @ p["out_proj_weight"].T + p["out_proj_bias"]


def reference_forward(raw, img_features, jv_tokens, pos_embed, nhead):
    hw, bs, c = img_features.shape
    query = jnp.tile(jv_tokens[:, None, :], (1, bs, 1))
    mem = img_features
    for p in raw["encoder_layers"]:
        qk = mem + pos_embed
        mem = _ref_ln(mem + _ref_mha(qk, qk, mem, p["self_attn"], nhead),
                      p["norm1_w"], p["norm1_b"])
        h = jax.nn.relu(mem @ p["linear1_w"].T + p["linear1_b"])
        mem = _ref_ln(mem + h @ p["linear2_w"].T + p["linear2_b"],
                      p["norm2_w"], p["norm2_b"])
    mem = _ref_ln(mem, raw["encoder_norm_w"], raw["encoder_norm_b"])
    out = jnp.zeros_like(query)
    for p in raw["decoder_layers"]:
        qk = out + query
        out = _ref_ln(out + _ref_mha(qk, qk, out, p["self_attn"], nhead),
                      p["norm1_w"], p["norm1_b"])
        out = _ref_ln(out + _ref_mha(out + query, mem + pos_embed, mem,
                                     p["cross_attn"], nhead),
                      p["norm2_w"], p["norm2_b"])
        h = jax.nn.relu(out @ p["linear1_w"].T + p["linear1_b"])
        out = _ref_ln(out + h @ p["linear2_w"].T + p["linear2_b"],
                      p["norm3_w"], p["norm3_b"])
    out = _ref_ln(out, raw["decoder_norm_w"], raw["decoder_norm_b"])
    return out[None].transpose(0, 2, 1, 3), mem.transpose(1, 0, 2)


# ----------------------------------------------------------------------------
if __name__ == "__main__":
    d_model, nhead, ffn = 32, 4, 64
    num_enc, num_dec = 2, 2
    hw, bs, nq = 16, 2, 8        # hw = flattened spatial, bs = batch, nq = jv tokens

    root = jax.random.PRNGKey(0)
    kp, k1, k2, k3 = jax.random.split(root, 4)
    raw_params = init_params(kp, d_model, ffn, num_enc, num_dec)
    enc_p = prepare_encoder_params(raw_params, d_model, nhead)   # one-time prep, outside jit
    dec_p = prepare_decoder_params(raw_params, d_model, nhead)

    img_features = jax.random.normal(k1, (hw, bs, d_model), jnp.float32)
    jv_tokens = jax.random.normal(k2, (nq, d_model), jnp.float32)
    pos_embed = jax.random.normal(k3, (hw, bs, d_model), jnp.float32)

    fwd = jax.jit(functools.partial(transformer_qs_forward, nhead=nhead,
                                    num_enc=num_enc, num_dec=num_dec))
    hs, memory = fwd(enc_p, dec_p, img_features, jv_tokens, pos_embed)
    jax.block_until_ready((hs, memory))

    assert hs.shape == (1, bs, nq, d_model), hs.shape
    assert memory.shape == (bs, hw, d_model), memory.shape
    assert bool(jnp.isfinite(hs).all()) and bool(jnp.isfinite(memory).all())

    # Correctness vs. pure-JAX f32 reference (kernel uses bf16 matmul inputs, f32 softmax/LN).
    hs_ref, mem_ref = jax.jit(functools.partial(reference_forward, nhead=nhead))(
        raw_params, img_features, jv_tokens, pos_embed)
    jax.block_until_ready((hs_ref, mem_ref))
    hs_err = float(jnp.max(jnp.abs(hs - hs_ref)))
    mem_err = float(jnp.max(jnp.abs(memory - mem_ref)))
    assert hs_err < 0.15 and mem_err < 0.15, (hs_err, mem_err)

    # TODO(synk): dropout layers are identity (eval mode); training-time dropout not modeled.
    print("KERNEL_OK")
</pallas_src>

<mosaic_0001>
module attributes {stable_mosaic.version = 11 : i64} {
  func.func @_encoder_stack_kernel(%arg0: i32, %arg1: memref<16x32xf32, #tpu.memory_space<vmem>>, %arg2: memref<16x32xf32, #tpu.memory_space<vmem>>, %arg3: memref<2x32x64xbf16, #tpu.memory_space<vmem>>, %arg4: memref<2x2x32x32xbf16, #tpu.memory_space<vmem>>, %arg5: memref<2x32x64xbf16, #tpu.memory_space<vmem>>, %arg6: memref<2x64x32xbf16, #tpu.memory_space<vmem>>, %arg7: memref<2x64xf32, #tpu.memory_space<vmem>>, %arg8: memref<2x64xf32, #tpu.memory_space<vmem>>, %arg9: memref<2x3x32xf32, #tpu.memory_space<vmem>>, %arg10: memref<2x4x32xf32, #tpu.memory_space<vmem>>, %arg11: memref<2x32xf32, #tpu.memory_space<vmem>>, %arg12: memref<16x32xf32, #tpu.memory_space<vmem>>) attributes {dimension_semantics = [#tpu.dimension_semantics<parallel>], iteration_bounds = array<i64: 2>, scalar_prefetch = 0 : i64, scratch_operands = 0 : i64, tpu.core_type = #tpu.core_type<tc>, window_params = [{transform_indices = @transform_0, window_bounds = array<i64: 16, 32>}, {transform_indices = @transform_1, window_bounds = array<i64: 16, 32>}, {pipeline_mode = #tpu.pipeline_mode<synchronous>, transform_indices = @transform_2, window_bounds = array<i64: 2, 32, 64>}, {pipeline_mode = #tpu.pipeline_mode<synchronous>, transform_indices = @transform_3, window_bounds = array<i64: 2, 2, 32, 32>}, {pipeline_mode = #tpu.pipeline_mode<synchronous>, transform_indices = @transform_4, window_bounds = array<i64: 2, 32, 64>}, {pipeline_mode = #tpu.pipeline_mode<synchronous>, transform_indices = @transform_5, window_bounds = array<i64: 2, 64, 32>}, {pipeline_mode = #tpu.pipeline_mode<synchronous>, transform_indices = @transform_6, window_bounds = array<i64: 2, 64>}, {pipeline_mode = #tpu.pipeline_mode<synchronous>, transform_indices = @transform_7, window_bounds = array<i64: 2, 64>}, {pipeline_mode = #tpu.pipeline_mode<synchronous>, transform_indices = @transform_8, window_bounds = array<i64: 2, 3, 32>}, {pipeline_mode = #tpu.pipeline_mode<synchronous>, transform_indices = @transform_9, window_bounds = array<i64: 2, 4, 32>}, {pipeline_mode = #tpu.pipeline_mode<synchronous>, transform_indices = @transform_10, window_bounds = array<i64: 2, 32>}, {transform_indices = @transform_11, window_bounds = array<i64: 16, 32>}]} {
    %c0 = arith.constant 0 : index
    %c0_0 = arith.constant 0 : index
    %0 = vector.load %arg1[%c0, %c0_0] : memref<16x32xf32, #tpu.memory_space<vmem>>, vector<16x32xf32>
    %c0_1 = arith.constant 0 : index
    %c0_2 = arith.constant 0 : index
    %1 = vector.load %arg2[%c0_1, %c0_2] : memref<16x32xf32, #tpu.memory_space<vmem>>, vector<16x32xf32>
    %2 = arith.addf %0, %1 : vector<16x32xf32>
    %3 = arith.truncf %2 : vector<16x32xf32> to vector<16x32xbf16>
    %c0_3 = arith.constant 0 : index
    %c0_4 = arith.constant 0 : index
    %c0_5 = arith.constant 0 : index
    %4 = vector.load %arg3[%c0_3, %c0_4, %c0_5] : memref<2x32x64xbf16, #tpu.memory_space<vmem>>, vector<1x32x64xbf16>
    %5 = vector.shape_cast %4 : vector<1x32x64xbf16> to vector<32x64xbf16>
    %cst = arith.constant dense<0.000000e+00> : vector<16x64xf32>
    %6 = tpu.matmul %3, %5, %cst {dimension_numbers = #tpu.dot_dimension_numbers<[1], [0], [0], [1], [0, 0, 1, 1], [], []>} : vector<16x32xbf16>, vector<32x64xbf16>, vector<16x64xf32> -> vector<16x64xf32>
    %c0_6 = arith.constant 0 : index
    %c0_7 = arith.constant 0 : index
    %7 = vector.load %arg7[%c0_6, %c0_7] : memref<2x64xf32, #tpu.memory_space<vmem>>, vector<1x64xf32>
    %8 = vector.broadcast %7 : vector<1x64xf32> to vector<16x64xf32>
    %9 = arith.addf %6, %8 : vector<16x64xf32>
    %10 = arith.truncf %0 : vector<16x32xf32> to vector<16x32xbf16>
    %c0_8 = arith.constant 0 : index
    %c0_9 = arith.constant 0 : index
    %c0_10 = arith.constant 0 : index
    %c0_11 = arith.constant 0 : index
    %11 = vector.load %arg4[%c0_8, %c0_9, %c0_10, %c0_11] : memref<2x2x32x32xbf16, #tpu.memory_space<vmem>>, vector<1x1x32x32xbf16>
    %12 = vector.shape_cast %11 : vector<1x1x32x32xbf16> to vector<32x32xbf16>
    %cst_12 = arith.constant dense<0.000000e+00> : vector<16x32xf32>
    %13 = tpu.matmul %10, %12, %cst_12 {dimension_numbers = #tpu.dot_dimension_numbers<[1], [0], [0], [1], [0, 0, 1, 1], [], []>} : vector<16x32xbf16>, vector<32x32xbf16>, vector<16x32xf32> -> vector<16x32xf32>
    %c0_13 = arith.constant 0 : index
    %c0_14 = arith.constant 0 : index
    %c0_15 = arith.constant 0 : index
    %14 = vector.load %arg9[%c0_13, %c0_14, %c0_15] : memref<2x3x32xf32, #tpu.memory_space<vmem>>, vector<1x1x32xf32>
    %15 = vector.shape_cast %14 : vector<1x1x32xf32> to vector<1x32xf32>
    %16 = vector.broadcast %15 : vector<1x32xf32> to vector<16x32xf32>
    %17 = arith.addf %13, %16 : vector<16x32xf32>
    %18 = vector.extract_strided_slice %9 {offsets = [0, 0], sizes = [16, 32], strides = [1, 1]} : vector<16x64xf32> to vector<16x32xf32>
    %19 = vector.extract_strided_slice %9 {offsets = [0, 32], sizes = [16, 32], strides = [1, 1]} : vector<16x64xf32> to vector<16x32xf32>
    %20 = vector.shape_cast %18 : vector<16x32xf32> to vector<16x4x8xf32>
    %21 = arith.truncf %20 : vector<16x4x8xf32> to vector<16x4x8xbf16>
    %22 = vector.shape_cast %19 : vector<16x32xf32> to vector<16x4x8xf32>
    %23 = arith.truncf %22 : vector<16x4x8xf32> to vector<16x4x8xbf16>
    %24 = vector.shape_cast %17 : vector<16x32xf32> to vector<16x4x8xf32>
    %25 = arith.truncf %24 : vector<16x4x8xf32> to vector<16x4x8xbf16>
    "tpu.trace_start"() <{level = 10 : i32, message = "qhd,khd->hqk"}> : () -> ()
    %cst_16 = arith.constant dense<0.000000e+00> : vector<4x16x16xf32>
    %26 = tpu.matmul %21, %23, %cst_16 {dimension_numbers = #tpu.dot_dimension_numbers<[2], [2], [0], [0], [0, 1, 0, 0, 1, 0], [1], [1]>} : vector<16x4x8xbf16>, vector<16x4x8xbf16>, vector<4x16x16xf32> -> vector<4x16x16xf32>
    "tpu.trace_stop"() : () -> ()
    %cst_17 = arith.constant dense<0xFF800000> : vector<4x16xf32>
    %27 = vector.multi_reduction <maximumf>, %26, %cst_17 [2] : vector<4x16x16xf32> to vector<4x16xf32>
    %28 = vector.shape_cast %27 : vector<4x16xf32> to vector<4x16x1xf32>
    %29 = vector.broadcast %28 : vector<4x16x1xf32> to vector<4x16x16xf32>
    %30 = arith.subf %26, %29 : vector<4x16x16xf32>
    %31 = math.exp %30 : vector<4x16x16xf32>
    %cst_18 = arith.constant dense<0.000000e+00> : vector<4x16xf32>
    %32 = vector.multi_reduction <add>, %31, %cst_18 [2] : vector<4x16x16xf32> to vector<4x16xf32>
    %33 = vector.shape_cast %32 : vector<4x16xf32> to vector<4x16x1xf32>
    %34 = vector.broadcast %33 : vector<4x16x1xf32> to vector<4x16x16xf32>
    %35 = arith.divf %31, %34 : vector<4x16x16xf32>
    %36 = arith.truncf %35 : vector<4x16x16xf32> to vector<4x16x16xbf16>
    "tpu.trace_start"() <{level = 10 : i32, message = "hqk,khd->qhd"}> : () -> ()
    %cst_19 = arith.constant dense<0.000000e+00> : vector<4x8x16xf32>
    %37 = tpu.matmul %25, %36, %cst_19 {dimension_numbers = #tpu.dot_dimension_numbers<[0], [2], [2], [1], [0, 1, 0, 2, 1, 1], [1], [0]>} : vector<16x4x8xbf16>, vector<4x16x16xbf16>, vector<4x8x16xf32> -> vector<4x8x16xf32>
    %38 = tpu.transpose %37, [2, 0, 1] : vector<4x8x16xf32> -> vector<16x4x8xf32>
    "tpu.trace_stop"() : () -> ()
    %39 = vector.shape_cast %38 : vector<16x4x8xf32> to vector<16x32xf32>
    %40 = arith.truncf %39 : vector<16x32xf32> to vector<16x32xbf16>
    %c0_20 = arith.constant 0 : index
    %c1 = arith.constant 1 : index
    %c0_21 = arith.constant 0 : index
    %c0_22 = arith.constant 0 : index
    %41 = vector.load %arg4[%c0_20, %c1, %c0_21, %c0_22] : memref<2x2x32x32xbf16, #tpu.memory_space<vmem>>, vector<1x1x32x32xbf16>
    %42 = vector.shape_cast %41 : vector<1x1x32x32xbf16> to vector<32x32xbf16>
    %cst_23 = arith.constant dense<0.000000e+00> : vector<16x32xf32>
    %43 = tpu.matmul %40, %42, %cst_23 {dimension_numbers = #tpu.dot_dimension_numbers<[1], [0], [0], [1], [0, 0, 1, 1], [], []>} : vector<16x32xbf16>, vector<32x32xbf16>, vector<16x32xf32> -> vector<16x32xf32>
    %c0_24 = arith.constant 0 : index
    %c1_25 = arith.constant 1 : index
    %c0_26 = arith.constant 0 : index
    %44 = vector.load %arg9[%c0_24, %c1_25, %c0_26] : memref<2x3x32xf32, #tpu.memory_space<vmem>>, vector<1x1x32xf32>
    %45 = vector.shape_cast %44 : vector<1x1x32xf32> to vector<1x32xf32>
    %46 = vector.broadcast %45 : vector<1x32xf32> to vector<16x32xf32>
    %47 = arith.addf %43, %46 : vector<16x32xf32>
    %48 = arith.addf %0, %47 : vector<16x32xf32>
    %c0_27 = arith.constant 0 : index
    %c0_28 = arith.constant 0 : index
    %c0_29 = arith.constant 0 : index
    %49 = vector.load %arg10[%c0_27, %c0_28, %c0_29] : memref<2x4x32xf32, #tpu.memory_space<vmem>>, vector<1x1x32xf32>
    %50 = vector.shape_cast %49 : vector<1x1x32xf32> to vector<1x32xf32>
    %c0_30 = arith.constant 0 : index
    %c1_31 = arith.constant 1 : index
    %c0_32 = arith.constant 0 : index
    %51 = vector.load %arg10[%c0_30, %c1_31, %c0_32] : memref<2x4x32xf32, #tpu.memory_space<vmem>>, vector<1x1x32xf32>
    %52 = vector.shape_cast %51 : vector<1x1x32xf32> to vector<1x32xf32>
    %cst_33 = arith.constant dense<0.000000e+00> : vector<16xf32>
    %53 = vector.multi_reduction <add>, %48, %cst_33 [1] : vector<16x32xf32> to vector<16xf32>
    %54 = vector.shape_cast %53 : vector<16xf32> to vector<16x1xf32>
    %cst_34 = arith.constant 3.200000e+01 : f32
    %55 = vector.broadcast %cst_34 : f32 to vector<16x1xf32>
    %56 = arith.divf %54, %55 : vector<16x1xf32>
    %57 = vector.broadcast %56 : vector<16x1xf32> to vector<16x32xf32>
    %58 = arith.subf %48, %57 : vector<16x32xf32>
    %59 = arith.mulf %58, %58 : vector<16x32xf32>
    %cst_35 = arith.constant dense<0.000000e+00> : vector<16xf32>
    %60 = vector.multi_reduction <add>, %59, %cst_35 [1] : vector<16x32xf32> to vector<16xf32>
    %61 = vector.shape_cast %60 : vector<16xf32> to vector<16x1xf32>
    %cst_36 = arith.constant 3.200000e+01 : f32
    %62 = vector.broadcast %cst_36 : f32 to vector<16x1xf32>
    %63 = arith.divf %61, %62 : vector<16x1xf32>
    %64 = vector.broadcast %56 : vector<16x1xf32> to vector<16x32xf32>
    %65 = arith.subf %48, %64 : vector<16x32xf32>
    %cst_37 = arith.constant 9.99999974E-6 : f32
    %66 = vector.broadcast %cst_37 : f32 to vector<16x1xf32>
    %67 = arith.addf %63, %66 : vector<16x1xf32>
    %68 = math.rsqrt %67 : vector<16x1xf32>
    %69 = vector.broadcast %68 : vector<16x1xf32> to vector<16x32xf32>
    %70 = arith.mulf %65, %69 : vector<16x32xf32>
    %71 = vector.broadcast %50 : vector<1x32xf32> to vector<16x32xf32>
    %72 = arith.mulf %70, %71 : vector<16x32xf32>
    %73 = vector.broadcast %52 : vector<1x32xf32> to vector<16x32xf32>
    %74 = arith.addf %72, %73 : vector<16x32xf32>
    %75 = arith.truncf %74 : vector<16x32xf32> to vector<16x32xbf16>
    %c0_38 = arith.constant 0 : index
    %c0_39 = arith.constant 0 : index
    %c0_40 = arith.constant 0 : index
    %76 = vector.load %arg5[%c0_38, %c0_39, %c0_40] : memref<2x32x64xbf16, #tpu.memory_space<vmem>>, vector<1x32x64xbf16>
    %77 = vector.shape_cast %76 : vector<1x32x64xbf16> to vector<32x64xbf16>
    %cst_41 = arith.constant dense<0.000000e+00> : vector<16x64xf32>
    %78 = tpu.matmul %75, %77, %cst_41 {dimension_numbers = #tpu.dot_dimension_numbers<[1], [0], [0], [1], [0, 0, 1, 1], [], []>} : vector<16x32xbf16>, vector<32x64xbf16>, vector<16x64xf32> -> vector<16x64xf32>
    %c0_42 = arith.constant 0 : index
    %c0_43 = arith.constant 0 : index
    %79 = vector.load %arg8[%c0_42, %c0_43] : memref<2x64xf32, #tpu.memory_space<vmem>>, vector<1x64xf32>
    %80 = vector.broadcast %79 : vector<1x64xf32> to vector<16x64xf32>
    %81 = arith.addf %78, %80 : vector<16x64xf32>
    %cst_44 = arith.constant 0.000000e+00 : f32
    %82 = vector.broadcast %cst_44 : f32 to vector<16x64xf32>
    %83 = arith.maximumf %81, %82 : vector<16x64xf32>
    %84 = arith.truncf %83 : vector<16x64xf32> to vector<16x64xbf16>
    %c0_45 = arith.constant 0 : index
    %c0_46 = arith.constant 0 : index
    %c0_47 = arith.constant 0 : index
    %85 = vector.load %arg6[%c0_45, %c0_46, %c0_47] : memref<2x64x32xbf16, #tpu.memory_space<vmem>>, vector<1x64x32xbf16>
    %86 = vector.shape_cast %85 : vector<1x64x32xbf16> to vector<64x32xbf16>
    %cst_48 = arith.constant dense<0.000000e+00> : vector<16x32xf32>
    %87 = tpu.matmul %84, %86, %cst_48 {dimension_numbers = #tpu.dot_dimension_numbers<[1], [0], [0], [1], [0, 0, 1, 1], [], []>} : vector<16x64xbf16>, vector<64x32xbf16>, vector<16x32xf32> -> vector<16x32xf32>
    %c0_49 = arith.constant 0 : index
    %c2 = arith.constant 2 : index
    %c0_50 = arith.constant 0 : index
    %88 = vector.load %arg9[%c0_49, %c2, %c0_50] : memref<2x3x32xf32, #tpu.memory_space<vmem>>, vector<1x1x32xf32>
    %89 = vector.shape_cast %88 : vector<1x1x32xf32> to vector<1x32xf32>
    %90 = vector.broadcast %89 : vector<1x32xf32> to vector<16x32xf32>
    %91 = arith.addf %87, %90 : vector<16x32xf32>
    %92 = arith.addf %74, %91 : vector<16x32xf32>
    %c0_51 = arith.constant 0 : index
    %c2_52 = arith.constant 2 : index
    %c0_53 = arith.constant 0 : index
    %93 = vector.load %arg10[%c0_51, %c2_52, %c0_53] : memref<2x4x32xf32, #tpu.memory_space<vmem>>, vector<1x1x32xf32>
    %94 = vector.shape_cast %93 : vector<1x1x32xf32> to vector<1x32xf32>
    %c0_54 = arith.constant 0 : index
    %c3 = arith.constant 3 : index
    %c0_55 = arith.constant 0 : index
    %95 = vector.load %arg10[%c0_54, %c3, %c0_55] : memref<2x4x32xf32, #tpu.memory_space<vmem>>, vector<1x1x32xf32>
    %96 = vector.shape_cast %95 : vector<1x1x32xf32> to vector<1x32xf32>
    %cst_56 = arith.constant dense<0.000000e+00> : vector<16xf32>
    %97 = vector.multi_reduction <add>, %92, %cst_56 [1] : vector<16x32xf32> to vector<16xf32>
    %98 = vector.shape_cast %97 : vector<16xf32> to vector<16x1xf32>
    %cst_57 = arith.constant 3.200000e+01 : f32
    %99 = vector.broadcast %cst_57 : f32 to vector<16x1xf32>
    %100 = arith.divf %98, %99 : vector<16x1xf32>
    %101 = vector.broadcast %100 : vector<16x1xf32> to vector<16x32xf32>
    %102 = arith.subf %92, %101 : vector<16x32xf32>
    %103 = arith.mulf %102, %102 : vector<16x32xf32>
    %cst_58 = arith.constant dense<0.000000e+00> : vector<16xf32>
    %104 = vector.multi_reduction <add>, %103, %cst_58 [1] : vector<16x32xf32> to vector<16xf32>
    %105 = vector.shape_cast %104 : vector<16xf32> to vector<16x1xf32>
    %cst_59 = arith.constant 3.200000e+01 : f32
    %106 = vector.broadcast %cst_59 : f32 to vector<16x1xf32>
    %107 = arith.divf %105, %106 : vector<16x1xf32>
    %108 = vector.broadcast %100 : vector<16x1xf32> to vector<16x32xf32>
    %109 = arith.subf %92, %108 : vector<16x32xf32>
    %cst_60 = arith.constant 9.99999974E-6 : f32
    %110 = vector.broadcast %cst_60 : f32 to vector<16x1xf32>
    %111 = arith.addf %107, %110 : vector<16x1xf32>
    %112 = math.rsqrt %111 : vector<16x1xf32>
    %113 = vector.broadcast %112 : vector<16x1xf32> to vector<16x32xf32>
    %114 = arith.mulf %109, %113 : vector<16x32xf32>
    %115 = vector.broadcast %94 : vector<1x32xf32> to vector<16x32xf32>
    %116 = arith.mulf %114, %115 : vector<16x32xf32>
    %117 = vector.broadcast %96 : vector<1x32xf32> to vector<16x32xf32>
    %118 = arith.addf %116, %117 : vector<16x32xf32>
    %119 = arith.addf %118, %1 : vector<16x32xf32>
    %120 = arith.truncf %119 : vector<16x32xf32> to vector<16x32xbf16>
    %c1_61 = arith.constant 1 : index
    %c0_62 = arith.constant 0 : index
    %c0_63 = arith.constant 0 : index
    %121 = vector.load %arg3[%c1_61, %c0_62, %c0_63] : memref<2x32x64xbf16, #tpu.memory_space<vmem>>, vector<1x32x64xbf16>
    %122 = vector.shape_cast %121 : vector<1x32x64xbf16> to vector<32x64xbf16>
    %cst_64 = arith.constant dense<0.000000e+00> : vector<16x64xf32>
    %123 = tpu.matmul %120, %122, %cst_64 {dimension_numbers = #tpu.dot_dimension_numbers<[1], [0], [0], [1], [0, 0, 1, 1], [], []>} : vector<16x32xbf16>, vector<32x64xbf16>, vector<16x64xf32> -> vector<16x64xf32>
    %c1_65 = arith.constant 1 : index
    %c0_66 = arith.constant 0 : index
    %124 = vector.load %arg7[%c1_65, %c0_66] : memref<2x64xf32, #tpu.memory_space<vmem>>, vector<1x64xf32>
    %125 = vector.broadcast %124 : vector<1x64xf32> to vector<16x64xf32>
    %126 = arith.addf %123, %125 : vector<16x64xf32>
    %127 = arith.truncf %118 : vector<16x32xf32> to vector<16x32xbf16>
    %c1_67 = arith.constant 1 : index
    %c0_68 = arith.constant 0 : index
    %c0_69 = arith.constant 0 : index
    %c0_70 = arith.constant 0 : index
    %128 = vector.load %arg4[%c1_67, %c0_68, %c0_69, %c0_70] : memref<2x2x32x32xbf16, #tpu.memory_space<vmem>>, vector<1x1x32x32xbf16>
    %129 = vector.shape_cast %128 : vector<1x1x32x32xbf16> to vector<32x32xbf16>
    %cst_71 = arith.constant dense<0.000000e+00> : vector<16x32xf32>
    %130 = tpu.matmul %127, %129, %cst_71 {dimension_numbers = #tpu.dot_dimension_numbers<[1], [0], [0], [1], [0, 0, 1, 1], [], []>} : vector<16x32xbf16>, vector<32x32xbf16>, vector<16x32xf32> -> vector<16x32xf32>
    %c1_72 = arith.constant 1 : index
    %c0_73 = arith.constant 0 : index
    %c0_74 = arith.constant 0 : index
    %131 = vector.load %arg9[%c1_72, %c0_73, %c0_74] : memref<2x3x32xf32, #tpu.memory_space<vmem>>, vector<1x1x32xf32>
    %132 = vector.shape_cast %131 : vector<1x1x32xf32> to vector<1x32xf32>
    %133 = vector.broadcast %132 : vector<1x32xf32> to vector<16x32xf32>
    %134 = arith.addf %130, %133 : vector<16x32xf32>
    %135 = vector.extract_strided_slice %126 {offsets = [0, 0], sizes = [16, 32], strides = [1, 1]} : vector<16x64xf32> to vector<16x32xf32>
    %136 = vector.extract_strided_slice %126 {offsets = [0, 32], sizes = [16, 32], strides = [1, 1]} : vector<16x64xf32> to vector<16x32xf32>
    %137 = vector.shape_cast %135 : vector<16x32xf32> to vector<16x4x8xf32>
    %138 = arith.truncf %137 : vector<16x4x8xf32> to vector<16x4x8xbf16>
    %139 = vector.shape_cast %136 : vector<16x32xf32> to vector<16x4x8xf32>
    %140 = arith.truncf %139 : vector<16x4x8xf32> to vector<16x4x8xbf16>
    %141 = vector.shape_cast %134 : vector<16x32xf32> to vector<16x4x8xf32>
    %142 = arith.truncf %141 : vector<16x4x8xf32> to vector<16x4x8xbf16>
    "tpu.trace_start"() <{level = 10 : i32, message = "qhd,khd->hqk"}> : () -> ()
    %cst_75 = arith.constant dense<0.000000e+00> : vector<4x16x16xf32>
    %143 = tpu.matmul %138, %140, %cst_75 {dimension_numbers = #tpu.dot_dimension_numbers<[2], [2], [0], [0], [0, 1, 0, 0, 1, 0], [1], [1]>} : vector<16x4x8xbf16>, vector<16x4x8xbf16>, vector<4x16x16xf32> -> vector<4x16x16xf32>
    "tpu.trace_stop"() : () -> ()
    %cst_76 = arith.constant dense<0xFF800000> : vector<4x16xf32>
    %144 = vector.multi_reduction <maximumf>, %143, %cst_76 [2] : vector<4x16x16xf32> to vector<4x16xf32>
    %145 = vector.shape_cast %144 : vector<4x16xf32> to vector<4x16x1xf32>
    %146 = vector.broadcast %145 : vector<4x16x1xf32> to vector<4x16x16xf32>
    %147 = arith.subf %143, %146 : vector<4x16x16xf32>
    %148 = math.exp %147 : vector<4x16x16xf32>
    %cst_77 = arith.constant dense<0.000000e+00> : vector<4x16xf32>
    %149 = vector.multi_reduction <add>, %148, %cst_77 [2] : vector<4x16x16xf32> to vector<4x16xf32>
    %150 = vector.shape_cast %149 : vector<4x16xf32> to vector<4x16x1xf32>
    %151 = vector.broadcast %150 : vector<4x16x1xf32> to vector<4x16x16xf32>
    %152 = arith.divf %148, %151 : vector<4x16x16xf32>
    %153 = arith.truncf %152 : vector<4x16x16xf32> to vector<4x16x16xbf16>
    "tpu.trace_start"() <{level = 10 : i32, message = "hqk,khd->qhd"}> : () -> ()
    %cst_78 = arith.constant dense<0.000000e+00> : vector<4x8x16xf32>
    %154 = tpu.matmul %142, %153, %cst_78 {dimension_numbers = #tpu.dot_dimension_numbers<[0], [2], [2], [1], [0, 1, 0, 2, 1, 1], [1], [0]>} : vector<16x4x8xbf16>, vector<4x16x16xbf16>, vector<4x8x16xf32> -> vector<4x8x16xf32>
    %155 = tpu.transpose %154, [2, 0, 1] : vector<4x8x16xf32> -> vector<16x4x8xf32>
    "tpu.trace_stop"() : () -> ()
    %156 = vector.shape_cast %155 : vector<16x4x8xf32> to vector<16x32xf32>
    %157 = arith.truncf %156 : vector<16x32xf32> to vector<16x32xbf16>
    %c1_79 = arith.constant 1 : index
    %c1_80 = arith.constant 1 : index
    %c0_81 = arith.constant 0 : index
    %c0_82 = arith.constant 0 : index
    %158 = vector.load %arg4[%c1_79, %c1_80, %c0_81, %c0_82] : memref<2x2x32x32xbf16, #tpu.memory_space<vmem>>, vector<1x1x32x32xbf16>
    %159 = vector.shape_cast %158 : vector<1x1x32x32xbf16> to vector<32x32xbf16>
    %cst_83 = arith.constant dense<0.000000e+00> : vector<16x32xf32>
    %160 = tpu.matmul %157, %159, %cst_83 {dimension_numbers = #tpu.dot_dimension_numbers<[1], [0], [0], [1], [0, 0, 1, 1], [], []>} : vector<16x32xbf16>, vector<32x32xbf16>, vector<16x32xf32> -> vector<16x32xf32>
    %c1_84 = arith.constant 1 : index
    %c1_85 = arith.constant 1 : index
    %c0_86 = arith.constant 0 : index
    %161 = vector.load %arg9[%c1_84, %c1_85, %c0_86] : memref<2x3x32xf32, #tpu.memory_space<vmem>>, vector<1x1x32xf32>
    %162 = vector.shape_cast %161 : vector<1x1x32xf32> to vector<1x32xf32>
    %163 = vector.broadcast %162 : vector<1x32xf32> to vector<16x32xf32>
    %164 = arith.addf %160, %163 : vector<16x32xf32>
    %165 = arith.addf %118, %164 : vector<16x32xf32>
    %c1_87 = arith.constant 1 : index
    %c0_88 = arith.constant 0 : index
    %c0_89 = arith.constant 0 : index
    %166 = vector.load %arg10[%c1_87, %c0_88, %c0_89] : memref<2x4x32xf32, #tpu.memory_space<vmem>>, vector<1x1x32xf32>
    %167 = vector.shape_cast %166 : vector<1x1x32xf32> to vector<1x32xf32>
    %c1_90 = arith.constant 1 : index
    %c1_91 = arith.constant 1 : index
    %c0_92 = arith.constant 0 : index
    %168 = vector.load %arg10[%c1_90, %c1_91, %c0_92] : memref<2x4x32xf32, #tpu.memory_space<vmem>>, vector<1x1x32xf32>
    %169 = vector.shape_cast %168 : vector<1x1x32xf32> to vector<1x32xf32>
    %cst_93 = arith.constant dense<0.000000e+00> : vector<16xf32>
    %170 = vector.multi_reduction <add>, %165, %cst_93 [1] : vector<16x32xf32> to vector<16xf32>
    %171 = vector.shape_cast %170 : vector<16xf32> to vector<16x1xf32>
    %cst_94 = arith.constant 3.200000e+01 : f32
    %172 = vector.broadcast %cst_94 : f32 to vector<16x1xf32>
    %173 = arith.divf %171, %172 : vector<16x1xf32>
    %174 = vector.broadcast %173 : vector<16x1xf32> to vector<16x32xf32>
    %175 = arith.subf %165, %174 : vector<16x32xf32>
    %176 = arith.mulf %175, %175 : vector<16x32xf32>
    %cst_95 = arith.constant dense<0.000000e+00> : vector<16xf32>
    %177 = vector.multi_reduction <add>, %176, %cst_95 [1] : vector<16x32xf32> to vector<16xf32>
    %178 = vector.shape_cast %177 : vector<16xf32> to vector<16x1xf32>
    %cst_96 = arith.constant 3.200000e+01 : f32
    %179 = vector.broadcast %cst_96 : f32 to vector<16x1xf32>
    %180 = arith.divf %178, %179 : vector<16x1xf32>
    %181 = vector.broadcast %173 : vector<16x1xf32> to vector<16x32xf32>
    %182 = arith.subf %165, %181 : vector<16x32xf32>
    %cst_97 = arith.constant 9.99999974E-6 : f32
    %183 = vector.broadcast %cst_97 : f32 to vector<16x1xf32>
    %184 = arith.addf %180, %183 : vector<16x1xf32>
    %185 = math.rsqrt %184 : vector<16x1xf32>
    %186 = vector.broadcast %185 : vector<16x1xf32> to vector<16x32xf32>
    %187 = arith.mulf %182, %186 : vector<16x32xf32>
    %188 = vector.broadcast %167 : vector<1x32xf32> to vector<16x32xf32>
    %189 = arith.mulf %187, %188 : vector<16x32xf32>
    %190 = vector.broadcast %169 : vector<1x32xf32> to vector<16x32xf32>
    %191 = arith.addf %189, %190 : vector<16x32xf32>
    %192 = arith.truncf %191 : vector<16x32xf32> to vector<16x32xbf16>
    %c1_98 = arith.constant 1 : index
    %c0_99 = arith.constant 0 : index
    %c0_100 = arith.constant 0 : index
    %193 = vector.load %arg5[%c1_98, %c0_99, %c0_100] : memref<2x32x64xbf16, #tpu.memory_space<vmem>>, vector<1x32x64xbf16>
    %194 = vector.shape_cast %193 : vector<1x32x64xbf16> to vector<32x64xbf16>
    %cst_101 = arith.constant dense<0.000000e+00> : vector<16x64xf32>
    %195 = tpu.matmul %192, %194, %cst_101 {dimension_numbers = #tpu.dot_dimension_numbers<[1], [0], [0], [1], [0, 0, 1, 1], [], []>} : vector<16x32xbf16>, vector<32x64xbf16>, vector<16x64xf32> -> vector<16x64xf32>
    %c1_102 = arith.constant 1 : index
    %c0_103 = arith.constant 0 : index
    %196 = vector.load %arg8[%c1_102, %c0_103] : memref<2x64xf32, #tpu.memory_space<vmem>>, vector<1x64xf32>
    %197 = vector.broadcast %196 : vector<1x64xf32> to vector<16x64xf32>
    %198 = arith.addf %195, %197 : vector<16x64xf32>
    %cst_104 = arith.constant 0.000000e+00 : f32
    %199 = vector.broadcast %cst_104 : f32 to vector<16x64xf32>
    %200 = arith.maximumf %198, %199 : vector<16x64xf32>
    %201 = arith.truncf %200 : vector<16x64xf32> to vector<16x64xbf16>
    %c1_105 = arith.constant 1 : index
    %c0_106 = arith.constant 0 : index
    %c0_107 = arith.constant 0 : index
    %202 = vector.load %arg6[%c1_105, %c0_106, %c0_107] : memref<2x64x32xbf16, #tpu.memory_space<vmem>>, vector<1x64x32xbf16>
    %203 = vector.shape_cast %202 : vector<1x64x32xbf16> to vector<64x32xbf16>
    %cst_108 = arith.constant dense<0.000000e+00> : vector<16x32xf32>
    %204 = tpu.matmul %201, %203, %cst_108 {dimension_numbers = #tpu.dot_dimension_numbers<[1], [0], [0], [1], [0, 0, 1, 1], [], []>} : vector<16x64xbf16>, vector<64x32xbf16>, vector<16x32xf32> -> vector<16x32xf32>
    %c1_109 = arith.constant 1 : index
    %c2_110 = arith.constant 2 : index
    %c0_111 = arith.constant 0 : index
    %205 = vector.load %arg9[%c1_109, %c2_110, %c0_111] : memref<2x3x32xf32, #tpu.memory_space<vmem>>, vector<1x1x32xf32>
    %206 = vector.shape_cast %205 : vector<1x1x32xf32> to vector<1x32xf32>
    %207 = vector.broadcast %206 : vector<1x32xf32> to vector<16x32xf32>
    %208 = arith.addf %204, %207 : vector<16x32xf32>
    %209 = arith.addf %191, %208 : vector<16x32xf32>
    %c1_112 = arith.constant 1 : index
    %c2_113 = arith.constant 2 : index
    %c0_114 = arith.constant 0 : index
    %210 = vector.load %arg10[%c1_112, %c2_113, %c0_114] : memref<2x4x32xf32, #tpu.memory_space<vmem>>, vector<1x1x32xf32>
    %211 = vector.shape_cast %210 : vector<1x1x32xf32> to vector<1x32xf32>
    %c1_115 = arith.constant 1 : index
    %c3_116 = arith.constant 3 : index
    %c0_117 = arith.constant 0 : index
    %212 = vector.load %arg10[%c1_115, %c3_116, %c0_117] : memref<2x4x32xf32, #tpu.memory_space<vmem>>, vector<1x1x32xf32>
    %213 = vector.shape_cast %212 : vector<1x1x32xf32> to vector<1x32xf32>
    %cst_118 = arith.constant dense<0.000000e+00> : vector<16xf32>
    %214 = vector.multi_reduction <add>, %209, %cst_118 [1] : vector<16x32xf32> to vector<16xf32>
    %215 = vector.shape_cast %214 : vector<16xf32> to vector<16x1xf32>
    %cst_119 = arith.constant 3.200000e+01 : f32
    %216 = vector.broadcast %cst_119 : f32 to vector<16x1xf32>
    %217 = arith.divf %215, %216 : vector<16x1xf32>
    %218 = vector.broadcast %217 : vector<16x1xf32> to vector<16x32xf32>
    %219 = arith.subf %209, %218 : vector<16x32xf32>
    %220 = arith.mulf %219, %219 : vector<16x32xf32>
    %cst_120 = arith.constant dense<0.000000e+00> : vector<16xf32>
    %221 = vector.multi_reduction <add>, %220, %cst_120 [1] : vector<16x32xf32> to vector<16xf32>
    %222 = vector.shape_cast %221 : vector<16xf32> to vector<16x1xf32>
    %cst_121 = arith.constant 3.200000e+01 : f32
    %223 = vector.broadcast %cst_121 : f32 to vector<16x1xf32>
    %224 = arith.divf %222, %223 : vector<16x1xf32>
    %225 = vector.broadcast %217 : vector<16x1xf32> to vector<16x32xf32>
    %226 = arith.subf %209, %225 : vector<16x32xf32>
    %cst_122 = arith.constant 9.99999974E-6 : f32
    %227 = vector.broadcast %cst_122 : f32 to vector<16x1xf32>
    %228 = arith.addf %224, %227 : vector<16x1xf32>
    %229 = math.rsqrt %228 : vector<16x1xf32>
    %230 = vector.broadcast %229 : vector<16x1xf32> to vector<16x32xf32>
    %231 = arith.mulf %226, %230 : vector<16x32xf32>
    %232 = vector.broadcast %211 : vector<1x32xf32> to vector<16x32xf32>
    %233 = arith.mulf %231, %232 : vector<16x32xf32>
    %234 = vector.broadcast %213 : vector<1x32xf32> to vector<16x32xf32>
    %235 = arith.addf %233, %234 : vector<16x32xf32>
    %c0_123 = arith.constant 0 : index
    %c0_124 = arith.constant 0 : index
    %236 = vector.load %arg11[%c0_123, %c0_124] : memref<2x32xf32, #tpu.memory_space<vmem>>, vector<1x32xf32>
    %c1_125 = arith.constant 1 : index
    %c0_126 = arith.constant 0 : index
    %237 = vector.load %arg11[%c1_125, %c0_126] : memref<2x32xf32, #tpu.memory_space<vmem>>, vector<1x32xf32>
    %cst_127 = arith.constant dense<0.000000e+00> : vector<16xf32>
    %238 = vector.multi_reduction <add>, %235, %cst_127 [1] : vector<16x32xf32> to vector<16xf32>
    %239 = vector.shape_cast %238 : vector<16xf32> to vector<16x1xf32>
    %cst_128 = arith.constant 3.200000e+01 : f32
    %240 = vector.broadcast %cst_128 : f32 to vector<16x1xf32>
    %241 = arith.divf %239, %240 : vector<16x1xf32>
    %242 = vector.broadcast %241 : vector<16x1xf32> to vector<16x32xf32>
    %243 = arith.subf %235, %242 : vector<16x32xf32>
    %244 = arith.mulf %243, %243 : vector<16x32xf32>
    %cst_129 = arith.constant dense<0.000000e+00> : vector<16xf32>
    %245 = vector.multi_reduction <add>, %244, %cst_129 [1] : vector<16x32xf32> to vector<16xf32>
    %246 = vector.shape_cast %245 : vector<16xf32> to vector<16x1xf32>
    %cst_130 = arith.constant 3.200000e+01 : f32
    %247 = vector.broadcast %cst_130 : f32 to vector<16x1xf32>
    %248 = arith.divf %246, %247 : vector<16x1xf32>
    %249 = vector.broadcast %241 : vector<16x1xf32> to vector<16x32xf32>
    %250 = arith.subf %235, %249 : vector<16x32xf32>
    %cst_131 = arith.constant 9.99999974E-6 : f32
    %251 = vector.broadcast %cst_131 : f32 to vector<16x1xf32>
    %252 = arith.addf %248, %251 : vector<16x1xf32>
    %253 = math.rsqrt %252 : vector<16x1xf32>
    %254 = vector.broadcast %253 : vector<16x1xf32> to vector<16x32xf32>
    %255 = arith.mulf %250, %254 : vector<16x32xf32>
    %256 = vector.broadcast %236 : vector<1x32xf32> to vector<16x32xf32>
    %257 = arith.mulf %255, %256 : vector<16x32xf32>
    %258 = vector.broadcast %237 : vector<1x32xf32> to vector<16x32xf32>
    %259 = arith.addf %257, %258 : vector<16x32xf32>
    %c0_132 = arith.constant 0 : index
    %c0_133 = arith.constant 0 : index
    %260 = vector.load %arg12[%c0_132, %c0_133] : memref<16x32xf32, #tpu.memory_space<vmem>>, vector<16x32xf32>
    tpu.vector_store %arg12[%c0_132, %c0_133], %259 {strides = array<i32>} : memref<16x32xf32, #tpu.memory_space<vmem>>, vector<16x32xf32>,
    return
  }
  func.func @transform_0(%arg0: i32) -> (i32, i32) {
    %c0_i32 = arith.constant 0 : i32
    %c0_i32_0 = arith.constant 0 : i32
    return %arg0, %c0_i32 : i32, i32
  }
  func.func @transform_1(%arg0: i32) -> (i32, i32) {
    %c0_i32 = arith.constant 0 : i32
    %c0_i32_0 = arith.constant 0 : i32
    return %arg0, %c0_i32 : i32, i32
  }
  func.func @transform_2(%arg0: i32) -> (i32, i32, i32) {
    %c0_i32 = arith.constant 0 : i32
    %c0_i32_0 = arith.constant 0 : i32
    %c0_i32_1 = arith.constant 0 : i32
    %c0_i32_2 = arith.constant 0 : i32
    return %c0_i32, %c0_i32_0, %c0_i32_1 : i32, i32, i32
  }
  func.func @transform_3(%arg0: i32) -> (i32, i32, i32, i32) {
    %c0_i32 = arith.constant 0 : i32
    %c0_i32_0 = arith.constant 0 : i32
    %c0_i32_1 = arith.constant 0 : i32
    %c0_i32_2 = arith.constant 0 : i32
    %c0_i32_3 = arith.constant 0 : i32
    return %c0_i32, %c0_i32_0, %c0_i32_1, %c0_i32_2 : i32, i32, i32, i32
  }
  func.func @transform_4(%arg0: i32) -> (i32, i32, i32) {
    %c0_i32 = arith.constant 0 : i32
    %c0_i32_0 = arith.constant 0 : i32
    %c0_i32_1 = arith.constant 0 : i32
    %c0_i32_2 = arith.constant 0 : i32
    return %c0_i32, %c0_i32_0, %c0_i32_1 : i32, i32, i32
  }
  func.func @transform_5(%arg0: i32) -> (i32, i32, i32) {
    %c0_i32 = arith.constant 0 : i32
    %c0_i32_0 = arith.constant 0 : i32
    %c0_i32_1 = arith.constant 0 : i32
    %c0_i32_2 = arith.constant 0 : i32
    return %c0_i32, %c0_i32_0, %c0_i32_1 : i32, i32, i32
  }
  func.func @transform_6(%arg0: i32) -> (i32, i32) {
    %c0_i32 = arith.constant 0 : i32
    %c0_i32_0 = arith.constant 0 : i32
    %c0_i32_1 = arith.constant 0 : i32
    return %c0_i32, %c0_i32_0 : i32, i32
  }
  func.func @transform_7(%arg0: i32) -> (i32, i32) {
    %c0_i32 = arith.constant 0 : i32
    %c0_i32_0 = arith.constant 0 : i32
    %c0_i32_1 = arith.constant 0 : i32
    return %c0_i32, %c0_i32_0 : i32, i32
  }
  func.func @transform_8(%arg0: i32) -> (i32, i32, i32) {
    %c0_i32 = arith.constant 0 : i32
    %c0_i32_0 = arith.constant 0 : i32
    %c0_i32_1 = arith.constant 0 : i32
    %c0_i32_2 = arith.constant 0 : i32
    return %c0_i32, %c0_i32_0, %c0_i32_1 : i32, i32, i32
  }
  func.func @transform_9(%arg0: i32) -> (i32, i32, i32) {
    %c0_i32 = arith.constant 0 : i32
    %c0_i32_0 = arith.constant 0 : i32
    %c0_i32_1 = arith.constant 0 : i32
    %c0_i32_2 = arith.constant 0 : i32
    return %c0_i32, %c0_i32_0, %c0_i32_1 : i32, i32, i32
  }
  func.func @transform_10(%arg0: i32) -> (i32, i32) {
    %c0_i32 = arith.constant 0 : i32
    %c0_i32_0 = arith.constant 0 : i32
    %c0_i32_1 = arith.constant 0 : i32
    return %c0_i32, %c0_i32_0 : i32, i32
  }
  func.func @transform_11(%arg0: i32) -> (i32, i32) {
    %c0_i32 = arith.constant 0 : i32
    %c0_i32_0 = arith.constant 0 : i32
    return %arg0, %c0_i32 : i32, i32
  }
}

module attributes {stable_mosaic.version = 11 : i64} {
  func.func @_decoder_stack_kernel(%arg0: i32, %arg1: memref<16x32xf32, #tpu.memory_space<vmem>>, %arg2: memref<16x32xf32, #tpu.memory_space<vmem>>, %arg3: memref<8x32xf32, #tpu.memory_space<vmem>>, %arg4: memref<2x32x64xbf16, #tpu.memory_space<vmem>>, %arg5: memref<2x6x32x32xbf16, #tpu.memory_space<vmem>>, %arg6: memref<2x32x64xbf16, #tpu.memory_space<vmem>>, %arg7: memref<2x64x32xbf16, #tpu.memory_space<vmem>>, %arg8: memref<2x64xf32, #tpu.memory_space<vmem>>, %arg9: memref<2x64xf32, #tpu.memory_space<vmem>>, %arg10: memref<2x7x32xf32, #tpu.memory_space<vmem>>, %arg11: memref<2x6x32xf32, #tpu.memory_space<vmem>>, %arg12: memref<2x32xf32, #tpu.memory_space<vmem>>, %arg13: memref<8x32xf32, #tpu.memory_space<vmem>>) attributes {dimension_semantics = [#tpu.dimension_semantics<parallel>], iteration_bounds = array<i64: 2>, scalar_prefetch = 0 : i64, scratch_operands = 0 : i64, tpu.core_type = #tpu.core_type<tc>, window_params = [{transform_indices = @transform_0, window_bounds = array<i64: 16, 32>}, {transform_indices = @transform_1, window_bounds = array<i64: 16, 32>}, {pipeline_mode = #tpu.pipeline_mode<synchronous>, transform_indices = @transform_2, window_bounds = array<i64: 8, 32>}, {pipeline_mode = #tpu.pipeline_mode<synchronous>, transform_indices = @transform_3, window_bounds = array<i64: 2, 32, 64>}, {pipeline_mode = #tpu.pipeline_mode<synchronous>, transform_indices = @transform_4, window_bounds = array<i64: 2, 6, 32, 32>}, {pipeline_mode = #tpu.pipeline_mode<synchronous>, transform_indices = @transform_5, window_bounds = array<i64: 2, 32, 64>}, {pipeline_mode = #tpu.pipeline_mode<synchronous>, transform_indices = @transform_6, window_bounds = array<i64: 2, 64, 32>}, {pipeline_mode = #tpu.pipeline_mode<synchronous>, transform_indices = @transform_7, window_bounds = array<i64: 2, 64>}, {pipeline_mode = #tpu.pipeline_mode<synchronous>, transform_indices = @transform_8, window_bounds = array<i64: 2, 64>}, {pipeline_mode = #tpu.pipeline_mode<synchronous>, transform_indices = @transform_9, window_bounds = array<i64: 2, 7, 32>}, {pipeline_mode = #tpu.pipeline_mode<synchronous>, transform_indices = @transform_10, window_bounds = array<i64: 2, 6, 32>}, {pipeline_mode = #tpu.pipeline_mode<synchronous>, transform_indices = @transform_11, window_bounds = array<i64: 2, 32>}, {transform_indices = @transform_12, window_bounds = array<i64: 8, 32>}]} {
    %c0 = arith.constant 0 : index
    %c0_0 = arith.constant 0 : index
    %0 = vector.load %arg1[%c0, %c0_0] : memref<16x32xf32, #tpu.memory_space<vmem>>, vector<16x32xf32>
    %c0_1 = arith.constant 0 : index
    %c0_2 = arith.constant 0 : index
    %1 = vector.load %arg2[%c0_1, %c0_2] : memref<16x32xf32, #tpu.memory_space<vmem>>, vector<16x32xf32>
    %c0_3 = arith.constant 0 : index
    %c0_4 = arith.constant 0 : index
    %2 = vector.load %arg3[%c0_3, %c0_4] : memref<8x32xf32, #tpu.memory_space<vmem>>, vector<8x32xf32>
    %3 = arith.truncf %0 : vector<16x32xf32> to vector<16x32xbf16>
    %4 = arith.addf %0, %1 : vector<16x32xf32>
    %5 = arith.truncf %4 : vector<16x32xf32> to vector<16x32xbf16>
    %cst = arith.constant 0.000000e+00 : f32
    %6 = vector.broadcast %cst : f32 to vector<8x32xf32>
    %7 = arith.addf %6, %2 : vector<8x32xf32>
    %8 = arith.truncf %7 : vector<8x32xf32> to vector<8x32xbf16>
    %c0_5 = arith.constant 0 : index
    %c0_6 = arith.constant 0 : index
    %c0_7 = arith.constant 0 : index
    %9 = vector.load %arg4[%c0_5, %c0_6, %c0_7] : memref<2x32x64xbf16, #tpu.memory_space<vmem>>, vector<1x32x64xbf16>
    %10 = vector.shape_cast %9 : vector<1x32x64xbf16> to vector<32x64xbf16>
    %cst_8 = arith.constant dense<0.000000e+00> : vector<8x64xf32>
    %11 = tpu.matmul %8, %10, %cst_8 {dimension_numbers = #tpu.dot_dimension_numbers<[1], [0], [0], [1], [0, 0, 1, 1], [], []>} : vector<8x32xbf16>, vector<32x64xbf16>, vector<8x64xf32> -> vector<8x64xf32>
    %c0_9 = arith.constant 0 : index
    %c0_10 = arith.constant 0 : index
    %12 = vector.load %arg8[%c0_9, %c0_10] : memref<2x64xf32, #tpu.memory_space<vmem>>, vector<1x64xf32>
    %13 = vector.broadcast %12 : vector<1x64xf32> to vector<8x64xf32>
    %14 = arith.addf %11, %13 : vector<8x64xf32>
    %15 = arith.truncf %6 : vector<8x32xf32> to vector<8x32xbf16>
    %c0_11 = arith.constant 0 : index
    %c0_12 = arith.constant 0 : index
    %c0_13 = arith.constant 0 : index
    %c0_14 = arith.constant 0 : index
    %16 = vector.load %arg5[%c0_11, %c0_12, %c0_13, %c0_14] : memref<2x6x32x32xbf16, #tpu.memory_space<vmem>>, vector<1x1x32x32xbf16>
    %17 = vector.shape_cast %16 : vector<1x1x32x32xbf16> to vector<32x32xbf16>
    %cst_15 = arith.constant dense<0.000000e+00> : vector<8x32xf32>
    %18 = tpu.matmul %15, %17, %cst_15 {dimension_numbers = #tpu.dot_dimension_numbers<[1], [0], [0], [1], [0, 0, 1, 1], [], []>} : vector<8x32xbf16>, vector<32x32xbf16>, vector<8x32xf32> -> vector<8x32xf32>
    %c0_16 = arith.constant 0 : index
    %c0_17 = arith.constant 0 : index
    %c0_18 = arith.constant 0 : index
    %19 = vector.load %arg10[%c0_16, %c0_17, %c0_18] : memref<2x7x32xf32, #tpu.memory_space<vmem>>, vector<1x1x32xf32>
    %20 = vector.shape_cast %19 : vector<1x1x32xf32> to vector<1x32xf32>
    %21 = vector.broadcast %20 : vector<1x32xf32> to vector<8x32xf32>
    %22 = arith.addf %18, %21 : vector<8x32xf32>
    %23 = vector.extract_strided_slice %14 {offsets = [0, 0], sizes = [8, 32], strides = [1, 1]} : vector<8x64xf32> to vector<8x32xf32>
    %24 = vector.extract_strided_slice %14 {offsets = [0, 32], sizes = [8, 32], strides = [1, 1]} : vector<8x64xf32> to vector<8x32xf32>
    %25 = vector.shape_cast %23 : vector<8x32xf32> to vector<8x4x8xf32>
    %26 = arith.truncf %25 : vector<8x4x8xf32> to vector<8x4x8xbf16>
    %27 = vector.shape_cast %24 : vector<8x32xf32> to vector<8x4x8xf32>
    %28 = arith.truncf %27 : vector<8x4x8xf32> to vector<8x4x8xbf16>
    %29 = vector.shape_cast %22 : vector<8x32xf32> to vector<8x4x8xf32>
    %30 = arith.truncf %29 : vector<8x4x8xf32> to vector<8x4x8xbf16>
    "tpu.trace_start"() <{level = 10 : i32, message = "qhd,khd->hqk"}> : () -> ()
    %cst_19 = arith.constant dense<0.000000e+00> : vector<4x8x8xf32>
    %31 = tpu.matmul %26, %28, %cst_19 {dimension_numbers = #tpu.dot_dimension_numbers<[2], [2], [0], [0], [0, 1, 0, 0, 1, 0], [1], [1]>} : vector<8x4x8xbf16>, vector<8x4x8xbf16>, vector<4x8x8xf32> -> vector<4x8x8xf32>
    "tpu.trace_stop"() : () -> ()
    %cst_20 = arith.constant dense<0xFF800000> : vector<4x8xf32>
    %32 = vector.multi_reduction <maximumf>, %31, %cst_20 [2] : vector<4x8x8xf32> to vector<4x8xf32>
    %33 = vector.shape_cast %32 : vector<4x8xf32> to vector<4x8x1xf32>
    %34 = vector.broadcast %33 : vector<4x8x1xf32> to vector<4x8x8xf32>
    %35 = arith.subf %31, %34 : vector<4x8x8xf32>
    %36 = math.exp %35 : vector<4x8x8xf32>
    %cst_21 = arith.constant dense<0.000000e+00> : vector<4x8xf32>
    %37 = vector.multi_reduction <add>, %36, %cst_21 [2] : vector<4x8x8xf32> to vector<4x8xf32>
    %38 = vector.shape_cast %37 : vector<4x8xf32> to vector<4x8x1xf32>
    %39 = vector.broadcast %38 : vector<4x8x1xf32> to vector<4x8x8xf32>
    %40 = arith.divf %36, %39 : vector<4x8x8xf32>
    %41 = arith.truncf %40 : vector<4x8x8xf32> to vector<4x8x8xbf16>
    "tpu.trace_start"() <{level = 10 : i32, message = "hqk,khd->qhd"}> : () -> ()
    %cst_22 = arith.constant dense<0.000000e+00> : vector<4x8x8xf32>
    %42 = tpu.matmul %30, %41, %cst_22 {dimension_numbers = #tpu.dot_dimension_numbers<[0], [2], [2], [1], [0, 1, 0, 2, 1, 1], [1], [0]>} : vector<8x4x8xbf16>, vector<4x8x8xbf16>, vector<4x8x8xf32> -> vector<4x8x8xf32>
    %43 = tpu.transpose %42, [2, 0, 1] : vector<4x8x8xf32> -> vector<8x4x8xf32>
    "tpu.trace_stop"() : () -> ()
    %44 = vector.shape_cast %43 : vector<8x4x8xf32> to vector<8x32xf32>
    %45 = arith.truncf %44 : vector<8x32xf32> to vector<8x32xbf16>
    %c0_23 = arith.constant 0 : index
    %c1 = arith.constant 1 : index
    %c0_24 = arith.constant 0 : index
    %c0_25 = arith.constant 0 : index
    %46 = vector.load %arg5[%c0_23, %c1, %c0_24, %c0_25] : memref<2x6x32x32xbf16, #tpu.memory_space<vmem>>, vector<1x1x32x32xbf16>
    %47 = vector.shape_cast %46 : vector<1x1x32x32xbf16> to vector<32x32xbf16>
    %cst_26 = arith.constant dense<0.000000e+00> : vector<8x32xf32>
    %48 = tpu.matmul %45, %47, %cst_26 {dimension_numbers = #tpu.dot_dimension_numbers<[1], [0], [0], [1], [0, 0, 1, 1], [], []>} : vector<8x32xbf16>, vector<32x32xbf16>, vector<8x32xf32> -> vector<8x32xf32>
    %c0_27 = arith.constant 0 : index
    %c1_28 = arith.constant 1 : index
    %c0_29 = arith.constant 0 : index
    %49 = vector.load %arg10[%c0_27, %c1_28, %c0_29] : memref<2x7x32xf32, #tpu.memory_space<vmem>>, vector<1x1x32xf32>
    %50 = vector.shape_cast %49 : vector<1x1x32xf32> to vector<1x32xf32>
    %51 = vector.broadcast %50 : vector<1x32xf32> to vector<8x32xf32>
    %52 = arith.addf %48, %51 : vector<8x32xf32>
    %53 = arith.addf %6, %52 : vector<8x32xf32>
    %c0_30 = arith.constant 0 : index
    %c0_31 = arith.constant 0 : index
    %c0_32 = arith.constant 0 : index
    %54 = vector.load %arg11[%c0_30, %c0_31, %c0_32] : memref<2x6x32xf32, #tpu.memory_space<vmem>>, vector<1x1x32xf32>
    %55 = vector.shape_cast %54 : vector<1x1x32xf32> to vector<1x32xf32>
    %c0_33 = arith.constant 0 : index
    %c1_34 = arith.constant 1 : index
    %c0_35 = arith.constant 0 : index
    %56 = vector.load %arg11[%c0_33, %c1_34, %c0_35] : memref<2x6x32xf32, #tpu.memory_space<vmem>>, vector<1x1x32xf32>
    %57 = vector.shape_cast %56 : vector<1x1x32xf32> to vector<1x32xf32>
    %cst_36 = arith.constant dense<0.000000e+00> : vector<8xf32>
    %58 = vector.multi_reduction <add>, %53, %cst_36 [1] : vector<8x32xf32> to vector<8xf32>
    %59 = vector.shape_cast %58 : vector<8xf32> to vector<8x1xf32>
    %cst_37 = arith.constant 3.200000e+01 : f32
    %60 = vector.broadcast %cst_37 : f32 to vector<8x1xf32>
    %61 = arith.divf %59, %60 : vector<8x1xf32>
    %62 = vector.broadcast %61 : vector<8x1xf32> to vector<8x32xf32>
    %63 = arith.subf %53, %62 : vector<8x32xf32>
    %64 = arith.mulf %63, %63 : vector<8x32xf32>
    %cst_38 = arith.constant dense<0.000000e+00> : vector<8xf32>
    %65 = vector.multi_reduction <add>, %64, %cst_38 [1] : vector<8x32xf32> to vector<8xf32>
    %66 = vector.shape_cast %65 : vector<8xf32> to vector<8x1xf32>
    %cst_39 = arith.constant 3.200000e+01 : f32
    %67 = vector.broadcast %cst_39 : f32 to vector<8x1xf32>
    %68 = arith.divf %66, %67 : vector<8x1xf32>
    %69 = vector.broadcast %61 : vector<8x1xf32> to vector<8x32xf32>
    %70 = arith.subf %53, %69 : vector<8x32xf32>
    %cst_40 = arith.constant 9.99999974E-6 : f32
    %71 = vector.broadcast %cst_40 : f32 to vector<8x1xf32>
    %72 = arith.addf %68, %71 : vector<8x1xf32>
    %73 = math.rsqrt %72 : vector<8x1xf32>
    %74 = vector.broadcast %73 : vector<8x1xf32> to vector<8x32xf32>
    %75 = arith.mulf %70, %74 : vector<8x32xf32>
    %76 = vector.broadcast %55 : vector<1x32xf32> to vector<8x32xf32>
    %77 = arith.mulf %75, %76 : vector<8x32xf32>
    %78 = vector.broadcast %57 : vector<1x32xf32> to vector<8x32xf32>
    %79 = arith.addf %77, %78 : vector<8x32xf32>
    %80 = arith.addf %79, %2 : vector<8x32xf32>
    %81 = arith.truncf %80 : vector<8x32xf32> to vector<8x32xbf16>
    %c0_41 = arith.constant 0 : index
    %c2 = arith.constant 2 : index
    %c0_42 = arith.constant 0 : index
    %c0_43 = arith.constant 0 : index
    %82 = vector.load %arg5[%c0_41, %c2, %c0_42, %c0_43] : memref<2x6x32x32xbf16, #tpu.memory_space<vmem>>, vector<1x1x32x32xbf16>
    %83 = vector.shape_cast %82 : vector<1x1x32x32xbf16> to vector<32x32xbf16>
    %cst_44 = arith.constant dense<0.000000e+00> : vector<8x32xf32>
    %84 = tpu.matmul %81, %83, %cst_44 {dimension_numbers = #tpu.dot_dimension_numbers<[1], [0], [0], [1], [0, 0, 1, 1], [], []>} : vector<8x32xbf16>, vector<32x32xbf16>, vector<8x32xf32> -> vector<8x32xf32>
    %c0_45 = arith.constant 0 : index
    %c2_46 = arith.constant 2 : index
    %c0_47 = arith.constant 0 : index
    %85 = vector.load %arg10[%c0_45, %c2_46, %c0_47] : memref<2x7x32xf32, #tpu.memory_space<vmem>>, vector<1x1x32xf32>
    %86 = vector.shape_cast %85 : vector<1x1x32xf32> to vector<1x32xf32>
    %87 = vector.broadcast %86 : vector<1x32xf32> to vector<8x32xf32>
    %88 = arith.addf %84, %87 : vector<8x32xf32>
    %c0_48 = arith.constant 0 : index
    %c3 = arith.constant 3 : index
    %c0_49 = arith.constant 0 : index
    %c0_50 = arith.constant 0 : index
    %89 = vector.load %arg5[%c0_48, %c3, %c0_49, %c0_50] : memref<2x6x32x32xbf16, #tpu.memory_space<vmem>>, vector<1x1x32x32xbf16>
    %90 = vector.shape_cast %89 : vector<1x1x32x32xbf16> to vector<32x32xbf16>
    %cst_51 = arith.constant dense<0.000000e+00> : vector<16x32xf32>
    %91 = tpu.matmul %5, %90, %cst_51 {dimension_numbers = #tpu.dot_dimension_numbers<[1], [0], [0], [1], [0, 0, 1, 1], [], []>} : vector<16x32xbf16>, vector<32x32xbf16>, vector<16x32xf32> -> vector<16x32xf32>
    %c0_52 = arith.constant 0 : index
    %c3_53 = arith.constant 3 : index
    %c0_54 = arith.constant 0 : index
    %92 = vector.load %arg10[%c0_52, %c3_53, %c0_54] : memref<2x7x32xf32, #tpu.memory_space<vmem>>, vector<1x1x32xf32>
    %93 = vector.shape_cast %92 : vector<1x1x32xf32> to vector<1x32xf32>
    %94 = vector.broadcast %93 : vector<1x32xf32> to vector<16x32xf32>
    %95 = arith.addf %91, %94 : vector<16x32xf32>
    %c0_55 = arith.constant 0 : index
    %c4 = arith.constant 4 : index
    %c0_56 = arith.constant 0 : index
    %c0_57 = arith.constant 0 : index
    %96 = vector.load %arg5[%c0_55, %c4, %c0_56, %c0_57] : memref<2x6x32x32xbf16, #tpu.memory_space<vmem>>, vector<1x1x32x32xbf16>
    %97 = vector.shape_cast %96 : vector<1x1x32x32xbf16> to vector<32x32xbf16>
    %cst_58 = arith.constant dense<0.000000e+00> : vector<16x32xf32>
    %98 = tpu.matmul %3, %97, %cst_58 {dimension_numbers = #tpu.dot_dimension_numbers<[1], [0], [0], [1], [0, 0, 1, 1], [], []>} : vector<16x32xbf16>, vector<32x32xbf16>, vector<16x32xf32> -> vector<16x32xf32>
    %c0_59 = arith.constant 0 : index
    %c4_60 = arith.constant 4 : index
    %c0_61 = arith.constant 0 : index
    %99 = vector.load %arg10[%c0_59, %c4_60, %c0_61] : memref<2x7x32xf32, #tpu.memory_space<vmem>>, vector<1x1x32xf32>
    %100 = vector.shape_cast %99 : vector<1x1x32xf32> to vector<1x32xf32>
    %101 = vector.broadcast %100 : vector<1x32xf32> to vector<16x32xf32>
    %102 = arith.addf %98, %101 : vector<16x32xf32>
    %103 = vector.shape_cast %88 : vector<8x32xf32> to vector<8x4x8xf32>
    %104 = arith.truncf %103 : vector<8x4x8xf32> to vector<8x4x8xbf16>
    %105 = vector.shape_cast %95 : vector<16x32xf32> to vector<16x4x8xf32>
    %106 = arith.truncf %105 : vector<16x4x8xf32> to vector<16x4x8xbf16>
    %107 = vector.shape_cast %102 : vector<16x32xf32> to vector<16x4x8xf32>
    %108 = arith.truncf %107 : vector<16x4x8xf32> to vector<16x4x8xbf16>
    "tpu.trace_start"() <{level = 10 : i32, message = "qhd,khd->hqk"}> : () -> ()
    %cst_62 = arith.constant dense<0.000000e+00> : vector<4x8x16xf32>
    %109 = tpu.matmul %104, %106, %cst_62 {dimension_numbers = #tpu.dot_dimension_numbers<[2], [2], [0], [0], [0, 1, 0, 0, 1, 0], [1], [1]>} : vector<8x4x8xbf16>, vector<16x4x8xbf16>, vector<4x8x16xf32> -> vector<4x8x16xf32>
    "tpu.trace_stop"() : () -> ()
    %cst_63 = arith.constant dense<0xFF800000> : vector<4x8xf32>
    %110 = vector.multi_reduction <maximumf>, %109, %cst_63 [2] : vector<4x8x16xf32> to vector<4x8xf32>
    %111 = vector.shape_cast %110 : vector<4x8xf32> to vector<4x8x1xf32>
    %112 = vector.broadcast %111 : vector<4x8x1xf32> to vector<4x8x16xf32>
    %113 = arith.subf %109, %112 : vector<4x8x16xf32>
    %114 = math.exp %113 : vector<4x8x16xf32>
    %cst_64 = arith.constant dense<0.000000e+00> : vector<4x8xf32>
    %115 = vector.multi_reduction <add>, %114, %cst_64 [2] : vector<4x8x16xf32> to vector<4x8xf32>
    %116 = vector.shape_cast %115 : vector<4x8xf32> to vector<4x8x1xf32>
    %117 = vector.broadcast %116 : vector<4x8x1xf32> to vector<4x8x16xf32>
    %118 = arith.divf %114, %117 : vector<4x8x16xf32>
    %119 = arith.truncf %118 : vector<4x8x16xf32> to vector<4x8x16xbf16>
    "tpu.trace_start"() <{level = 10 : i32, message = "hqk,khd->qhd"}> : () -> ()
    %cst_65 = arith.constant dense<0.000000e+00> : vector<4x8x8xf32>
    %120 = tpu.matmul %108, %119, %cst_65 {dimension_numbers = #tpu.dot_dimension_numbers<[0], [2], [2], [1], [0, 1, 0, 2, 1, 1], [1], [0]>} : vector<16x4x8xbf16>, vector<4x8x16xbf16>, vector<4x8x8xf32> -> vector<4x8x8xf32>
    %121 = tpu.transpose %120, [2, 0, 1] : vector<4x8x8xf32> -> vector<8x4x8xf32>
    "tpu.trace_stop"() : () -> ()
    %122 = vector.shape_cast %121 : vector<8x4x8xf32> to vector<8x32xf32>
    %123 = arith.truncf %122 : vector<8x32xf32> to vector<8x32xbf16>
    %c0_66 = arith.constant 0 : index
    %c5 = arith.constant 5 : index
    %c0_67 = arith.constant 0 : index
    %c0_68 = arith.constant 0 : index
    %124 = vector.load %arg5[%c0_66, %c5, %c0_67, %c0_68] : memref<2x6x32x32xbf16, #tpu.memory_space<vmem>>, vector<1x1x32x32xbf16>
    %125 = vector.shape_cast %124 : vector<1x1x32x32xbf16> to vector<32x32xbf16>
    %cst_69 = arith.constant dense<0.000000e+00> : vector<8x32xf32>
    %126 = tpu.matmul %123, %125, %cst_69 {dimension_numbers = #tpu.dot_dimension_numbers<[1], [0], [0], [1], [0, 0, 1, 1], [], []>} : vector<8x32xbf16>, vector<32x32xbf16>, vector<8x32xf32> -> vector<8x32xf32>
    %c0_70 = arith.constant 0 : index
    %c5_71 = arith.constant 5 : index
    %c0_72 = arith.constant 0 : index
    %127 = vector.load %arg10[%c0_70, %c5_71, %c0_72] : memref<2x7x32xf32, #tpu.memory_space<vmem>>, vector<1x1x32xf32>
    %128 = vector.shape_cast %127 : vector<1x1x32xf32> to vector<1x32xf32>
    %129 = vector.broadcast %128 : vector<1x32xf32> to vector<8x32xf32>
    %130 = arith.addf %126, %129 : vector<8x32xf32>
    %131 = arith.addf %79, %130 : vector<8x32xf32>
    %c0_73 = arith.constant 0 : index
    %c2_74 = arith.constant 2 : index
    %c0_75 = arith.constant 0 : index
    %132 = vector.load %arg11[%c0_73, %c2_74, %c0_75] : memref<2x6x32xf32, #tpu.memory_space<vmem>>, vector<1x1x32xf32>
    %133 = vector.shape_cast %132 : vector<1x1x32xf32> to vector<1x32xf32>
    %c0_76 = arith.constant 0 : index
    %c3_77 = arith.constant 3 : index
    %c0_78 = arith.constant 0 : index
    %134 = vector.load %arg11[%c0_76, %c3_77, %c0_78] : memref<2x6x32xf32, #tpu.memory_space<vmem>>, vector<1x1x32xf32>
    %135 = vector.shape_cast %134 : vector<1x1x32xf32> to vector<1x32xf32>
    %cst_79 = arith.constant dense<0.000000e+00> : vector<8xf32>
    %136 = vector.multi_reduction <add>, %131, %cst_79 [1] : vector<8x32xf32> to vector<8xf32>
    %137 = vector.shape_cast %136 : vector<8xf32> to vector<8x1xf32>
    %cst_80 = arith.constant 3.200000e+01 : f32
    %138 = vector.broadcast %cst_80 : f32 to vector<8x1xf32>
    %139 = arith.divf %137, %138 : vector<8x1xf32>
    %140 = vector.broadcast %139 : vector<8x1xf32> to vector<8x32xf32>
    %141 = arith.subf %131, %140 : vector<8x32xf32>
    %142 = arith.mulf %141, %141 : vector<8x32xf32>
    %cst_81 = arith.constant dense<0.000000e+00> : vector<8xf32>
    %143 = vector.multi_reduction <add>, %142, %cst_81 [1] : vector<8x32xf32> to vector<8xf32>
    %144 = vector.shape_cast %143 : vector<8xf32> to vector<8x1xf32>
    %cst_82 = arith.constant 3.200000e+01 : f32
    %145 = vector.broadcast %cst_82 : f32 to vector<8x1xf32>
    %146 = arith.divf %144, %145 : vector<8x1xf32>
    %147 = vector.broadcast %139 : vector<8x1xf32> to vector<8x32xf32>
    %148 = arith.subf %131, %147 : vector<8x32xf32>
    %cst_83 = arith.constant 9.99999974E-6 : f32
    %149 = vector.broadcast %cst_83 : f32 to vector<8x1xf32>
    %150 = arith.addf %146, %149 : vector<8x1xf32>
    %151 = math.rsqrt %150 : vector<8x1xf32>
    %152 = vector.broadcast %151 : vector<8x1xf32> to vector<8x32xf32>
    %153 = arith.mulf %148, %152 : vector<8x32xf32>
    %154 = vector.broadcast %133 : vector<1x32xf32> to vector<8x32xf32>
    %155 = arith.mulf %153, %154 : vector<8x32xf32>
    %156 = vector.broadcast %135 : vector<1x32xf32> to vector<8x32xf32>
    %157 = arith.addf %155, %156 : vector<8x32xf32>
    %158 = arith.truncf %157 : vector<8x32xf32> to vector<8x32xbf16>
    %c0_84 = arith.constant 0 : index
    %c0_85 = arith.constant 0 : index
    %c0_86 = arith.constant 0 : index
    %159 = vector.load %arg6[%c0_84, %c0_85, %c0_86] : memref<2x32x64xbf16, #tpu.memory_space<vmem>>, vector<1x32x64xbf16>
    %160 = vector.shape_cast %159 : vector<1x32x64xbf16> to vector<32x64xbf16>
    %cst_87 = arith.constant dense<0.000000e+00> : vector<8x64xf32>
    %161 = tpu.matmul %158, %160, %cst_87 {dimension_numbers = #tpu.dot_dimension_numbers<[1], [0], [0], [1], [0, 0, 1, 1], [], []>} : vector<8x32xbf16>, vector<32x64xbf16>, vector<8x64xf32> -> vector<8x64xf32>
    %c0_88 = arith.constant 0 : index
    %c0_89 = arith.constant 0 : index
    %162 = vector.load %arg9[%c0_88, %c0_89] : memref<2x64xf32, #tpu.memory_space<vmem>>, vector<1x64xf32>
    %163 = vector.broadcast %162 : vector<1x64xf32> to vector<8x64xf32>
    %164 = arith.addf %161, %163 : vector<8x64xf32>
    %cst_90 = arith.constant 0.000000e+00 : f32
    %165 = vector.broadcast %cst_90 : f32 to vector<8x64xf32>
    %166 = arith.maximumf %164, %165 : vector<8x64xf32>
    %167 = arith.truncf %166 : vector<8x64xf32> to vector<8x64xbf16>
    %c0_91 = arith.constant 0 : index
    %c0_92 = arith.constant 0 : index
    %c0_93 = arith.constant 0 : index
    %168 = vector.load %arg7[%c0_91, %c0_92, %c0_93] : memref<2x64x32xbf16, #tpu.memory_space<vmem>>, vector<1x64x32xbf16>
    %169 = vector.shape_cast %168 : vector<1x64x32xbf16> to vector<64x32xbf16>
    %cst_94 = arith.constant dense<0.000000e+00> : vector<8x32xf32>
    %170 = tpu.matmul %167, %169, %cst_94 {dimension_numbers = #tpu.dot_dimension_numbers<[1], [0], [0], [1], [0, 0, 1, 1], [], []>} : vector<8x64xbf16>, vector<64x32xbf16>, vector<8x32xf32> -> vector<8x32xf32>
    %c0_95 = arith.constant 0 : index
    %c6 = arith.constant 6 : index
    %c0_96 = arith.constant 0 : index
    %171 = vector.load %arg10[%c0_95, %c6, %c0_96] : memref<2x7x32xf32, #tpu.memory_space<vmem>>, vector<1x1x32xf32>
    %172 = vector.shape_cast %171 : vector<1x1x32xf32> to vector<1x32xf32>
    %173 = vector.broadcast %172 : vector<1x32xf32> to vector<8x32xf32>
    %174 = arith.addf %170, %173 : vector<8x32xf32>
    %175 = arith.addf %157, %174 : vector<8x32xf32>
    %c0_97 = arith.constant 0 : index
    %c4_98 = arith.constant 4 : index
    %c0_99 = arith.constant 0 : index
    %176 = vector.load %arg11[%c0_97, %c4_98, %c0_99] : memref<2x6x32xf32, #tpu.memory_space<vmem>>, vector<1x1x32xf32>
    %177 = vector.shape_cast %176 : vector<1x1x32xf32> to vector<1x32xf32>
    %c0_100 = arith.constant 0 : index
    %c5_101 = arith.constant 5 : index
    %c0_102 = arith.constant 0 : index
    %178 = vector.load %arg11[%c0_100, %c5_101, %c0_102] : memref<2x6x32xf32, #tpu.memory_space<vmem>>, vector<1x1x32xf32>
    %179 = vector.shape_cast %178 : vector<1x1x32xf32> to vector<1x32xf32>
    %cst_103 = arith.constant dense<0.000000e+00> : vector<8xf32>
    %180 = vector.multi_reduction <add>, %175, %cst_103 [1] : vector<8x32xf32> to vector<8xf32>
    %181 = vector.shape_cast %180 : vector<8xf32> to vector<8x1xf32>
    %cst_104 = arith.constant 3.200000e+01 : f32
    %182 = vector.broadcast %cst_104 : f32 to vector<8x1xf32>
    %183 = arith.divf %181, %182 : vector<8x1xf32>
    %184 = vector.broadcast %183 : vector<8x1xf32> to vector<8x32xf32>
    %185 = arith.subf %175, %184 : vector<8x32xf32>
    %186 = arith.mulf %185, %185 : vector<8x32xf32>
    %cst_105 = arith.constant dense<0.000000e+00> : vector<8xf32>
    %187 = vector.multi_reduction <add>, %186, %cst_105 [1] : vector<8x32xf32> to vector<8xf32>
    %188 = vector.shape_cast %187 : vector<8xf32> to vector<8x1xf32>
    %cst_106 = arith.constant 3.200000e+01 : f32
    %189 = vector.broadcast %cst_106 : f32 to vector<8x1xf32>
    %190 = arith.divf %188, %189 : vector<8x1xf32>
    %191 = vector.broadcast %183 : vector<8x1xf32> to vector<8x32xf32>
    %192 = arith.subf %175, %191 : vector<8x32xf32>
    %cst_107 = arith.constant 9.99999974E-6 : f32
    %193 = vector.broadcast %cst_107 : f32 to vector<8x1xf32>
    %194 = arith.addf %190, %193 : vector<8x1xf32>
    %195 = math.rsqrt %194 : vector<8x1xf32>
    %196 = vector.broadcast %195 : vector<8x1xf32> to vector<8x32xf32>
    %197 = arith.mulf %192, %196 : vector<8x32xf32>
    %198 = vector.broadcast %177 : vector<1x32xf32> to vector<8x32xf32>
    %199 = arith.mulf %197, %198 : vector<8x32xf32>
    %200 = vector.broadcast %179 : vector<1x32xf32> to vector<8x32xf32>
    %201 = arith.addf %199, %200 : vector<8x32xf32>
    %202 = arith.addf %201, %2 : vector<8x32xf32>
    %203 = arith.truncf %202 : vector<8x32xf32> to vector<8x32xbf16>
    %c1_108 = arith.constant 1 : index
    %c0_109 = arith.constant 0 : index
    %c0_110 = arith.constant 0 : index
    %204 = vector.load %arg4[%c1_108, %c0_109, %c0_110] : memref<2x32x64xbf16, #tpu.memory_space<vmem>>, vector<1x32x64xbf16>
    %205 = vector.shape_cast %204 : vector<1x32x64xbf16> to vector<32x64xbf16>
    %cst_111 = arith.constant dense<0.000000e+00> : vector<8x64xf32>
    %206 = tpu.matmul %203, %205, %cst_111 {dimension_numbers = #tpu.dot_dimension_numbers<[1], [0], [0], [1], [0, 0, 1, 1], [], []>} : vector<8x32xbf16>, vector<32x64xbf16>, vector<8x64xf32> -> vector<8x64xf32>
    %c1_112 = arith.constant 1 : index
    %c0_113 = arith.constant 0 : index
    %207 = vector.load %arg8[%c1_112, %c0_113] : memref<2x64xf32, #tpu.memory_space<vmem>>, vector<1x64xf32>
    %208 = vector.broadcast %207 : vector<1x64xf32> to vector<8x64xf32>
    %209 = arith.addf %206, %208 : vector<8x64xf32>
    %210 = arith.truncf %201 : vector<8x32xf32> to vector<8x32xbf16>
    %c1_114 = arith.constant 1 : index
    %c0_115 = arith.constant 0 : index
    %c0_116 = arith.constant 0 : index
    %c0_117 = arith.constant 0 : index
    %211 = vector.load %arg5[%c1_114, %c0_115, %c0_116, %c0_117] : memref<2x6x32x32xbf16, #tpu.memory_space<vmem>>, vector<1x1x32x32xbf16>
    %212 = vector.shape_cast %211 : vector<1x1x32x32xbf16> to vector<32x32xbf16>
    %cst_118 = arith.constant dense<0.000000e+00> : vector<8x32xf32>
    %213 = tpu.matmul %210, %212, %cst_118 {dimension_numbers = #tpu.dot_dimension_numbers<[1], [0], [0], [1], [0, 0, 1, 1], [], []>} : vector<8x32xbf16>, vector<32x32xbf16>, vector<8x32xf32> -> vector<8x32xf32>
    %c1_119 = arith.constant 1 : index
    %c0_120 = arith.constant 0 : index
    %c0_121 = arith.constant 0 : index
    %214 = vector.load %arg10[%c1_119, %c0_120, %c0_121] : memref<2x7x32xf32, #tpu.memory_space<vmem>>, vector<1x1x32xf32>
    %215 = vector.shape_cast %214 : vector<1x1x32xf32> to vector<1x32xf32>
    %216 = vector.broadcast %215 : vector<1x32xf32> to vector<8x32xf32>
    %217 = arith.addf %213, %216 : vector<8x32xf32>
    %218 = vector.extract_strided_slice %209 {offsets = [0, 0], sizes = [8, 32], strides = [1, 1]} : vector<8x64xf32> to vector<8x32xf32>
    %219 = vector.extract_strided_slice %209 {offsets = [0, 32], sizes = [8, 32], strides = [1, 1]} : vector<8x64xf32> to vector<8x32xf32>
    %220 = vector.shape_cast %218 : vector<8x32xf32> to vector<8x4x8xf32>
    %221 = arith.truncf %220 : vector<8x4x8xf32> to vector<8x4x8xbf16>
    %222 = vector.shape_cast %219 : vector<8x32xf32> to vector<8x4x8xf32>
    %223 = arith.truncf %222 : vector<8x4x8xf32> to vector<8x4x8xbf16>
    %224 = vector.shape_cast %217 : vector<8x32xf32> to vector<8x4x8xf32>
    %225 = arith.truncf %224 : vector<8x4x8xf32> to vector<8x4x8xbf16>
    "tpu.trace_start"() <{level = 10 : i32, message = "qhd,khd->hqk"}> : () -> ()
    %cst_122 = arith.constant dense<0.000000e+00> : vector<4x8x8xf32>
    %226 = tpu.matmul %221, %223, %cst_122 {dimension_numbers = #tpu.dot_dimension_numbers<[2], [2], [0], [0], [0, 1, 0, 0, 1, 0], [1], [1]>} : vector<8x4x8xbf16>, vector<8x4x8xbf16>, vector<4x8x8xf32> -> vector<4x8x8xf32>
    "tpu.trace_stop"() : () -> ()
    %cst_123 = arith.constant dense<0xFF800000> : vector<4x8xf32>
    %227 = vector.multi_reduction <maximumf>, %226, %cst_123 [2] : vector<4x8x8xf32> to vector<4x8xf32>
    %228 = vector.shape_cast %227 : vector<4x8xf32> to vector<4x8x1xf32>
    %229 = vector.broadcast %228 : vector<4x8x1xf32> to vector<4x8x8xf32>
    %230 = arith.subf %226, %229 : vector<4x8x8xf32>
    %231 = math.exp %230 : vector<4x8x8xf32>
    %cst_124 = arith.constant dense<0.000000e+00> : vector<4x8xf32>
    %232 = vector.multi_reduction <add>, %231, %cst_124 [2] : vector<4x8x8xf32> to vector<4x8xf32>
    %233 = vector.shape_cast %232 : vector<4x8xf32> to vector<4x8x1xf32>
    %234 = vector.broadcast %233 : vector<4x8x1xf32> to vector<4x8x8xf32>
    %235 = arith.divf %231, %234 : vector<4x8x8xf32>
    %236 = arith.truncf %235 : vector<4x8x8xf32> to vector<4x8x8xbf16>
    "tpu.trace_start"() <{level = 10 : i32, message = "hqk,khd->qhd"}> : () -> ()
    %cst_125 = arith.constant dense<0.000000e+00> : vector<4x8x8xf32>
    %237 = tpu.matmul %225, %236, %cst_125 {dimension_numbers = #tpu.dot_dimension_numbers<[0], [2], [2], [1], [0, 1, 0, 2, 1, 1], [1], [0]>} : vector<8x4x8xbf16>, vector<4x8x8xbf16>, vector<4x8x8xf32> -> vector<4x8x8xf32>
    %238 = tpu.transpose %237, [2, 0, 1] : vector<4x8x8xf32> -> vector<8x4x8xf32>
    "tpu.trace_stop"() : () -> ()
    %239 = vector.shape_cast %238 : vector<8x4x8xf32> to vector<8x32xf32>
    %240 = arith.truncf %239 : vector<8x32xf32> to vector<8x32xbf16>
    %c1_126 = arith.constant 1 : index
    %c1_127 = arith.constant 1 : index
    %c0_128 = arith.constant 0 : index
    %c0_129 = arith.constant 0 : index
    %241 = vector.load %arg5[%c1_126, %c1_127, %c0_128, %c0_129] : memref<2x6x32x32xbf16, #tpu.memory_space<vmem>>, vector<1x1x32x32xbf16>
    %242 = vector.shape_cast %241 : vector<1x1x32x32xbf16> to vector<32x32xbf16>
    %cst_130 = arith.constant dense<0.000000e+00> : vector<8x32xf32>
    %243 = tpu.matmul %240, %242, %cst_130 {dimension_numbers = #tpu.dot_dimension_numbers<[1], [0], [0], [1], [0, 0, 1, 1], [], []>} : vector<8x32xbf16>, vector<32x32xbf16>, vector<8x32xf32> -> vector<8x32xf32>
    %c1_131 = arith.constant 1 : index
    %c1_132 = arith.constant 1 : index
    %c0_133 = arith.constant 0 : index
    %244 = vector.load %arg10[%c1_131, %c1_132, %c0_133] : memref<2x7x32xf32, #tpu.memory_space<vmem>>, vector<1x1x32xf32>
    %245 = vector.shape_cast %244 : vector<1x1x32xf32> to vector<1x32xf32>
    %246 = vector.broadcast %245 : vector<1x32xf32> to vector<8x32xf32>
    %247 = arith.addf %243, %246 : vector<8x32xf32>
    %248 = arith.addf %201, %247 : vector<8x32xf32>
    %c1_134 = arith.constant 1 : index
    %c0_135 = arith.constant 0 : index
    %c0_136 = arith.constant 0 : index
    %249 = vector.load %arg11[%c1_134, %c0_135, %c0_136] : memref<2x6x32xf32, #tpu.memory_space<vmem>>, vector<1x1x32xf32>
    %250 = vector.shape_cast %249 : vector<1x1x32xf32> to vector<1x32xf32>
    %c1_137 = arith.constant 1 : index
    %c1_138 = arith.constant 1 : index
    %c0_139 = arith.constant 0 : index
    %251 = vector.load %arg11[%c1_137, %c1_138, %c0_139] : memref<2x6x32xf32, #tpu.memory_space<vmem>>, vector<1x1x32xf32>
    %252 = vector.shape_cast %251 : vector<1x1x32xf32> to vector<1x32xf32>
    %cst_140 = arith.constant dense<0.000000e+00> : vector<8xf32>
    %253 = vector.multi_reduction <add>, %248, %cst_140 [1] : vector<8x32xf32> to vector<8xf32>
    %254 = vector.shape_cast %253 : vector<8xf32> to vector<8x1xf32>
    %cst_141 = arith.constant 3.200000e+01 : f32
    %255 = vector.broadcast %cst_141 : f32 to vector<8x1xf32>
    %256 = arith.divf %254, %255 : vector<8x1xf32>
    %257 = vector.broadcast %256 : vector<8x1xf32> to vector<8x32xf32>
    %258 = arith.subf %248, %257 : vector<8x32xf32>
    %259 = arith.mulf %258, %258 : vector<8x32xf32>
    %cst_142 = arith.constant dense<0.000000e+00> : vector<8xf32>
    %260 = vector.multi_reduction <add>, %259, %cst_142 [1] : vector<8x32xf32> to vector<8xf32>
    %261 = vector.shape_cast %260 : vector<8xf32> to vector<8x1xf32>
    %cst_143 = arith.constant 3.200000e+01 : f32
    %262 = vector.broadcast %cst_143 : f32 to vector<8x1xf32>
    %263 = arith.divf %261, %262 : vector<8x1xf32>
    %264 = vector.broadcast %256 : vector<8x1xf32> to vector<8x32xf32>
    %265 = arith.subf %248, %264 : vector<8x32xf32>
    %cst_144 = arith.constant 9.99999974E-6 : f32
    %266 = vector.broadcast %cst_144 : f32 to vector<8x1xf32>
    %267 = arith.addf %263, %266 : vector<8x1xf32>
    %268 = math.rsqrt %267 : vector<8x1xf32>
    %269 = vector.broadcast %268 : vector<8x1xf32> to vector<8x32xf32>
    %270 = arith.mulf %265, %269 : vector<8x32xf32>
    %271 = vector.broadcast %250 : vector<1x32xf32> to vector<8x32xf32>
    %272 = arith.mulf %270, %271 : vector<8x32xf32>
    %273 = vector.broadcast %252 : vector<1x32xf32> to vector<8x32xf32>
    %274 = arith.addf %272, %273 : vector<8x32xf32>
    %275 = arith.addf %274, %2 : vector<8x32xf32>
    %276 = arith.truncf %275 : vector<8x32xf32> to vector<8x32xbf16>
    %c1_145 = arith.constant 1 : index
    %c2_146 = arith.constant 2 : index
    %c0_147 = arith.constant 0 : index
    %c0_148 = arith.constant 0 : index
    %277 = vector.load %arg5[%c1_145, %c2_146, %c0_147, %c0_148] : memref<2x6x32x32xbf16, #tpu.memory_space<vmem>>, vector<1x1x32x32xbf16>
    %278 = vector.shape_cast %277 : vector<1x1x32x32xbf16> to vector<32x32xbf16>
    %cst_149 = arith.constant dense<0.000000e+00> : vector<8x32xf32>
    %279 = tpu.matmul %276, %278, %cst_149 {dimension_numbers = #tpu.dot_dimension_numbers<[1], [0], [0], [1], [0, 0, 1, 1], [], []>} : vector<8x32xbf16>, vector<32x32xbf16>, vector<8x32xf32> -> vector<8x32xf32>
    %c1_150 = arith.constant 1 : index
    %c2_151 = arith.constant 2 : index
    %c0_152 = arith.constant 0 : index
    %280 = vector.load %arg10[%c1_150, %c2_151, %c0_152] : memref<2x7x32xf32, #tpu.memory_space<vmem>>, vector<1x1x32xf32>
    %281 = vector.shape_cast %280 : vector<1x1x32xf32> to vector<1x32xf32>
    %282 = vector.broadcast %281 : vector<1x32xf32> to vector<8x32xf32>
    %283 = arith.addf %279, %282 : vector<8x32xf32>
    %c1_153 = arith.constant 1 : index
    %c3_154 = arith.constant 3 : index
    %c0_155 = arith.constant 0 : index
    %c0_156 = arith.constant 0 : index
    %284 = vector.load %arg5[%c1_153, %c3_154, %c0_155, %c0_156] : memref<2x6x32x32xbf16, #tpu.memory_space<vmem>>, vector<1x1x32x32xbf16>
    %285 = vector.shape_cast %284 : vector<1x1x32x32xbf16> to vector<32x32xbf16>
    %cst_157 = arith.constant dense<0.000000e+00> : vector<16x32xf32>
    %286 = tpu.matmul %5, %285, %cst_157 {dimension_numbers = #tpu.dot_dimension_numbers<[1], [0], [0], [1], [0, 0, 1, 1], [], []>} : vector<16x32xbf16>, vector<32x32xbf16>, vector<16x32xf32> -> vector<16x32xf32>
    %c1_158 = arith.constant 1 : index
    %c3_159 = arith.constant 3 : index
    %c0_160 = arith.constant 0 : index
    %287 = vector.load %arg10[%c1_158, %c3_159, %c0_160] : memref<2x7x32xf32, #tpu.memory_space<vmem>>, vector<1x1x32xf32>
    %288 = vector.shape_cast %287 : vector<1x1x32xf32> to vector<1x32xf32>
    %289 = vector.broadcast %288 : vector<1x32xf32> to vector<16x32xf32>
    %290 = arith.addf %286, %289 : vector<16x32xf32>
    %c1_161 = arith.constant 1 : index
    %c4_162 = arith.constant 4 : index
    %c0_163 = arith.constant 0 : index
    %c0_164 = arith.constant 0 : index
    %291 = vector.load %arg5[%c1_161, %c4_162, %c0_163, %c0_164] : memref<2x6x32x32xbf16, #tpu.memory_space<vmem>>, vector<1x1x32x32xbf16>
    %292 = vector.shape_cast %291 : vector<1x1x32x32xbf16> to vector<32x32xbf16>
    %cst_165 = arith.constant dense<0.000000e+00> : vector<16x32xf32>
    %293 = tpu.matmul %3, %292, %cst_165 {dimension_numbers = #tpu.dot_dimension_numbers<[1], [0], [0], [1], [0, 0, 1, 1], [], []>} : vector<16x32xbf16>, vector<32x32xbf16>, vector<16x32xf32> -> vector<16x32xf32>
    %c1_166 = arith.constant 1 : index
    %c4_167 = arith.constant 4 : index
    %c0_168 = arith.constant 0 : index
    %294 = vector.load %arg10[%c1_166, %c4_167, %c0_168] : memref<2x7x32xf32, #tpu.memory_space<vmem>>, vector<1x1x32xf32>
    %295 = vector.shape_cast %294 : vector<1x1x32xf32> to vector<1x32xf32>
    %296 = vector.broadcast %295 : vector<1x32xf32> to vector<16x32xf32>
    %297 = arith.addf %293, %296 : vector<16x32xf32>
    %298 = vector.shape_cast %283 : vector<8x32xf32> to vector<8x4x8xf32>
    %299 = arith.truncf %298 : vector<8x4x8xf32> to vector<8x4x8xbf16>
    %300 = vector.shape_cast %290 : vector<16x32xf32> to vector<16x4x8xf32>
    %301 = arith.truncf %300 : vector<16x4x8xf32> to vector<16x4x8xbf16>
    %302 = vector.shape_cast %297 : vector<16x32xf32> to vector<16x4x8xf32>
    %303 = arith.truncf %302 : vector<16x4x8xf32> to vector<16x4x8xbf16>
    "tpu.trace_start"() <{level = 10 : i32, message = "qhd,khd->hqk"}> : () -> ()
    %cst_169 = arith.constant dense<0.000000e+00> : vector<4x8x16xf32>
    %304 = tpu.matmul %299, %301, %cst_169 {dimension_numbers = #tpu.dot_dimension_numbers<[2], [2], [0], [0], [0, 1, 0, 0, 1, 0], [1], [1]>} : vector<8x4x8xbf16>, vector<16x4x8xbf16>, vector<4x8x16xf32> -> vector<4x8x16xf32>
    "tpu.trace_stop"() : () -> ()
    %cst_170 = arith.constant dense<0xFF800000> : vector<4x8xf32>
    %305 = vector.multi_reduction <maximumf>, %304, %cst_170 [2] : vector<4x8x16xf32> to vector<4x8xf32>
    %306 = vector.shape_cast %305 : vector<4x8xf32> to vector<4x8x1xf32>
    %307 = vector.broadcast %306 : vector<4x8x1xf32> to vector<4x8x16xf32>
    %308 = arith.subf %304, %307 : vector<4x8x16xf32>
    %309 = math.exp %308 : vector<4x8x16xf32>
    %cst_171 = arith.constant dense<0.000000e+00> : vector<4x8xf32>
    %310 = vector.multi_reduction <add>, %309, %cst_171 [2] : vector<4x8x16xf32> to vector<4x8xf32>
    %311 = vector.shape_cast %310 : vector<4x8xf32> to vector<4x8x1xf32>
    %312 = vector.broadcast %311 : vector<4x8x1xf32> to vector<4x8x16xf32>
    %313 = arith.divf %309, %312 : vector<4x8x16xf32>
    %314 = arith.truncf %313 : vector<4x8x16xf32> to vector<4x8x16xbf16>
    "tpu.trace_start"() <{level = 10 : i32, message = "hqk,khd->qhd"}> : () -> ()
    %cst_172 = arith.constant dense<0.000000e+00> : vector<4x8x8xf32>
    %315 = tpu.matmul %303, %314, %cst_172 {dimension_numbers = #tpu.dot_dimension_numbers<[0], [2], [2], [1], [0, 1, 0, 2, 1, 1], [1], [0]>} : vector<16x4x8xbf16>, vector<4x8x16xbf16>, vector<4x8x8xf32> -> vector<4x8x8xf32>
    %316 = tpu.transpose %315, [2, 0, 1] : vector<4x8x8xf32> -> vector<8x4x8xf32>
    "tpu.trace_stop"() : () -> ()
    %317 = vector.shape_cast %316 : vector<8x4x8xf32> to vector<8x32xf32>
    %318 = arith.truncf %317 : vector<8x32xf32> to vector<8x32xbf16>
    %c1_173 = arith.constant 1 : index
    %c5_174 = arith.constant 5 : index
    %c0_175 = arith.constant 0 : index
    %c0_176 = arith.constant 0 : index
    %319 = vector.load %arg5[%c1_173, %c5_174, %c0_175, %c0_176] : memref<2x6x32x32xbf16, #tpu.memory_space<vmem>>, vector<1x1x32x32xbf16>
    %320 = vector.shape_cast %319 : vector<1x1x32x32xbf16> to vector<32x32xbf16>
    %cst_177 = arith.constant dense<0.000000e+00> : vector<8x32xf32>
    %321 = tpu.matmul %318, %320, %cst_177 {dimension_numbers = #tpu.dot_dimension_numbers<[1], [0], [0], [1], [0, 0, 1, 1], [], []>} : vector<8x32xbf16>, vector<32x32xbf16>, vector<8x32xf32> -> vector<8x32xf32>
    %c1_178 = arith.constant 1 : index
    %c5_179 = arith.constant 5 : index
    %c0_180 = arith.constant 0 : index
    %322 = vector.load %arg10[%c1_178, %c5_179, %c0_180] : memref<2x7x32xf32, #tpu.memory_space<vmem>>, vector<1x1x32xf32>
    %323 = vector.shape_cast %322 : vector<1x1x32xf32> to vector<1x32xf32>
    %324 = vector.broadcast %323 : vector<1x32xf32> to vector<8x32xf32>
    %325 = arith.addf %321, %324 : vector<8x32xf32>
    %326 = arith.addf %274, %325 : vector<8x32xf32>
    %c1_181 = arith.constant 1 : index
    %c2_182 = arith.constant 2 : index
    %c0_183 = arith.constant 0 : index
    %327 = vector.load %arg11[%c1_181, %c2_182, %c0_183] : memref<2x6x32xf32, #tpu.memory_space<vmem>>, vector<1x1x32xf32>
    %328 = vector.shape_cast %327 : vector<1x1x32xf32> to vector<1x32xf32>
    %c1_184 = arith.constant 1 : index
    %c3_185 = arith.constant 3 : index
    %c0_186 = arith.constant 0 : index
    %329 = vector.load %arg11[%c1_184, %c3_185, %c0_186] : memref<2x6x32xf32, #tpu.memory_space<vmem>>, vector<1x1x32xf32>
    %330 = vector.shape_cast %329 : vector<1x1x32xf32> to vector<1x32xf32>
    %cst_187 = arith.constant dense<0.000000e+00> : vector<8xf32>
    %331 = vector.multi_reduction <add>, %326, %cst_187 [1] : vector<8x32xf32> to vector<8xf32>
    %332 = vector.shape_cast %331 : vector<8xf32> to vector<8x1xf32>
    %cst_188 = arith.constant 3.200000e+01 : f32
    %333 = vector.broadcast %cst_188 : f32 to vector<8x1xf32>
    %334 = arith.divf %332, %333 : vector<8x1xf32>
    %335 = vector.broadcast %334 : vector<8x1xf32> to vector<8x32xf32>
    %336 = arith.subf %326, %335 : vector<8x32xf32>
    %337 = arith.mulf %336, %336 : vector<8x32xf32>
    %cst_189 = arith.constant dense<0.000000e+00> : vector<8xf32>
    %338 = vector.multi_reduction <add>, %337, %cst_189 [1] : vector<8x32xf32> to vector<8xf32>
    %339 = vector.shape_cast %338 : vector<8xf32> to vector<8x1xf32>
    %cst_190 = arith.constant 3.200000e+01 : f32
    %340 = vector.broadcast %cst_190 : f32 to vector<8x1xf32>
    %341 = arith.divf %339, %340 : vector<8x1xf32>
    %342 = vector.broadcast %334 : vector<8x1xf32> to vector<8x32xf32>
    %343 = arith.subf %326, %342 : vector<8x32xf32>
    %cst_191 = arith.constant 9.99999974E-6 : f32
    %344 = vector.broadcast %cst_191 : f32 to vector<8x1xf32>
    %345 = arith.addf %341, %344 : vector<8x1xf32>
    %346 = math.rsqrt %345 : vector<8x1xf32>
    %347 = vector.broadcast %346 : vector<8x1xf32> to vector<8x32xf32>
    %348 = arith.mulf %343, %347 : vector<8x32xf32>
    %349 = vector.broadcast %328 : vector<1x32xf32> to vector<8x32xf32>
    %350 = arith.mulf %348, %349 : vector<8x32xf32>
    %351 = vector.broadcast %330 : vector<1x32xf32> to vector<8x32xf32>
    %352 = arith.addf %350, %351 : vector<8x32xf32>
    %353 = arith.truncf %352 : vector<8x32xf32> to vector<8x32xbf16>
    %c1_192 = arith.constant 1 : index
    %c0_193 = arith.constant 0 : index
    %c0_194 = arith.constant 0 : index
    %354 = vector.load %arg6[%c1_192, %c0_193, %c0_194] : memref<2x32x64xbf16, #tpu.memory_space<vmem>>, vector<1x32x64xbf16>
    %355 = vector.shape_cast %354 : vector<1x32x64xbf16> to vector<32x64xbf16>
    %cst_195 = arith.constant dense<0.000000e+00> : vector<8x64xf32>
    %356 = tpu.matmul %353, %355, %cst_195 {dimension_numbers = #tpu.dot_dimension_numbers<[1], [0], [0], [1], [0, 0, 1, 1], [], []>} : vector<8x32xbf16>, vector<32x64xbf16>, vector<8x64xf32> -> vector<8x64xf32>
    %c1_196 = arith.constant 1 : index
    %c0_197 = arith.constant 0 : index
    %357 = vector.load %arg9[%c1_196, %c0_197] : memref<2x64xf32, #tpu.memory_space<vmem>>, vector<1x64xf32>
    %358 = vector.broadcast %357 : vector<1x64xf32> to vector<8x64xf32>
    %359 = arith.addf %356, %358 : vector<8x64xf32>
    %cst_198 = arith.constant 0.000000e+00 : f32
    %360 = vector.broadcast %cst_198 : f32 to vector<8x64xf32>
    %361 = arith.maximumf %359, %360 : vector<8x64xf32>
    %362 = arith.truncf %361 : vector<8x64xf32> to vector<8x64xbf16>
    %c1_199 = arith.constant 1 : index
    %c0_200 = arith.constant 0 : index
    %c0_201 = arith.constant 0 : index
    %363 = vector.load %arg7[%c1_199, %c0_200, %c0_201] : memref<2x64x32xbf16, #tpu.memory_space<vmem>>, vector<1x64x32xbf16>
    %364 = vector.shape_cast %363 : vector<1x64x32xbf16> to vector<64x32xbf16>
    %cst_202 = arith.constant dense<0.000000e+00> : vector<8x32xf32>
    %365 = tpu.matmul %362, %364, %cst_202 {dimension_numbers = #tpu.dot_dimension_numbers<[1], [0], [0], [1], [0, 0, 1, 1], [], []>} : vector<8x64xbf16>, vector<64x32xbf16>, vector<8x32xf32> -> vector<8x32xf32>
    %c1_203 = arith.constant 1 : index
    %c6_204 = arith.constant 6 : index
    %c0_205 = arith.constant 0 : index
    %366 = vector.load %arg10[%c1_203, %c6_204, %c0_205] : memref<2x7x32xf32, #tpu.memory_space<vmem>>, vector<1x1x32xf32>
    %367 = vector.shape_cast %366 : vector<1x1x32xf32> to vector<1x32xf32>
    %368 = vector.broadcast %367 : vector<1x32xf32> to vector<8x32xf32>
    %369 = arith.addf %365, %368 : vector<8x32xf32>
    %370 = arith.addf %352, %369 : vector<8x32xf32>
    %c1_206 = arith.constant 1 : index
    %c4_207 = arith.constant 4 : index
    %c0_208 = arith.constant 0 : index
    %371 = vector.load %arg11[%c1_206, %c4_207, %c0_208] : memref<2x6x32xf32, #tpu.memory_space<vmem>>, vector<1x1x32xf32>
    %372 = vector.shape_cast %371 : vector<1x1x32xf32> to vector<1x32xf32>
    %c1_209 = arith.constant 1 : index
    %c5_210 = arith.constant 5 : index
    %c0_211 = arith.constant 0 : index
    %373 = vector.load %arg11[%c1_209, %c5_210, %c0_211] : memref<2x6x32xf32, #tpu.memory_space<vmem>>, vector<1x1x32xf32>
    %374 = vector.shape_cast %373 : vector<1x1x32xf32> to vector<1x32xf32>
    %cst_212 = arith.constant dense<0.000000e+00> : vector<8xf32>
    %375 = vector.multi_reduction <add>, %370, %cst_212 [1] : vector<8x32xf32> to vector<8xf32>
    %376 = vector.shape_cast %375 : vector<8xf32> to vector<8x1xf32>
    %cst_213 = arith.constant 3.200000e+01 : f32
    %377 = vector.broadcast %cst_213 : f32 to vector<8x1xf32>
    %378 = arith.divf %376, %377 : vector<8x1xf32>
    %379 = vector.broadcast %378 : vector<8x1xf32> to vector<8x32xf32>
    %380 = arith.subf %370, %379 : vector<8x32xf32>
    %381 = arith.mulf %380, %380 : vector<8x32xf32>
    %cst_214 = arith.constant dense<0.000000e+00> : vector<8xf32>
    %382 = vector.multi_reduction <add>, %381, %cst_214 [1] : vector<8x32xf32> to vector<8xf32>
    %383 = vector.shape_cast %382 : vector<8xf32> to vector<8x1xf32>
    %cst_215 = arith.constant 3.200000e+01 : f32
    %384 = vector.broadcast %cst_215 : f32 to vector<8x1xf32>
    %385 = arith.divf %383, %384 : vector<8x1xf32>
    %386 = vector.broadcast %378 : vector<8x1xf32> to vector<8x32xf32>
    %387 = arith.subf %370, %386 : vector<8x32xf32>
    %cst_216 = arith.constant 9.99999974E-6 : f32
    %388 = vector.broadcast %cst_216 : f32 to vector<8x1xf32>
    %389 = arith.addf %385, %388 : vector<8x1xf32>
    %390 = math.rsqrt %389 : vector<8x1xf32>
    %391 = vector.broadcast %390 : vector<8x1xf32> to vector<8x32xf32>
    %392 = arith.mulf %387, %391 : vector<8x32xf32>
    %393 = vector.broadcast %372 : vector<1x32xf32> to vector<8x32xf32>
    %394 = arith.mulf %392, %393 : vector<8x32xf32>
    %395 = vector.broadcast %374 : vector<1x32xf32> to vector<8x32xf32>
    %396 = arith.addf %394, %395 : vector<8x32xf32>
    %c0_217 = arith.constant 0 : index
    %c0_218 = arith.constant 0 : index
    %397 = vector.load %arg12[%c0_217, %c0_218] : memref<2x32xf32, #tpu.memory_space<vmem>>, vector<1x32xf32>
    %c1_219 = arith.constant 1 : index
    %c0_220 = arith.constant 0 : index
    %398 = vector.load %arg12[%c1_219, %c0_220] : memref<2x32xf32, #tpu.memory_space<vmem>>, vector<1x32xf32>
    %cst_221 = arith.constant dense<0.000000e+00> : vector<8xf32>
    %399 = vector.multi_reduction <add>, %396, %cst_221 [1] : vector<8x32xf32> to vector<8xf32>
    %400 = vector.shape_cast %399 : vector<8xf32> to vector<8x1xf32>
    %cst_222 = arith.constant 3.200000e+01 : f32
    %401 = vector.broadcast %cst_222 : f32 to vector<8x1xf32>
    %402 = arith.divf %400, %401 : vector<8x1xf32>
    %403 = vector.broadcast %402 : vector<8x1xf32> to vector<8x32xf32>
    %404 = arith.subf %396, %403 : vector<8x32xf32>
    %405 = arith.mulf %404, %404 : vector<8x32xf32>
    %cst_223 = arith.constant dense<0.000000e+00> : vector<8xf32>
    %406 = vector.multi_reduction <add>, %405, %cst_223 [1] : vector<8x32xf32> to vector<8xf32>
    %407 = vector.shape_cast %406 : vector<8xf32> to vector<8x1xf32>
    %cst_224 = arith.constant 3.200000e+01 : f32
    %408 = vector.broadcast %cst_224 : f32 to vector<8x1xf32>
    %409 = arith.divf %407, %408 : vector<8x1xf32>
    %410 = vector.broadcast %402 : vector<8x1xf32> to vector<8x32xf32>
    %411 = arith.subf %396, %410 : vector<8x32xf32>
    %cst_225 = arith.constant 9.99999974E-6 : f32
    %412 = vector.broadcast %cst_225 : f32 to vector<8x1xf32>
    %413 = arith.addf %409, %412 : vector<8x1xf32>
    %414 = math.rsqrt %413 : vector<8x1xf32>
    %415 = vector.broadcast %414 : vector<8x1xf32> to vector<8x32xf32>
    %416 = arith.mulf %411, %415 : vector<8x32xf32>
    %417 = vector.broadcast %397 : vector<1x32xf32> to vector<8x32xf32>
    %418 = arith.mulf %416, %417 : vector<8x32xf32>
    %419 = vector.broadcast %398 : vector<1x32xf32> to vector<8x32xf32>
    %420 = arith.addf %418, %419 : vector<8x32xf32>
    %c0_226 = arith.constant 0 : index
    %c0_227 = arith.constant 0 : index
    %421 = vector.load %arg13[%c0_226, %c0_227] : memref<8x32xf32, #tpu.memory_space<vmem>>, vector<8x32xf32>
    tpu.vector_store %arg13[%c0_226, %c0_227], %420 {strides = array<i32>} : memref<8x32xf32, #tpu.memory_space<vmem>>, vector<8x32xf32>,
    return
  }
  func.func @transform_0(%arg0: i32) -> (i32, i32) {
    %c0_i32 = arith.constant 0 : i32
    %c0_i32_0 = arith.constant 0 : i32
    return %arg0, %c0_i32 : i32, i32
  }
  func.func @transform_1(%arg0: i32) -> (i32, i32) {
    %c0_i32 = arith.constant 0 : i32
    %c0_i32_0 = arith.constant 0 : i32
    return %arg0, %c0_i32 : i32, i32
  }
  func.func @transform_2(%arg0: i32) -> (i32, i32) {
    %c0_i32 = arith.constant 0 : i32
    %c0_i32_0 = arith.constant 0 : i32
    %c0_i32_1 = arith.constant 0 : i32
    return %c0_i32, %c0_i32_0 : i32, i32
  }
  func.func @transform_3(%arg0: i32) -> (i32, i32, i32) {
    %c0_i32 = arith.constant 0 : i32
    %c0_i32_0 = arith.constant 0 : i32
    %c0_i32_1 = arith.constant 0 : i32
    %c0_i32_2 = arith.constant 0 : i32
    return %c0_i32, %c0_i32_0, %c0_i32_1 : i32, i32, i32
  }
  func.func @transform_4(%arg0: i32) -> (i32, i32, i32, i32) {
    %c0_i32 = arith.constant 0 : i32
    %c0_i32_0 = arith.constant 0 : i32
    %c0_i32_1 = arith.constant 0 : i32
    %c0_i32_2 = arith.constant 0 : i32
    %c0_i32_3 = arith.constant 0 : i32
    return %c0_i32, %c0_i32_0, %c0_i32_1, %c0_i32_2 : i32, i32, i32, i32
  }
  func.func @transform_5(%arg0: i32) -> (i32, i32, i32) {
    %c0_i32 = arith.constant 0 : i32
    %c0_i32_0 = arith.constant 0 : i32
    %c0_i32_1 = arith.constant 0 : i32
    %c0_i32_2 = arith.constant 0 : i32
    return %c0_i32, %c0_i32_0, %c0_i32_1 : i32, i32, i32
  }
  func.func @transform_6(%arg0: i32) -> (i32, i32, i32) {
    %c0_i32 = arith.constant 0 : i32
    %c0_i32_0 = arith.constant 0 : i32
    %c0_i32_1 = arith.constant 0 : i32
    %c0_i32_2 = arith.constant 0 : i32
    return %c0_i32, %c0_i32_0, %c0_i32_1 : i32, i32, i32
  }
  func.func @transform_7(%arg0: i32) -> (i32, i32) {
    %c0_i32 = arith.constant 0 : i32
    %c0_i32_0 = arith.constant 0 : i32
    %c0_i32_1 = arith.constant 0 : i32
    return %c0_i32, %c0_i32_0 : i32, i32
  }
  func.func @transform_8(%arg0: i32) -> (i32, i32) {
    %c0_i32 = arith.constant 0 : i32
    %c0_i32_0 = arith.constant 0 : i32
    %c0_i32_1 = arith.constant 0 : i32
    return %c0_i32, %c0_i32_0 : i32, i32
  }
  func.func @transform_9(%arg0: i32) -> (i32, i32, i32) {
    %c0_i32 = arith.constant 0 : i32
    %c0_i32_0 = arith.constant 0 : i32
    %c0_i32_1 = arith.constant 0 : i32
    %c0_i32_2 = arith.constant 0 : i32
    return %c0_i32, %c0_i32_0, %c0_i32_1 : i32, i32, i32
  }
  func.func @transform_10(%arg0: i32) -> (i32, i32, i32) {
    %c0_i32 = arith.constant 0 : i32
    %c0_i32_0 = arith.constant 0 : i32
    %c0_i32_1 = arith.constant 0 : i32
    %c0_i32_2 = arith.constant 0 : i32
    return %c0_i32, %c0_i32_0, %c0_i32_1 : i32, i32, i32
  }
  func.func @transform_11(%arg0: i32) -> (i32, i32) {
    %c0_i32 = arith.constant 0 : i32
    %c0_i32_0 = arith.constant 0 : i32
    %c0_i32_1 = arith.constant 0 : i32
    return %c0_i32, %c0_i32_0 : i32, i32
  }
  func.func @transform_12(%arg0: i32) -> (i32, i32) {
    %c0_i32 = arith.constant 0 : i32
    %c0_i32_0 = arith.constant 0 : i32
    return %arg0, %c0_i32 : i32, i32
  }
}

</mosaic_0001>

<bundles_post_ra>
// kernel: transformer_qs_forward.2
= control target key start
LH: loop header
LB: loop body
LE: loop exit
PB: predicated region body
PF: predicated region fallthrough
CT: control target
= control target key end

     0   :  { %s7552_s17 = smov 0   ;;  %s8627_s0 = inlined_call_operand.vmem [shape: f32[32,32], index: 0, kind: input, shape index: {}]   ;;  %s8628_s1 = inlined_call_operand.vmem [shape: f32[32,32], index: 1, kind: input, shape index: {}]   ;;  %s8629_s2 = inlined_call_operand.vmem [shape: bf16[2,32,64], index: 2, kind: input, shape index: {}]   ;;  %s8630_s3 = inlined_call_operand.vmem [shape: bf16[2,2,32,32], index: 3, kind: input, shape index: {}]   ;;  %s8631_s4 = inlined_call_operand.vmem [shape: bf16[2,32,64], index: 4, kind: input, shape index: {}]   ;;  %s8632_s5 = inlined_call_operand.vmem [shape: bf16[2,64,32], index: 5, kind: input, shape index: {}]   ;;  %s8633_s6 = inlined_call_operand.vmem [shape: f32[2,64], index: 6, kind: input, shape index: {}]   ;;  %s8634_s7 = inlined_call_operand.vmem [shape: f32[2,64], index: 7, kind: input, shape index: {}]   ;;  %s8635_s8 = inlined_call_operand.vmem [shape: f32[2,3,32], index: 8, kind: input, shape index: {}]   ;;  %s8636_s9 = inlined_call_operand.vmem [shape: f32[2,4,32], index: 9, kind: input, shape index: {}]   ;;  %s8637_s10 = inlined_call_operand.vmem [shape: f32[2,32], index: 10, kind: input, shape index: {}]   ;;  %s8638_s11 = inlined_call_operand.vmem [shape: f32[32,32], index: 11, kind: output, shape index: {}]  }
   0x1 LB: > { %s6918_s18 = sadd.s32 4294967295, %s7478_s17   ;;  %p6922_p0 = scmp.ge.s32.totalorder %s7478_s17, 1  ;;  %s7478_s17 = sphi %s7552_s17, %s21_s17  }
   0x2   : > { %p349_p1 = scmp.lt.s32.totalorder %s7478_s17, 3 }
   0x4   : > { %p350_p2 = pnand %p6922_p0, %p349_p1 }
   0x5   : > { %s6923_s23 = sshll.u32 (!%p350_p2), %s6918_s18, 1  ;;  %s7482_s14 = smov (!%p350_p2), 112  }
   0x6   : > { %353 = sbr.rel (%p350_p2) target bundleno = 6280 (0x1888), region = 64  ;;  %p395_p3 = scmp.lt.s32.totalorder (!%p350_p2), %s6923_s23, 3 }
   0x7   : > { %s7483_s15 = smov (!%p350_p2), 120   ;;  %s7484_s19 = smov (!%p350_p2), 104  }
   0x8   : > { %s7485_s22 = smov (!%p350_p2), 96   ;;  %s7489_s13 = smov (!%p350_p2), 16  }
   0x9   : > { %s7490_s16 = smov (!%p350_p2), 8   ;;  %s7491_s18 = smov (!%p350_p2), 24  }
   0xb   : > { %v7360_v0 = vld [vmem:[%s8629_s2 + $0x8] sm:$0xff]   ;;  %v7480_v1 = vmov 0.0   ;;  %v7361_v2 = vld [vmem:[%s8629_s2] sm:$0xff]   ;;  %vm7481_vm0 = vmmov 0   ;;  %s8640_s23 = smov (!%p395_p3, %s6923_s23), 3  ;;  %vm441_vm1 = vcmask 261120   ;;  %v577_v31 = vlaneseq }
   0xc   : > { %7126 = vmatprep.subr.bf16.mxu1 %v7480_v1  ;;  %7142 = vmatprep.subr.bf16.mxu0 %v7480_v1  ;;  %s7573_s24 = sshll.u32 %s8640_s23, 3  ;;  %v6929_v10 = vld [vmem:[%s8633_s6] ss:$0 sm:$0xff]  ;;  %v7362_v17 = vld [vmem:[%s8630_s3 + $0x8] sm:$0xff]   ;;  %v7486_v29 = vmov 1983009808  }
   0xd   : > { %7127 = vmatpush3.bf16.msra.mxu1 %v7360_v0  ;;  %7130 = vmatprep.mubr.msk.bf16.mxu1 %vm7481_vm0, %v7480_v1  ;;  %s7580_s27 = scalar_lea.vmem %s8627_s0, %s7573_s24  ;;  %s7586_s30 = scalar_lea.vmem %s8628_s1, %s7573_s24  ;;  %v7363_v18 = vld [vmem:[%s8630_s3] sm:$0xff]   ;;  %v575_v30 = vunpack.c.l.s4 %v7486_v29  ;;  %v7487_v34 = vmov 1934713408   ;;  %v578_v37 = vshrl.u32 %v577_v31, 7  ;;  %vm1802_vm2 = vcmask 1043456  }
   0xe   : > { %7128 = vmatprep.subr.bf16.mxu1 %v7480_v1  ;;  %7144 = vmatprep.mubr.msk.bf16.mxu0 %vm7481_vm0, %v7480_v1  ;;  %v413_v3 = vld [vmem:[%s7580_s27] sm:$0xff]  ;;  %v414_v4 = vld [vmem:[%s7580_s27 + $0x8] sm:$0xff]  ;;  %v607_v35 = vunpack.c.l.s4 %v7487_v34  ;;  %vm1798_vm3 = vcmask 64512   ;;  %vm1988_vm4 = vcmask 130048   ;;  %vm3307_vm5 = vcmask 195584  }
   0xf   : > { %v415_v5 = vld [vmem:[%s7586_s30] sm:$0xff]  ;;  %v416_v6 = vld [vmem:[%s7586_s30 + $0x8] sm:$0xff]  ;;  %v486_v19 = vpack.c.bf16 %v414_v4, %v413_v3  ;;  %v576_v36 = vunpack.c.0.s8 %v575_v30  ;;  %vm3526_vm6 = vcmask 523264  }
  0x10   : > { %v417_v7 = vadd.f32 %v415_v5, %v413_v3  ;;  %v418_v8 = vadd.f32 %v416_v6, %v414_v4  ;;  %v608_v41 = vunpack.c.0.s8 %v607_v35 }
  0x11   : > { %7129 = vmatpush3.bf16.msra.mxu1 %v7361_v2  ;;  %v7653_v43 = vsub.s32 %v576_v36, %v578_v37 }
  0x12   : > { %7134 = vmatprep.subr.bf16.mxu1 %v7480_v1  ;;  %v419_v9 = vpack.c.bf16 %v418_v8, %v417_v7  ;;  %v7659_v51 = vsub.s32 %v608_v41, %v578_v37 }
  0x14   : > { %7131 = vmatmul.mubr.msk.bf16.vlgmr.msra.gmra.mxu1 %vm441_vm1, %v419_v9 }
  0x15   : > { %7138 = vmatprep.mubr.msk.bf16.mxu1 %vm7481_vm0, %v7480_v1  ;;  %7135 = vmatpush3.bf16.msra.mxu1 %v7362_v17 }
  0x16   : > { %7136 = vmatprep.subr.bf16.mxu1 %v7480_v1 }
  0x19   : > { %7137 = vmatpush3.bf16.msra.mxu1 %v7363_v18 }
  0x1a   : > { %7148 = vmatprep.subr.bf16.mxu1 %v7480_v1 }
  0x1c   : > { %7139 = vmatmul.mubr.msk.bf16.vlgmr.msra.gmra.mxu1 %vm441_vm1, %v486_v19 }
  0x1d   : > { %7150 = vmatprep.mubr.msk.bf16.mxu1 %vm7481_vm0, %v7480_v1 }
  0xd4   : > { %v479_v11 = vpop.f32.mrf.mxu1 }
  0xd5   : > { %v7598_v12 = vadd.f32 %v6929_v10, %v479_v11 }
  0xd6   : > { %v7132_v13 = vpop.f32.mrf.mxu1 }
  0xd7   : > { %560 = vrot.lane.b32.xlu1 %v7598_v12, %s7482_s14  ;;  %554 = vrot.lane.b32.xlu0 %v7598_v12, %s7483_s15 }
  0xd8   : > { %v482_v14 = vpop.f32.mrf.mxu1 }
  0xd9   : > { %v7604_v15 = vadd.f32 %v6929_v10, %v482_v14 }
  0xda   : > { %v7133_v16 = vpop.f32.mrf.mxu1 }
  0xdb   : > { %562 = vrot.lane.b32.xlu1 %v7604_v15, %s7482_s14  ;;  %556 = vrot.lane.b32.xlu0 %v7604_v15, %s7483_s15 }
  0xdf   : > { %568 = vrot.lane.b32.xlu1 %v7604_v15, %s7484_s19  ;;  %566 = vrot.lane.b32.xlu0 %v7598_v12, %s7484_s19 }
  0xe3   : > { %726 = vrot.lane.b32.xlu1 %v7604_v15, %s7485_s22  ;;  %724 = vrot.lane.b32.xlu0 %v7598_v12, %s7485_s22 }
 0x149   : > { %v7629_v20 = vpop.permute.xlu1 %560  ;;  %v7631_v21 = vpop.permute.xlu0 %554 }
 0x14a   : > { %728 = vrot.lane.b32.xlu0 %v7631_v21, %s7485_s22 }
 0x14d   : > { %v7635_v22 = vpop.permute.xlu0 %556  ;;  %v7641_v23 = vpop.permute.xlu1 %562 }
 0x14e   : > { %732 = vrot.lane.b32.xlu0 %v7629_v20, %s7485_s22  ;;  %730 = vrot.lane.b32.xlu1 %v7635_v22, %s7485_s22 }
 0x151   : > { %v7643_v24 = vpop.permute.xlu0 %566  ;;  %v7649_v25 = vpop.permute.xlu1 %568 }
 0x152   : > { %734 = vrot.lane.b32.xlu1 %v7641_v23, %s7485_s22  ;;  %736 = vrot.lane.b32.xlu0 %v7643_v24, %s7485_s22 }
 0x155   : > { %v725_v26 = vpop.permute.xlu0 %724  ;;  %v727_v27 = vpop.permute.xlu1 %726 }
 0x156   : > { %738 = vrot.lane.b32.xlu1 %v7649_v25, %s7485_s22 }
 0x1bc   : > { %v729_v28 = vpop.permute.xlu0 %728 }
 0x1c0   : > { %v731_v32 = vpop.permute.xlu1 %730  ;;  %v733_v33 = vpop.permute.xlu0 %732 }
 0x1c1   : > { %v748_v38 = vcombine.low %v725_v26, %v733_v33  ;;  %v749_v39 = vcombine.high %v725_v26, %v733_v33 }
 0x1c3   : > { %v756_v46 = vrot.slane %v748_v38, %v7653_v43  ;;  %v763_v47 = vrot.slane %v749_v39, %v7653_v43 }
 0x1c4   : > { %v735_v40 = vpop.permute.xlu1 %734  ;;  %v737_v42 = vpop.permute.xlu0 %736 }
 0x1c5   : > { %v764_v44 = vcombine.low %v729_v28, %v737_v42  ;;  %v765_v45 = vcombine.high %v729_v28, %v737_v42  ;;  %v816_v57 = vcombine.low %v727_v27, %v735_v40  ;;  %v817_v9 = vcombine.high %v727_v27, %v735_v40 }
 0x1c7   : > { %v772_v48 = vrot.slane %v764_v44, %v7653_v43  ;;  %v779_v49 = vrot.slane %v765_v45, %v7653_v43  ;;  %v824_v2 = vrot.slane %v816_v57, %v7653_v43  ;;  %v831_v18 = vrot.slane %v817_v9, %v7653_v43  ;;  %v7681_v45 = vpop.f32.mrf.mxu1 }
 0x1c8   : > { %v739_v50 = vpop.permute.xlu1 %738 }
 0x1c9   : > { %v832_v52 = vcombine.low %v731_v32, %v739_v50  ;;  %v796_v53 = vcombine.low %v763_v47, %v779_v49  ;;  %v780_v54 = vcombine.low %v756_v46, %v772_v48  ;;  %v797_v55 = vcombine.high %v763_v47, %v779_v49  ;;  %v7140_v47 = vpop.f32.mrf.mxu1 }
 0x1ca   : > { %v781_v56 = vcombine.high %v756_v46, %v772_v48  ;;  %v833_v3 = vcombine.high %v731_v32, %v739_v50 }
 0x1cb   : > { %v804_v58 = vrot.slane %v796_v53, %v7659_v51  ;;  %v788_v59 = vrot.slane %v780_v54, %v7659_v51  ;;  %v840_v60 = vrot.slane %v832_v52, %v7653_v43  ;;  %v811_v63 = vrot.slane %v797_v55, %v7659_v51  ;;  %v7683_v48 = vpop.f32.mrf.mxu1 }
 0x1cc   : > { %v795_v0 = vrot.slane %v781_v56, %v7659_v51  ;;  %v847_v10 = vrot.slane %v833_v3, %v7653_v43 }
 0x1cd   : > { %v888_v61 = vpack.c.bf16 %v804_v58, %v804_v58  ;;  %v884_v62 = vpack.c.bf16 %v788_v59, %v788_v59  ;;  %v848_v4 = vcombine.low %v824_v2, %v840_v60  ;;  %v890_v5 = vpack.c.bf16 %v811_v63, %v811_v63  ;;  %v7141_v49 = vpop.f32.mrf.mxu1 }
 0x1ce   : > { %v886_v6 = vpack.c.bf16 %v795_v0, %v795_v0  ;;  %v813_v7 = vcombine.high %v795_v0, %v7480_v1  ;;  %v812_v8 = vcombine.high %v788_v59, %v7480_v1  ;;  %v849_v11 = vcombine.high %v824_v2, %v840_v60 }
 0x1cf   : > { %1248 = vxpose.xlu1.c.b16.start.end [1/1] (short) (narrow) %v888_v61, 16  ;;  %1184 = vxpose.xlu0.c.b16.start.end [1/1] (short) (narrow) %v884_v62, 16  ;;  %v814_v16 = vcombine.high %v804_v58, %v7480_v1  ;;  %v856_v17 = vrot.slane %v848_v4, %v7659_v51  ;;  %v864_v19 = vcombine.low %v831_v18, %v847_v10 }
 0x1d0   : > { %v887_v13 = vpack.c.bf16 %v813_v7, %v813_v7  ;;  %v885_v14 = vpack.c.bf16 %v812_v8, %v812_v8  ;;  %v815_v27 = vcombine.high %v811_v63, %v7480_v1  ;;  %v863_v29 = vrot.slane %v849_v11, %v7659_v51 }
 0x1d1   : > { %v889_v26 = vpack.c.bf16 %v814_v16, %v814_v16  ;;  %v892_v28 = vpack.c.bf16 %v856_v17, %v856_v17  ;;  %v865_v30 = vcombine.high %v831_v18, %v847_v10  ;;  %v880_v33 = vcombine.high %v856_v17, %v7480_v1 }
 0x1d2   : > { %v891_v31 = vpack.c.bf16 %v815_v27, %v815_v27  ;;  %v894_v32 = vpack.c.bf16 %v863_v29, %v863_v29  ;;  %v872_v34 = vrot.slane %v864_v19, %v7659_v51  ;;  %v881_v37 = vcombine.high %v863_v29, %v7480_v1 }
 0x1d3   : > { %1280 = vxpose.xlu1.c.b16.start.end [1/1] (short) (narrow) %v890_v5, 16  ;;  %1216 = vxpose.xlu0.c.b16.start.end [1/1] (short) (narrow) %v886_v6, 16  ;;  %v893_v35 = vpack.c.bf16 %v880_v33, %v880_v33  ;;  %v879_v38 = vrot.slane %v865_v30, %v7659_v51 }
 0x1d4   : > { %v896_v36 = vpack.c.bf16 %v872_v34, %v872_v34  ;;  %v895_v39 = vpack.c.bf16 %v881_v37, %v881_v37  ;;  %v882_v41 = vcombine.high %v872_v34, %v7480_v1 }
 0x1d5   : > { %v898_v40 = vpack.c.bf16 %v879_v38, %v879_v38  ;;  %v883_v44 = vcombine.high %v879_v38, %v7480_v1 }
 0x1d6   : > { %v897_v42 = vpack.c.bf16 %v882_v41, %v882_v41 }
 0x1d7   : > { %1232 = vxpose.xlu0.c.b16.start.end [1/1] (short) (narrow) %v887_v13, 16  ;;  %1200 = vxpose.xlu1.c.b16.start.end [1/1] (short) (narrow) %v885_v14, 16  ;;  %v899_v46 = vpack.c.bf16 %v883_v44, %v883_v44 }
 0x1db   : > { %1264 = vxpose.xlu0.c.b16.start.end [1/1] (short) (narrow) %v889_v26, 16  ;;  %1312 = vxpose.xlu1.c.b16.start.end [1/1] (short) (narrow) %v892_v28, 16 }
 0x1df   : > { %1296 = vxpose.xlu0.c.b16.start.end [1/1] (short) (narrow) %v891_v31, 16  ;;  %1344 = vxpose.xlu1.c.b16.start.end [1/1] (short) (narrow) %v894_v32, 16 }
 0x1e3   : > { %1328 = vxpose.xlu0.c.b16.start.end [1/1] (short) (narrow) %v893_v35, 16  ;;  %1376 = vxpose.xlu1.c.b16.start.end [1/1] (short) (narrow) %v896_v36, 16 }
 0x1e7   : > { %1360 = vxpose.xlu0.c.b16.start.end [1/1] (short) (narrow) %v895_v39, 16  ;;  %1408 = vxpose.xlu1.c.b16.start.end [1/1] (short) (narrow) %v898_v40, 16 }
 0x1eb   : > { %1392 = vxpose.xlu0.c.b16.start.end [1/1] (short) (narrow) %v897_v42, 16 }
 0x1ef   : > { %1424 = vxpose.xlu0.c.b16.start.end [1/1] (short) (narrow) %v899_v46, 16 }
 0x231   : > { %v1256_v50 = vpop.trf.xlu1  ;;  %v1192_v52 = vpop.trf.xlu0 }
 0x232   : > { %v1440_v5 = vcombine.low %v1192_v52, %v1256_v50 }
 0x234   : > { %v1447_v13 = vrot.slane %v1440_v5, %v7653_v43 }
 0x235   : > { %v1288_v53 = vpop.trf.xlu1  ;;  %v1224_v54 = vpop.trf.xlu0 }
 0x236   : > { %v1448_v2 = vcombine.low %v1224_v54, %v1288_v53 }
 0x238   : > { %v1455_v9 = vrot.slane %v1448_v2, %v7653_v43 }
 0x239   : > { %v1240_v55 = vpop.trf.xlu0  ;;  %v1208_v56 = vpop.trf.xlu1 }
 0x23a   : > { %v1472_v19 = vcombine.low %v1447_v13, %v1455_v9  ;;  %v1473_v40 = vcombine.high %v1447_v13, %v1455_v9  ;;  %v588_v13 = vcombine.low %v7631_v21, %v7643_v24 }
 0x23c   : > { %v1480_v34 = vrot.slane %v1472_v19, %v7659_v51  ;;  %v573_v19 = vcombine.high %v7598_v12, %v7629_v20 }
 0x23d   : > { %v1272_v57 = vpop.trf.xlu0  ;;  %v1320_v58 = vpop.trf.xlu1 }
 0x23e   : > { %v1508_v10 = vcombine.low %v1208_v56, %v1272_v57  ;;  %v1487_v56 = vrot.slane %v1473_v40, %v7659_v51 }
 0x240   : > { %v1515_v26 = vrot.slane %v1508_v10, %v7653_v43 }
 0x241   : > { %v1304_v59 = vpop.trf.xlu0  ;;  %v1352_v60 = vpop.trf.xlu1 }
 0x242   : > { %v1516_v6 = vcombine.low %v1240_v55, %v1304_v59 }
 0x244   : > { %v1523_v14 = vrot.slane %v1516_v6, %v7653_v43  ;;  %v6933_v6 = vld [vmem:[%s8635_s8] ss:$0 sm:$0xff] }
 0x245   : > { %v1336_v61 = vpop.trf.xlu0  ;;  %v1384_v62 = vpop.trf.xlu1  ;;  %v7705_v10 = vadd.f32 %v6933_v6, %v7681_v45  ;;  %v656_v45 = vcombine.low %v7635_v22, %v7649_v25 }
 0x246   : > { %v1456_v3 = vcombine.low %v1320_v58, %v1384_v62  ;;  %v1540_v27 = vcombine.low %v1515_v26, %v1523_v14  ;;  %v1541_v35 = vcombine.high %v1515_v26, %v1523_v14  ;;  %v589_v14 = vcombine.high %v7631_v21, %v7643_v24 }
 0x247   : > { %v596_v26 = vrot.slane %v588_v13, %v7653_v43 }
 0x248   : > { %v1463_v11 = vrot.slane %v1456_v3, %v7653_v43  ;;  %v1548_v38 = vrot.slane %v1540_v27, %v7659_v51  ;;  %v1555_v47 = vrot.slane %v1541_v35, %v7659_v51  ;;  %v603_v21 = vrot.slane %v589_v14, %v7653_v43 }
 0x249   : > { %v1368_v63 = vpop.trf.xlu0  ;;  %v1416_v0 = vpop.trf.xlu1 }
 0x24a   : > { %v1464_v4 = vcombine.low %v1352_v60, %v1416_v0 }
 0x24c   : > { %v1471_v7 = vrot.slane %v1464_v4, %v7653_v43 }
 0x24d   : > { %v1400_v8 = vpop.trf.xlu0 }
 0x24e   : > { %v1488_v16 = vcombine.low %v1463_v11, %v1471_v7  ;;  %v1524_v17 = vcombine.low %v1336_v61, %v1400_v8  ;;  %v1489_v36 = vcombine.high %v1463_v11, %v1471_v7  ;;  %v7710_v11 = vadd.f32 %v6933_v6, %v7683_v48 }
 0x24f   : > { %v657_v48 = vcombine.high %v7635_v22, %v7649_v25  ;;  %v664_v22 = vrot.slane %v656_v45, %v7653_v43 }
 0x250   : > { %v1531_v29 = vrot.slane %v1524_v17, %v7653_v43  ;;  %v1496_v31 = vrot.slane %v1488_v16, %v7659_v51  ;;  %v1503_v46 = vrot.slane %v1489_v36, %v7659_v51  ;;  %v640_v16 = vcombine.low %v7604_v15, %v7641_v23 }
 0x251   : > { %v1432_v18 = vpop.trf.xlu0  ;;  %v641_v17 = vcombine.high %v7604_v15, %v7641_v23  ;;  %v671_v25 = vrot.slane %v657_v48, %v7653_v43  ;;  %v587_v23 = vrot.slane %v573_v19, %v7653_v43 }
 0x252   : > { %v1532_v28 = vcombine.low %v1368_v63, %v1432_v18  ;;  %v1504_v37 = vcombine.low %v1480_v34, %v1496_v31  ;;  %v1505_v53 = vcombine.high %v1480_v34, %v1496_v31  ;;  %v1506_v60 = vcombine.low %v1487_v56, %v1503_v46 }
 0x253   : > { %v1507_v3 = vcombine.high %v1487_v56, %v1503_v46  ;;  %v572_v18 = vcombine.low %v7598_v12, %v7629_v20  ;;  %v648_v24 = vrot.slane %v640_v16, %v7653_v43 }
 0x254   : > { %v1539_v30 = vrot.slane %v1532_v28, %v7653_v43  ;;  %v1580_v50 = vshrl.u32 %v1504_v37, 16  ;;  %v1588_v59 = vshrl.u32 %v1505_v53, 16  ;;  %v1596_v2 = vshrl.u32 %v1506_v60, 16 }
 0x255   : > { %v1604_v8 = vshrl.u32 %v1507_v3, 16  ;;  %v655_v28 = vrot.slane %v641_v17, %v7653_v43  ;;  %v580_v15 = vrot.slane %v572_v18, %v7653_v43  ;;  %v672_v27 = vcombine.low %v648_v24, %v664_v22 }
 0x256   : > { %v1556_v32 = vcombine.low %v1531_v29, %v1539_v30  ;;  %v1557_v33 = vcombine.high %v1531_v29, %v1539_v30  ;;  %v673_v29 = vcombine.high %v648_v24, %v664_v22 }
 0x257   : > { %v688_v30 = vcombine.low %v655_v28, %v671_v25  ;;  %v689_v12 = vcombine.high %v655_v28, %v671_v25  ;;  %v604_v20 = vcombine.low %v580_v15, %v596_v26  ;;  %v605_v31 = vcombine.high %v580_v15, %v596_v26 }
 0x258   : > { %v1564_v39 = vrot.slane %v1556_v32, %v7659_v51  ;;  %v1571_v44 = vrot.slane %v1557_v33, %v7659_v51  ;;  %v620_v32 = vcombine.low %v587_v23, %v603_v21  ;;  %v621_v33 = vcombine.high %v587_v23, %v603_v21 }
 0x259   : > { %v680_v34 = vrot.slane %v672_v27, %v7659_v51  ;;  %v687_v35 = vrot.slane %v673_v29, %v7659_v51  ;;  %v696_v36 = vrot.slane %v688_v30, %v7659_v51 }
 0x25a   : > { %v1572_v41 = vcombine.low %v1548_v38, %v1564_v39  ;;  %v1573_v42 = vcombine.high %v1548_v38, %v1564_v39  ;;  %v1574_v57 = vcombine.low %v1555_v47, %v1571_v44  ;;  %v1575_v63 = vcombine.high %v1555_v47, %v1571_v44 }
 0x25b   : > { %v612_v38 = vrot.slane %v604_v20, %v7659_v51  ;;  %v619_v39 = vrot.slane %v605_v31, %v7659_v51  ;;  %v628_v40 = vrot.slane %v620_v32, %v7659_v51  ;;  %v705_v44 = vcombine.high %v687_v35, %v7480_v1 }
 0x25c   : > { %v1578_v49 = vpack.i.b16 %v1572_v41, %v1504_v37  ;;  %v1581_v52 = vshrl.u32 %v1572_v41, 16  ;;  %v1589_v55 = vshrl.u32 %v1573_v42, 16  ;;  %v1586_v58 = vpack.i.b16 %v1573_v42, %v1505_v53 }
 0x25d   : > { %v1597_v62 = vshrl.u32 %v1574_v57, 16  ;;  %v1594_v0 = vpack.i.b16 %v1574_v57, %v1506_v60  ;;  %v1605_v5 = vshrl.u32 %v1575_v63, 16  ;;  %v1602_v7 = vpack.i.b16 %v1575_v63, %v1507_v3 }
 0x25e   : > { %1608 = vxpose.xlu1.c.b16.start.end [1/1] (short) (narrow) %v1578_v49, 16  ;;  %v1582_v54 = vpack.i.b16 %v1581_v52, %v1580_v50  ;;  %v1590_v61 = vpack.i.b16 %v1589_v55, %v1588_v59  ;;  %v703_v37 = vrot.slane %v689_v12, %v7659_v51  ;;  %v635_v41 = vrot.slane %v621_v33, %v7659_v51 }
 0x25f   : > { %v1598_v4 = vpack.i.b16 %v1597_v62, %v1596_v2  ;;  %v1606_v9 = vpack.i.b16 %v1605_v5, %v1604_v8  ;;  %v704_v42 = vcombine.high %v680_v34, %v7480_v1  ;;  %v706_v46 = vcombine.high %v696_v36, %v7480_v1 }
 0x260   : > { %1624 = vxpose.xlu0.c.b16.start.end [1/1] (short) (narrow) %v1582_v54, 16  ;;  %v707_v47 = vcombine.high %v703_v37, %v7480_v1  ;;  %v636_v49 = vcombine.high %v612_v38, %v7480_v1  ;;  %v637_v50 = vcombine.high %v619_v39, %v7480_v1  ;;  %v638_v52 = vcombine.high %v628_v40, %v7480_v1 }
 0x261   : > { %v639_v53 = vcombine.high %v635_v41, %v7480_v1  ;;  %v6943_v56 = vpack.c.bf16 %v706_v46, %v704_v42  ;;  %v6940_v62 = vpack.c.bf16 %v703_v37, %v687_v35  ;;  %v6937_v63 = vpack.c.bf16 %v628_v40, %v612_v38 }
 0x262   : > { %1640 = vxpose.xlu1.c.b16.start.end [1/1] (short) (narrow) %v1586_v58, 16  ;;  %v6944_v57 = vpack.c.bf16 %v707_v47, %v705_v44  ;;  %v6941_v58 = vpack.c.bf16 %v638_v52, %v636_v49 }
 0x263   : > { %v6942_v59 = vpack.c.bf16 %v639_v53, %v637_v50  ;;  %v1145_v6 = vrot.slane %v6943_v56, %v7653_v43  ;;  %v1103_v13 = vrot.slane %v6940_v62, %v7653_v43 }
 0x264   : > { %1656 = vxpose.xlu0.c.b16.start.end [1/1] (short) (narrow) %v1590_v61, 16  ;;  %v6939_v61 = vpack.c.bf16 %v696_v36, %v680_v34  ;;  %v7488_v36 = vmov 0  }
 0x265   : > { %v1137_v5 = vrot.slane %v6942_v59, %v7653_v43 }
 0x266   : > { %1672 = vxpose.xlu1.c.b16.start.end [1/1] (short) (narrow) %v1594_v0, 16  ;;  %v6938_v0 = vpack.c.bf16 %v635_v41, %v619_v39  ;;  %v1095_v48 = vrot.slane %v6939_v61, %v7653_v43 }
 0x268   : > { %1688 = vxpose.xlu0.c.b16.start.end [1/1] (short) (narrow) %v1598_v4, 16  ;;  %v1129_v4 = vrot.slane %v6941_v58, %v7653_v43  ;;  %v1087_v45 = vrot.slane %v6938_v0, %v7653_v43  ;;  %v1112_v21 = vcombine.low %v1095_v48, %v1103_v13 }
 0x26a   : > { %1704 = vxpose.xlu1.c.b16.start.end [1/1] (short) (narrow) %v1602_v7, 16  ;;  %v1153_v7 = vrot.slane %v6944_v57, %v7653_v43  ;;  %v1154_v17 = vcombine.low %v1129_v4, %v1137_v5  ;;  %v1119_v31 = vrot.slane %v1112_v21, %v7659_v51 }
 0x26c   : > { %1720 = vxpose.xlu0.c.b16.start.end [1/1] (short) (narrow) %v1606_v9, 16  ;;  %v1079_v9 = vrot.slane %v6937_v63, %v7653_v43  ;;  %v1162_v18 = vcombine.low %v1145_v6, %v1153_v7  ;;  %v1161_v23 = vrot.slane %v1154_v17, %v7659_v51 }
 0x26e   : > { %902 = vrot.lane.b32.xlu1 %v7705_v10, %s7483_s15  ;;  %v1104_v26 = vcombine.low %v1079_v9, %v1087_v45  ;;  %v1169_v27 = vrot.slane %v1162_v18, %v7659_v51 }
 0x270   : > { %v1111_v20 = vrot.slane %v1104_v26, %v7659_v51  ;;  %v1170_v34 = vcombine.low %v1161_v23, %v1169_v27  ;;  %v1171_v57 = vcombine.high %v1161_v23, %v1169_v27 }
 0x272   : > { %908 = vrot.lane.b32.xlu1 %v7705_v10, %s7482_s14  ;;  %v1120_v38 = vcombine.low %v1111_v20, %v1119_v31  ;;  %v1176_v44 = vshrl.u32 %v1170_v34, 16  ;;  %v1182_v63 = vshrl.u32 %v1171_v57, 16 }
 0x275   : > { %904 = vrot.lane.b32.xlu0 %v7710_v11, %s7483_s15 }
 0x276   : > { %910 = vrot.lane.b32.xlu1 %v7710_v11, %s7482_s14 }
 0x279   : > { %914 = vrot.lane.b32.xlu0 %v7705_v10, %s7484_s19 }
 0x27a   : > { %916 = vrot.lane.b32.xlu1 %v7710_v11, %s7484_s19 }
 0x2c0   : > { %v1616_v54 = vpop.trf.xlu1 }
 0x2c2   : > { %v1632_v55 = vpop.trf.xlu0 }
 0x2c4   : > { %v1648_v60 = vpop.trf.xlu1 }
 0x2c6   : > { %v1664_v2 = vpop.trf.xlu0 }
 0x2c8   : > { %v1680_v3 = vpop.trf.xlu1 }
 0x2c9   : > { %v1736_v14 = vcombine.low %v1616_v54, %v1680_v3  ;;  %v1174_v54 = vpack.i.b16 %v1170_v34, %v1120_v38 }
 0x2ca   : > { %v1696_v8 = vpop.trf.xlu0 }
 0x2cb   : > { %v1761_v19 = vcombine.low %v1632_v55, %v1696_v8  ;;  %v1743_v24 = vrot.slane %v1736_v14, %v7653_v43  ;;  %v1175_v55 = vshrl.u32 %v1120_v38, 16 }
 0x2cc   : > { %v1712_v16 = vpop.trf.xlu1 }
 0x2cd   : > { %v1744_v22 = vcombine.low %v1648_v60, %v1712_v16  ;;  %v1768_v29 = vrot.slane %v1761_v19, %v7653_v43  ;;  %v1177_v59 = vpack.i.b16 %v1176_v44, %v1175_v55  ;;  %v1121_v60 = vcombine.high %v1111_v20, %v1119_v31 }
 0x2ce   : > { %v1728_v25 = vpop.trf.xlu0 }
 0x2cf   : > { %v1751_v28 = vrot.slane %v1744_v22, %v7653_v43  ;;  %v1769_v15 = vcombine.low %v1664_v2, %v1728_v25  ;;  %v1180_v0 = vpack.i.b16 %v1171_v57, %v1121_v60  ;;  %v1181_v2 = vshrl.u32 %v1121_v60, 16 }
 0x2d1   : > { %v1752_v30 = vcombine.low %v1743_v24, %v1751_v28  ;;  %v1776_v12 = vrot.slane %v1769_v15, %v7653_v43  ;;  %v1183_v4 = vpack.i.b16 %v1182_v63, %v1181_v2 }
 0x2d3   : > { %v1777_v32 = vcombine.low %v1768_v29, %v1776_v12  ;;  %v1759_v33 = vrot.slane %v1752_v30, %v7659_v51 }
 0x2d5   : > { %v1784_v35 = vrot.slane %v1777_v32, %v7659_v51  ;;  %v1760_v37 = vcombine.high %v1759_v33, %v7488_v36  ;;  %v1789_v40 = vshrl.u32 %v1759_v33, 16 }
 0x2d7   : > { %v1788_v39 = vpack.i.b16 %v1784_v35, %v1759_v33  ;;  %v1790_v41 = vshrl.u32 %v1784_v35, 16  ;;  %v1785_v42 = vcombine.high %v1784_v35, %v7488_v36  ;;  %v1795_v46 = vshrl.u32 %v1760_v37, 16 }
 0x2d9   : > { %v1804_v47 = vsel %vm1802_vm2, %v1788_v39, 0  ;;  %v1791_v49 = vpack.i.b16 %v1790_v41, %v1789_v40  ;;  %v1794_v50 = vpack.i.b16 %v1785_v42, %v1760_v37  ;;  %v1796_v52 = vshrl.u32 %v1785_v42, 16 }
 0x2da   : > { %7143 = vmatpush3.bf16.msra.mxu0 %v1804_v47 }
 0x2db   : > { %v1851_v53 = vsel %vm1802_vm2, %v1791_v49, 0  ;;  %7154 = vmatprep.subr.bf16.mxu0 %v7480_v1  ;;  %v1797_v56 = vpack.i.b16 %v1796_v52, %v1795_v46  ;;  %v1898_v58 = vsel %vm1802_vm2, %v1794_v50, 0 }
 0x2dc   : > { %7149 = vmatpush3.bf16.msra.mxu1 %v1851_v53 }
 0x2dd   : > { %7145 = vmatmul.mubr.msk.bf16.vlgmr.msra.gmra.mxu0 %vm1798_vm3, %v1174_v54  ;;  %7160 = vmatprep.subr.bf16.mxu1 %v7480_v1  ;;  %v1945_v61 = vsel %vm1802_vm2, %v1797_v56, 0 }
 0x2de   : > { %7155 = vmatpush3.bf16.msra.mxu0 %v1898_v58  ;;  %7156 = vmatprep.mubr.msk.bf16.mxu0 %vm7481_vm0, %v7480_v1 }
 0x2df   : > { %7151 = vmatmul.mubr.msk.bf16.vlgmr.msra.gmra.mxu1 %vm1798_vm3, %v1177_v59  ;;  %7166 = vmatprep.subr.bf16.mxu0 %v7480_v1 }
 0x2e0   : > { %7161 = vmatpush3.bf16.msra.mxu1 %v1945_v61  ;;  %7162 = vmatprep.mubr.msk.bf16.mxu1 %vm7481_vm0, %v7480_v1  ;;  %v903_v62 = vpop.permute.xlu1 %902 }
 0x2e1   : > { %7172 = vmatprep.subr.bf16.mxu1 %v7480_v1 }
 0x2e4   : > { %v909_v3 = vpop.permute.xlu1 %908 }
 0x2e5   : > { %7157 = vmatmul.mubr.msk.bf16.vlgmr.msra.gmra.mxu0 %vm1798_vm3, %v1180_v0  ;;  %v920_v6 = vcombine.low %v7705_v10, %v909_v3  ;;  %v921_v7 = vcombine.high %v7705_v10, %v909_v3 }
 0x2e6   : > { %7168 = vmatprep.mubr.msk.bf16.mxu0 %vm7481_vm0, %v7480_v1 }
 0x2e7   : > { %7163 = vmatmul.mubr.msk.bf16.vlgmr.msra.gmra.mxu1 %vm1798_vm3, %v1183_v4  ;;  %v7800_v5 = vpop.permute.xlu0 %904  ;;  %v928_v45 = vrot.slane %v920_v6, %v7653_v43  ;;  %v935_v48 = vrot.slane %v921_v7, %v7653_v43 }
 0x2e8   : > { %v7804_v8 = vpop.permute.xlu1 %910  ;;  %7174 = vmatprep.mubr.msk.bf16.mxu1 %vm7481_vm0, %v7480_v1 }
 0x2e9   : > { %v988_v10 = vcombine.low %v7710_v11, %v7804_v8 }
 0x2eb   : > { %v915_v9 = vpop.permute.xlu0 %914  ;;  %v996_v28 = vrot.slane %v988_v10, %v7653_v43 }
 0x2ec   : > { %v936_v13 = vcombine.low %v903_v62, %v915_v9  ;;  %v937_v14 = vcombine.high %v903_v62, %v915_v9  ;;  %v7810_v16 = vpop.permute.xlu1 %916 }
 0x2ed   : > { %v1004_v19 = vcombine.low %v7800_v5, %v7810_v16 }
 0x2ee   : > { %v944_v17 = vrot.slane %v936_v13, %v7653_v43  ;;  %v951_v18 = vrot.slane %v937_v14, %v7653_v43 }
 0x2ef   : > { %v1012_v15 = vrot.slane %v1004_v19, %v7653_v43 }
 0x2f0   : > { %v952_v22 = vcombine.low %v928_v45, %v944_v17  ;;  %v953_v25 = vcombine.high %v928_v45, %v944_v17  ;;  %v968_v26 = vcombine.low %v935_v48, %v951_v18  ;;  %v969_v30 = vcombine.high %v935_v48, %v951_v18 }
 0x2f1   : > { %v1020_v34 = vcombine.low %v996_v28, %v1012_v15  ;;  %v1021_v42 = vcombine.high %v996_v28, %v1012_v15 }
 0x2f2   : > { %v960_v21 = vrot.slane %v952_v22, %v7659_v51  ;;  %v967_v24 = vrot.slane %v953_v25, %v7659_v51  ;;  %v976_v29 = vrot.slane %v968_v26, %v7659_v51  ;;  %v983_v33 = vrot.slane %v969_v30, %v7659_v51 }
 0x2f3   : > { %v1028_v39 = vrot.slane %v1020_v34, %v7659_v51  ;;  %v1035_v47 = vrot.slane %v1021_v42, %v7659_v51  ;;  %v989_v22 = vcombine.high %v7710_v11, %v7804_v8  ;;  %v1005_v25 = vcombine.high %v7800_v5, %v7810_v16 }
 0x2f4   : > { %v1056_v23 = vpack.c.bf16 %v960_v21, %v960_v21  ;;  %v984_v27 = vcombine.high %v960_v21, %v7480_v1  ;;  %v1058_v20 = vpack.c.bf16 %v967_v24, %v967_v24  ;;  %v985_v31 = vcombine.high %v967_v24, %v7480_v1 }
 0x2f5   : > { %v1060_v32 = vpack.c.bf16 %v976_v29, %v976_v29  ;;  %v986_v37 = vcombine.high %v976_v29, %v7480_v1  ;;  %v1062_v38 = vpack.c.bf16 %v983_v33, %v983_v33  ;;  %v987_v41 = vcombine.high %v983_v33, %v7480_v1 }
 0x2f6   : > { %2081 = vxpose.xlu0.c.b16.start.end [1/1] (short) (narrow) %v1056_v23, 16  ;;  %v1057_v12 = vpack.c.bf16 %v984_v27, %v984_v27  ;;  %v1059_v35 = vpack.c.bf16 %v985_v31, %v985_v31  ;;  %v1064_v44 = vpack.c.bf16 %v1028_v39, %v1028_v39  ;;  %v1052_v49 = vcombine.high %v1028_v39, %v7480_v1 }
 0x2f7   : > { %v1061_v40 = vpack.c.bf16 %v986_v37, %v986_v37  ;;  %v1063_v46 = vpack.c.bf16 %v987_v41, %v987_v41  ;;  %v1066_v50 = vpack.c.bf16 %v1035_v47, %v1035_v47  ;;  %v1053_v53 = vcombine.high %v1035_v47, %v7480_v1 }
 0x2f8   : > { %2097 = vxpose.xlu1.c.b16.start.end [1/1] (short) (narrow) %v1057_v12, 16  ;;  %v1065_v52 = vpack.c.bf16 %v1052_v49, %v1052_v49  ;;  %v1003_v26 = vrot.slane %v989_v22, %v7653_v43  ;;  %v1019_v21 = vrot.slane %v1005_v25, %v7653_v43 }
 0x2f9   : > { %v1067_v54 = vpack.c.bf16 %v1053_v53, %v1053_v53 }
 0x2fa   : > { %2113 = vxpose.xlu0.c.b16.start.end [1/1] (short) (narrow) %v1058_v20, 16  ;;  %v1036_v24 = vcombine.low %v1003_v26, %v1019_v21  ;;  %v1037_v15 = vcombine.high %v1003_v26, %v1019_v21 }
 0x2fc   : > { %2145 = vxpose.xlu1.c.b16.start.end [1/1] (short) (narrow) %v1060_v32, 16  ;;  %v1044_v28 = vrot.slane %v1036_v24, %v7659_v51  ;;  %v1051_v27 = vrot.slane %v1037_v15, %v7659_v51 }
 0x2fe   : > { %2129 = vxpose.xlu0.c.b16.start.end [1/1] (short) (narrow) %v1059_v35, 16  ;;  %v1068_v23 = vpack.c.bf16 %v1044_v28, %v1044_v28  ;;  %v1054_v29 = vcombine.high %v1044_v28, %v7480_v1  ;;  %v1070_v30 = vpack.c.bf16 %v1051_v27, %v1051_v27  ;;  %v1055_v11 = vcombine.high %v1051_v27, %v7480_v1 }
 0x300   : > { %2177 = vxpose.xlu1.c.b16.start.end [1/1] (short) (narrow) %v1062_v38, 16  ;;  %v1069_v12 = vpack.c.bf16 %v1054_v29, %v1054_v29  ;;  %v1071_v5 = vpack.c.bf16 %v1055_v11, %v1055_v11 }
 0x302   : > { %2161 = vxpose.xlu0.c.b16.start.end [1/1] (short) (narrow) %v1061_v40, 16 }
 0x304   : > { %2209 = vxpose.xlu1.c.b16.start.end [1/1] (short) (narrow) %v1064_v44, 16 }
 0x306   : > { %2193 = vxpose.xlu0.c.b16.start.end [1/1] (short) (narrow) %v1063_v46, 16 }
 0x308   : > { %2241 = vxpose.xlu1.c.b16.start.end [1/1] (short) (narrow) %v1066_v50, 16 }
 0x30a   : > { %2225 = vxpose.xlu0.c.b16.start.end [1/1] (short) (narrow) %v1065_v52, 16 }
 0x30e   : > { %2257 = vxpose.xlu0.c.b16.start.end [1/1] (short) (narrow) %v1067_v54, 16 }
 0x358   : > { %v2089_v8 = vpop.trf.xlu0 }
 0x35a   : > { %v2105_v20 = vpop.trf.xlu1 }
 0x35c   : > { %v2121_v16 = vpop.trf.xlu0 }
 0x35e   : > { %v2153_v32 = vpop.trf.xlu1 }
 0x35f   : > { %v2337_v52 = vcombine.low %v2089_v8, %v2153_v32 }
 0x360   : > { %v2137_v31 = vpop.trf.xlu0 }
 0x362   : > { %v2185_v34 = vpop.trf.xlu1 }
 0x363   : > { %v2345_v53 = vcombine.low %v2121_v16, %v2185_v34 }
 0x364   : > { %v2169_v33 = vpop.trf.xlu0 }
 0x366   : > { %v2217_v37 = vpop.trf.xlu1 }
 0x368   : > { %v2201_v35 = vpop.trf.xlu0 }
 0x36a   : > { %v2249_v39 = vpop.trf.xlu1 }
 0x36c   : > { %v2233_v38 = vpop.trf.xlu0 }
 0x370   : > { %v2265_v40 = vpop.trf.xlu0 }
 0x39d   : > { %v7832_v55 = vpop.f32.mrf.mxu0 }
 0x39e   : > { %v1989_v56 = vsel %vm1988_vm4, %v7832_v55, -inf }
 0x39f   : > { %v7146_v57 = vpop.f32.mrf.mxu0  ;;  %1990 = vmax.xlane.f32.xlu1 %v1989_v56  ;;  %v7836_v58 = vpop.f32.mrf.mxu1 }
 0x3a0   : > { %v1995_v62 = vsel %vm1988_vm4, %v7836_v58, -inf  ;;  %v2405_v57 = vcombine.low %v2105_v20, %v2169_v33 }
 0x3a1   : > { %v7838_v59 = vpop.f32.mrf.mxu0  ;;  %v7152_v60 = vpop.f32.mrf.mxu1 }
 0x3a2   : > { %v1992_v61 = vsel %vm1988_vm4, %v7838_v59, -inf  ;;  %v2413_v60 = vcombine.low %v2137_v31, %v2201_v35 }
 0x3a3   : > { %v7147_v63 = vpop.f32.mrf.mxu0  ;;  %1993 = vmax.xlane.f32.xlu0 %v1992_v61  ;;  %1996 = vmax.xlane.f32.xlu1 %v1995_v62  ;;  %v7844_v0 = vpop.f32.mrf.mxu1  ;;  %v2344_v62 = vrot.slane %v2337_v52, %v7653_v43 }
 0x3a4   : > { %v1998_v6 = vsel %vm1988_vm4, %v7844_v0, -inf  ;;  %v2352_v63 = vrot.slane %v2345_v53, %v7653_v43 }
 0x3a5   : > { %v7153_v2 = vpop.f32.mrf.mxu1  ;;  %v7846_v3 = vpop.f32.mrf.mxu0 }
 0x3a6   : > { %v2001_v4 = vsel %vm1988_vm4, %v7846_v3, -inf  ;;  %v2369_v22 = vcombine.low %v2344_v62, %v2352_v63 }
 0x3a7   : > { %v7158_v7 = vpop.f32.mrf.mxu0  ;;  %2002 = vmax.xlane.f32.xlu1 %v2001_v4  ;;  %1999 = vmax.xlane.f32.xlu0 %v1998_v6  ;;  %v7852_v9 = vpop.f32.mrf.mxu1 }
 0x3a8   : > { %v2007_v14 = vsel %vm1988_vm4, %v7852_v9, -inf  ;;  %v2412_v7 = vrot.slane %v2405_v57, %v7653_v43 }
 0x3a9   : > { %v7854_v45 = vpop.f32.mrf.mxu0  ;;  %v7164_v48 = vpop.f32.mrf.mxu1 }
 0x3aa   : > { %v2004_v13 = vsel %vm1988_vm4, %v7854_v45, -inf  ;;  %v2420_v48 = vrot.slane %v2413_v60, %v7653_v43 }
 0x3ab   : > { %v7159_v17 = vpop.f32.mrf.mxu0  ;;  %2005 = vmax.xlane.f32.xlu0 %v2004_v13  ;;  %2008 = vmax.xlane.f32.xlu1 %v2007_v14  ;;  %v7860_v18 = vpop.f32.mrf.mxu1 }
 0x3ac   : > { %v2010_v19 = vsel %vm1988_vm4, %v7860_v18, -inf  ;;  %v2437_v24 = vcombine.low %v2412_v7, %v2420_v48  ;;  %v2438_v29 = vcombine.high %v2412_v7, %v2420_v48 }
 0x3ad   : > { %v7165_v10 = vpop.f32.mrf.mxu1 }
 0x3ae   : > { %v2370_v10 = vcombine.high %v2344_v62, %v2352_v63  ;;  %v2445_v20 = vrot.slane %v2437_v24, %v7659_v51  ;;  %v2452_v34 = vrot.slane %v2438_v29, %v7659_v51 }
 0x3af   : > { %2011 = vmax.xlane.f32.xlu0 %v2010_v19 }
 0x3d8   : > { %2273 = vxpose.xlu1.c.b16.start.end [1/1] (short) (narrow) %v1068_v23, 16 }
 0x3dc   : > { %2305 = vxpose.xlu1.c.b16.start.end [1/1] (short) (narrow) %v1070_v30, 16  ;;  %2289 = vxpose.xlu0.c.b16.start.end [1/1] (short) (narrow) %v1069_v12, 16  ;;  %v2384_v30 = vrot.slane %v2370_v10, %v7659_v51 }
 0x3e0   : > { %2321 = vxpose.xlu0.c.b16.start.end [1/1] (short) (narrow) %v1071_v5, 16  ;;  %v2377_v5 = vrot.slane %v2369_v22, %v7659_v51 }
 0x428   : > { %v1991_v41 = vpop.xlane.xlu1 %1990 }
 0x429   : > { %v2013_v33 = vsub.f32 %v7832_v55, %v1991_v41 }
 0x42b   : > { %v2021_v57 = vmul.f32 1.442695, %v2013_v33 }
 0x42c   : > { %v7874_v42 = vpop.xlane.xlu0 %1993  ;;  %v7876_v44 = vpop.xlane.xlu1 %1996 }
 0x42d   : > { %v2015_v41 = vsub.f32 %v7836_v58, %v7876_v44  ;;  %7384 = vpow2.f32 %v2021_v57 }
 0x430   : > { %v7878_v46 = vpop.xlane.xlu1 %2002  ;;  %v7880_v47 = vpop.xlane.xlu0 %1999 }
 0x434   : > { %v7882_v49 = vpop.xlane.xlu0 %2005  ;;  %v7884_v50 = vpop.xlane.xlu1 %2008 }
 0x435   : > { %v2018_v10 = vsub.f32 %v7854_v45, %v7882_v49  ;;  %v2019_v22 = vsub.f32 %v7852_v9, %v7884_v50 }
 0x438   : > { %v7886_v54 = vpop.xlane.xlu0 %2011 }
 0x43a   : > { %v2281_v56 = vpop.trf.xlu1  ;;  %v7385_v49 = vpop.eup %7384 }
 0x43b   : > { %v2353_v61 = vcombine.low %v2217_v37, %v2281_v56  ;;  %v2037_v24 = vsel %vm1988_vm4, %v7385_v49, 0.0 }
 0x43d   : > { %v2360_v13 = vrot.slane %v2353_v61, %v7653_v43 }
 0x43e   : > { %v2313_v2 = vpop.trf.xlu1  ;;  %v2297_v4 = vpop.trf.xlu0 }
 0x43f   : > { %v2361_v6 = vcombine.low %v2249_v39, %v2313_v2  ;;  %v2421_v17 = vcombine.low %v2233_v38, %v2297_v4  ;;  %v2014_v38 = vsub.f32 %v7838_v59, %v7874_v42  ;;  %v2016_v4 = vsub.f32 %v7844_v0, %v7880_v47 }
 0x441   : > { %v2368_v14 = vrot.slane %v2361_v6, %v7653_v43  ;;  %v2428_v28 = vrot.slane %v2421_v17, %v7653_v43  ;;  %v2023_v63 = vmul.f32 1.442695, %v2014_v38  ;;  %v2027_v17 = vmul.f32 1.442695, %v2016_v4 }
 0x442   : > { %v2329_v19 = vpop.trf.xlu0 }
 0x443   : > { %v2385_v25 = vcombine.low %v2360_v13, %v2368_v14  ;;  %v2386_v26 = vcombine.high %v2360_v13, %v2368_v14  ;;  %v2429_v21 = vcombine.low %v2265_v40, %v2329_v19  ;;  %v2025_v13 = vmul.f32 1.442695, %v2015_v41 }
 0x444   : > { %v2017_v14 = vsub.f32 %v7846_v3, %v7878_v46  ;;  %7386 = vpow2.f32 %v2023_v63  ;;  %v2031_v3 = vmul.f32 1.442695, %v2018_v10  ;;  %v2020_v46 = vsub.f32 %v7860_v18, %v7886_v54 }
 0x445   : > { %v2436_v15 = vrot.slane %v2429_v21, %v7653_v43  ;;  %v2393_v23 = vrot.slane %v2385_v25, %v7659_v51  ;;  %v2400_v27 = vrot.slane %v2386_v26, %v7659_v51  ;;  %7388 = vpow2.f32 %v2025_v13 }
 0x446   : > { %v2029_v47 = vmul.f32 1.442695, %v2017_v14  ;;  %7390 = vpow2.f32 %v2027_v17  ;;  %v2033_v26 = vmul.f32 1.442695, %v2019_v22  ;;  %v2035_v45 = vmul.f32 1.442695, %v2020_v46 }
 0x447   : > { %v2453_v12 = vcombine.low %v2428_v28, %v2436_v15  ;;  %v2454_v11 = vcombine.high %v2428_v28, %v2436_v15  ;;  %v7900_v8 = vcombine.high %v2384_v30, %v2400_v27  ;;  %v2401_v16 = vcombine.low %v2377_v5, %v2393_v23 }
 0x448   : > { %v2402_v56 = vcombine.high %v2377_v5, %v2393_v23  ;;  %v2403_v48 = vcombine.low %v2384_v30, %v2400_v27  ;;  %7392 = vpow2.f32 %v2029_v47 }
 0x449   : > { %v2461_v31 = vrot.slane %v2453_v12, %v7659_v51  ;;  %v2468_v32 = vrot.slane %v2454_v11, %v7659_v51  ;;  %v2477_v52 = vshrl.u32 %v2401_v16, 16  ;;  %v2501_v61 = vshrl.u32 %v7900_v8, 16 }
 0x44a   : > { %v2485_v7 = vshrl.u32 %v2402_v56, 16  ;;  %v2493_v0 = vshrl.u32 %v2403_v48, 16  ;;  %7394 = vpow2.f32 %v2031_v3 }
 0x44b   : > { %v2469_v35 = vcombine.low %v2445_v20, %v2461_v31  ;;  %v2470_v37 = vcombine.high %v2445_v20, %v2461_v31  ;;  %v7909_v39 = vcombine.high %v2452_v34, %v2468_v32  ;;  %v2471_v42 = vcombine.low %v2452_v34, %v2468_v32 }
 0x44c   : > { %7396 = vpow2.f32 %v2033_v26 }
 0x44d   : > { %v2475_v40 = vpack.i.b16 %v2469_v35, %v2401_v16  ;;  %v2478_v53 = vshrl.u32 %v2469_v35, 16  ;;  %v2499_v60 = vpack.i.b16 %v7909_v39, %v7900_v8  ;;  %v2502_v55 = vshrl.u32 %v7909_v39, 16 }
 0x44e   : > { %v2486_v59 = vshrl.u32 %v2470_v37, 16  ;;  %v2483_v6 = vpack.i.b16 %v2470_v37, %v2402_v56  ;;  %v2494_v44 = vshrl.u32 %v2471_v42, 16  ;;  %v2491_v19 = vpack.i.b16 %v2471_v42, %v2403_v48 }
 0x44f   : > { %2505 = vxpose.xlu1.c.b16.start.end [1/1] (short) (narrow) %v2475_v40, 16  ;;  %v2479_v62 = vpack.i.b16 %v2478_v53, %v2477_v52  ;;  %v2503_v2 = vpack.i.b16 %v2502_v55, %v2501_v61  ;;  %7398 = vpow2.f32 %v2035_v45 }
 0x450   : > { %v2487_v58 = vpack.i.b16 %v2486_v59, %v2485_v7  ;;  %v2495_v25 = vpack.i.b16 %v2494_v44, %v2493_v0 }
 0x451   : > { %2521 = vxpose.xlu0.c.b16.start.end [1/1] (short) (narrow) %v2479_v62, 16  ;;  %v7387_v21 = vpop.eup %7386 }
 0x452   : > { %v7389_v28 = vpop.eup %7388  ;;  %v2040_v9 = vsel %vm1988_vm4, %v7387_v21, 0.0 }
 0x453   : > { %2537 = vxpose.xlu1.c.b16.start.end [1/1] (short) (narrow) %v2483_v6, 16  ;;  %v7391_v50 = vpop.eup %7390  ;;  %v2043_v15 = vsel %vm1988_vm4, %v7389_v28, 0.0 }
 0x454   : > { %v2046_v54 = vsel %vm1988_vm4, %v7391_v50, 0.0 }
 0x455   : > { %2553 = vxpose.xlu0.c.b16.start.end [1/1] (short) (narrow) %v2487_v58, 16  ;;  %v7930_v18 = vpop.eup %7392 }
 0x456   : > { %v2049_v27 = vsel %vm1988_vm4, %v7930_v18, 0.0 }
 0x457   : > { %2569 = vxpose.xlu1.c.b16.start.end [1/1] (short) (narrow) %v2491_v19, 16  ;;  %v7933_v23 = vpop.eup %7394 }
 0x458   : > { %v2052_v30 = vsel %vm1988_vm4, %v7933_v23, 0.0 }
 0x459   : > { %2585 = vxpose.xlu0.c.b16.start.end [1/1] (short) (narrow) %v2495_v25, 16  ;;  %v7937_v29 = vpop.eup %7396 }
 0x45a   : > { %v2055_v11 = vsel %vm1988_vm4, %v7937_v29, 0.0 }
 0x45c   : > { %v7941_v12 = vpop.eup %7398 }
 0x45d   : > { %v2058_v5 = vsel %vm1988_vm4, %v7941_v12, 0.0 }
 0x464   : > { %2038 = vadd.xlane.f32.xlu1 %v2037_v24 }
 0x466   : > { %2041 = vadd.xlane.f32.xlu0 %v2040_v9 }
 0x468   : > { %2044 = vadd.xlane.f32.xlu1 %v2043_v15 }
 0x46a   : > { %2047 = vadd.xlane.f32.xlu0 %v2046_v54 }
 0x46c   : > { %2050 = vadd.xlane.f32.xlu1 %v2049_v27 }
 0x46e   : > { %2053 = vadd.xlane.f32.xlu0 %v2052_v30 }
 0x470   : > { %2056 = vadd.xlane.f32.xlu1 %v2055_v11 }
 0x472   : > { %2059 = vadd.xlane.f32.xlu0 %v2058_v5 }
 0x49d   : > { %2601 = vxpose.xlu1.c.b16.start.end [1/1] (short) (narrow) %v2499_v60, 16 }
 0x49f   : > { %2617 = vxpose.xlu0.c.b16.start.end [1/1] (short) (narrow) %v2503_v2, 16 }
 0x4b1   : > { %v2513_v16 = vpop.trf.xlu1 }
 0x4b3   : > { %v2529_v20 = vpop.trf.xlu0 }
 0x4b5   : > { %v2545_v31 = vpop.trf.xlu1 }
 0x4b7   : > { %v2561_v32 = vpop.trf.xlu0 }
 0x4b9   : > { %v2577_v33 = vpop.trf.xlu1 }
 0x4ba   : > { %v2633_v60 = vcombine.low %v2513_v16, %v2577_v33 }
 0x4bb   : > { %v2593_v34 = vpop.trf.xlu0 }
 0x4bc   : > { %v2658_v59 = vcombine.low %v2529_v20, %v2593_v34  ;;  %v2640_v4 = vrot.slane %v2633_v60, %v7653_v43 }
 0x4be   : > { %v2665_v17 = vrot.slane %v2658_v59, %v7653_v43 }
 0x4ed   : > { %v2039_v35 = vpop.xlane.xlu1 %2038 }
 0x4ee   : > { %7400 = vrcp.f32 %v2039_v35 }
 0x4ef   : > { %v2042_v37 = vpop.xlane.xlu0 %2041 }
 0x4f0   : > { %7402 = vrcp.f32 %v2042_v37 }
 0x4f1   : > { %v2045_v38 = vpop.xlane.xlu1 %2044 }
 0x4f2   : > { %7404 = vrcp.f32 %v2045_v38 }
 0x4f3   : > { %v2048_v40 = vpop.xlane.xlu0 %2047 }
 0x4f4   : > { %7406 = vrcp.f32 %v2048_v40 }
 0x4f5   : > { %v2051_v52 = vpop.xlane.xlu1 %2050 }
 0x4f6   : > { %7408 = vrcp.f32 %v2051_v52 }
 0x4f7   : > { %v2054_v53 = vpop.xlane.xlu0 %2053 }
 0x4f8   : > { %7410 = vrcp.f32 %v2054_v53 }
 0x4f9   : > { %v2057_v8 = vpop.xlane.xlu1 %2056 }
 0x4fa   : > { %7412 = vrcp.f32 %v2057_v8 }
 0x4fb   : > { %v7401_v39 = vpop.eup %7400  ;;  %v2060_v56 = vpop.xlane.xlu0 %2059 }
 0x4fc   : > { %7414 = vrcp.f32 %v2060_v56  ;;  %v2062_v61 = vmul.f32 %v7401_v39, %v7385_v49 }
 0x4fd   : > { %v7403_v57 = vpop.eup %7402 }
 0x4fe   : > { %v2064_v55 = vmul.f32 %v7403_v57, %v7387_v21 }
 0x4ff   : > { %v7405_v41 = vpop.eup %7404  ;;  %v2609_v62 = vpop.trf.xlu1 }
 0x500   : > { %v2641_v42 = vcombine.low %v2545_v31, %v2609_v62  ;;  %v2077_v63 = vpack.c.bf16 %v2064_v55, %v2062_v61  ;;  %v2066_v7 = vmul.f32 %v7405_v41, %v7389_v28 }
 0x501   : > { %v7407_v2 = vpop.eup %7406  ;;  %v2625_v6 = vpop.trf.xlu0 }
 0x502   : > { %v2648_v48 = vrot.slane %v2641_v42, %v7653_v43  ;;  %v2666_v13 = vcombine.low %v2561_v32, %v2625_v6  ;;  %v2699_v14 = vsel %vm1988_vm4, %v2077_v63, 0  ;;  %v2068_v58 = vmul.f32 %v7407_v2, %v7391_v50 }
 0x503   : > { %v7409_v44 = vpop.eup %7408  ;;  %7167 = vmatpush3.bf16.xpose.msra.mxu0 %v2699_v14 }
 0x504   : > { %v2649_v10 = vcombine.low %v2640_v4, %v2648_v48  ;;  %v2673_v19 = vrot.slane %v2666_v13, %v7653_v43  ;;  %v2078_v0 = vpack.c.bf16 %v2068_v58, %v2066_v7  ;;  %7178 = vmatprep.subr.bf16.mxu0 %v7480_v1  ;;  %v2070_v22 = vmul.f32 %v7409_v44, %v7930_v18 }
 0x505   : > { %v7411_v47 = vpop.eup %7410 }
 0x506   : > { %v2656_v25 = vrot.slane %v2649_v10, %v7659_v51  ;;  %v2674_v3 = vcombine.low %v2665_v17, %v2673_v19  ;;  %v2745_v46 = vsel %vm1988_vm4, %v2078_v0, 0  ;;  %v2072_v26 = vmul.f32 %v7411_v47, %v7933_v23 }
 0x507   : > { %7173 = vmatpush3.bf16.xpose.msra.mxu1 %v2745_v46  ;;  %v7413_v45 = vpop.eup %7412 }
 0x508   : > { %v2681_v49 = vrot.slane %v2674_v3, %v7659_v51  ;;  %v2079_v21 = vpack.c.bf16 %v2072_v26, %v2070_v22  ;;  %7184 = vmatprep.subr.bf16.mxu1 %v7480_v1  ;;  %v2686_v28 = vshrl.u32 %v2656_v25, 16  ;;  %v2074_v18 = vmul.f32 %v7413_v45, %v7937_v29 }
 0x509   : > { %v7415_v24 = vpop.eup %7414  ;;  %v2657_v11 = vcombine.high %v2656_v25, %v7488_v36 }
 0x50a   : > { %v2687_v9 = vshrl.u32 %v2681_v49, 16  ;;  %v2685_v50 = vpack.i.b16 %v2681_v49, %v2656_v25  ;;  %v2791_v15 = vsel %vm1988_vm4, %v2079_v21, 0  ;;  %v2076_v54 = vmul.f32 %v7415_v24, %v7941_v12 }
 0x50b   : > { %v2682_v27 = vcombine.high %v2681_v49, %v7488_v36  ;;  %v2692_v16 = vshrl.u32 %v2657_v11, 16 }
 0x50c   : > { %7169 = vmatmul.mubr.msk.bf16.vlgmr.msra.gmra.mxu0 %vm1988_vm4, %v2685_v50  ;;  %v2688_v23 = vpack.i.b16 %v2687_v9, %v2686_v28  ;;  %v2080_v30 = vpack.c.bf16 %v2076_v54, %v2074_v18 }
 0x50d   : > { %7179 = vmatpush3.bf16.xpose.msra.mxu0 %v2791_v15  ;;  %7180 = vmatprep.mubr.msk.bf16.mxu0 %vm7481_vm0, %v7480_v1  ;;  %v2693_v12 = vshrl.u32 %v2682_v27, 16  ;;  %v2691_v5 = vpack.i.b16 %v2682_v27, %v2657_v11 }
 0x50e   : > { %7175 = vmatmul.mubr.msk.bf16.vlgmr.msra.gmra.mxu1 %vm1988_vm4, %v2688_v23  ;;  %7190 = vmatprep.subr.bf16.mxu0 %v7480_v1  ;;  %v2837_v29 = vsel %vm1988_vm4, %v2080_v30, 0 }
 0x50f   : > { %7186 = vmatprep.mubr.msk.bf16.mxu1 %vm7481_vm0, %v7480_v1  ;;  %7185 = vmatpush3.bf16.xpose.msra.mxu1 %v2837_v29  ;;  %v2694_v20 = vpack.i.b16 %v2693_v12, %v2692_v16 }
 0x510   : > { %7198 = vmatprep.subr.bf16.mxu1 %v7480_v1 }
 0x514   : > { %7181 = vmatmul.mubr.msk.bf16.vlgmr.msra.gmra.mxu0 %vm1988_vm4, %v2691_v5 }
 0x515   : > { %7194 = vmatprep.mubr.msk.bf16.mxu0 %vm7481_vm0, %v7480_v1 }
 0x516   : > { %7187 = vmatmul.mubr.msk.bf16.vlgmr.msra.gmra.mxu1 %vm1988_vm4, %v2694_v20 }
 0x517   : > { %7202 = vmatprep.mubr.msk.bf16.mxu1 %vm7481_vm0, %v7480_v1 }
 0x5cc   : > { %v2735_v31 = vpop.f32.mrf.mxu0 }
 0x5cd   : > { %2879 = vxpose.xlu1.b32.start.end [1/1] (short) (narrow) %v2735_v31, 16 }
 0x5ce   : > { %v7170_v32 = vpop.f32.mrf.mxu0  ;;  %v2781_v33 = vpop.f32.mrf.mxu1 }
 0x5cf   : > { %2911 = vxpose.xlu0.b32.start.end [1/1] (short) (narrow) %v2781_v33, 16 }
 0x5d0   : > { %v2738_v34 = vpop.f32.mrf.mxu0  ;;  %v7176_v35 = vpop.f32.mrf.mxu1 }
 0x5d2   : > { %v7171_v37 = vpop.f32.mrf.mxu0  ;;  %v2784_v38 = vpop.f32.mrf.mxu1 }
 0x5d4   : > { %v7177_v40 = vpop.f32.mrf.mxu1  ;;  %v2827_v52 = vpop.f32.mrf.mxu0 }
 0x5d5   : > { %2943 = vxpose.xlu0.b32.start.end [1/1] (short) (narrow) %v2827_v52, 16 }
 0x5d6   : > { %v7182_v53 = vpop.f32.mrf.mxu0  ;;  %v2873_v8 = vpop.f32.mrf.mxu1 }
 0x5d7   : > { %2975 = vxpose.xlu1.b32.start.end [1/1] (short) (narrow) %v2873_v8, 16 }
 0x5d8   : > { %v2830_v39 = vpop.f32.mrf.mxu0  ;;  %v7188_v56 = vpop.f32.mrf.mxu1 }
 0x5d9   : > { %v7364_v56 = vld [vmem:[%s8630_s3 + $0x18] sm:$0xff]  }
 0x5da   : > { %v7183_v57 = vpop.f32.mrf.mxu0  ;;  %v2876_v60 = vpop.f32.mrf.mxu1  ;;  %7191 = vmatpush3.bf16.msra.mxu0 %v7364_v56 }
 0x5db   : > { %7192 = vmatprep.subr.bf16.mxu0 %v7480_v1 }
 0x5dc   : > { %v7189_v61 = vpop.f32.mrf.mxu1 }
 0x649   : > { %v2895_v55 = vpop.trf.xlu1 }
 0x64b   : > { %v2927_v41 = vpop.trf.xlu0 }
 0x64d   : > { %v2896_v62 = vpop.trf.xlu1 }
 0x64f   : > { %v2928_v59 = vpop.trf.xlu0 }
 0x653   : > { %v2959_v42 = vpop.trf.xlu0  ;;  %v2991_v4 = vpop.trf.xlu1 }
 0x654   : > { %v3007_v63 = vcombine.low %v2895_v55, %v2959_v42  ;;  %v3008_v2 = vcombine.high %v2895_v55, %v2959_v42  ;;  %v3023_v6 = vcombine.low %v2927_v41, %v2991_v4  ;;  %v3024_v7 = vcombine.high %v2927_v41, %v2991_v4 }
 0x656   : > { %v3015_v48 = vrot.slane %v3007_v63, %v7653_v43  ;;  %v3022_v13 = vrot.slane %v3008_v2, %v7653_v43  ;;  %v3031_v14 = vrot.slane %v3023_v6, %v7653_v43  ;;  %v3038_v58 = vrot.slane %v3024_v7, %v7653_v43 }
 0x657   : > { %v2960_v44 = vpop.trf.xlu0  ;;  %v2992_v19 = vpop.trf.xlu1 }
 0x658   : > { %v3075_v17 = vcombine.low %v2896_v62, %v2960_v44  ;;  %v3076_v10 = vcombine.high %v2896_v62, %v2960_v44  ;;  %v3039_v0 = vcombine.low %v3015_v48, %v3031_v14  ;;  %v3040_v47 = vcombine.high %v3015_v48, %v3031_v14  ;;  %v7365_v48 = vld [vmem:[%s8630_s3 + $0x10] sm:$0xff]  }
 0x659   : > { %v3055_v22 = vcombine.low %v3022_v13, %v3038_v58  ;;  %v3056_v25 = vcombine.high %v3022_v13, %v3038_v58  ;;  %v3091_v26 = vcombine.low %v2928_v59, %v2992_v19  ;;  %v3092_v45 = vcombine.high %v2928_v59, %v2992_v19  ;;  %7193 = vmatpush3.bf16.msra.mxu0 %v7365_v48 }
 0x65a   : > { %v3083_v3 = vrot.slane %v3075_v17, %v7653_v43  ;;  %v3090_v46 = vrot.slane %v3076_v10, %v7653_v43  ;;  %v3047_v49 = vrot.slane %v3039_v0, %v7659_v51  ;;  %v3054_v21 = vrot.slane %v3040_v47, %v7659_v51  ;;  %7206 = vmatprep.subr.bf16.mxu0 %v7480_v1 }
 0x65b   : > { %v3063_v24 = vrot.slane %v3055_v22, %v7659_v51  ;;  %v3070_v28 = vrot.slane %v3056_v25, %v7659_v51  ;;  %v3099_v9 = vrot.slane %v3091_v26, %v7653_v43  ;;  %v3106_v50 = vrot.slane %v3092_v45, %v7653_v43 }
 0x65c   : > { %v3143_v15 = vcombine.low %v3047_v49, %v3054_v21  ;;  %v6953_v18 = vcombine.high %v3047_v49, %v3054_v21 }
 0x65d   : > { %v3159_v54 = vcombine.low %v3063_v24, %v3070_v28  ;;  %v6954_v23 = vcombine.high %v3063_v24, %v3070_v28  ;;  %v3107_v27 = vcombine.low %v3083_v3, %v3099_v9  ;;  %v3108_v30 = vcombine.high %v3083_v3, %v3099_v9 }
 0x65e   : > { %v3123_v11 = vcombine.low %v3090_v46, %v3106_v50  ;;  %v3124_v29 = vcombine.high %v3090_v46, %v3106_v50  ;;  %v3150_v12 = vrot.slane %v3143_v15, %v7653_v43  ;;  %v3158_v5 = vrot.slane %v6953_v18, %v7653_v43 }
 0x65f   : > { %v3166_v16 = vrot.slane %v3159_v54, %v7653_v43  ;;  %v3174_v20 = vrot.slane %v6954_v23, %v7653_v43  ;;  %v3115_v31 = vrot.slane %v3107_v27, %v7659_v51  ;;  %v3122_v32 = vrot.slane %v3108_v30, %v7659_v51 }
 0x660   : > { %v3131_v33 = vrot.slane %v3123_v11, %v7659_v51  ;;  %v3138_v34 = vrot.slane %v3124_v29, %v7659_v51  ;;  %v3176_v35 = vcombine.high %v3150_v12, %v3158_v5  ;;  %v3175_v38 = vcombine.low %v3150_v12, %v3158_v5  ;;  %v6961_v5 = vld [vmem:[%s8635_s8 + $0x1] ss:$0 sm:$0xff] }
 0x661   : > { %v3192_v37 = vcombine.high %v3166_v16, %v3174_v20  ;;  %v3191_v40 = vcombine.low %v3166_v16, %v3174_v20  ;;  %v3211_v52 = vcombine.low %v3115_v31, %v3122_v32  ;;  %v6955_v53 = vcombine.high %v3115_v31, %v3122_v32  ;;  %v7468_v32 = vld [vmem:[%s7580_s27] sm:$0xff] }
 0x662   : > { %v3227_v8 = vcombine.low %v3131_v33, %v3138_v34  ;;  %v6956_v39 = vcombine.high %v3131_v33, %v3138_v34  ;;  %v3183_v57 = vrot.slane %v3175_v38, %v7659_v51  ;;  %v3190_v59 = vrot.slane %v3176_v35, %v7659_v51 }
 0x663   : > { %v3199_v60 = vrot.slane %v3191_v40, %v7659_v51  ;;  %v3218_v61 = vrot.slane %v3211_v52, %v7653_v43  ;;  %v3226_v55 = vrot.slane %v6955_v53, %v7653_v43  ;;  %v3206_v42 = vrot.slane %v3192_v37, %v7659_v51  ;;  %v7469_v40 = vld [vmem:[%s7580_s27 + $0x8] sm:$0xff] }
 0x664   : > { %v3234_v41 = vrot.slane %v3227_v8, %v7653_v43  ;;  %v3242_v62 = vrot.slane %v6956_v39, %v7653_v43 }
 0x665   : > { %v3207_v63 = vcombine.low %v3183_v57, %v3199_v60  ;;  %v3244_v2 = vcombine.high %v3218_v61, %v3226_v55  ;;  %v3243_v6 = vcombine.low %v3218_v61, %v3226_v55  ;;  %v3209_v17 = vcombine.low %v3190_v59, %v3206_v42 }
 0x666   : > { %v3260_v4 = vcombine.high %v3234_v41, %v3242_v62  ;;  %v3259_v7 = vcombine.low %v3234_v41, %v3242_v62  ;;  %v3208_v19 = vcombine.high %v3183_v57, %v3199_v60  ;;  %v3210_v46 = vcombine.high %v3190_v59, %v3206_v42  ;;  %v7366_v42 = vld [vmem:[%s8631_s4 + $0x8] sm:$0xff]  }
 0x667   : > { %v3258_v13 = vrot.slane %v3244_v2, %v7659_v51  ;;  %v3251_v58 = vrot.slane %v3243_v6, %v7659_v51  ;;  %7199 = vmatpush3.bf16.msra.mxu1 %v7366_v42  ;;  %v7368_v2 = vld [vmem:[%s8632_s5 + $0x18] sm:$0xff]  }
 0x668   : > { %v3274_v14 = vrot.slane %v3260_v4, %v7659_v51  ;;  %v3267_v44 = vrot.slane %v3259_v7, %v7659_v51  ;;  %7200 = vmatprep.subr.bf16.mxu1 %v7480_v1 }
 0x66a   : > { %v3277_v10 = vcombine.low %v3258_v13, %v3274_v14  ;;  %v3276_v0 = vcombine.high %v3251_v58, %v3267_v44  ;;  %v3275_v47 = vcombine.low %v3251_v58, %v3267_v44  ;;  %v3278_v3 = vcombine.high %v3258_v13, %v3274_v14 }
 0x66c   : > { %v7335_v22 = vpack.i.bf16 %v3277_v10, %v3209_v17  ;;  %v7330_v25 = vpack.i.bf16 %v3276_v0, %v3208_v19  ;;  %v7340_v26 = vpack.i.bf16 %v3278_v3, %v3210_v46  ;;  %v6965_v17 = vld [vmem:[%s8636_s9] ss:$0 sm:$0xff] }
 0x66e   : > { %7336 = vrot.lane.b32.xlu1 %v7335_v22, %s7489_s13  ;;  %7331 = vrot.lane.b32.xlu0 %v7330_v25, %s7490_s16 }
 0x672   : > { %7341 = vrot.lane.b32.xlu1 %v7340_v26, %s7491_s18  ;;  %v7369_v26 = vld [vmem:[%s8632_s5 + $0x10] sm:$0xff]  }
 0x6e0   : > { %v7337_v45 = vpop.permute.xlu1 %7336  ;;  %v7332_v49 = vpop.permute.xlu0 %7331 }
 0x6e1   : > { %v7334_v21 = vunpack.i.h.bf16 %v7332_v49  ;;  %v7333_v24 = vunpack.i.l.bf16 %v7332_v49  ;;  %v7339_v28 = vunpack.i.h.bf16 %v7337_v45  ;;  %v7338_v9 = vunpack.i.l.bf16 %v7337_v45  ;;  %v7370_v45 = vld [vmem:[%s8632_s5 + $0x8] sm:$0xff]   ;;  %v7371_v49 = vld [vmem:[%s8632_s5] sm:$0xff]  }
 0x6e3   : > { %v3303_v50 = vsel %vm1798_vm3, %v3207_v63, %v7333_v24  ;;  %v3304_v15 = vsel %vm1798_vm3, %v3275_v47, %v7334_v21  ;;  %v7367_v63 = vld [vmem:[%s8631_s4] sm:$0xff]  }
 0x6e4   : > { %v7342_v18 = vpop.permute.xlu1 %7341  ;;  %v3305_v27 = vsel %vm1988_vm4, %v3303_v50, %v7338_v9  ;;  %v3306_v30 = vsel %vm1988_vm4, %v3304_v15, %v7339_v28  ;;  %7201 = vmatpush3.bf16.msra.mxu1 %v7367_v63  ;;  %v6966_v47 = vld [vmem:[%s8636_s9 + $0x1] ss:$0 sm:$0xff]  ;;  %v6967_v21 = vld [vmem:[%s8634_s7] ss:$0 sm:$0xff] }
 0x6e5   : > { %v7344_v54 = vunpack.i.h.bf16 %v7342_v18  ;;  %v7343_v23 = vunpack.i.l.bf16 %v7342_v18  ;;  %7218 = vmatprep.subr.bf16.mxu1 %v7480_v1 }
 0x6e7   : > { %v3308_v11 = vsel %vm3307_vm5, %v3305_v27, %v7343_v23  ;;  %v3309_v29 = vsel %vm3307_vm5, %v3306_v30, %v7344_v54  ;;  %v6971_v30 = vld [vmem:[%s8635_s8 + $0x2] ss:$0 sm:$0xff] }
 0x6e8   : > { %v3310_v12 = vpack.c.bf16 %v3309_v29, %v3308_v11 }
 0x6ea   : > { %7195 = vmatmul.mubr.msk.bf16.vlgmr.msra.gmra.mxu0 %vm441_vm1, %v3310_v12 }
 0x6eb   : > { %7214 = vmatprep.mubr.msk.bf16.mxu0 %vm7481_vm0, %v7480_v1  ;;  %7207 = vmatpush3.bf16.msra.mxu0 %v7368_v2 }
 0x6ec   : > { %7208 = vmatprep.subr.bf16.mxu0 %v7480_v1 }
 0x6ef   : > { %7209 = vmatpush3.bf16.msra.mxu0 %v7369_v26  ;;  %v6983_v26 = vld [vmem:[%s8633_s6 + $0x1] ss:$0 sm:$0xff] }
 0x6f0   : > { %7210 = vmatprep.subr.bf16.mxu0 %v7480_v1 }
 0x6f3   : > { %7211 = vmatpush3.bf16.msra.mxu0 %v7370_v45 }
 0x6f4   : > { %7212 = vmatprep.subr.bf16.mxu0 %v7480_v1 }
 0x6f7   : > { %7213 = vmatpush3.bf16.msra.mxu0 %v7371_v49 }
 0x6f8   : > { %7234 = vmatprep.subr.bf16.mxu0 %v7480_v1 }
 0x7aa   : > { %v3370_v16 = vpop.f32.mrf.mxu0 }
 0x7ab   : > { %v3371_v20 = vadd.f32 %v6961_v5, %v3370_v16 }
 0x7ac   : > { %v7196_v31 = vpop.f32.mrf.mxu0 }
 0x7ad   : > { %v3377_v33 = vadd.f32 %v7468_v32, %v3371_v20 }
 0x7ae   : > { %v3373_v34 = vpop.f32.mrf.mxu0 }
 0x7af   : > { %v3374_v35 = vadd.f32 %v6961_v5, %v3373_v34  ;;  %v3381_v37 = vsel %vm441_vm1, %v3377_v33, 0.0 }
 0x7b0   : > { %3382 = vadd.xlane.f32.xlu1 %v3381_v37  ;;  %v7197_v38 = vpop.f32.mrf.mxu0 }
 0x7b1   : > { %v3378_v52 = vadd.f32 %v7469_v40, %v3374_v35 }
 0x7b3   : > { %v3384_v53 = vsel %vm441_vm1, %v3378_v52, 0.0 }
 0x7b4   : > { %3385 = vadd.xlane.f32.xlu0 %v3384_v53 }
 0x839   : > { %v3383_v8 = vpop.xlane.xlu1 %3382 }
 0x83a   : > { %v3388_v39 = vmul.f32 0.03125, %v3383_v8 }
 0x83c   : > { %v3390_v56 = vsub.f32 %v3377_v33, %v3388_v39 }
 0x83d   : > { %v3386_v57 = vpop.xlane.xlu0 %3385 }
 0x83e   : > { %v3389_v60 = vmul.f32 0.03125, %v3386_v57  ;;  %v3392_v61 = vmul.f32 %v3390_v56, %v3390_v56 }
 0x840   : > { %v3391_v55 = vsub.f32 %v3378_v52, %v3389_v60  ;;  %v3394_v41 = vsel %vm441_vm1, %v3392_v61, 0.0  ;;  %v7372_v60 = vld [vmem:[%s8629_s2 + $0x18] sm:$0xff]   ;;  %v7373_v61 = vld [vmem:[%s8629_s2 + $0x10] sm:$0xff]  }
 0x841   : > { %3395 = vadd.xlane.f32.xlu0 %v3394_v41 }
 0x842   : > { %v3393_v62 = vmul.f32 %v3391_v55, %v3391_v55 }
 0x844   : > { %v3397_v59 = vsel %vm441_vm1, %v3393_v62, 0.0 }
 0x845   : > { %3398 = vadd.xlane.f32.xlu1 %v3397_v59 }
 0x8ca   : > { %v3396_v4 = vpop.xlane.xlu0 %3395 }
 0x8cb   : > { %v3400_v6 = vmul.f32 0.03125, %v3396_v4  ;;  %v6977_v4 = vld [vmem:[%s8636_s9 + $0x2] ss:$0 sm:$0xff] }
 0x8cd   : > { %v3402_v7 = vadd.f32 1e-05, %v3400_v6 }
 0x8ce   : > { %v3399_v48 = vpop.xlane.xlu1 %3398 }
 0x8cf   : > { %7416 = vrsqrt.f32 %v3402_v7  ;;  %v3401_v13 = vmul.f32 0.03125, %v3399_v48 }
 0x8d1   : > { %v3403_v14 = vadd.f32 1e-05, %v3401_v13  ;;  %v6978_v13 = vld [vmem:[%s8636_s9 + $0x3] ss:$0 sm:$0xff] }
 0x8d3   : > { %7418 = vrsqrt.f32 %v3403_v14 }
 0x8dc   : > { %v7417_v58 = vpop.eup %7416 }
 0x8dd   : > { %v3406_v44 = vmul.f32 %v7417_v58, %v3390_v56 }
 0x8df   : > { %v3412_v0 = vmul.f32 %v6965_v17, %v3406_v44 }
 0x8e0   : > { %v7419_v10 = vpop.eup %7418 }
 0x8e1   : > { %v3407_v19 = vmul.f32 %v7419_v10, %v3391_v55  ;;  %v3418_v25 = vadd.f32 %v6966_v47, %v3412_v0  ;;  %v7470_v10 = vld [vmem:[%s7586_s30] sm:$0xff]  ;;  %v7471_v0 = vld [vmem:[%s7586_s30 + $0x8] sm:$0xff] }
 0x8e3   : > { %v3413_v22 = vmul.f32 %v6965_v17, %v3407_v19 }
 0x8e5   : > { %v3419_v3 = vadd.f32 %v6966_v47, %v3413_v22  ;;  %v7374_v22 = vld [vmem:[%s8630_s3 + $0x28] sm:$0xff]  }
 0x8e7   : > { %v3420_v46 = vpack.c.bf16 %v3419_v3, %v3418_v25 }
 0x8e9   : > { %7203 = vmatmul.mubr.msk.bf16.vlgmr.msra.gmra.mxu1 %vm441_vm1, %v3420_v46 }
 0x8ea   : > { %7222 = vmatprep.mubr.msk.bf16.mxu1 %vm7481_vm0, %v7480_v1  ;;  %7219 = vmatpush3.bf16.msra.mxu1 %v7372_v60 }
 0x8eb   : > { %7220 = vmatprep.subr.bf16.mxu1 %v7480_v1 }
 0x8ee   : > { %7221 = vmatpush3.bf16.msra.mxu1 %v7373_v61 }
 0x8ef   : > { %7226 = vmatprep.subr.bf16.mxu1 %v7480_v1 }
 0x9a9   : > { %v3479_v24 = vpop.f32.mrf.mxu1 }
 0x9aa   : > { %v3480_v9 = vadd.f32 %v6967_v21, %v3479_v24 }
 0x9ab   : > { %v7204_v28 = vpop.f32.mrf.mxu1 }
 0x9ac   : > { %v3486_v54 = vmax.f32 %v3480_v9, 0.0 }
 0x9ad   : > { %v3482_v50 = vpop.f32.mrf.mxu1 }
 0x9ae   : > { %v3483_v15 = vadd.f32 %v6967_v21, %v3482_v50 }
 0x9af   : > { %v7205_v18 = vpop.f32.mrf.mxu1 }
 0x9b0   : > { %v3487_v23 = vmax.f32 %v3483_v15, 0.0 }
 0x9b2   : > { %v3488_v27 = vpack.c.bf16 %v3487_v23, %v3486_v54 }
 0x9b4   : > { %7215 = vmatmul.mubr.msk.bf16.vlgmr.msra.gmra.mxu0 %vm3526_vm6, %v3488_v27 }
 0x9b5   : > { %7236 = vmatprep.mubr.msk.bf16.mxu0 %vm7481_vm0, %v7480_v1 }
 0xa74   : > { %v3564_v11 = vpop.f32.mrf.mxu0 }
 0xa75   : > { %v3565_v29 = vadd.f32 %v6971_v30, %v3564_v11 }
 0xa76   : > { %v7216_v12 = vpop.f32.mrf.mxu0 }
 0xa77   : > { %v3571_v5 = vadd.f32 %v3565_v29, %v3418_v25 }
 0xa78   : > { %v3567_v16 = vpop.f32.mrf.mxu0 }
 0xa79   : > { %v3568_v20 = vadd.f32 %v6971_v30, %v3567_v16  ;;  %v3575_v31 = vsel %vm441_vm1, %v3571_v5, 0.0 }
 0xa7a   : > { %3576 = vadd.xlane.f32.xlu0 %v3575_v31  ;;  %v7217_v32 = vpop.f32.mrf.mxu0 }
 0xa7b   : > { %v3572_v33 = vadd.f32 %v3568_v20, %v3419_v3  ;;  %v7375_v3 = vld [vmem:[%s8630_s3 + $0x20] sm:$0xff]  }
 0xa7d   : > { %v3578_v34 = vsel %vm441_vm1, %v3572_v33, 0.0 }
 0xa7e   : > { %3579 = vadd.xlane.f32.xlu1 %v3578_v34 }
 0xb03   : > { %v3577_v35 = vpop.xlane.xlu0 %3576 }
 0xb04   : > { %v3581_v37 = vmul.f32 0.03125, %v3577_v35 }
 0xb06   : > { %v3583_v38 = vsub.f32 %v3571_v5, %v3581_v37 }
 0xb07   : > { %v3580_v40 = vpop.xlane.xlu1 %3579 }
 0xb08   : > { %v3582_v52 = vmul.f32 0.03125, %v3580_v40  ;;  %v3585_v53 = vmul.f32 %v3583_v38, %v3583_v38 }
 0xb0a   : > { %v3584_v8 = vsub.f32 %v3572_v33, %v3582_v52  ;;  %v3587_v39 = vsel %vm441_vm1, %v3585_v53, 0.0 }
 0xb0b   : > { %3588 = vadd.xlane.f32.xlu0 %v3587_v39 }
 0xb0c   : > { %v3586_v56 = vmul.f32 %v3584_v8, %v3584_v8 }
 0xb0e   : > { %v3590_v57 = vsel %vm441_vm1, %v3586_v56, 0.0 }
 0xb0f   : > { %3591 = vadd.xlane.f32.xlu1 %v3590_v57 }
 0xb94   : > { %v3589_v55 = vpop.xlane.xlu0 %3588 }
 0xb95   : > { %v3593_v41 = vmul.f32 0.03125, %v3589_v55 }
 0xb97   : > { %v3595_v62 = vadd.f32 1e-05, %v3593_v41 }
 0xb98   : > { %v3592_v59 = vpop.xlane.xlu1 %3591 }
 0xb99   : > { %7420 = vrsqrt.f32 %v3595_v62  ;;  %v3594_v42 = vmul.f32 0.03125, %v3592_v59 }
 0xb9b   : > { %v3596_v63 = vadd.f32 1e-05, %v3594_v42 }
 0xb9d   : > { %7422 = vrsqrt.f32 %v3596_v63 }
 0xba6   : > { %v7421_v2 = vpop.eup %7420 }
 0xba7   : > { %v3599_v6 = vmul.f32 %v7421_v2, %v3583_v38 }
 0xba9   : > { %v3605_v7 = vmul.f32 %v6977_v4, %v3599_v6 }
 0xbaa   : > { %v7423_v48 = vpop.eup %7422 }
 0xbab   : > { %v3600_v14 = vmul.f32 %v7423_v48, %v3584_v8  ;;  %v8103_v44 = vadd.f32 %v6978_v13, %v3605_v7 }
 0xbad   : > { %v3606_v58 = vmul.f32 %v6977_v4, %v3600_v14  ;;  %v3613_v19 = vadd.f32 %v7470_v10, %v8103_v44 }
 0xbaf   : > { %v8105_v17 = vadd.f32 %v6978_v13, %v3606_v58 }
 0xbb1   : > { %v3614_v47 = vadd.f32 %v7471_v0, %v8105_v17  ;;  %v3682_v46 = vpack.c.bf16 %v8105_v17, %v8103_v44 }
 0xbb3   : > { %v3615_v25 = vpack.c.bf16 %v3614_v47, %v3613_v19 }
 0xbb5   : > { %7223 = vmatmul.mubr.msk.bf16.vlgmr.msra.gmra.mxu1 %vm441_vm1, %v3615_v25 }
 0xbb6   : > { %7227 = vmatpush3.bf16.msra.mxu1 %v7374_v22  ;;  %7230 = vmatprep.mubr.msk.bf16.mxu1 %vm7481_vm0, %v7480_v1 }
 0xbb7   : > { %7228 = vmatprep.subr.bf16.mxu1 %v7480_v1 }
 0xbba   : > { %7229 = vmatpush3.bf16.msra.mxu1 %v7375_v3 }
 0xbbb   : > { %7240 = vmatprep.subr.bf16.mxu1 %v7480_v1 }
 0xbbd   : > { %7231 = vmatmul.mubr.msk.bf16.vlgmr.msra.gmra.mxu1 %vm441_vm1, %v3682_v46 }
 0xbbe   : > { %7242 = vmatprep.mubr.msk.bf16.mxu1 %vm7481_vm0, %v7480_v1 }
 0xc75   : > { %v3675_v45 = vpop.f32.mrf.mxu1 }
 0xc76   : > { %v8130_v49 = vadd.f32 %v6983_v26, %v3675_v45 }
 0xc77   : > { %v7224_v21 = vpop.f32.mrf.mxu1 }
 0xc78   : > { %3758 = vrot.lane.b32.xlu1 %v8130_v49, %s7482_s14  ;;  %3752 = vrot.lane.b32.xlu0 %v8130_v49, %s7483_s15 }
 0xc79   : > { %v3678_v24 = vpop.f32.mrf.mxu1 }
 0xc7a   : > { %v8136_v28 = vadd.f32 %v6983_v26, %v3678_v24 }
 0xc7b   : > { %v7225_v9 = vpop.f32.mrf.mxu1 }
 0xc7c   : > { %3760 = vrot.lane.b32.xlu0 %v8136_v28, %s7482_s14  ;;  %3754 = vrot.lane.b32.xlu1 %v8136_v28, %s7483_s15 }
 0xc7d   : > { %v8142_v50 = vpop.f32.mrf.mxu1 }
 0xc7f   : > { %v7232_v15 = vpop.f32.mrf.mxu1 }
 0xc80   : > { %3766 = vrot.lane.b32.xlu0 %v8136_v28, %s7484_s19  ;;  %3764 = vrot.lane.b32.xlu1 %v8130_v49, %s7484_s19 }
 0xc81   : > { %v8148_v18 = vpop.f32.mrf.mxu1 }
 0xc83   : > { %v7233_v54 = vpop.f32.mrf.mxu1 }
 0xc84   : > { %3924 = vrot.lane.b32.xlu0 %v8136_v28, %s7485_s22  ;;  %3922 = vrot.lane.b32.xlu1 %v8130_v49, %s7485_s22 }
 0xcea   : > { %v8154_v23 = vpop.permute.xlu1 %3758  ;;  %v8156_v27 = vpop.permute.xlu0 %3752 }
 0xceb   : > { %3926 = vrot.lane.b32.xlu1 %v8156_v27, %s7485_s22 }
 0xcee   : > { %v8160_v30 = vpop.permute.xlu1 %3754  ;;  %v8166_v11 = vpop.permute.xlu0 %3760 }
 0xcef   : > { %3930 = vrot.lane.b32.xlu1 %v8154_v23, %s7485_s22  ;;  %3928 = vrot.lane.b32.xlu0 %v8160_v30, %s7485_s22 }
 0xcf2   : > { %v8168_v29 = vpop.permute.xlu1 %3764  ;;  %v8174_v12 = vpop.permute.xlu0 %3766 }
 0xcf3   : > { %3932 = vrot.lane.b32.xlu0 %v8166_v11, %s7485_s22  ;;  %3934 = vrot.lane.b32.xlu1 %v8168_v29, %s7485_s22 }
 0xcf6   : > { %v3923_v5 = vpop.permute.xlu1 %3922  ;;  %v3925_v16 = vpop.permute.xlu0 %3924 }
 0xcf7   : > { %3936 = vrot.lane.b32.xlu0 %v8174_v12, %s7485_s22 }
 0xd5d   : > { %v3927_v20 = vpop.permute.xlu1 %3926 }
 0xd61   : > { %v3929_v31 = vpop.permute.xlu0 %3928  ;;  %v3931_v32 = vpop.permute.xlu1 %3930 }
 0xd62   : > { %v3946_v33 = vcombine.low %v3923_v5, %v3931_v32  ;;  %v3947_v34 = vcombine.high %v3923_v5, %v3931_v32 }
 0xd64   : > { %v3954_v52 = vrot.slane %v3946_v33, %v7653_v43  ;;  %v3961_v53 = vrot.slane %v3947_v34, %v7653_v43 }
 0xd65   : > { %v3933_v35 = vpop.permute.xlu0 %3932  ;;  %v3935_v37 = vpop.permute.xlu1 %3934 }
 0xd66   : > { %v3962_v38 = vcombine.low %v3927_v20, %v3935_v37  ;;  %v3963_v40 = vcombine.high %v3927_v20, %v3935_v37  ;;  %v4014_v41 = vcombine.low %v3925_v16, %v3933_v35  ;;  %v4015_v47 = vcombine.high %v3925_v16, %v3933_v35 }
 0xd68   : > { %v3970_v8 = vrot.slane %v3962_v38, %v7653_v43  ;;  %v3977_v39 = vrot.slane %v3963_v40, %v7653_v43  ;;  %v4022_v48 = vrot.slane %v4014_v41, %v7653_v43  ;;  %v4029_v24 = vrot.slane %v4015_v47, %v7653_v43 }
 0xd69   : > { %v3937_v56 = vpop.permute.xlu0 %3936 }
 0xd6a   : > { %v4030_v57 = vcombine.low %v3929_v31, %v3937_v56  ;;  %v3978_v60 = vcombine.low %v3954_v52, %v3970_v8  ;;  %v3979_v61 = vcombine.high %v3954_v52, %v3970_v8  ;;  %v3994_v55 = vcombine.low %v3961_v53, %v3977_v39 }
 0xd6b   : > { %v3995_v42 = vcombine.high %v3961_v53, %v3977_v39  ;;  %v4031_v13 = vcombine.high %v3929_v31, %v3937_v56 }
 0xd6c   : > { %v3986_v62 = vrot.slane %v3978_v60, %v7659_v51  ;;  %v3993_v59 = vrot.slane %v3979_v61, %v7659_v51  ;;  %v4038_v63 = vrot.slane %v4030_v57, %v7653_v43  ;;  %v4002_v6 = vrot.slane %v3994_v55, %v7659_v51 }
 0xd6d   : > { %v4009_v14 = vrot.slane %v3995_v42, %v7659_v51  ;;  %v4045_v22 = vrot.slane %v4031_v13, %v7653_v43 }
 0xd6e   : > { %v4084_v2 = vpack.c.bf16 %v3993_v59, %v3993_v59  ;;  %v4082_v4 = vpack.c.bf16 %v3986_v62, %v3986_v62  ;;  %v4011_v7 = vcombine.high %v3993_v59, %v7480_v1  ;;  %v4046_v58 = vcombine.low %v4022_v48, %v4038_v63 }
 0xd6f   : > { %v4086_v10 = vpack.c.bf16 %v4002_v6, %v4002_v6  ;;  %v4012_v0 = vcombine.high %v4002_v6, %v7480_v1  ;;  %v4047_v25 = vcombine.high %v4022_v48, %v4038_v63  ;;  %v4088_v3 = vpack.c.bf16 %v4009_v14, %v4009_v14 }
 0xd70   : > { %4414 = vxpose.xlu0.c.b16.start.end [1/1] (short) (narrow) %v4084_v2, 16  ;;  %4382 = vxpose.xlu1.c.b16.start.end [1/1] (short) (narrow) %v4082_v4, 16  ;;  %v4085_v19 = vpack.c.bf16 %v4011_v7, %v4011_v7  ;;  %v4013_v26 = vcombine.high %v4009_v14, %v7480_v1  ;;  %v4010_v45 = vcombine.high %v3986_v62, %v7480_v1 }
 0xd71   : > { %v4087_v46 = vpack.c.bf16 %v4012_v0, %v4012_v0  ;;  %v4054_v21 = vrot.slane %v4046_v58, %v7659_v51  ;;  %v4062_v9 = vcombine.low %v4029_v24, %v4045_v22  ;;  %v4061_v16 = vrot.slane %v4047_v25, %v7659_v51 }
 0xd72   : > { %v4089_v15 = vpack.c.bf16 %v4013_v26, %v4013_v26  ;;  %v4083_v54 = vpack.c.bf16 %v4010_v45, %v4010_v45  ;;  %v4063_v20 = vcombine.high %v4029_v24, %v4045_v22 }
 0xd73   : > { %v4078_v5 = vcombine.high %v4054_v21, %v7480_v1  ;;  %v4090_v32 = vpack.c.bf16 %v4054_v21, %v4054_v21  ;;  %v4079_v33 = vcombine.high %v4061_v16, %v7480_v1  ;;  %v4070_v34 = vrot.slane %v4062_v9, %v7659_v51 }
 0xd74   : > { %4446 = vxpose.xlu0.c.b16.start.end [1/1] (short) (narrow) %v4086_v10, 16  ;;  %4430 = vxpose.xlu1.c.b16.start.end [1/1] (short) (narrow) %v4085_v19, 16  ;;  %v4092_v37 = vpack.c.bf16 %v4061_v16, %v4061_v16  ;;  %v4077_v40 = vrot.slane %v4063_v20, %v7659_v51 }
 0xd75   : > { %v4091_v31 = vpack.c.bf16 %v4078_v5, %v4078_v5  ;;  %v4093_v35 = vpack.c.bf16 %v4079_v33, %v4079_v33  ;;  %v4080_v38 = vcombine.high %v4070_v34, %v7480_v1  ;;  %v4094_v53 = vpack.c.bf16 %v4070_v34, %v4070_v34 }
 0xd76   : > { %v4081_v8 = vcombine.high %v4077_v40, %v7480_v1  ;;  %v4096_v56 = vpack.c.bf16 %v4077_v40, %v4077_v40 }
 0xd77   : > { %v4095_v52 = vpack.c.bf16 %v4080_v38, %v4080_v38 }
 0xd78   : > { %4478 = vxpose.xlu0.c.b16.start.end [1/1] (short) (narrow) %v4088_v3, 16  ;;  %4462 = vxpose.xlu1.c.b16.start.end [1/1] (short) (narrow) %v4087_v46, 16  ;;  %v4097_v39 = vpack.c.bf16 %v4081_v8, %v4081_v8 }
 0xd7c   : > { %4494 = vxpose.xlu1.c.b16.start.end [1/1] (short) (narrow) %v4089_v15, 16  ;;  %4398 = vxpose.xlu0.c.b16.start.end [1/1] (short) (narrow) %v4083_v54, 16 }
 0xd80   : > { %4526 = vxpose.xlu1.c.b16.start.end [1/1] (short) (narrow) %v4091_v31, 16  ;;  %4510 = vxpose.xlu0.c.b16.start.end [1/1] (short) (narrow) %v4090_v32, 16 }
 0xd84   : > { %4558 = vxpose.xlu1.c.b16.start.end [1/1] (short) (narrow) %v4093_v35, 16  ;;  %4542 = vxpose.xlu0.c.b16.start.end [1/1] (short) (narrow) %v4092_v37, 16 }
 0xd88   : > { %4590 = vxpose.xlu1.c.b16.start.end [1/1] (short) (narrow) %v4095_v52, 16  ;;  %4574 = vxpose.xlu0.c.b16.start.end [1/1] (short) (narrow) %v4094_v53, 16 }
 0xd8c   : > { %4622 = vxpose.xlu1.c.b16.start.end [1/1] (short) (narrow) %v4097_v39, 16  ;;  %4606 = vxpose.xlu0.c.b16.start.end [1/1] (short) (narrow) %v4096_v56, 16 }
 0xdd2   : > { %v4422_v57 = vpop.trf.xlu0  ;;  %v4390_v60 = vpop.trf.xlu1 }
 0xdd6   : > { %v4454_v61 = vpop.trf.xlu0  ;;  %v4438_v55 = vpop.trf.xlu1 }
 0xdd7   : > { %v4638_v14 = vcombine.low %v4390_v60, %v4454_v61 }
 0xdd9   : > { %v4645_v3 = vrot.slane %v4638_v14, %v7653_v43 }
 0xdda   : > { %v4486_v41 = vpop.trf.xlu0  ;;  %v4470_v62 = vpop.trf.xlu1 }
 0xddb   : > { %v4646_v7 = vcombine.low %v4422_v57, %v4486_v41 }
 0xddd   : > { %v4653_v19 = vrot.slane %v4646_v7, %v7653_v43 }
 0xdde   : > { %v4502_v59 = vpop.trf.xlu1  ;;  %v4406_v42 = vpop.trf.xlu0 }
 0xddf   : > { %v4714_v48 = vcombine.low %v4438_v55, %v4502_v59  ;;  %v4706_v13 = vcombine.low %v4406_v42, %v4470_v62  ;;  %v4670_v24 = vcombine.low %v4645_v3, %v4653_v19  ;;  %v4671_v34 = vcombine.high %v4645_v3, %v4653_v19 }
 0xde1   : > { %v4721_v0 = vrot.slane %v4714_v48, %v7653_v43  ;;  %v4713_v47 = vrot.slane %v4706_v13, %v7653_v43  ;;  %v4678_v35 = vrot.slane %v4670_v24, %v7659_v51  ;;  %v4685_v61 = vrot.slane %v4671_v34, %v7659_v51 }
 0xde2   : > { %v4534_v63 = vpop.trf.xlu1  ;;  %v4518_v2 = vpop.trf.xlu0  ;;  %v3787_v24 = vcombine.high %v8156_v27, %v8168_v29 }
 0xde3   : > { %v4738_v9 = vcombine.low %v4713_v47, %v4721_v0  ;;  %v4739_v37 = vcombine.high %v4713_v47, %v4721_v0 }
 0xde5   : > { %v4746_v38 = vrot.slane %v4738_v9, %v7659_v51  ;;  %v4753_v55 = vrot.slane %v4739_v37, %v7659_v51  ;;  %v3838_v9 = vcombine.low %v8136_v28, %v8166_v11 }
 0xde6   : > { %v4566_v4 = vpop.trf.xlu1  ;;  %v4550_v6 = vpop.trf.xlu0 }
 0xdea   : > { %v4598_v58 = vpop.trf.xlu1  ;;  %v4582_v10 = vpop.trf.xlu0 }
 0xdeb   : > { %v4722_v22 = vcombine.low %v4534_v63, %v4598_v58  ;;  %v4654_v25 = vcombine.low %v4518_v2, %v4582_v10 }
 0xded   : > { %v4729_v15 = vrot.slane %v4722_v22, %v7653_v43  ;;  %v4661_v54 = vrot.slane %v4654_v25, %v7653_v43 }
 0xdee   : > { %v4630_v46 = vpop.trf.xlu1  ;;  %v4614_v26 = vpop.trf.xlu0 }
 0xdef   : > { %v4730_v45 = vcombine.low %v4566_v4, %v4630_v46  ;;  %v4662_v21 = vcombine.low %v4550_v6, %v4614_v26  ;;  %v6992_v46 = vld [vmem:[%s8635_s8 + $0x4] ss:$0 sm:$0xff] }
 0xdf0   : > { %v8222_v26 = vadd.f32 %v6992_v46, %v8148_v18  ;;  %v3854_v18 = vcombine.low %v8160_v30, %v8174_v12 }
 0xdf1   : > { %v4737_v5 = vrot.slane %v4730_v45, %v7653_v43  ;;  %v4669_v16 = vrot.slane %v4662_v21, %v7653_v43  ;;  %v8227_v45 = vadd.f32 %v6992_v46, %v8142_v50  ;;  %v3855_v50 = vcombine.high %v8160_v30, %v8174_v12 }
 0xdf2   : > { %v3786_v21 = vcombine.low %v8156_v27, %v8168_v29  ;;  %v3862_v30 = vrot.slane %v3854_v18, %v7653_v43  ;;  %v3801_v27 = vrot.slane %v3787_v24, %v7653_v43  ;;  %v3846_v29 = vrot.slane %v3838_v9, %v7653_v43 }
 0xdf3   : > { %v4754_v20 = vcombine.low %v4729_v15, %v4737_v5  ;;  %v4755_v31 = vcombine.high %v4729_v15, %v4737_v5  ;;  %v4686_v32 = vcombine.low %v4661_v54, %v4669_v16  ;;  %v4687_v33 = vcombine.high %v4661_v54, %v4669_v16 }
 0xdf4   : > { %v3839_v15 = vcombine.high %v8136_v28, %v8166_v11  ;;  %v3770_v54 = vcombine.low %v8130_v49, %v8154_v23  ;;  %v3771_v5 = vcombine.high %v8130_v49, %v8154_v23  ;;  %v3869_v12 = vrot.slane %v3855_v50, %v7653_v43 }
 0xdf5   : > { %v4762_v40 = vrot.slane %v4754_v20, %v7659_v51  ;;  %v4694_v52 = vrot.slane %v4686_v32, %v7659_v51  ;;  %v4769_v53 = vrot.slane %v4755_v31, %v7659_v51  ;;  %v4701_v8 = vrot.slane %v4687_v33, %v7659_v51 }
 0xdf6   : > { %v3794_v16 = vrot.slane %v3786_v21, %v7653_v43  ;;  %v3853_v20 = vrot.slane %v3839_v15, %v7653_v43  ;;  %v3778_v28 = vrot.slane %v3770_v54, %v7653_v43  ;;  %v3785_v11 = vrot.slane %v3771_v5, %v7653_v43 }
 0xdf7   : > { %v4702_v39 = vcombine.low %v4678_v35, %v4694_v52  ;;  %v4770_v56 = vcombine.low %v4746_v38, %v4762_v40  ;;  %v4703_v57 = vcombine.high %v4678_v35, %v4694_v52  ;;  %v4771_v60 = vcombine.high %v4746_v38, %v4762_v40 }
 0xdf8   : > { %v4704_v42 = vcombine.low %v4685_v61, %v4701_v8  ;;  %v4772_v6 = vcombine.low %v4753_v55, %v4769_v53  ;;  %v4705_v48 = vcombine.high %v4685_v61, %v4701_v8  ;;  %v4773_v10 = vcombine.high %v4753_v55, %v4769_v53 }
 0xdf9   : > { %v4776_v41 = vpack.i.b16 %v4770_v56, %v4702_v39  ;;  %v4778_v62 = vshrl.u32 %v4702_v39, 16  ;;  %v4779_v59 = vshrl.u32 %v4770_v56, 16  ;;  %v4786_v2 = vshrl.u32 %v4703_v57, 16 }
 0xdfa   : > { %v4787_v4 = vshrl.u32 %v4771_v60, 16  ;;  %v4784_v7 = vpack.i.b16 %v4771_v60, %v4703_v57  ;;  %v4794_v14 = vshrl.u32 %v4704_v42, 16  ;;  %v4795_v58 = vshrl.u32 %v4772_v6, 16 }
 0xdfb   : > { %4806 = vxpose.xlu0.c.b16.start.end [1/1] (short) (narrow) %v4776_v41, 16  ;;  %v4780_v63 = vpack.i.b16 %v4779_v59, %v4778_v62  ;;  %v4792_v19 = vpack.i.b16 %v4772_v6, %v4704_v42  ;;  %v4802_v47 = vshrl.u32 %v4705_v48, 16  ;;  %v4803_v22 = vshrl.u32 %v4773_v10, 16 }
 0xdfc   : > { %v4788_v13 = vpack.i.b16 %v4787_v4, %v4786_v2  ;;  %v4796_v0 = vpack.i.b16 %v4795_v58, %v4794_v14  ;;  %v4800_v25 = vpack.i.b16 %v4773_v10, %v4705_v48  ;;  %v3870_v31 = vcombine.low %v3846_v29, %v3862_v30 }
 0xdfd   : > { %4822 = vxpose.xlu1.c.b16.start.end [1/1] (short) (narrow) %v4780_v63, 16  ;;  %v4804_v3 = vpack.i.b16 %v4803_v22, %v4802_v47  ;;  %v3871_v32 = vcombine.high %v3846_v29, %v3862_v30  ;;  %v3886_v33 = vcombine.low %v3853_v20, %v3869_v12  ;;  %v3887_v49 = vcombine.high %v3853_v20, %v3869_v12 }
 0xdfe   : > { %v3802_v23 = vcombine.low %v3778_v28, %v3794_v16  ;;  %v3803_v34 = vcombine.high %v3778_v28, %v3794_v16  ;;  %v3818_v35 = vcombine.low %v3785_v11, %v3801_v27  ;;  %v3819_v37 = vcombine.high %v3785_v11, %v3801_v27 }
 0xdff   : > { %4838 = vxpose.xlu0.c.b16.start.end [1/1] (short) (narrow) %v4784_v7, 16  ;;  %v3878_v38 = vrot.slane %v3870_v31, %v7659_v51  ;;  %v3885_v40 = vrot.slane %v3871_v32, %v7659_v51  ;;  %v3894_v52 = vrot.slane %v3886_v33, %v7659_v51  ;;  %v3901_v53 = vrot.slane %v3887_v49, %v7659_v51 }
 0xe00   : > { %v3810_v8 = vrot.slane %v3802_v23, %v7659_v51  ;;  %v3817_v39 = vrot.slane %v3803_v34, %v7659_v51  ;;  %v3826_v56 = vrot.slane %v3818_v35, %v7659_v51  ;;  %v3833_v57 = vrot.slane %v3819_v37, %v7659_v51 }
 0xe01   : > { %4854 = vxpose.xlu1.c.b16.start.end [1/1] (short) (narrow) %v4788_v13, 16  ;;  %v3902_v60 = vcombine.high %v3878_v38, %v7480_v1  ;;  %v3903_v61 = vcombine.high %v3885_v40, %v7480_v1  ;;  %v3904_v55 = vcombine.high %v3894_v52, %v7480_v1  ;;  %v3905_v41 = vcombine.high %v3901_v53, %v7480_v1 }
 0xe02   : > { %v3834_v62 = vcombine.high %v3810_v8, %v7480_v1  ;;  %v3835_v59 = vcombine.high %v3817_v39, %v7480_v1  ;;  %v3836_v42 = vcombine.high %v3826_v56, %v7480_v1  ;;  %v3837_v63 = vcombine.high %v3833_v57, %v7480_v1 }
 0xe03   : > { %4870 = vxpose.xlu0.c.b16.start.end [1/1] (short) (narrow) %v4792_v19, 16  ;;  %v7002_v6 = vpack.c.bf16 %v3904_v55, %v3902_v60  ;;  %v7003_v7 = vpack.c.bf16 %v3905_v41, %v3903_v61  ;;  %v6998_v58 = vpack.c.bf16 %v3894_v52, %v3878_v38  ;;  %v6999_v10 = vpack.c.bf16 %v3901_v53, %v3885_v40 }
 0xe04   : > { %v7000_v48 = vpack.c.bf16 %v3836_v42, %v3834_v62  ;;  %v7001_v13 = vpack.c.bf16 %v3837_v63, %v3835_v59  ;;  %v6996_v19 = vpack.c.bf16 %v3826_v56, %v3810_v8 }
 0xe05   : > { %4886 = vxpose.xlu1.c.b16.start.end [1/1] (short) (narrow) %v4796_v0, 16  ;;  %v6997_v0 = vpack.c.bf16 %v3833_v57, %v3817_v39  ;;  %v4343_v22 = vrot.slane %v7002_v6, %v7653_v43  ;;  %v4293_v50 = vrot.slane %v6998_v58, %v7653_v43  ;;  %v4301_v21 = vrot.slane %v6999_v10, %v7653_v43 }
 0xe06   : > { %v4335_v46 = vrot.slane %v7001_v13, %v7653_v43  ;;  %v4277_v24 = vrot.slane %v6996_v19, %v7653_v43 }
 0xe07   : > { %4902 = vxpose.xlu0.c.b16.start.end [1/1] (short) (narrow) %v4800_v25, 16  ;;  %v4351_v25 = vrot.slane %v7003_v7, %v7653_v43  ;;  %v4285_v9 = vrot.slane %v6997_v0, %v7653_v43  ;;  %v4310_v29 = vcombine.low %v4293_v50, %v4301_v21 }
 0xe09   : > { %4918 = vxpose.xlu1.c.b16.start.end [1/1] (short) (narrow) %v4804_v3, 16  ;;  %v4327_v3 = vrot.slane %v7000_v48, %v7653_v43  ;;  %v4360_v12 = vcombine.low %v4343_v22, %v4351_v25  ;;  %v4302_v20 = vcombine.low %v4277_v24, %v4285_v9  ;;  %v4317_v38 = vrot.slane %v4310_v29, %v7659_v51 }
 0xe0b   : > { %v4352_v30 = vcombine.low %v4327_v3, %v4335_v46  ;;  %v4367_v49 = vrot.slane %v4360_v12, %v7659_v51  ;;  %v4309_v37 = vrot.slane %v4302_v20, %v7659_v51 }
 0xe0d   : > { %4102 = vrot.lane.b32.xlu1 %v8222_v26, %s7483_s15  ;;  %v4359_v33 = vrot.slane %v4352_v30, %v7659_v51  ;;  %v4318_v56 = vcombine.low %v4309_v37, %v4317_v38  ;;  %v4319_v19 = vcombine.high %v4309_v37, %v4317_v38 }
 0xe0f   : > { %v4368_v53 = vcombine.low %v4359_v33, %v4367_v49  ;;  %v4373_v7 = vshrl.u32 %v4318_v56, 16  ;;  %v4369_v58 = vcombine.high %v4359_v33, %v4367_v49  ;;  %v4379_v25 = vshrl.u32 %v4319_v19, 16 }
 0xe10   : > { %4100 = vrot.lane.b32.xlu0 %v8227_v45, %s7483_s15 }
 0xe11   : > { %4106 = vrot.lane.b32.xlu1 %v8227_v45, %s7482_s14  ;;  %v4374_v41 = vshrl.u32 %v4368_v53, 16  ;;  %v4372_v6 = vpack.i.b16 %v4368_v53, %v4318_v56  ;;  %v4380_v0 = vshrl.u32 %v4369_v58, 16  ;;  %v4378_v22 = vpack.i.b16 %v4369_v58, %v4319_v19 }
 0xe13   : > { %v4381_v46 = vpack.i.b16 %v4380_v0, %v4379_v25 }
 0xe14   : > { %4108 = vrot.lane.b32.xlu0 %v8222_v26, %s7482_s14 }
 0xe15   : > { %4112 = vrot.lane.b32.xlu1 %v8227_v45, %s7484_s19 }
 0xe18   : > { %4114 = vrot.lane.b32.xlu0 %v8222_v26, %s7484_s19  ;;  %s410_s19 = scalar_lea.vmem %s8638_s11, %s7573_s24 }
 0xe5d   : > { %v4814_v2 = vpop.trf.xlu0 }
 0xe5f   : > { %v4830_v4 = vpop.trf.xlu1 }
 0xe61   : > { %v4846_v14 = vpop.trf.xlu0 }
 0xe63   : > { %v4862_v47 = vpop.trf.xlu1 }
 0xe65   : > { %v4878_v18 = vpop.trf.xlu0 }
 0xe66   : > { %v4934_v54 = vcombine.low %v4814_v2, %v4878_v18 }
 0xe67   : > { %v4894_v15 = vpop.trf.xlu1 }
 0xe68   : > { %v4959_v16 = vcombine.low %v4830_v4, %v4894_v15  ;;  %v4941_v11 = vrot.slane %v4934_v54, %v7653_v43 }
 0xe69   : > { %v4910_v5 = vpop.trf.xlu0 }
 0xe6a   : > { %v4942_v27 = vcombine.low %v4846_v14, %v4910_v5  ;;  %v4966_v23 = vrot.slane %v4959_v16, %v7653_v43  ;;  %v4375_v14 = vpack.i.b16 %v4374_v41, %v4373_v7 }
 0xe6b   : > { %v4926_v28 = vpop.trf.xlu1 }
 0xe6c   : > { %v4949_v31 = vrot.slane %v4942_v27, %v7653_v43  ;;  %v4967_v32 = vcombine.low %v4862_v47, %v4926_v28 }
 0xe6e   : > { %v4950_v34 = vcombine.low %v4941_v11, %v4949_v31  ;;  %v4974_v35 = vrot.slane %v4967_v32, %v7653_v43 }
 0xe70   : > { %v4957_v40 = vrot.slane %v4950_v34, %v7659_v51  ;;  %v4975_v52 = vcombine.low %v4966_v23, %v4974_v35 }
 0xe72   : > { %v4982_v8 = vrot.slane %v4975_v52, %v7659_v51  ;;  %v4958_v39 = vcombine.high %v4957_v40, %v7488_v36  ;;  %v4987_v60 = vshrl.u32 %v4957_v40, 16 }
 0xe74   : > { %v4986_v57 = vpack.i.b16 %v4982_v8, %v4957_v40  ;;  %v4988_v61 = vshrl.u32 %v4982_v8, 16  ;;  %v4983_v55 = vcombine.high %v4982_v8, %v7488_v36  ;;  %v4993_v62 = vshrl.u32 %v4958_v39, 16 }
 0xe76   : > { %v5000_v59 = vsel %vm1802_vm2, %v4986_v57, 0  ;;  %v4989_v42 = vpack.i.b16 %v4988_v61, %v4987_v60  ;;  %v4992_v63 = vpack.i.b16 %v4983_v55, %v4958_v39  ;;  %v4994_v2 = vshrl.u32 %v4983_v55, 16 }
 0xe77   : > { %7235 = vmatpush3.bf16.msra.mxu0 %v5000_v59 }
 0xe78   : > { %v5047_v4 = vsel %vm1802_vm2, %v4989_v42, 0  ;;  %7246 = vmatprep.subr.bf16.mxu0 %v7480_v1  ;;  %v4995_v48 = vpack.i.b16 %v4994_v2, %v4993_v62  ;;  %v5094_v13 = vsel %vm1802_vm2, %v4992_v63, 0 }
 0xe79   : > { %7241 = vmatpush3.bf16.msra.mxu1 %v5047_v4 }
 0xe7a   : > { %7237 = vmatmul.mubr.msk.bf16.vlgmr.msra.gmra.mxu0 %vm1798_vm3, %v4372_v6  ;;  %7252 = vmatprep.subr.bf16.mxu1 %v7480_v1  ;;  %v5141_v10 = vsel %vm1802_vm2, %v4995_v48, 0 }
 0xe7b   : > { %7247 = vmatpush3.bf16.msra.mxu0 %v5094_v13  ;;  %7248 = vmatprep.mubr.msk.bf16.mxu0 %vm7481_vm0, %v7480_v1 }
 0xe7c   : > { %7243 = vmatmul.mubr.msk.bf16.vlgmr.msra.gmra.mxu1 %vm1798_vm3, %v4375_v14  ;;  %7258 = vmatprep.subr.bf16.mxu0 %v7480_v1 }
 0xe7d   : > { %7253 = vmatpush3.bf16.msra.mxu1 %v5141_v10  ;;  %7254 = vmatprep.mubr.msk.bf16.mxu1 %vm7481_vm0, %v7480_v1 }
 0xe7e   : > { %7264 = vmatprep.subr.bf16.mxu1 %v7480_v1 }
 0xe7f   : > { %v4103_v47 = vpop.permute.xlu1 %4102 }
 0xe82   : > { %7249 = vmatmul.mubr.msk.bf16.vlgmr.msra.gmra.mxu0 %vm1798_vm3, %v4378_v22  ;;  %v4101_v3 = vpop.permute.xlu0 %4100 }
 0xe83   : > { %v4107_v18 = vpop.permute.xlu1 %4106  ;;  %7260 = vmatprep.mubr.msk.bf16.mxu0 %vm7481_vm0, %v7480_v1 }
 0xe84   : > { %7255 = vmatmul.mubr.msk.bf16.vlgmr.msra.gmra.mxu1 %vm1798_vm3, %v4381_v46  ;;  %v4118_v50 = vcombine.low %v8227_v45, %v4107_v18  ;;  %v4119_v21 = vcombine.high %v8227_v45, %v4107_v18 }
 0xe85   : > { %7266 = vmatprep.mubr.msk.bf16.mxu1 %vm7481_vm0, %v7480_v1 }
 0xe86   : > { %v4109_v24 = vpop.permute.xlu0 %4108  ;;  %v4126_v30 = vrot.slane %v4118_v50, %v7653_v43  ;;  %v4133_v12 = vrot.slane %v4119_v21, %v7653_v43 }
 0xe87   : > { %v4113_v9 = vpop.permute.xlu1 %4112  ;;  %v4187_v5 = vcombine.high %v8222_v26, %v4109_v24  ;;  %v4186_v49 = vcombine.low %v8222_v26, %v4109_v24 }
 0xe88   : > { %v4134_v15 = vcombine.low %v4101_v3, %v4113_v9  ;;  %v4135_v54 = vcombine.high %v4101_v3, %v4113_v9 }
 0xe89   : > { %v8327_v32 = vrot.slane %v4187_v5, %v7653_v43  ;;  %v4194_v39 = vrot.slane %v4186_v49, %v7653_v43 }
 0xe8a   : > { %v4142_v16 = vrot.slane %v4134_v15, %v7653_v43  ;;  %v4149_v27 = vrot.slane %v4135_v54, %v7653_v43  ;;  %v4115_v29 = vpop.permute.xlu0 %4114 }
 0xe8b   : > { %v4202_v20 = vcombine.low %v4103_v47, %v4115_v29  ;;  %v4203_v28 = vcombine.high %v4103_v47, %v4115_v29 }
 0xe8c   : > { %v4150_v11 = vcombine.low %v4126_v30, %v4142_v16  ;;  %v4151_v31 = vcombine.high %v4126_v30, %v4142_v16  ;;  %v4166_v45 = vcombine.low %v4133_v12, %v4149_v27  ;;  %v4167_v35 = vcombine.high %v4133_v12, %v4149_v27 }
 0xe8d   : > { %v8330_v33 = vrot.slane %v4203_v28, %v7653_v43  ;;  %v4210_v37 = vrot.slane %v4202_v20, %v7653_v43 }
 0xe8e   : > { %v4158_v23 = vrot.slane %v4150_v11, %v7659_v51  ;;  %v4165_v34 = vrot.slane %v4151_v31, %v7659_v51  ;;  %v4174_v26 = vrot.slane %v4166_v45, %v7659_v51  ;;  %v4181_v55 = vrot.slane %v4167_v35, %v7659_v51 }
 0xe8f   : > { %v4234_v38 = vcombine.low %v8327_v32, %v8330_v33  ;;  %v4235_v40 = vcombine.high %v8327_v32, %v8330_v33  ;;  %v4218_v57 = vcombine.low %v4194_v39, %v4210_v37  ;;  %v4219_v62 = vcombine.high %v4194_v39, %v4210_v37 }
 0xe90   : > { %v4254_v52 = vpack.c.bf16 %v4158_v23, %v4158_v23  ;;  %v4182_v53 = vcombine.high %v4158_v23, %v7480_v1  ;;  %v4183_v8 = vcombine.high %v4165_v34, %v7480_v1  ;;  %v4184_v61 = vcombine.high %v4174_v26, %v7480_v1 }
 0xe91   : > { %v4256_v41 = vpack.c.bf16 %v4165_v34, %v4165_v34  ;;  %v4185_v42 = vcombine.high %v4181_v55, %v7480_v1  ;;  %v4226_v63 = vrot.slane %v4218_v57, %v7659_v51  ;;  %v4258_v2 = vpack.c.bf16 %v4174_v26, %v4174_v26 }
 0xe92   : > { %5276 = vxpose.xlu1.c.b16.start.end [1/1] (short) (narrow) %v4254_v52, 16  ;;  %v4255_v56 = vpack.c.bf16 %v4182_v53, %v4182_v53  ;;  %v4257_v60 = vpack.c.bf16 %v4183_v8, %v4183_v8  ;;  %v4259_v59 = vpack.c.bf16 %v4184_v61, %v4184_v61  ;;  %v4233_v7 = vrot.slane %v4219_v62, %v7659_v51 }
 0xe93   : > { %v4261_v4 = vpack.c.bf16 %v4185_v42, %v4185_v42  ;;  %v4250_v6 = vcombine.high %v4226_v63, %v7480_v1  ;;  %v4260_v48 = vpack.c.bf16 %v4181_v55, %v4181_v55  ;;  %v4262_v58 = vpack.c.bf16 %v4226_v63, %v4226_v63 }
 0xe94   : > { %5292 = vxpose.xlu0.c.b16.start.end [1/1] (short) (narrow) %v4255_v56, 16  ;;  %v4251_v14 = vcombine.high %v4233_v7, %v7480_v1  ;;  %v4264_v19 = vpack.c.bf16 %v4233_v7, %v4233_v7  ;;  %v4242_v49 = vrot.slane %v4234_v38, %v7659_v51  ;;  %v4249_v34 = vrot.slane %v4235_v40, %v7659_v51 }
 0xe95   : > { %v4263_v13 = vpack.c.bf16 %v4250_v6, %v4250_v6 }
 0xe96   : > { %5324 = vxpose.xlu1.c.b16.start.end [1/1] (short) (narrow) %v4257_v60, 16  ;;  %v4265_v10 = vpack.c.bf16 %v4251_v14, %v4251_v14  ;;  %v4266_v23 = vpack.c.bf16 %v4242_v49, %v4242_v49  ;;  %v4252_v35 = vcombine.high %v4242_v49, %v7480_v1  ;;  %v4268_v37 = vpack.c.bf16 %v4249_v34, %v4249_v34 }
 0xe97   : > { %v4253_v53 = vcombine.high %v4249_v34, %v7480_v1 }
 0xe98   : > { %5308 = vxpose.xlu0.c.b16.start.end [1/1] (short) (narrow) %v4256_v41, 16  ;;  %v4267_v52 = vpack.c.bf16 %v4252_v35, %v4252_v35 }
 0xe99   : > { %v4269_v8 = vpack.c.bf16 %v4253_v53, %v4253_v53 }
 0xe9a   : > { %5356 = vxpose.xlu1.c.b16.start.end [1/1] (short) (narrow) %v4259_v59, 16 }
 0xe9c   : > { %5340 = vxpose.xlu0.c.b16.start.end [1/1] (short) (narrow) %v4258_v2, 16 }
 0xe9e   : > { %5388 = vxpose.xlu1.c.b16.start.end [1/1] (short) (narrow) %v4261_v4, 16 }
 0xea0   : > { %5372 = vxpose.xlu0.c.b16.start.end [1/1] (short) (narrow) %v4260_v48, 16 }
 0xea2   : > { %5420 = vxpose.xlu1.c.b16.start.end [1/1] (short) (narrow) %v4263_v13, 16 }
 0xea4   : > { %5404 = vxpose.xlu0.c.b16.start.end [1/1] (short) (narrow) %v4262_v58, 16 }
 0xea6   : > { %5452 = vxpose.xlu1.c.b16.start.end [1/1] (short) (narrow) %v4265_v10, 16 }
 0xea8   : > { %5436 = vxpose.xlu0.c.b16.start.end [1/1] (short) (narrow) %v4264_v19, 16 }
 0xef4   : > { %v5284_v39 = vpop.trf.xlu1 }
 0xef6   : > { %v5300_v26 = vpop.trf.xlu0 }
 0xef8   : > { %v5332_v56 = vpop.trf.xlu1 }
 0xefa   : > { %v5316_v38 = vpop.trf.xlu0 }
 0xefc   : > { %v5364_v60 = vpop.trf.xlu1 }
 0xefd   : > { %v5600_v58 = vcombine.low %v5300_v26, %v5364_v60 }
 0xefe   : > { %v5348_v57 = vpop.trf.xlu0 }
 0xeff   : > { %v5532_v7 = vcombine.low %v5284_v39, %v5348_v57 }
 0xf00   : > { %v5396_v32 = vpop.trf.xlu1 }
 0xf01   : > { %v5539_v10 = vrot.slane %v5532_v7, %v7653_v43  ;;  %v5608_v19 = vcombine.low %v5332_v56, %v5396_v32 }
 0xf02   : > { %v5380_v61 = vpop.trf.xlu0 }
 0xf03   : > { %v5540_v48 = vcombine.low %v5316_v38, %v5380_v61 }
 0xf04   : > { %v5428_v40 = vpop.trf.xlu1 }
 0xf06   : > { %v5412_v33 = vpop.trf.xlu0 }
 0xf08   : > { %v5460_v41 = vpop.trf.xlu1 }
 0xf0a   : > { %v5444_v55 = vpop.trf.xlu0 }
 0xf3a   : > { %v8351_v0 = vpop.f32.mrf.mxu0 }
 0xf3b   : > { %v5184_v47 = vsel %vm1988_vm4, %v8351_v0, -inf }
 0xf3c   : > { %v7238_v22 = vpop.f32.mrf.mxu0  ;;  %5185 = vmax.xlane.f32.xlu0 %v5184_v47  ;;  %v8355_v25 = vpop.f32.mrf.mxu1  ;;  %v5547_v47 = vrot.slane %v5540_v48, %v7653_v43 }
 0xf3d   : > { %v5190_v50 = vsel %vm1988_vm4, %v8355_v25, -inf }
 0xf3e   : > { %v8357_v3 = vpop.f32.mrf.mxu0  ;;  %v7244_v46 = vpop.f32.mrf.mxu1 }
 0xf3f   : > { %v5187_v18 = vsel %vm1988_vm4, %v8357_v3, -inf }
 0xf40   : > { %v7239_v21 = vpop.f32.mrf.mxu0  ;;  %5188 = vmax.xlane.f32.xlu1 %v5187_v18  ;;  %5191 = vmax.xlane.f32.xlu0 %v5190_v50  ;;  %v8363_v24 = vpop.f32.mrf.mxu1 }
 0xf41   : > { %v5193_v5 = vsel %vm1988_vm4, %v8363_v24, -inf  ;;  %v5607_v21 = vrot.slane %v5600_v58, %v7653_v43 }
 0xf42   : > { %v7245_v9 = vpop.f32.mrf.mxu1  ;;  %v8365_v15 = vpop.f32.mrf.mxu0 }
 0xf43   : > { %v5196_v54 = vsel %vm1988_vm4, %v8365_v15, -inf  ;;  %v5615_v9 = vrot.slane %v5608_v19, %v7653_v43 }
 0xf44   : > { %v7250_v30 = vpop.f32.mrf.mxu0  ;;  %5197 = vmax.xlane.f32.xlu0 %v5196_v54  ;;  %5194 = vmax.xlane.f32.xlu1 %v5193_v5  ;;  %v8371_v12 = vpop.f32.mrf.mxu1  ;;  %v5565_v54 = vcombine.high %v5539_v10, %v5547_v47 }
 0xf45   : > { %v5202_v20 = vsel %vm1988_vm4, %v8371_v12, -inf  ;;  %v5632_v49 = vcombine.low %v5607_v21, %v5615_v9 }
 0xf46   : > { %v8373_v16 = vpop.f32.mrf.mxu0  ;;  %v7256_v27 = vpop.f32.mrf.mxu1  ;;  %v5579_v34 = vrot.slane %v5565_v54, %v7659_v51 }
 0xf47   : > { %v5199_v29 = vsel %vm1988_vm4, %v8373_v16, -inf  ;;  %v5640_v56 = vrot.slane %v5632_v49, %v7659_v51 }
 0xf48   : > { %v7251_v28 = vpop.f32.mrf.mxu0  ;;  %5200 = vmax.xlane.f32.xlu1 %v5199_v29  ;;  %5203 = vmax.xlane.f32.xlu0 %v5202_v20  ;;  %v8379_v11 = vpop.f32.mrf.mxu1  ;;  %v5564_v20 = vcombine.low %v5539_v10, %v5547_v47 }
 0xf49   : > { %v5205_v45 = vsel %vm1988_vm4, %v8379_v11, -inf }
 0xf4a   : > { %v7257_v31 = vpop.f32.mrf.mxu1 }
 0xf4c   : > { %5206 = vmax.xlane.f32.xlu1 %v5205_v45 }
 0xf75   : > { %5468 = vxpose.xlu0.c.b16.start.end [1/1] (short) (narrow) %v4266_v23, 16  ;;  %v5633_v23 = vcombine.high %v5607_v21, %v5615_v9 }
 0xf77   : > { %v5647_v57 = vrot.slane %v5633_v23, %v7659_v51 }
 0xf79   : > { %5500 = vxpose.xlu0.c.b16.start.end [1/1] (short) (narrow) %v4268_v37, 16  ;;  %5484 = vxpose.xlu1.c.b16.start.end [1/1] (short) (narrow) %v4267_v52, 16 }
 0xf7d   : > { %5516 = vxpose.xlu1.c.b16.start.end [1/1] (short) (narrow) %v4269_v8, 16  ;;  %v5572_v8 = vrot.slane %v5564_v20, %v7659_v51 }
 0xfc5   : > { %v5186_v62 = vpop.xlane.xlu0 %5185 }
 0xfc9   : > { %v8393_v59 = vpop.xlane.xlu1 %5188  ;;  %v8395_v42 = vpop.xlane.xlu0 %5191 }
 0xfca   : > { %v5209_v7 = vsub.f32 %v8357_v3, %v8393_v59 }
 0xfcc   : > { %v5218_v3 = vmul.f32 1.442695, %v5209_v7 }
 0xfcd   : > { %v8397_v63 = vpop.xlane.xlu0 %5197  ;;  %v8399_v2 = vpop.xlane.xlu1 %5194 }
 0xfce   : > { %v5211_v21 = vsub.f32 %v8363_v24, %v8399_v2 }
 0xfd1   : > { %v8401_v4 = vpop.xlane.xlu1 %5200  ;;  %v8403_v6 = vpop.xlane.xlu0 %5203 }
 0xfd2   : > { %v5213_v20 = vsub.f32 %v8373_v16, %v8401_v4 }
 0xfd5   : > { %v8405_v13 = vpop.xlane.xlu1 %5206 }
 0xfd7   : > { %v5476_v14 = vpop.trf.xlu0 }
 0xfd8   : > { %v5548_v22 = vcombine.low %v5412_v33, %v5476_v14  ;;  %v5208_v33 = vsub.f32 %v8351_v0, %v5186_v62  ;;  %v5210_v0 = vsub.f32 %v8355_v25, %v8395_v42 }
 0xfda   : > { %v5555_v5 = vrot.slane %v5548_v22, %v7653_v43  ;;  %v5216_v19 = vmul.f32 1.442695, %v5208_v33 }
 0xfdb   : > { %v5508_v46 = vpop.trf.xlu0  ;;  %v5492_v18 = vpop.trf.xlu1 }
 0xfdc   : > { %v5556_v50 = vcombine.low %v5444_v55, %v5508_v46  ;;  %v5616_v27 = vcombine.low %v5428_v40, %v5492_v18  ;;  %7424 = vpow2.f32 %v5216_v19 }
 0xfdd   : > { %7426 = vpow2.f32 %v5218_v3 }
 0xfde   : > { %v5563_v30 = vrot.slane %v5556_v50, %v7653_v43  ;;  %v5623_v52 = vrot.slane %v5616_v27, %v7653_v43  ;;  %v5212_v27 = vsub.f32 %v8365_v15, %v8397_v63  ;;  %v5226_v15 = vmul.f32 1.442695, %v5213_v20 }
 0xfdf   : > { %v5524_v29 = vpop.trf.xlu1  ;;  %v5215_v63 = vsub.f32 %v8379_v11, %v8405_v13 }
 0xfe0   : > { %v5580_v28 = vcombine.low %v5555_v5, %v5563_v30  ;;  %v5581_v31 = vcombine.high %v5555_v5, %v5563_v30  ;;  %v5624_v45 = vcombine.low %v5460_v41, %v5524_v29  ;;  %v5220_v30 = vmul.f32 1.442695, %v5210_v0 }
 0xfe1   : > { %v5222_v29 = vmul.f32 1.442695, %v5211_v21  ;;  %v5224_v2 = vmul.f32 1.442695, %v5212_v27  ;;  %v5230_v16 = vmul.f32 1.442695, %v5215_v63 }
 0xfe2   : > { %v5588_v35 = vrot.slane %v5580_v28, %v7659_v51  ;;  %v5595_v37 = vrot.slane %v5581_v31, %v7659_v51  ;;  %v5631_v53 = vrot.slane %v5624_v45, %v7653_v43  ;;  %7428 = vpow2.f32 %v5220_v30 }
 0xfe3   : > { %v5214_v31 = vsub.f32 %v8371_v12, %v8403_v6  ;;  %7430 = vpow2.f32 %v5222_v29 }
 0xfe4   : > { %v8419_v26 = vcombine.high %v5579_v34, %v5595_v37  ;;  %v5648_v39 = vcombine.low %v5623_v52, %v5631_v53  ;;  %v5649_v38 = vcombine.high %v5623_v52, %v5631_v53  ;;  %v5596_v32 = vcombine.low %v5572_v8, %v5588_v35 }
 0xfe5   : > { %v5597_v10 = vcombine.high %v5572_v8, %v5588_v35  ;;  %v5598_v5 = vcombine.low %v5579_v34, %v5595_v37  ;;  %7432 = vpow2.f32 %v5224_v2  ;;  %v5228_v49 = vmul.f32 1.442695, %v5214_v31 }
 0xfe6   : > { %v5656_v60 = vrot.slane %v5648_v39, %v7659_v51  ;;  %v5663_v61 = vrot.slane %v5649_v38, %v7659_v51  ;;  %v5672_v14 = vshrl.u32 %v5596_v32, 16  ;;  %v5696_v22 = vshrl.u32 %v8419_v26, 16 }
 0xfe7   : > { %v5680_v54 = vshrl.u32 %v5597_v10, 16  ;;  %v5688_v24 = vshrl.u32 %v5598_v5, 16  ;;  %7434 = vpow2.f32 %v5226_v15 }
 0xfe8   : > { %v8426_v40 = vcombine.high %v5647_v57, %v5663_v61  ;;  %v5664_v55 = vcombine.low %v5640_v56, %v5656_v60  ;;  %v5665_v41 = vcombine.high %v5640_v56, %v5656_v60  ;;  %v5666_v50 = vcombine.low %v5647_v57, %v5663_v61 }
 0xfe9   : > { %v7425_v4 = vpop.eup %7424  ;;  %7436 = vpow2.f32 %v5228_v49 }
 0xfea   : > { %v5670_v48 = vpack.i.b16 %v5664_v55, %v5596_v32  ;;  %v5673_v58 = vshrl.u32 %v5664_v55, 16  ;;  %v5694_v47 = vpack.i.b16 %v8426_v40, %v8419_v26  ;;  %v5697_v46 = vshrl.u32 %v8426_v40, 16  ;;  %v7427_v23 = vpop.eup %7426 }
 0xfeb   : > { %v5681_v18 = vshrl.u32 %v5665_v41, 16  ;;  %v5678_v9 = vpack.i.b16 %v5665_v41, %v5597_v10  ;;  %v5689_v42 = vshrl.u32 %v5666_v50, 16  ;;  %v5686_v28 = vpack.i.b16 %v5666_v50, %v5598_v5 }
 0xfec   : > { %5700 = vxpose.xlu0.c.b16.start.end [1/1] (short) (narrow) %v5670_v48, 16  ;;  %v5674_v62 = vpack.i.b16 %v5673_v58, %v5672_v14  ;;  %v5698_v59 = vpack.i.b16 %v5697_v46, %v5696_v22  ;;  %7438 = vpow2.f32 %v5230_v16  ;;  %v5232_v34 = vsel %vm1988_vm4, %v7425_v4, 0.0 }
 0xfed   : > { %v5682_v25 = vpack.i.b16 %v5681_v18, %v5680_v54  ;;  %v5690_v45 = vpack.i.b16 %v5689_v42, %v5688_v24  ;;  %v5235_v12 = vsel %vm1988_vm4, %v7427_v23, 0.0 }
 0xfee   : > { %5716 = vxpose.xlu1.c.b16.start.end [1/1] (short) (narrow) %v5674_v62, 16 }
 0xfef   : > { %v7429_v35 = vpop.eup %7428 }
 0xff0   : > { %5732 = vxpose.xlu0.c.b16.start.end [1/1] (short) (narrow) %v5678_v9, 16  ;;  %v7431_v6 = vpop.eup %7430  ;;  %v5238_v37 = vsel %vm1988_vm4, %v7429_v35, 0.0 }
 0xff1   : > { %v5241_v13 = vsel %vm1988_vm4, %v7431_v6, 0.0 }
 0xff2   : > { %5748 = vxpose.xlu1.c.b16.start.end [1/1] (short) (narrow) %v5682_v25, 16  ;;  %v8449_v11 = vpop.eup %7432 }
 0xff3   : > { %v5244_v53 = vsel %vm1988_vm4, %v8449_v11, 0.0 }
 0xff4   : > { %5764 = vxpose.xlu0.c.b16.start.end [1/1] (short) (narrow) %v5686_v28, 16  ;;  %v8452_v52 = vpop.eup %7434 }
 0xff5   : > { %v5247_v39 = vsel %vm1988_vm4, %v8452_v52, 0.0 }
 0xff6   : > { %5780 = vxpose.xlu1.c.b16.start.end [1/1] (short) (narrow) %v5690_v45, 16  ;;  %v8456_v8 = vpop.eup %7436 }
 0xff7   : > { %v5250_v56 = vsel %vm1988_vm4, %v8456_v8, 0.0 }
 0xff9   : > { %v8460_v38 = vpop.eup %7438 }
 0xffa   : > { %v5253_v57 = vsel %vm1988_vm4, %v8460_v38, 0.0 }
0x1001   : > { %5233 = vadd.xlane.f32.xlu0 %v5232_v34 }
0x1003   : > { %5236 = vadd.xlane.f32.xlu1 %v5235_v12 }
0x1005   : > { %5239 = vadd.xlane.f32.xlu0 %v5238_v37 }
0x1007   : > { %5242 = vadd.xlane.f32.xlu1 %v5241_v13 }
0x1009   : > { %5245 = vadd.xlane.f32.xlu0 %v5244_v53 }
0x100b   : > { %5248 = vadd.xlane.f32.xlu1 %v5247_v39 }
0x100d   : > { %5251 = vadd.xlane.f32.xlu0 %v5250_v56 }
0x100f   : > { %5254 = vadd.xlane.f32.xlu1 %v5253_v57 }
0x103a   : > { %5796 = vxpose.xlu0.c.b16.start.end [1/1] (short) (narrow) %v5694_v47, 16 }
0x103c   : > { %5812 = vxpose.xlu1.c.b16.start.end [1/1] (short) (narrow) %v5698_v59, 16 }
0x104e   : > { %v5708_v60 = vpop.trf.xlu0 }
0x1050   : > { %v5724_v61 = vpop.trf.xlu1 }
0x1052   : > { %v5740_v32 = vpop.trf.xlu0 }
0x1054   : > { %v5756_v33 = vpop.trf.xlu1 }
0x1056   : > { %v5772_v55 = vpop.trf.xlu0 }
0x1057   : > { %v5828_v46 = vcombine.low %v5708_v60, %v5772_v55 }
0x1058   : > { %v5788_v41 = vpop.trf.xlu1 }
0x1059   : > { %v5853_v3 = vcombine.low %v5724_v61, %v5788_v41  ;;  %v5835_v54 = vrot.slane %v5828_v46, %v7653_v43 }
0x105b   : > { %v5860_v28 = vrot.slane %v5853_v3, %v7653_v43 }
0x108a   : > { %v5234_v7 = vpop.xlane.xlu0 %5233 }
0x108b   : > { %7440 = vrcp.f32 %v5234_v7 }
0x108c   : > { %v5237_v48 = vpop.xlane.xlu1 %5236 }
0x108d   : > { %7442 = vrcp.f32 %v5237_v48 }
0x108e   : > { %v5240_v14 = vpop.xlane.xlu0 %5239 }
0x108f   : > { %7444 = vrcp.f32 %v5240_v14 }
0x1090   : > { %v5243_v58 = vpop.xlane.xlu1 %5242 }
0x1091   : > { %7446 = vrcp.f32 %v5243_v58 }
0x1092   : > { %v5246_v10 = vpop.xlane.xlu0 %5245 }
0x1093   : > { %7448 = vrcp.f32 %v5246_v10 }
0x1094   : > { %v5249_v19 = vpop.xlane.xlu1 %5248 }
0x1095   : > { %7450 = vrcp.f32 %v5249_v19 }
0x1096   : > { %v5252_v26 = vpop.xlane.xlu0 %5251 }
0x1097   : > { %7452 = vrcp.f32 %v5252_v26 }
0x1098   : > { %v7441_v40 = vpop.eup %7440  ;;  %v5255_v47 = vpop.xlane.xlu1 %5254 }
0x1099   : > { %7454 = vrcp.f32 %v5255_v47  ;;  %v5257_v0 = vmul.f32 %v7441_v40, %v7425_v4 }
0x109a   : > { %v7443_v22 = vpop.eup %7442 }
0x109b   : > { %v5259_v62 = vmul.f32 %v7443_v22, %v7427_v23 }
0x109c   : > { %v7445_v18 = vpop.eup %7444  ;;  %v5804_v50 = vpop.trf.xlu0 }
0x109d   : > { %v5836_v59 = vcombine.low %v5740_v32, %v5804_v50  ;;  %v5272_v21 = vpack.c.bf16 %v5259_v62, %v5257_v0  ;;  %v5261_v30 = vmul.f32 %v7445_v18, %v7429_v35 }
0x109e   : > { %v7447_v9 = vpop.eup %7446  ;;  %v5820_v5 = vpop.trf.xlu1 }
0x109f   : > { %v5843_v27 = vrot.slane %v5836_v59, %v7653_v43  ;;  %v5861_v25 = vcombine.low %v5756_v33, %v5820_v5  ;;  %v5894_v42 = vsel %vm1988_vm4, %v5272_v21, 0  ;;  %v5263_v29 = vmul.f32 %v7447_v9, %v7431_v6 }
0x10a0   : > { %v7449_v20 = vpop.eup %7448  ;;  %7259 = vmatpush3.bf16.xpose.msra.mxu0 %v5894_v42 }
0x10a1   : > { %v5844_v24 = vcombine.low %v5835_v54, %v5843_v27  ;;  %v5868_v2 = vrot.slane %v5861_v25, %v7653_v43  ;;  %v5273_v31 = vpack.c.bf16 %v5263_v29, %v5261_v30  ;;  %7270 = vmatprep.subr.bf16.mxu0 %v7480_v1  ;;  %v5265_v15 = vmul.f32 %v7449_v20, %v8449_v11 }
0x10a2   : > { %v7451_v45 = vpop.eup %7450 }
0x10a3   : > { %v5851_v63 = vrot.slane %v5844_v24, %v7659_v51  ;;  %v5869_v49 = vcombine.low %v5860_v28, %v5868_v2  ;;  %v5940_v16 = vsel %vm1988_vm4, %v5273_v31, 0  ;;  %v5267_v4 = vmul.f32 %v7451_v45, %v8452_v52 }
0x10a4   : > { %7265 = vmatpush3.bf16.xpose.msra.mxu1 %v5940_v16  ;;  %v7453_v23 = vpop.eup %7452 }
0x10a5   : > { %v5876_v34 = vrot.slane %v5869_v49, %v7659_v51  ;;  %v5274_v35 = vpack.c.bf16 %v5267_v4, %v5265_v15  ;;  %7276 = vmatprep.subr.bf16.mxu1 %v7480_v1  ;;  %v5881_v6 = vshrl.u32 %v5851_v63, 16  ;;  %v5269_v53 = vmul.f32 %v7453_v23, %v8456_v8 }
0x10a6   : > { %v7455_v12 = vpop.eup %7454  ;;  %v5852_v60 = vcombine.high %v5851_v63, %v7488_v36 }
0x10a7   : > { %v5880_v37 = vpack.i.b16 %v5876_v34, %v5851_v63  ;;  %v5882_v13 = vshrl.u32 %v5876_v34, 16  ;;  %v5986_v11 = vsel %vm1988_vm4, %v5274_v35, 0  ;;  %v5271_v39 = vmul.f32 %v7455_v12, %v8460_v38 }
0x10a8   : > { %v5877_v56 = vcombine.high %v5876_v34, %v7488_v36  ;;  %v5887_v32 = vshrl.u32 %v5852_v60, 16 }
0x10a9   : > { %7261 = vmatmul.mubr.msk.bf16.vlgmr.msra.gmra.mxu0 %vm1988_vm4, %v5880_v37  ;;  %v5883_v52 = vpack.i.b16 %v5882_v13, %v5881_v6  ;;  %v5275_v57 = vpack.c.bf16 %v5271_v39, %v5269_v53 }
0x10aa   : > { %7271 = vmatpush3.bf16.xpose.msra.mxu0 %v5986_v11  ;;  %7272 = vmatprep.mubr.msk.bf16.mxu0 %vm7481_vm0, %v7480_v1  ;;  %v5888_v38 = vshrl.u32 %v5877_v56, 16  ;;  %v5886_v61 = vpack.i.b16 %v5877_v56, %v5852_v60 }
0x10ab   : > { %7267 = vmatmul.mubr.msk.bf16.vlgmr.msra.gmra.mxu1 %vm1988_vm4, %v5883_v52  ;;  %7282 = vmatprep.subr.bf16.mxu0 %v7480_v1  ;;  %v6032_v8 = vsel %vm1988_vm4, %v5275_v57, 0 }
0x10ac   : > { %7278 = vmatprep.mubr.msk.bf16.mxu1 %vm7481_vm0, %v7480_v1  ;;  %7277 = vmatpush3.bf16.xpose.msra.mxu1 %v6032_v8  ;;  %v5889_v33 = vpack.i.b16 %v5888_v38, %v5887_v32 }
0x10ad   : > { %7290 = vmatprep.subr.bf16.mxu1 %v7480_v1 }
0x10b1   : > { %7273 = vmatmul.mubr.msk.bf16.vlgmr.msra.gmra.mxu0 %vm1988_vm4, %v5886_v61 }
0x10b2   : > { %7286 = vmatprep.mubr.msk.bf16.mxu0 %vm7481_vm0, %v7480_v1 }
0x10b3   : > { %7279 = vmatmul.mubr.msk.bf16.vlgmr.msra.gmra.mxu1 %vm1988_vm4, %v5889_v33 }
0x10b4   : > { %7294 = vmatprep.mubr.msk.bf16.mxu1 %vm7481_vm0, %v7480_v1 }
0x1169   : > { %v5930_v36 = vpop.f32.mrf.mxu0 }
0x116a   : > { %6074 = vxpose.xlu0.b32.start.end [1/1] (short) (narrow) %v5930_v36, 16 }
0x116b   : > { %v7262_v55 = vpop.f32.mrf.mxu0  ;;  %v5976_v41 = vpop.f32.mrf.mxu1 }
0x116c   : > { %6106 = vxpose.xlu1.b32.start.end [1/1] (short) (narrow) %v5976_v41, 16 }
0x116d   : > { %v5933_v7 = vpop.f32.mrf.mxu0  ;;  %v7268_v48 = vpop.f32.mrf.mxu1 }
0x116f   : > { %v7263_v14 = vpop.f32.mrf.mxu0  ;;  %v5979_v58 = vpop.f32.mrf.mxu1 }
0x1171   : > { %v7269_v10 = vpop.f32.mrf.mxu1  ;;  %v6022_v19 = vpop.f32.mrf.mxu0 }
0x1172   : > { %6138 = vxpose.xlu0.b32.start.end [1/1] (short) (narrow) %v6022_v19, 16 }
0x1173   : > { %v7274_v26 = vpop.f32.mrf.mxu0  ;;  %v6068_v40 = vpop.f32.mrf.mxu1 }
0x1175   : > { %v6025_v47 = vpop.f32.mrf.mxu0  ;;  %v7280_v22 = vpop.f32.mrf.mxu1 }
0x1177   : > { %v7275_v46 = vpop.f32.mrf.mxu0  ;;  %6170 = vxpose.xlu0.b32.start.end [1/1] (short) (narrow) %v6068_v40, 16  ;;  %v6071_v0 = vpop.f32.mrf.mxu1 }
0x1179   : > { %v7281_v62 = vpop.f32.mrf.mxu1 }
0x117a   : > { %v7376_v62 = vld [vmem:[%s8630_s3 + $0x38] sm:$0xff]  }
0x117b   : > { %7283 = vmatpush3.bf16.msra.mxu0 %v7376_v62 }
0x117c   : > { %7284 = vmatprep.subr.bf16.mxu0 %v7480_v1 }
0x11e6   : > { %v6090_v18 = vpop.trf.xlu0 }
0x11e8   : > { %v6122_v21 = vpop.trf.xlu1 }
0x11ea   : > { %v6091_v50 = vpop.trf.xlu0 }
0x11ec   : > { %v6123_v28 = vpop.trf.xlu1 }
0x11ee   : > { %v6154_v3 = vpop.trf.xlu0 }
0x11ef   : > { %v6202_v9 = vcombine.low %v6090_v18, %v6154_v3  ;;  %v6203_v54 = vcombine.high %v6090_v18, %v6154_v3 }
0x11f1   : > { %v6210_v25 = vrot.slane %v6202_v9, %v7653_v43  ;;  %v6217_v42 = vrot.slane %v6203_v54, %v7653_v43 }
0x11f2   : > { %v6155_v59 = vpop.trf.xlu0 }
0x11f3   : > { %v6270_v24 = vcombine.low %v6091_v50, %v6155_v59  ;;  %v6271_v2 = vcombine.high %v6091_v50, %v6155_v59 }
0x11f5   : > { %v6278_v6 = vrot.slane %v6270_v24, %v7653_v43  ;;  %v6285_v37 = vrot.slane %v6271_v2, %v7653_v43 }
0x11f6   : > { %v6186_v5 = vpop.trf.xlu0 }
0x11f7   : > { %v6218_v30 = vcombine.low %v6122_v21, %v6186_v5  ;;  %v6219_v27 = vcombine.high %v6122_v21, %v6186_v5 }
0x11f9   : > { %v6226_v29 = vrot.slane %v6218_v30, %v7653_v43  ;;  %v6233_v20 = vrot.slane %v6219_v27, %v7653_v43 }
0x11fa   : > { %v6187_v31 = vpop.trf.xlu0 }
0x11fb   : > { %v6234_v45 = vcombine.low %v6210_v25, %v6226_v29  ;;  %v6235_v15 = vcombine.high %v6210_v25, %v6226_v29  ;;  %v6250_v63 = vcombine.low %v6217_v42, %v6233_v20  ;;  %v6251_v49 = vcombine.high %v6217_v42, %v6233_v20  ;;  %v7377_v42 = vld [vmem:[%s8630_s3 + $0x30] sm:$0xff]  }
0x11fc   : > { %v6286_v16 = vcombine.low %v6123_v28, %v6187_v31  ;;  %v6287_v4 = vcombine.high %v6123_v28, %v6187_v31  ;;  %7285 = vmatpush3.bf16.msra.mxu0 %v7377_v42  ;;  %v7027_v42 = vld [vmem:[%s8636_s9 + $0x4] ss:$0 sm:$0xff] }
0x11fd   : > { %v6242_v23 = vrot.slane %v6234_v45, %v7659_v51  ;;  %v6249_v34 = vrot.slane %v6235_v15, %v7659_v51  ;;  %v6258_v35 = vrot.slane %v6250_v63, %v7659_v51  ;;  %v6265_v12 = vrot.slane %v6251_v49, %v7659_v51  ;;  %7298 = vmatprep.subr.bf16.mxu0 %v7480_v1 }
0x11fe   : > { %v6294_v13 = vrot.slane %v6286_v16, %v7653_v43  ;;  %v6301_v11 = vrot.slane %v6287_v4, %v7653_v43 }
0x11ff   : > { %v6338_v53 = vcombine.low %v6242_v23, %v6249_v34  ;;  %v7012_v39 = vcombine.high %v6242_v23, %v6249_v34  ;;  %v6354_v52 = vcombine.low %v6258_v35, %v6265_v12  ;;  %v7013_v56 = vcombine.high %v6258_v35, %v6265_v12 }
0x1200   : > { %v6302_v57 = vcombine.low %v6278_v6, %v6294_v13  ;;  %v6303_v60 = vcombine.high %v6278_v6, %v6294_v13  ;;  %v6318_v8 = vcombine.low %v6285_v37, %v6301_v11  ;;  %v6319_v38 = vcombine.high %v6285_v37, %v6301_v11 }
0x1201   : > { %v6345_v61 = vrot.slane %v6338_v53, %v7653_v43  ;;  %v6353_v32 = vrot.slane %v7012_v39, %v7653_v43  ;;  %v6361_v33 = vrot.slane %v6354_v52, %v7653_v43  ;;  %v6369_v36 = vrot.slane %v7013_v56, %v7653_v43 }
0x1202   : > { %v6310_v55 = vrot.slane %v6302_v57, %v7659_v51  ;;  %v6317_v41 = vrot.slane %v6303_v60, %v7659_v51  ;;  %v6326_v7 = vrot.slane %v6318_v8, %v7659_v51  ;;  %v6333_v48 = vrot.slane %v6319_v38, %v7659_v51 }
0x1203   : > { %v6371_v14 = vcombine.high %v6345_v61, %v6353_v32  ;;  %v6387_v58 = vcombine.high %v6361_v33, %v6369_v36  ;;  %v6370_v10 = vcombine.low %v6345_v61, %v6353_v32  ;;  %v6386_v19 = vcombine.low %v6361_v33, %v6369_v36  ;;  %v7021_v61 = vld [vmem:[%s8635_s8 + $0x5] ss:$0 sm:$0xff] }
0x1204   : > { %v6406_v26 = vcombine.low %v6310_v55, %v6317_v41  ;;  %v7014_v40 = vcombine.high %v6310_v55, %v6317_v41  ;;  %v6422_v47 = vcombine.low %v6326_v7, %v6333_v48  ;;  %v7015_v22 = vcombine.high %v6326_v7, %v6333_v48 }
0x1205   : > { %v6378_v46 = vrot.slane %v6370_v10, %v7659_v51  ;;  %v6394_v0 = vrot.slane %v6386_v19, %v7659_v51  ;;  %v6385_v21 = vrot.slane %v6371_v14, %v7659_v51  ;;  %v6401_v9 = vrot.slane %v6387_v58, %v7659_v51 }
0x1206   : > { %v6413_v18 = vrot.slane %v6406_v26, %v7653_v43  ;;  %v6421_v50 = vrot.slane %v7014_v40, %v7653_v43  ;;  %v6429_v3 = vrot.slane %v6422_v47, %v7653_v43  ;;  %v6437_v59 = vrot.slane %v7015_v22, %v7653_v43 }
0x1207   : > { %v6402_v54 = vcombine.low %v6378_v46, %v6394_v0  ;;  %v6404_v24 = vcombine.low %v6385_v21, %v6401_v9  ;;  %v6403_v31 = vcombine.high %v6378_v46, %v6394_v0  ;;  %v6405_v4 = vcombine.high %v6385_v21, %v6401_v9 }
0x1208   : > { %v6439_v5 = vcombine.high %v6413_v18, %v6421_v50  ;;  %v6455_v30 = vcombine.high %v6429_v3, %v6437_v59  ;;  %v6438_v27 = vcombine.low %v6413_v18, %v6421_v50  ;;  %v6454_v25 = vcombine.low %v6429_v3, %v6437_v59  ;;  %v7379_v50 = vld [vmem:[%s8631_s4 + $0x10] sm:$0xff]   ;;  %v7380_v3 = vld [vmem:[%s8632_s5 + $0x38] sm:$0xff]  }
0x120a   : > { %v6453_v29 = vrot.slane %v6439_v5, %v7659_v51  ;;  %v6469_v43 = vrot.slane %v6455_v30, %v7659_v51  ;;  %v6446_v20 = vrot.slane %v6438_v27, %v7659_v51  ;;  %v6462_v28 = vrot.slane %v6454_v25, %v7659_v51 }
0x120c   : > { %v6472_v2 = vcombine.low %v6453_v29, %v6469_v43  ;;  %v6471_v45 = vcombine.high %v6446_v20, %v6462_v28  ;;  %v6470_v15 = vcombine.low %v6446_v20, %v6462_v28  ;;  %v6473_v16 = vcombine.high %v6453_v29, %v6469_v43  ;;  %v7028_v28 = vld [vmem:[%s8636_s9 + $0x5] ss:$0 sm:$0xff] }
0x120e   : > { %v7350_v63 = vpack.i.bf16 %v6472_v2, %v6404_v24  ;;  %v7345_v49 = vpack.i.bf16 %v6471_v45, %v6403_v31  ;;  %v7355_v23 = vpack.i.bf16 %v6473_v16, %v6405_v4  ;;  %v7033_v16 = vld [vmem:[%s8634_s7 + $0x1] ss:$0 sm:$0xff] }
0x1210   : > { %7351 = vrot.lane.b32.xlu0 %v7350_v63, %s7489_s13  ;;  %7346 = vrot.lane.b32.xlu1 %v7345_v49, %s7490_s16  ;;  %v7382_v63 = vld [vmem:[%s8632_s5 + $0x28] sm:$0xff]   ;;  %v7383_v49 = vld [vmem:[%s8632_s5 + $0x20] sm:$0xff]  }
0x1214   : > { %7356 = vrot.lane.b32.xlu1 %v7355_v23, %s7491_s18 }
0x1282   : > { %v7352_v51 = vpop.permute.xlu0 %7351  ;;  %v7347_v34 = vpop.permute.xlu1 %7346 }
0x1283   : > { %v7349_v35 = vunpack.i.h.bf16 %v7347_v34  ;;  %v7348_v12 = vunpack.i.l.bf16 %v7347_v34  ;;  %v7354_v6 = vunpack.i.h.bf16 %v7352_v51  ;;  %v7353_v37 = vunpack.i.l.bf16 %v7352_v51 }
0x1285   : > { %v6498_v13 = vsel %vm1798_vm3, %v6402_v54, %v7348_v12  ;;  %v6499_v11 = vsel %vm1798_vm3, %v6470_v15, %v7349_v35  ;;  %v7381_v15 = vld [vmem:[%s8632_s5 + $0x30] sm:$0xff]  }
0x1286   : > { %v7357_v53 = vpop.permute.xlu1 %7356  ;;  %v6500_v56 = vsel %vm1988_vm4, %v6498_v13, %v7353_v37  ;;  %v6501_v57 = vsel %vm1988_vm4, %v6499_v11, %v7354_v6 }
0x1287   : > { %v7359_v39 = vunpack.i.h.bf16 %v7357_v53  ;;  %v7358_v52 = vunpack.i.l.bf16 %v7357_v53 }
0x1289   : > { %v6502_v60 = vsel %vm3307_vm5, %v6500_v56, %v7358_v52  ;;  %v6503_v8 = vsel %vm3307_vm5, %v6501_v57, %v7359_v39 }
0x128a   : > { %v6504_v38 = vpack.c.bf16 %v6503_v8, %v6502_v60 }
0x128c   : > { %7287 = vmatmul.mubr.msk.bf16.vlgmr.msra.gmra.mxu0 %vm441_vm1, %v6504_v38 }
0x128d   : > { %7306 = vmatprep.mubr.msk.bf16.mxu0 %vm7481_vm0, %v7480_v1  ;;  %7299 = vmatpush3.bf16.msra.mxu0 %v7380_v3 }
0x128e   : > { %7300 = vmatprep.subr.bf16.mxu0 %v7480_v1 }
0x1291   : > { %7301 = vmatpush3.bf16.msra.mxu0 %v7381_v15 }
0x1292   : > { %7302 = vmatprep.subr.bf16.mxu0 %v7480_v1 }
0x1295   : > { %7303 = vmatpush3.bf16.msra.mxu0 %v7382_v63 }
0x1296   : > { %7304 = vmatprep.subr.bf16.mxu0 %v7480_v1 }
0x1299   : > { %7305 = vmatpush3.bf16.msra.mxu0 %v7383_v49 }
0x134c   : > { %v6564_v32 = vpop.f32.mrf.mxu0 }
0x134d   : > { %v6565_v33 = vadd.f32 %v7021_v61, %v6564_v32 }
0x134e   : > { %v7288_v36 = vpop.f32.mrf.mxu0 }
0x134f   : > { %v6571_v55 = vadd.f32 %v6565_v33, %v8103_v44 }
0x1350   : > { %v6567_v41 = vpop.f32.mrf.mxu0 }
0x1351   : > { %v6568_v7 = vadd.f32 %v7021_v61, %v6567_v41  ;;  %v6576_v48 = vsel %vm441_vm1, %v6571_v55, 0.0 }
0x1352   : > { %6577 = vadd.xlane.f32.xlu1 %v6576_v48  ;;  %v7289_v14 = vpop.f32.mrf.mxu0 }
0x1353   : > { %v6572_v58 = vadd.f32 %v6568_v7, %v8105_v17  ;;  %v7378_v17 = vld [vmem:[%s8631_s4 + $0x18] sm:$0xff]  }
0x1354   : > { %7291 = vmatpush3.bf16.msra.mxu1 %v7378_v17 }
0x1355   : > { %v6579_v10 = vsel %vm441_vm1, %v6572_v58, 0.0  ;;  %7292 = vmatprep.subr.bf16.mxu1 %v7480_v1  ;;  %v7046_v1 = vld [vmem:[%s8635_s8 + $0x6] ss:$0 sm:$0xff] }
0x1356   : > { %6580 = vadd.xlane.f32.xlu0 %v6579_v10 }
0x1358   : > { %7293 = vmatpush3.bf16.msra.mxu1 %v7379_v50 }
0x13db   : > { %v6578_v19 = vpop.xlane.xlu1 %6577 }
0x13dc   : > { %v6582_v26 = vmul.f32 0.03125, %v6578_v19 }
0x13de   : > { %v6584_v40 = vsub.f32 %v6571_v55, %v6582_v26 }
0x13df   : > { %v6581_v47 = vpop.xlane.xlu0 %6580 }
0x13e0   : > { %v6583_v22 = vmul.f32 0.03125, %v6581_v47  ;;  %v6586_v46 = vmul.f32 %v6584_v40, %v6584_v40 }
0x13e2   : > { %v6585_v0 = vsub.f32 %v6572_v58, %v6583_v22  ;;  %v6588_v44 = vsel %vm441_vm1, %v6586_v46, 0.0 }
0x13e3   : > { %6589 = vadd.xlane.f32.xlu1 %v6588_v44  ;;  %v7054_v44 = vld [vmem:[%s8636_s9 + $0x6] ss:$0 sm:$0xff] }
0x13e4   : > { %v6587_v62 = vmul.f32 %v6585_v0, %v6585_v0 }
0x13e6   : > { %v6591_v18 = vsel %vm441_vm1, %v6587_v62, 0.0 }
0x13e7   : > { %6592 = vadd.xlane.f32.xlu1 %v6591_v18  ;;  %v7055_v18 = vld [vmem:[%s8636_s9 + $0x7] ss:$0 sm:$0xff] }
0x146c   : > { %v6590_v59 = vpop.xlane.xlu1 %6589 }
0x146d   : > { %v6594_v21 = vmul.f32 0.03125, %v6590_v59 }
0x146f   : > { %v6596_v9 = vadd.f32 1e-05, %v6594_v21 }
0x1470   : > { %v6593_v54 = vpop.xlane.xlu1 %6592 }
0x1471   : > { %7456 = vrsqrt.f32 %v6596_v9  ;;  %v6595_v5 = vmul.f32 0.03125, %v6593_v54 }
0x1473   : > { %v6597_v30 = vadd.f32 1e-05, %v6595_v5 }
0x1475   : > { %7458 = vrsqrt.f32 %v6597_v30 }
0x147e   : > { %v7457_v27 = vpop.eup %7456 }
0x147f   : > { %v6600_v25 = vmul.f32 %v7457_v27, %v6584_v40 }
0x1481   : > { %v6606_v20 = vmul.f32 %v7027_v42, %v6600_v25 }
0x1482   : > { %v7459_v29 = vpop.eup %7458 }
0x1483   : > { %v6601_v43 = vmul.f32 %v7459_v29, %v6585_v0  ;;  %v6612_v2 = vadd.f32 %v7028_v28, %v6606_v20 }
0x1485   : > { %v6607_v24 = vmul.f32 %v7027_v42, %v6601_v43 }
0x1487   : > { %v6613_v31 = vadd.f32 %v7028_v28, %v6607_v24 }
0x1489   : > { %v6614_v45 = vpack.c.bf16 %v6613_v31, %v6612_v2 }
0x148b   : > { %7295 = vmatmul.mubr.msk.bf16.vlgmr.msra.gmra.mxu1 %vm441_vm1, %v6614_v45 }
0x154b   : > { %v6674_v4 = vpop.f32.mrf.mxu1 }
0x154c   : > { %v6675_v51 = vadd.f32 %v7033_v16, %v6674_v4 }
0x154d   : > { %v7296_v23 = vpop.f32.mrf.mxu1 }
0x154e   : > { %v6681_v6 = vmax.f32 %v6675_v51, 0.0  ;;  %v7056_v23 = vld [vmem:[%s8637_s10] ss:$0 sm:$0xff] }
0x154f   : > { %v6677_v34 = vpop.f32.mrf.mxu1 }
0x1550   : > { %v6678_v35 = vadd.f32 %v7033_v16, %v6677_v34  ;;  %v7057_v34 = vld [vmem:[%s8637_s10 + $0x1] ss:$0 sm:$0xff] }
0x1551   : > { %v7297_v12 = vpop.f32.mrf.mxu1 }
0x1552   : > { %v6682_v37 = vmax.f32 %v6678_v35, 0.0 }
0x1554   : > { %v6683_v13 = vpack.c.bf16 %v6682_v37, %v6681_v6 }
0x1556   : > { %7307 = vmatmul.mubr.msk.bf16.vlgmr.msra.gmra.mxu0 %vm3526_vm6, %v6683_v13 }
0x1616   : > { %v6759_v11 = vpop.f32.mrf.mxu0 }
0x1617   : > { %v6760_v53 = vadd.f32 %v7046_v1, %v6759_v11 }
0x1618   : > { %v7308_v39 = vpop.f32.mrf.mxu0 }
0x1619   : > { %v6766_v52 = vadd.f32 %v6760_v53, %v6612_v2 }
0x161a   : > { %v6762_v56 = vpop.f32.mrf.mxu0 }
0x161b   : > { %v6763_v57 = vadd.f32 %v7046_v1, %v6762_v56  ;;  %v6770_v60 = vsel %vm441_vm1, %v6766_v52, 0.0 }
0x161c   : > { %6771 = vadd.xlane.f32.xlu0 %v6770_v60  ;;  %v7309_v8 = vpop.f32.mrf.mxu0 }
0x161d   : > { %v6767_v38 = vadd.f32 %v6763_v57, %v6613_v31 }
0x161f   : > { %v6773_v61 = vsel %vm441_vm1, %v6767_v38, 0.0 }
0x1620   : > { %6774 = vadd.xlane.f32.xlu1 %v6773_v61 }
0x16a5   : > { %v6772_v32 = vpop.xlane.xlu0 %6771 }
0x16a6   : > { %v6776_v33 = vmul.f32 0.03125, %v6772_v32 }
0x16a8   : > { %v6778_v36 = vsub.f32 %v6766_v52, %v6776_v33 }
0x16a9   : > { %v6775_v55 = vpop.xlane.xlu1 %6774 }
0x16aa   : > { %v6777_v41 = vmul.f32 0.03125, %v6775_v55  ;;  %v6780_v7 = vmul.f32 %v6778_v36, %v6778_v36 }
0x16ac   : > { %v6779_v48 = vsub.f32 %v6767_v38, %v6777_v41  ;;  %v6782_v14 = vsel %vm441_vm1, %v6780_v7, 0.0 }
0x16ad   : > { %6783 = vadd.xlane.f32.xlu0 %v6782_v14 }
0x16ae   : > { %v6781_v58 = vmul.f32 %v6779_v48, %v6779_v48 }
0x16b0   : > { %v6785_v10 = vsel %vm441_vm1, %v6781_v58, 0.0 }
0x16b1   : > { %6786 = vadd.xlane.f32.xlu1 %v6785_v10 }
0x1736   : > { %v6784_v19 = vpop.xlane.xlu0 %6783 }
0x1737   : > { %v6788_v26 = vmul.f32 0.03125, %v6784_v19 }
0x1739   : > { %v6790_v40 = vadd.f32 1e-05, %v6788_v26 }
0x173a   : > { %v6787_v47 = vpop.xlane.xlu1 %6786 }
0x173b   : > { %7460 = vrsqrt.f32 %v6790_v40  ;;  %v6789_v22 = vmul.f32 0.03125, %v6787_v47 }
0x173d   : > { %v6791_v46 = vadd.f32 1e-05, %v6789_v22 }
0x173f   : > { %7462 = vrsqrt.f32 %v6791_v46 }
0x1748   : > { %v7461_v0 = vpop.eup %7460 }
0x1749   : > { %v6794_v62 = vmul.f32 %v7461_v0, %v6778_v36 }
0x174b   : > { %v6800_v17 = vmul.f32 %v7054_v44, %v6794_v62 }
0x174c   : > { %v7463_v50 = vpop.eup %7462 }
0x174d   : > { %v6806_v3 = vadd.f32 %v7055_v18, %v6800_v17  ;;  %v6795_v59 = vmul.f32 %v7463_v50, %v6779_v48 }
0x174f   : > { %v6810_v21 = vsel %vm441_vm1, %v6806_v3, 0.0  ;;  %v6801_v9 = vmul.f32 %v7054_v44, %v6795_v59 }
0x1750   : > { %6811 = vadd.xlane.f32.xlu0 %v6810_v21 }
0x1751   : > { %v6807_v54 = vadd.f32 %v7055_v18, %v6801_v9 }
0x1753   : > { %v6813_v5 = vsel %vm441_vm1, %v6807_v54, 0.0 }
0x1754   : > { %6814 = vadd.xlane.f32.xlu1 %v6813_v5 }
0x17d9   : > { %v6812_v30 = vpop.xlane.xlu0 %6811 }
0x17da   : > { %v6816_v27 = vmul.f32 0.03125, %v6812_v30 }
0x17dc   : > { %v6818_v25 = vsub.f32 %v6806_v3, %v6816_v27 }
0x17dd   : > { %v6815_v42 = vpop.xlane.xlu1 %6814 }
0x17de   : > { %v6817_v29 = vmul.f32 0.03125, %v6815_v42  ;;  %v6820_v43 = vmul.f32 %v6818_v25, %v6818_v25 }
0x17e0   : > { %v6819_v20 = vsub.f32 %v6807_v54, %v6817_v29  ;;  %v6822_v28 = vsel %vm441_vm1, %v6820_v43, 0.0 }
0x17e1   : > { %6823 = vadd.xlane.f32.xlu0 %v6822_v28 }
0x17e2   : > { %v6821_v24 = vmul.f32 %v6819_v20, %v6819_v20 }
0x17e4   : > { %v6825_v2 = vsel %vm441_vm1, %v6821_v24, 0.0 }
0x17e5   : > { %6826 = vadd.xlane.f32.xlu1 %v6825_v2 }
0x186a   : > { %v6824_v31 = vpop.xlane.xlu0 %6823 }
0x186b   : > { %v6828_v45 = vmul.f32 0.03125, %v6824_v31 }
0x186d   : > { %v6830_v15 = vadd.f32 1e-05, %v6828_v45 }
0x186e   : > { %v6827_v63 = vpop.xlane.xlu1 %6826 }
0x186f   : > { %7464 = vrsqrt.f32 %v6830_v15  ;;  %v6829_v49 = vmul.f32 0.03125, %v6827_v63 }
0x1871   : > { %v6831_v16 = vadd.f32 1e-05, %v6829_v49 }
0x1873   : > { %7466 = vrsqrt.f32 %v6831_v16 }
0x187c   : > { %v7465_v4 = vpop.eup %7464 }
0x187d   : > { %v6834_v51 = vmul.f32 %v7465_v4, %v6818_v25 }
0x187f   : > { %v6840_v35 = vmul.f32 %v7056_v23, %v6834_v51 }
0x1880   : > { %v7467_v12 = vpop.eup %7466 }
0x1881   : > { %v6846_v6 = vadd.f32 %v7057_v34, %v6840_v35  ;;  %v6835_v37 = vmul.f32 %v7467_v12, %v6819_v20 }
0x1883   : > { %6848 = vst.msk [vmem:[%s410_s19] sm:$0xff] %vm441_vm1, %v6846_v6  ;;  %v6841_v13 = vmul.f32 %v7056_v23, %v6835_v37 }
0x1885   : > { %v6847_v1 = vadd.f32 %v7057_v34, %v6841_v13 }
0x1887   : > { %6849 = vst.msk [vmem:[%s410_s19 + $0x8] sm:$0xff] %vm441_vm1, %v6847_v1 }
0x1888 PF: > { %s21_s17 = sadd.s32 1, %s7478_s17  }
0x1889   : > { %p18_p4 = scmp.ge.s32.totalorder %s21_s17, 4  }
0x188b   :  { %20 = sbr.rel (!%p18_p4) target bundleno = 1 (0x1), region = 105 }

// kernel: transformer_qs_forward.3
= control target key start
LH: loop header
LB: loop body
LE: loop exit
PB: predicated region body
PF: predicated region fallthrough
CT: control target
= control target key end

     0   :  { %s12882_s0 = inlined_call_operand.vmem [shape: f32[32,32], index: 0, kind: input, shape index: {}]   ;;  %s12883_s1 = inlined_call_operand.vmem [shape: f32[32,32], index: 1, kind: input, shape index: {}]   ;;  %s12884_s2 = inlined_call_operand.vmem [shape: f32[8,32], index: 2, kind: input, shape index: {}]   ;;  %s12885_s3 = inlined_call_operand.vmem [shape: bf16[2,32,64], index: 3, kind: input, shape index: {}]   ;;  %s12886_s4 = inlined_call_operand.vmem [shape: bf16[2,6,32,32], index: 4, kind: input, shape index: {}]   ;;  %s12887_s5 = inlined_call_operand.vmem [shape: bf16[2,32,64], index: 5, kind: input, shape index: {}]   ;;  %s12888_s6 = inlined_call_operand.vmem [shape: bf16[2,64,32], index: 6, kind: input, shape index: {}]   ;;  %s12889_s7 = inlined_call_operand.vmem [shape: f32[2,64], index: 7, kind: input, shape index: {}]   ;;  %s12890_s8 = inlined_call_operand.vmem [shape: f32[2,64], index: 8, kind: input, shape index: {}]   ;;  %s12891_s9 = inlined_call_operand.vmem [shape: f32[2,7,32], index: 9, kind: input, shape index: {}]   ;;  %s12892_s10 = inlined_call_operand.vmem [shape: f32[2,6,32], index: 10, kind: input, shape index: {}]   ;;  %s12893_s11 = inlined_call_operand.vmem [shape: f32[2,32], index: 11, kind: input, shape index: {}]   ;;  %s12894_s12 = inlined_call_operand.hbm [shape: f32[16,32], index: 12, kind: output, shape index: {}]  }
   0x1   :  { %12912 = sst [smem:[#allocation8_spill]] %s12882_s0 }
   0x2   :  { %12913 = sst [smem:[#allocation9_spill]] %s12883_s1 }
   0x3   :  { %17 = vsyncpa [#allocation3], 0 }
   0x4   :  { %19 = vsyncpa [#allocation3 + $0x1], 0  ;;  %s11482_s21 = smov 0   ;;  %s11484_s22 = smov 0  }
   0x5   :  { %s11486_s23 = smov 0   ;;  %s11488_s24 = smov 0  }
   0x6 LB: > { %12914 = sst [smem:[#allocation5_spill]] %s11398_s23  ;;  %s11503_s25 = sadd.s32 4294967295, %s11402_s24   ;;  %s11402_s24 = sphi %s11488_s24, %s12928_s24   ;;  %s11398_s23 = sphi %s11486_s23, %s12930_s23   ;;  %s11394_s22 = sphi %s11484_s22, %s12932_s22   ;;  %s11390_s21 = sphi %s11482_s21, %s12931_s21  }
   0x7   : > { %s10473_s26 = sadd.s32 4294967294, %s11402_s24   ;;  %s11507_s27 = sadd.s32 1, %s11402_s24  }
   0x8   : > { %12915 = sst [smem:[#allocation6_spill]] %s11507_s27  ;;  %s294_s28 = sadd.s32 1, %s11398_s23 }
   0x9   : > { %s291_s29 = ssub.s32 %s11402_s24, %s11507_s27  ;;  %p304_p0 = scmp.ne.s32.totalorder %s11398_s23, %s11394_s22 }
   0xa   : > { %p292_p1 = scmp.eq.s32.totalorder %s291_s29, 0  ;;  %p305_p2 = scmp.eq.s32.totalorder %s11503_s25, 1 }
   0xb   : > { %p310_p3 = scmp.ne.s32.totalorder %s11394_s22, %s11390_s21  ;;  %p311_p4 = scmp.eq.s32.totalorder %s10473_s26, 1 }
   0xc   : > { %s11518_s30 = scalar_select %p292_p1, %s11398_s23, %s294_s28  }
   0xd   : > { %p11520_p5 = por %p305_p2, %p304_p0  ;;  %p11524_p6 = por %p311_p4, %p310_p3 }
   0xe   : > { %12916 = sst [smem:[#allocation7_spill]] %s11518_s30  ;;  %p10476_p7 = scmp.ge.s32.totalorder %s11402_s24, 1 }
   0xf   : > { %p377_p8 = scmp.lt.s32.totalorder %s11402_s24, 3 }
  0x11   : > { %p378_p9 = pnand %p10476_p7, %p377_p8 }
  0x12   : > { %s12897_s29 = smov (!%p378_p9), 104   ;;  %s12905_s15 = smov (!%p378_p9), 120  }
  0x13   : > { %381 = sbr.rel (%p378_p9) target bundleno = 10378 (0x288a), region = 68  ;;  %s12895_s16 = smov (!%p378_p9), 96  }
  0x14   : > { %s12901_s17 = smov (!%p378_p9), 112   ;;  %s12899_s18 = smov (!%p378_p9), 16  }
  0x15   : > { %s12903_s19 = smov (!%p378_p9), 8   ;;  %s12907_s20 = smov (!%p378_p9), 24  }
  0x16   : > { %s10478_s26 = sshll.u32 (!%p378_p9), %s11503_s25, 1  ;;  %s12919_s0 = sld [smem:[#allocation8_spill]] (!%p378_p9) }
  0x17   : > { %p425_p10 = scmp.lt.s32.totalorder (!%p378_p9), %s10478_s26, 3  ;;  %s12920_s1 = sld [smem:[#allocation9_spill]] (!%p378_p9) }
  0x18   : > { %v11221_v0 = vld [vmem:[%s12885_s3 + $0x8] sm:$0xff]   ;;  %v11404_v1 = vmov 0.0   ;;  %v11222_v2 = vld [vmem:[%s12885_s3] sm:$0xff]   ;;  %vm11405_vm0 = vmmov 0   ;;  %vm469_vm1 = vcmask 261120   ;;  %v11410_v16 = vmov 0  }
  0x19   : > { %10826 = vmatprep.subr.bf16.mxu1 %v11404_v1  ;;  %10842 = vmatprep.subr.bf16.mxu0 %v11404_v1  ;;  %v441_v3 = vld [vmem:[%s12884_s2] sm:$0xff]  ;;  %v11223_v14 = vld [vmem:[%s12886_s4 + $0x8] sm:$0xff]   ;;  %v11411_v17 = vmov 1983009808   ;;  %v592_v19 = vlaneseq  ;;  %v11412_v23 = vmov 1934713408  }
  0x1a   : > { %10827 = vmatpush3.bf16.msra.mxu1 %v11221_v0  ;;  %10830 = vmatprep.mubr.msk.bf16.mxu1 %vm11405_vm0, %v11404_v1  ;;  %v447_v4 = vpack.c.bf16 %v441_v3, %v441_v3  ;;  %v10482_v5 = vld [vmem:[%s12889_s7] ss:$0 sm:$0xff]  ;;  %v590_v18 = vunpack.c.l.s4 %v11411_v17  ;;  %v622_v24 = vunpack.c.l.s4 %v11412_v23  ;;  %vm1321_vm2 = vcmask 1043456   ;;  %s12934_s26 = smov (!%p425_p10, %s10478_s26), 3  ;;  %s12926_s30 = smov 24  }
  0x1b   : > { %10828 = vmatprep.subr.bf16.mxu1 %v11404_v1  ;;  %10844 = vmatprep.mubr.msk.bf16.mxu0 %vm11405_vm0, %v11404_v1  ;;  %v11224_v15 = vld [vmem:[%s12886_s4] sm:$0xff]   ;;  %v593_v21 = vshrl.u32 %v592_v19, 7  ;;  %vm1317_vm3 = vcmask 64512   ;;  %s10479_s28 = sshll.u32 %s12934_s26, 3  ;;  %vm2430_vm4 = vcmask 130048   ;;  %vm2432_vm5 = vcmask 195584  }
  0x1c   : > { %v591_v20 = vunpack.c.0.s8 %v590_v18  ;;  %v623_v27 = vunpack.c.0.s8 %v622_v24  ;;  %s12923_s26 = smov 104   ;;  %vm5337_vm6 = vcmask 523264   ;;  %s12927_s23 = smov 96  }
  0x1e   : > { %10829 = vmatpush3.bf16.msra.mxu1 %v11222_v2  ;;  %v11586_v26 = vsub.s32 %v591_v20, %v593_v21  ;;  %v11592_v38 = vsub.s32 %v623_v27, %v593_v21 }
  0x1f   : > { %10834 = vmatprep.subr.bf16.mxu1 %v11404_v1 }
  0x21   : > { %10831 = vmatmul.mubr.msk.bf16.vlgmr.msra.gmra.mxu1 %vm469_vm1, %v447_v4 }
  0x22   : > { %10838 = vmatprep.mubr.msk.bf16.mxu1 %vm11405_vm0, %v11404_v1  ;;  %10835 = vmatpush3.bf16.msra.mxu1 %v11223_v14 }
  0x23   : > { %10836 = vmatprep.subr.bf16.mxu1 %v11404_v1 }
  0x26   : > { %10837 = vmatpush3.bf16.msra.mxu1 %v11224_v15 }
  0x27   : > { %10848 = vmatprep.subr.bf16.mxu1 %v11404_v1 }
  0x29   : > { %10839 = vmatmul.mubr.bf16.vlgmr.msra.gmra.mxu1 %v11410_v16 }
  0x2a   : > { %10850 = vmatprep.mubr.msk.bf16.mxu1 %vm11405_vm0, %v11404_v1 }
  0xe1   : > { %v507_v6 = vpop.f32.mrf.mxu1 }
  0xe2   : > { %v11553_v7 = vadd.f32 %v10482_v5, %v507_v6 }
  0xe3   : > { %v10832_v8 = vpop.f32.mrf.mxu1 }
  0xe4   : > { %584 = vrot.lane.b32.xlu1 %v11553_v7, %s12897_s29  ;;  %578 = vrot.lane.b32.xlu0 %v11553_v7, %s12905_s15 }
  0xe5   : > { %v510_v9 = vpop.f32.mrf.mxu1 }
  0xe7   : > { %v10833_v10 = vpop.f32.mrf.mxu1 }
  0xe8   : > { %663 = vrot.lane.b32.xlu1 %v11553_v7, %s12895_s16  ;;  %581 = vrot.lane.b32.xlu0 %v11553_v7, %s12901_s17 }
 0x156   : > { %v11563_v11 = vpop.permute.xlu0 %578  ;;  %v11567_v12 = vpop.permute.xlu1 %584 }
 0x157   : > { %665 = vrot.lane.b32.xlu0 %v11563_v11, %s12895_s16 }
 0x15a   : > { %v11569_v13 = vpop.permute.xlu0 %581  ;;  %v664_v22 = vpop.permute.xlu1 %663 }
 0x15b   : > { %669 = vrot.lane.b32.xlu0 %v11567_v12, %s12895_s16  ;;  %667 = vrot.lane.b32.xlu1 %v11569_v13, %s12895_s16  ;;  %s12925_s16 = smov 8  }
 0x1c9   : > { %v666_v25 = vpop.permute.xlu0 %665 }
 0x1cd   : > { %v668_v28 = vpop.permute.xlu1 %667  ;;  %v670_v29 = vpop.permute.xlu0 %669 }
 0x1ce   : > { %v675_v30 = vcombine.low %v664_v22, %v668_v28  ;;  %v676_v31 = vcombine.high %v664_v22, %v668_v28  ;;  %v691_v32 = vcombine.low %v666_v25, %v670_v29  ;;  %v692_v33 = vcombine.high %v666_v25, %v670_v29 }
 0x1d0   : > { %v683_v34 = vrot.slane %v675_v30, %v11586_v26  ;;  %v690_v35 = vrot.slane %v676_v31, %v11586_v26  ;;  %v699_v36 = vrot.slane %v691_v32, %v11586_v26  ;;  %v706_v37 = vrot.slane %v692_v33, %v11586_v26 }
 0x1d2   : > { %v708_v39 = vcombine.high %v683_v34, %v699_v36  ;;  %v707_v40 = vcombine.low %v683_v34, %v699_v36  ;;  %v723_v41 = vcombine.low %v690_v35, %v706_v37  ;;  %v724_v44 = vcombine.high %v690_v35, %v706_v37 }
 0x1d4   : > { %v722_v42 = vrot.slane %v708_v39, %v11592_v38  ;;  %v715_v43 = vrot.slane %v707_v40, %v11592_v38  ;;  %v731_v47 = vrot.slane %v723_v41, %v11592_v38  ;;  %v738_v49 = vrot.slane %v724_v44, %v11592_v38 }
 0x1d6   : > { %v745_v45 = vpack.c.bf16 %v722_v42, %v722_v42  ;;  %v743_v46 = vpack.c.bf16 %v715_v43, %v715_v43  ;;  %v740_v48 = vcombine.high %v722_v42, %v11404_v1  ;;  %v747_v50 = vpack.c.bf16 %v731_v47, %v731_v47 }
 0x1d7   : > { %v741_v52 = vcombine.high %v731_v47, %v11404_v1  ;;  %v739_v53 = vcombine.high %v715_v43, %v11404_v1  ;;  %v742_v56 = vcombine.high %v738_v49, %v11404_v1  ;;  %v749_v58 = vpack.c.bf16 %v738_v49, %v738_v49  ;;  %v10486_v47 = vld [vmem:[%s12891_s9] ss:$0 sm:$0xff] }
 0x1d8   : > { %931 = vxpose.xlu0.c.b16.start.end [1/1] (short) (narrow) %v745_v45, 16  ;;  %899 = vxpose.xlu1.c.b16.start.end [1/1] (short) (narrow) %v743_v46, 16  ;;  %v746_v51 = vpack.c.bf16 %v740_v48, %v740_v48  ;;  %v571_v48 = vpop.f32.mrf.mxu1 }
 0x1d9   : > { %v748_v54 = vpack.c.bf16 %v741_v52, %v741_v52  ;;  %v744_v55 = vpack.c.bf16 %v739_v53, %v739_v53  ;;  %v750_v57 = vpack.c.bf16 %v742_v56, %v742_v56  ;;  %v11617_v49 = vadd.f32 %v10486_v47, %v571_v48 }
 0x1da   : > { %v587_v53 = vcombine.low %v11553_v7, %v11569_v13  ;;  %v604_v56 = vcombine.high %v11563_v11, %v11567_v12 }
 0x1dc   : > { %963 = vxpose.xlu0.c.b16.start.end [1/1] (short) (narrow) %v747_v50, 16  ;;  %947 = vxpose.xlu1.c.b16.start.end [1/1] (short) (narrow) %v746_v51, 16  ;;  %v10840_v50 = vpop.f32.mrf.mxu1 }
 0x1de   : > { %v574_v51 = vpop.f32.mrf.mxu1 }
 0x1e0   : > { %979 = vxpose.xlu1.c.b16.start.end [1/1] (short) (narrow) %v748_v54, 16  ;;  %915 = vxpose.xlu0.c.b16.start.end [1/1] (short) (narrow) %v744_v55, 16  ;;  %v10841_v52 = vpop.f32.mrf.mxu1  ;;  %v588_v54 = vcombine.high %v11553_v7, %v11569_v13  ;;  %v603_v55 = vcombine.low %v11563_v11, %v11567_v12 }
 0x1e4   : > { %1011 = vxpose.xlu1.c.b16.start.end [1/1] (short) (narrow) %v750_v57, 16  ;;  %995 = vxpose.xlu0.c.b16.start.end [1/1] (short) (narrow) %v749_v58, 16  ;;  %v595_v57 = vrot.slane %v587_v53, %v11586_v26  ;;  %v602_v58 = vrot.slane %v588_v54, %v11586_v26 }
 0x23a   : > { %v939_v59 = vpop.trf.xlu0  ;;  %v907_v60 = vpop.trf.xlu1 }
 0x23e   : > { %v971_v61 = vpop.trf.xlu0  ;;  %v955_v62 = vpop.trf.xlu1 }
 0x23f   : > { %v1027_v2 = vcombine.low %v907_v60, %v971_v61  ;;  %v618_v60 = vrot.slane %v604_v56, %v11586_v26 }
 0x241   : > { %v1034_v9 = vrot.slane %v1027_v2, %v11586_v26 }
 0x242   : > { %v987_v63 = vpop.trf.xlu1  ;;  %v923_v0 = vpop.trf.xlu0 }
 0x243   : > { %v1061_v3 = vcombine.low %v923_v0, %v987_v63  ;;  %v635_v63 = vcombine.low %v602_v58, %v618_v60  ;;  %v636_v0 = vcombine.high %v602_v58, %v618_v60 }
 0x245   : > { %v1068_v10 = vrot.slane %v1061_v3, %v11586_v26  ;;  %v643_v2 = vrot.slane %v635_v63, %v11592_v38  ;;  %v650_v11 = vrot.slane %v636_v0, %v11592_v38 }
 0x246   : > { %v1019_v4 = vpop.trf.xlu1  ;;  %v1003_v5 = vpop.trf.xlu0 }
 0x247   : > { %v1069_v6 = vcombine.low %v955_v62, %v1019_v4  ;;  %v1035_v8 = vcombine.low %v939_v59, %v1003_v5  ;;  %v611_v59 = vrot.slane %v603_v55, %v11586_v26 }
 0x249   : > { %v1076_v14 = vrot.slane %v1069_v6, %v11586_v26  ;;  %v1042_v15 = vrot.slane %v1035_v8, %v11586_v26  ;;  %v619_v61 = vcombine.low %v595_v57, %v611_v59  ;;  %v620_v62 = vcombine.high %v595_v57, %v611_v59 }
 0x24a   : > { %v653_v6 = vcombine.high %v643_v2, %v11404_v1  ;;  %v654_v8 = vcombine.high %v650_v11, %v11404_v1 }
 0x24b   : > { %v1077_v17 = vcombine.low %v1068_v10, %v1076_v14  ;;  %v1078_v18 = vcombine.high %v1068_v10, %v1076_v14  ;;  %v1043_v19 = vcombine.low %v1034_v9, %v1042_v15  ;;  %v1044_v20 = vcombine.high %v1034_v9, %v1042_v15 }
 0x24c   : > { %v627_v7 = vrot.slane %v619_v61, %v11592_v38  ;;  %v634_v13 = vrot.slane %v620_v62, %v11592_v38 }
 0x24d   : > { %v1051_v21 = vrot.slane %v1043_v19, %v11592_v38  ;;  %v1085_v22 = vrot.slane %v1077_v17, %v11592_v38  ;;  %v1058_v23 = vrot.slane %v1044_v20, %v11592_v38  ;;  %v1092_v24 = vrot.slane %v1078_v18, %v11592_v38 }
 0x24e   : > { %v651_v4 = vcombine.high %v627_v7, %v11404_v1  ;;  %v652_v5 = vcombine.high %v634_v13, %v11404_v1  ;;  %v10489_v18 = vpack.c.bf16 %v643_v2, %v627_v7  ;;  %v10490_v19 = vpack.c.bf16 %v650_v11, %v634_v13 }
 0x24f   : > { %v1097_v25 = vpack.i.b16 %v1085_v22, %v1051_v21  ;;  %v1099_v27 = vshrl.u32 %v1051_v21, 16  ;;  %v1100_v28 = vshrl.u32 %v1085_v22, 16  ;;  %v1115_v29 = vshrl.u32 %v1058_v23, 16 }
 0x250   : > { %v1116_v31 = vshrl.u32 %v1092_v24, 16  ;;  %v1059_v32 = vcombine.high %v1051_v21, %v11410_v16  ;;  %v1093_v33 = vcombine.high %v1085_v22, %v11410_v16  ;;  %v1113_v34 = vpack.i.b16 %v1092_v24, %v1058_v23 }
 0x251   : > { %1127 = vxpose.xlu0.c.b16.start.end [1/1] (short) (narrow) %v1097_v25, 16  ;;  %v1101_v30 = vpack.i.b16 %v1100_v28, %v1099_v27  ;;  %v1060_v35 = vcombine.high %v1058_v23, %v11410_v16  ;;  %v1094_v40 = vcombine.high %v1092_v24, %v11410_v16  ;;  %v10491_v14 = vpack.c.bf16 %v653_v6, %v651_v4 }
 0x252   : > { %v1117_v36 = vpack.i.b16 %v1116_v31, %v1115_v29  ;;  %v1107_v37 = vshrl.u32 %v1059_v32, 16  ;;  %v1108_v39 = vshrl.u32 %v1093_v33, 16  ;;  %v1105_v41 = vpack.i.b16 %v1093_v33, %v1059_v32 }
 0x253   : > { %1143 = vxpose.xlu1.c.b16.start.end [1/1] (short) (narrow) %v1101_v30, 16  ;;  %v1123_v43 = vshrl.u32 %v1060_v35, 16  ;;  %v1124_v44 = vshrl.u32 %v1094_v40, 16  ;;  %v1121_v45 = vpack.i.b16 %v1094_v40, %v1060_v35  ;;  %v10492_v15 = vpack.c.bf16 %v654_v8, %v652_v5 }
 0x254   : > { %v1109_v42 = vpack.i.b16 %v1108_v39, %v1107_v37  ;;  %v869_v23 = vrot.slane %v10491_v14, %v11586_v26  ;;  %v844_v28 = vrot.slane %v10489_v18, %v11586_v26  ;;  %v852_v29 = vrot.slane %v10490_v19, %v11586_v26 }
 0x255   : > { %1191 = vxpose.xlu0.c.b16.start.end [1/1] (short) (narrow) %v1113_v34, 16  ;;  %v1125_v46 = vpack.i.b16 %v1124_v44, %v1123_v43  ;;  %v877_v24 = vrot.slane %v10492_v15, %v11586_v26 }
 0x256   : > { %v853_v39 = vcombine.low %v844_v28, %v852_v29 }
 0x257   : > { %1207 = vxpose.xlu1.c.b16.start.end [1/1] (short) (narrow) %v1117_v36, 16  ;;  %v878_v34 = vcombine.low %v869_v23, %v877_v24 }
 0x259   : > { %1159 = vxpose.xlu0.c.b16.start.end [1/1] (short) (narrow) %v1105_v41, 16 }
 0x25b   : > { %1175 = vxpose.xlu1.c.b16.start.end [1/1] (short) (narrow) %v1109_v42, 16  ;;  %v885_v42 = vrot.slane %v878_v34, %v11592_v38 }
 0x25d   : > { %1223 = vxpose.xlu0.c.b16.start.end [1/1] (short) (narrow) %v1121_v45, 16  ;;  %v860_v45 = vrot.slane %v853_v39, %v11592_v38  ;;  %v891_v51 = vshrl.u32 %v885_v42, 16  ;;  %v886_v63 = vcombine.high %v885_v42, %v11410_v16 }
 0x25f   : > { %1239 = vxpose.xlu1.c.b16.start.end [1/1] (short) (narrow) %v1125_v46, 16  ;;  %v889_v58 = vpack.i.b16 %v885_v42, %v860_v45  ;;  %v890_v59 = vshrl.u32 %v860_v45, 16  ;;  %v861_v7 = vcombine.high %v860_v45, %v11410_v16  ;;  %v897_v13 = vshrl.u32 %v886_v63, 16 }
 0x261   : > { %v892_v62 = vpack.i.b16 %v891_v51, %v890_v59  ;;  %v895_v2 = vpack.i.b16 %v886_v63, %v861_v7  ;;  %v896_v11 = vshrl.u32 %v861_v7, 16 }
 0x263   : > { %755 = vrot.lane.b32.xlu1 %v11617_v49, %s12901_s17  ;;  %s10701_s17 = sshll.u32 %s11503_s25, 7 }
 0x266   : > { %752 = vrot.lane.b32.xlu0 %v11617_v49, %s12905_s15  ;;  %s434_s15 = scalar_lea.vmem %s12920_s1, %s10479_s28 }
 0x2b3   : > { %v1135_v12 = vpop.trf.xlu0 }
 0x2b5   : > { %v1151_v3 = vpop.trf.xlu1 }
 0x2b7   : > { %v1199_v9 = vpop.trf.xlu0 }
 0x2b8   : > { %v1255_v21 = vcombine.low %v1135_v12, %v1199_v9  ;;  %v898_v12 = vpack.i.b16 %v897_v13, %v896_v11 }
 0x2b9   : > { %v1215_v10 = vpop.trf.xlu1 }
 0x2ba   : > { %v1280_v25 = vcombine.low %v1151_v3, %v1215_v10  ;;  %v1262_v31 = vrot.slane %v1255_v21, %v11586_v26 }
 0x2bb   : > { %v1167_v17 = vpop.trf.xlu0 }
 0x2bc   : > { %v1287_v35 = vrot.slane %v1280_v25, %v11586_v26 }
 0x2bd   : > { %v1183_v20 = vpop.trf.xlu1 }
 0x2bf   : > { %v1231_v22 = vpop.trf.xlu0 }
 0x2c0   : > { %v1263_v27 = vcombine.low %v1167_v17, %v1231_v22 }
 0x2c1   : > { %v1247_v30 = vpop.trf.xlu1 }
 0x2c2   : > { %v1270_v32 = vrot.slane %v1263_v27, %v11586_v26  ;;  %v1288_v33 = vcombine.low %v1183_v20, %v1247_v30 }
 0x2c4   : > { %v1271_v36 = vcombine.low %v1262_v31, %v1270_v32  ;;  %v1295_v37 = vrot.slane %v1288_v33, %v11586_v26 }
 0x2c6   : > { %v1296_v40 = vcombine.low %v1287_v35, %v1295_v37  ;;  %v1278_v41 = vrot.slane %v1271_v36, %v11592_v38 }
 0x2c8   : > { %v1303_v43 = vrot.slane %v1296_v40, %v11592_v38  ;;  %v1279_v44 = vcombine.high %v1278_v41, %v11410_v16  ;;  %v1308_v47 = vshrl.u32 %v1278_v41, 16 }
 0x2ca   : > { %v1307_v46 = vpack.i.b16 %v1303_v43, %v1278_v41  ;;  %v1309_v48 = vshrl.u32 %v1303_v43, 16  ;;  %v1304_v50 = vcombine.high %v1303_v43, %v11410_v16  ;;  %v1314_v52 = vshrl.u32 %v1279_v44, 16 }
 0x2cc   : > { %v1323_v53 = vsel %vm1321_vm2, %v1307_v46, 0  ;;  %v1310_v54 = vpack.i.b16 %v1309_v48, %v1308_v47  ;;  %v1313_v55 = vpack.i.b16 %v1304_v50, %v1279_v44  ;;  %v1315_v56 = vshrl.u32 %v1304_v50, 16 }
 0x2cd   : > { %10843 = vmatpush3.bf16.msra.mxu0 %v1323_v53 }
 0x2ce   : > { %v1369_v57 = vsel %vm1321_vm2, %v1310_v54, 0  ;;  %10854 = vmatprep.subr.bf16.mxu0 %v11404_v1  ;;  %v1316_v60 = vpack.i.b16 %v1315_v56, %v1314_v52  ;;  %v1415_v61 = vsel %vm1321_vm2, %v1313_v55, 0 }
 0x2cf   : > { %10849 = vmatpush3.bf16.msra.mxu1 %v1369_v57 }
 0x2d0   : > { %10845 = vmatmul.mubr.msk.bf16.vlgmr.msra.gmra.mxu0 %vm1317_vm3, %v889_v58  ;;  %10860 = vmatprep.subr.bf16.mxu1 %v11404_v1  ;;  %v1461_v0 = vsel %vm1321_vm2, %v1316_v60, 0 }
 0x2d1   : > { %10855 = vmatpush3.bf16.msra.mxu0 %v1415_v61  ;;  %10856 = vmatprep.mubr.msk.bf16.mxu0 %vm11405_vm0, %v11404_v1 }
 0x2d2   : > { %10851 = vmatmul.mubr.msk.bf16.vlgmr.msra.gmra.mxu1 %vm1317_vm3, %v892_v62  ;;  %10866 = vmatprep.subr.bf16.mxu0 %v11404_v1 }
 0x2d3   : > { %10861 = vmatpush3.bf16.msra.mxu1 %v1461_v0  ;;  %10862 = vmatprep.mubr.msk.bf16.mxu1 %vm11405_vm0, %v11404_v1 }
 0x2d4   : > { %10872 = vmatprep.subr.bf16.mxu1 %v11404_v1 }
 0x2d5   : > { %v756_v29 = vpop.permute.xlu1 %755 }
 0x2d6   : > { %v761_v32 = vcombine.low %v11617_v49, %v756_v29  ;;  %v762_v35 = vcombine.high %v11617_v49, %v756_v29 }
 0x2d8   : > { %10857 = vmatmul.mubr.msk.bf16.vlgmr.msra.gmra.mxu0 %vm1317_vm3, %v895_v2  ;;  %v753_v33 = vpop.permute.xlu0 %752  ;;  %v769_v39 = vrot.slane %v761_v32, %v11586_v26  ;;  %v776_v42 = vrot.slane %v762_v35, %v11586_v26 }
 0x2d9   : > { %10868 = vmatprep.mubr.msk.bf16.mxu0 %vm11405_vm0, %v11404_v1 }
 0x2da   : > { %10863 = vmatmul.mubr.msk.bf16.vlgmr.msra.gmra.mxu1 %vm1317_vm3, %v898_v12 }
 0x2db   : > { %10874 = vmatprep.mubr.msk.bf16.mxu1 %vm11405_vm0, %v11404_v1 }
 0x390   : > { %v11679_v3 = vpop.f32.mrf.mxu0 }
 0x391   : > { %v1503_v4 = vsel %vm1317_vm3, %v11679_v3, -inf }
 0x392   : > { %v10846_v5 = vpop.f32.mrf.mxu0  ;;  %1504 = vmax.xlane.f32.xlu0 %v1503_v4  ;;  %v11683_v6 = vpop.f32.mrf.mxu1 }
 0x393   : > { %v1506_v8 = vsel %vm1317_vm3, %v11683_v6, -inf }
 0x394   : > { %v1362_v9 = vpop.f32.mrf.mxu0  ;;  %1507 = vmax.xlane.f32.xlu1 %v1506_v8  ;;  %v10852_v10 = vpop.f32.mrf.mxu1 }
 0x396   : > { %v10847_v14 = vpop.f32.mrf.mxu0  ;;  %v1408_v15 = vpop.f32.mrf.mxu1 }
 0x398   : > { %v10853_v17 = vpop.f32.mrf.mxu1  ;;  %v11687_v18 = vpop.f32.mrf.mxu0 }
 0x399   : > { %v1509_v19 = vsel %vm1317_vm3, %v11687_v18, -inf }
 0x39a   : > { %v10858_v20 = vpop.f32.mrf.mxu0  ;;  %1510 = vmax.xlane.f32.xlu0 %v1509_v19  ;;  %v11691_v21 = vpop.f32.mrf.mxu1 }
 0x39b   : > { %v1512_v22 = vsel %vm1317_vm3, %v11691_v21, -inf }
 0x39c   : > { %v1454_v23 = vpop.f32.mrf.mxu0  ;;  %1513 = vmax.xlane.f32.xlu1 %v1512_v22  ;;  %v10864_v24 = vpop.f32.mrf.mxu1 }
 0x39e   : > { %v10859_v25 = vpop.f32.mrf.mxu0  ;;  %v1500_v27 = vpop.f32.mrf.mxu1 }
 0x3a0   : > { %v10865_v28 = vpop.f32.mrf.mxu1 }
 0x3ad   : > { %758 = vrot.lane.b32.xlu1 %v11617_v49, %s12897_s29  ;;  %s12924_s29 = smov 16  }
 0x41b   : > { %v1505_v63 = vpop.xlane.xlu0 %1504 }
 0x41c   : > { %v1515_v27 = vsub.f32 %v11679_v3, %v1505_v63 }
 0x41d   : > { %v11697_v30 = vpop.xlane.xlu1 %1507 }
 0x41e   : > { %v1516_v32 = vsub.f32 %v11683_v6, %v11697_v30 }
 0x423   : > { %v1511_v0 = vpop.xlane.xlu0 %1510 }
 0x425   : > { %v11699_v31 = vpop.xlane.xlu1 %1513 }
 0x426   : > { %v1518_v6 = vsub.f32 %v11691_v21, %v11699_v31 }
 0x429   : > { %v759_v34 = vpop.permute.xlu1 %758 }
 0x42a   : > { %v777_v36 = vcombine.low %v753_v33, %v759_v34  ;;  %v778_v37 = vcombine.high %v753_v33, %v759_v34 }
 0x42c   : > { %v785_v40 = vrot.slane %v777_v36, %v11586_v26  ;;  %v792_v41 = vrot.slane %v778_v37, %v11586_v26 }
 0x42e   : > { %v793_v43 = vcombine.low %v769_v39, %v785_v40  ;;  %v794_v44 = vcombine.high %v769_v39, %v785_v40  ;;  %v809_v46 = vcombine.low %v776_v42, %v792_v41  ;;  %v810_v52 = vcombine.high %v776_v42, %v792_v41 }
 0x42f   : > { %v1519_v40 = vmul.f32 1.442695, %v1515_v27  ;;  %v1517_v41 = vsub.f32 %v11687_v18, %v1511_v0  ;;  %v1525_v18 = vmul.f32 1.442695, %v1518_v6 }
 0x430   : > { %v801_v45 = vrot.slane %v793_v43, %v11592_v38  ;;  %v808_v49 = vrot.slane %v794_v44, %v11592_v38  ;;  %v817_v51 = vrot.slane %v809_v46, %v11592_v38  ;;  %v824_v56 = vrot.slane %v810_v52, %v11592_v38 }
 0x431   : > { %v1521_v44 = vmul.f32 1.442695, %v1516_v32  ;;  %11261 = vpow2.f32 %v1519_v40 }
 0x432   : > { %v829_v47 = vpack.c.bf16 %v801_v45, %v801_v45  ;;  %v825_v48 = vcombine.high %v801_v45, %v11404_v1  ;;  %v831_v53 = vpack.c.bf16 %v808_v49, %v808_v49  ;;  %v826_v54 = vcombine.high %v808_v49, %v11404_v1 }
 0x433   : > { %v833_v55 = vpack.c.bf16 %v817_v51, %v817_v51  ;;  %v827_v58 = vcombine.high %v817_v51, %v11404_v1  ;;  %v835_v59 = vpack.c.bf16 %v824_v56, %v824_v56  ;;  %v828_v61 = vcombine.high %v824_v56, %v11404_v1 }
 0x434   : > { %1551 = vxpose.xlu0.c.b16.start.end [1/1] (short) (narrow) %v829_v47, 16  ;;  %v830_v50 = vpack.c.bf16 %v825_v48, %v825_v48  ;;  %v832_v57 = vpack.c.bf16 %v826_v54, %v826_v54  ;;  %v1523_v47 = vmul.f32 1.442695, %v1517_v41  ;;  %11263 = vpow2.f32 %v1521_v44 }
 0x435   : > { %v834_v60 = vpack.c.bf16 %v827_v58, %v827_v58  ;;  %v836_v62 = vpack.c.bf16 %v828_v61, %v828_v61 }
 0x436   : > { %1567 = vxpose.xlu1.c.b16.start.end [1/1] (short) (narrow) %v830_v50, 16  ;;  %11265 = vpow2.f32 %v1523_v47 }
 0x437   : > { %11267 = vpow2.f32 %v1525_v18 }
 0x438   : > { %1583 = vxpose.xlu0.c.b16.start.end [1/1] (short) (narrow) %v831_v53, 16 }
 0x43a   : > { %1615 = vxpose.xlu1.c.b16.start.end [1/1] (short) (narrow) %v833_v55, 16 }
 0x43c   : > { %1599 = vxpose.xlu0.c.b16.start.end [1/1] (short) (narrow) %v832_v57, 16 }
 0x43e   : > { %1647 = vxpose.xlu1.c.b16.start.end [1/1] (short) (narrow) %v835_v59, 16  ;;  %v11262_v21 = vpop.eup %11261 }
 0x43f   : > { %v1527_v53 = vsel %vm1317_vm3, %v11262_v21, 0.0 }
 0x440   : > { %1631 = vxpose.xlu0.c.b16.start.end [1/1] (short) (narrow) %v834_v60, 16 }
 0x441   : > { %v11264_v31 = vpop.eup %11263 }
 0x442   : > { %v1530_v55 = vsel %vm1317_vm3, %v11264_v31, 0.0 }
 0x443   : > { %v11266_v54 = vpop.eup %11265 }
 0x444   : > { %1663 = vxpose.xlu0.c.b16.start.end [1/1] (short) (narrow) %v836_v62, 16  ;;  %v11268_v56 = vpop.eup %11267  ;;  %v1533_v57 = vsel %vm1317_vm3, %v11266_v54, 0.0 }
 0x445   : > { %v1536_v58 = vsel %vm1317_vm3, %v11268_v56, 0.0 }
 0x496   : > { %v1559_v7 = vpop.trf.xlu0 }
 0x498   : > { %v1575_v13 = vpop.trf.xlu1 }
 0x49a   : > { %v1591_v2 = vpop.trf.xlu0 }
 0x49c   : > { %v1623_v11 = vpop.trf.xlu1 }
 0x49d   : > { %v1679_v4 = vcombine.low %v1559_v7, %v1623_v11 }
 0x49e   : > { %v1607_v12 = vpop.trf.xlu0 }
 0x49f   : > { %v1686_v14 = vrot.slane %v1679_v4, %v11586_v26 }
 0x4a0   : > { %v1655_v5 = vpop.trf.xlu1 }
 0x4a1   : > { %v1687_v8 = vcombine.low %v1591_v2, %v1655_v5 }
 0x4a2   : > { %v1639_v9 = vpop.trf.xlu0 }
 0x4a3   : > { %v1694_v10 = vrot.slane %v1687_v8, %v11586_v26  ;;  %v1713_v15 = vcombine.low %v1575_v13, %v1639_v9 }
 0x4a5   : > { %v1695_v17 = vcombine.low %v1686_v14, %v1694_v10  ;;  %v1720_v22 = vrot.slane %v1713_v15, %v11586_v26  ;;  %v1696_v33 = vcombine.high %v1686_v14, %v1694_v10 }
 0x4a6   : > { %v1671_v19 = vpop.trf.xlu0 }
 0x4a7   : > { %v1721_v20 = vcombine.low %v1607_v12, %v1671_v19  ;;  %v1703_v24 = vrot.slane %v1695_v17, %v11592_v38  ;;  %v1710_v46 = vrot.slane %v1696_v33, %v11592_v38 }
 0x4a9   : > { %v1728_v23 = vrot.slane %v1721_v20, %v11586_v26  ;;  %v1751_v34 = vshrl.u32 %v1703_v24, 16  ;;  %v1711_v37 = vcombine.high %v1703_v24, %v11410_v16  ;;  %v1767_v51 = vshrl.u32 %v1710_v46, 16 }
 0x4aa   : > { %v1712_v60 = vcombine.high %v1710_v46, %v11410_v16 }
 0x4ab   : > { %v1729_v25 = vcombine.low %v1720_v22, %v1728_v23  ;;  %v1730_v28 = vcombine.high %v1720_v22, %v1728_v23  ;;  %v1759_v45 = vshrl.u32 %v1711_v37, 16 }
 0x4ac   : > { %v1775_v63 = vshrl.u32 %v1712_v60, 16 }
 0x4ad   : > { %v1737_v29 = vrot.slane %v1729_v25, %v11592_v38  ;;  %v1744_v43 = vrot.slane %v1730_v28, %v11592_v38 }
 0x4af   : > { %v1749_v35 = vpack.i.b16 %v1737_v29, %v1703_v24  ;;  %v1752_v36 = vshrl.u32 %v1737_v29, 16  ;;  %v1745_v39 = vcombine.high %v1737_v29, %v11410_v16  ;;  %v1768_v49 = vshrl.u32 %v1744_v43, 16 }
 0x4b0   : > { %v1765_v50 = vpack.i.b16 %v1744_v43, %v1710_v46  ;;  %v1746_v59 = vcombine.high %v1744_v43, %v11410_v16 }
 0x4b1   : > { %1779 = vxpose.xlu1.c.b16.start.end [1/1] (short) (narrow) %v1749_v35, 16  ;;  %v1753_v42 = vpack.i.b16 %v1752_v36, %v1751_v34  ;;  %v1760_v3 = vshrl.u32 %v1745_v39, 16  ;;  %v1757_v30 = vpack.i.b16 %v1745_v39, %v1711_v37  ;;  %v1769_v52 = vpack.i.b16 %v1768_v49, %v1767_v51 }
 0x4b2   : > { %v1776_v61 = vshrl.u32 %v1746_v59, 16  ;;  %v1773_v62 = vpack.i.b16 %v1746_v59, %v1712_v60 }
 0x4b3   : > { %1795 = vxpose.xlu0.c.b16.start.end [1/1] (short) (narrow) %v1753_v42, 16  ;;  %v1761_v48 = vpack.i.b16 %v1760_v3, %v1759_v45 }
 0x4b4   : > { %v1777_v0 = vpack.i.b16 %v1776_v61, %v1775_v63 }
 0x4b5   : > { %1811 = vxpose.xlu1.c.b16.start.end [1/1] (short) (narrow) %v1757_v30, 16 }
 0x4b7   : > { %1827 = vxpose.xlu0.c.b16.start.end [1/1] (short) (narrow) %v1761_v48, 16 }
 0x4b9   : > { %1843 = vxpose.xlu1.c.b16.start.end [1/1] (short) (narrow) %v1765_v50, 16 }
 0x4bb   : > { %1859 = vxpose.xlu0.c.b16.start.end [1/1] (short) (narrow) %v1769_v52, 16 }
 0x4c6   : > { %1528 = vadd.xlane.f32.xlu1 %v1527_v53 }
 0x4c8   : > { %1531 = vadd.xlane.f32.xlu0 %v1530_v55 }
 0x4ca   : > { %1534 = vadd.xlane.f32.xlu1 %v1533_v57 }
 0x4cc   : > { %1537 = vadd.xlane.f32.xlu0 %v1536_v58 }
 0x4f7   : > { %1875 = vxpose.xlu1.c.b16.start.end [1/1] (short) (narrow) %v1773_v62, 16 }
 0x4f9   : > { %1891 = vxpose.xlu0.c.b16.start.end [1/1] (short) (narrow) %v1777_v0, 16 }
 0x513   : > { %v1787_v7 = vpop.trf.xlu1 }
 0x515   : > { %v1803_v13 = vpop.trf.xlu0 }
 0x517   : > { %v1819_v2 = vpop.trf.xlu1 }
 0x519   : > { %v1835_v11 = vpop.trf.xlu0 }
 0x51b   : > { %v1851_v12 = vpop.trf.xlu1 }
 0x51c   : > { %v1907_v19 = vcombine.low %v1787_v7, %v1851_v12 }
 0x51d   : > { %v1867_v4 = vpop.trf.xlu0 }
 0x51e   : > { %v1932_v15 = vcombine.low %v1803_v13, %v1867_v4  ;;  %v1914_v32 = vrot.slane %v1907_v19, %v11586_v26 }
 0x520   : > { %v1939_v25 = vrot.slane %v1932_v15, %v11586_v26 }
 0x54f   : > { %v1529_v5 = vpop.xlane.xlu1 %1528 }
 0x550   : > { %11269 = vrcp.f32 %v1529_v5 }
 0x551   : > { %v1532_v8 = vpop.xlane.xlu0 %1531 }
 0x552   : > { %11271 = vrcp.f32 %v1532_v8 }
 0x553   : > { %v1535_v9 = vpop.xlane.xlu1 %1534 }
 0x554   : > { %11273 = vrcp.f32 %v1535_v9 }
 0x555   : > { %v1538_v10 = vpop.xlane.xlu0 %1537 }
 0x556   : > { %11275 = vrcp.f32 %v1538_v10 }
 0x559   : > { %v1883_v14 = vpop.trf.xlu1 }
 0x55a   : > { %v1915_v17 = vcombine.low %v1819_v2, %v1883_v14 }
 0x55b   : > { %v1899_v20 = vpop.trf.xlu0 }
 0x55c   : > { %v1940_v22 = vcombine.low %v1835_v11, %v1899_v20  ;;  %v1922_v24 = vrot.slane %v1915_v17, %v11586_v26 }
 0x55d   : > { %v11270_v23 = vpop.eup %11269 }
 0x55e   : > { %v1947_v27 = vrot.slane %v1940_v22, %v11586_v26  ;;  %v1540_v28 = vmul.f32 %v11270_v23, %v11262_v21  ;;  %v1923_v37 = vcombine.low %v1914_v32, %v1922_v24  ;;  %v11225_v32 = vld [vmem:[%s12886_s4 + $0x18] sm:$0xff]  }
 0x55f   : > { %v11272_v29 = vpop.eup %11271 }
 0x560   : > { %v1948_v33 = vcombine.low %v1939_v25, %v1947_v27  ;;  %v1547_v34 = vpack.c.bf16 %v1540_v28, %v1540_v28  ;;  %v1542_v35 = vmul.f32 %v11272_v29, %v11264_v31  ;;  %v1930_v43 = vrot.slane %v1923_v37, %v11592_v38 }
 0x561   : > { %v11274_v36 = vpop.eup %11273 }
 0x562   : > { %v1973_v39 = vsel %vm1317_vm3, %v1547_v34, 0  ;;  %v1955_v41 = vrot.slane %v1948_v33, %v11592_v38  ;;  %v1548_v42 = vpack.c.bf16 %v1542_v35, %v1542_v35  ;;  %v1544_v3 = vmul.f32 %v11274_v36, %v11266_v54 }
 0x563   : > { %v11276_v40 = vpop.eup %11275  ;;  %10867 = vmatpush3.bf16.xpose.msra.mxu0 %v1973_v39  ;;  %v1960_v47 = vshrl.u32 %v1930_v43, 16  ;;  %v1931_v51 = vcombine.high %v1930_v43, %v11410_v16 }
 0x564   : > { %10878 = vmatprep.subr.bf16.mxu0 %v11404_v1  ;;  %v2019_v44 = vsel %vm1317_vm3, %v1548_v42, 0  ;;  %v1546_v6 = vmul.f32 %v11276_v40, %v11268_v56  ;;  %v1549_v30 = vpack.c.bf16 %v1544_v3, %v1544_v3  ;;  %v1961_v45 = vshrl.u32 %v1955_v41, 16  ;;  %v11226_v42 = vld [vmem:[%s12886_s4 + $0x10] sm:$0xff]  }
 0x565   : > { %10873 = vmatpush3.bf16.xpose.msra.mxu1 %v2019_v44  ;;  %v1959_v46 = vpack.i.b16 %v1955_v41, %v1930_v43  ;;  %v1956_v18 = vcombine.high %v1955_v41, %v11410_v16  ;;  %v1966_v53 = vshrl.u32 %v1931_v51, 16 }
 0x566   : > { %10884 = vmatprep.subr.bf16.mxu1 %v11404_v1  ;;  %v1550_v48 = vpack.c.bf16 %v1546_v6, %v1546_v6  ;;  %v2065_v49 = vsel %vm1317_vm3, %v1549_v30, 0  ;;  %v1962_v50 = vpack.i.b16 %v1961_v45, %v1960_v47 }
 0x567   : > { %v1967_v21 = vshrl.u32 %v1956_v18, 16  ;;  %v1965_v31 = vpack.i.b16 %v1956_v18, %v1931_v51 }
 0x568   : > { %v2111_v52 = vsel %vm1317_vm3, %v1550_v48, 0 }
 0x569   : > { %v1968_v54 = vpack.i.b16 %v1967_v21, %v1966_v53 }
 0x56a   : > { %10869 = vmatmul.mubr.msk.bf16.vlgmr.msra.gmra.mxu0 %vm1317_vm3, %v1959_v46 }
 0x56b   : > { %10879 = vmatpush3.bf16.xpose.msra.mxu0 %v2065_v49  ;;  %10880 = vmatprep.mubr.msk.bf16.mxu0 %vm11405_vm0, %v11404_v1 }
 0x56c   : > { %10890 = vmatprep.subr.bf16.mxu0 %v11404_v1  ;;  %10875 = vmatmul.mubr.msk.bf16.vlgmr.msra.gmra.mxu1 %vm1317_vm3, %v1962_v50 }
 0x56d   : > { %10885 = vmatpush3.bf16.xpose.msra.mxu1 %v2111_v52  ;;  %10886 = vmatprep.mubr.msk.bf16.mxu1 %vm11405_vm0, %v11404_v1 }
 0x56e   : > { %10898 = vmatprep.subr.bf16.mxu1 %v11404_v1 }
 0x572   : > { %10881 = vmatmul.mubr.msk.bf16.vlgmr.msra.gmra.mxu0 %vm1317_vm3, %v1965_v31 }
 0x573   : > { %10894 = vmatprep.mubr.msk.bf16.mxu0 %vm11405_vm0, %v11404_v1  ;;  %10891 = vmatpush3.bf16.msra.mxu0 %v11225_v32 }
 0x574   : > { %10887 = vmatmul.mubr.msk.bf16.vlgmr.msra.gmra.mxu1 %vm1317_vm3, %v1968_v54  ;;  %10892 = vmatprep.subr.bf16.mxu0 %v11404_v1 }
 0x575   : > { %10902 = vmatprep.mubr.msk.bf16.mxu1 %vm11405_vm0, %v11404_v1 }
 0x577   : > { %10893 = vmatpush3.bf16.msra.mxu0 %v11226_v42 }
 0x578   : > { %10906 = vmatprep.subr.bf16.mxu0 %v11404_v1 }
 0x62a   : > { %v2009_v55 = vpop.f32.mrf.mxu0 }
 0x62b   : > { %2153 = vxpose.xlu1.b32.start.end [1/1] (short) (narrow) %v2009_v55, 8 }
 0x62c   : > { %v10870_v56 = vpop.f32.mrf.mxu0  ;;  %v2055_v57 = vpop.f32.mrf.mxu1 }
 0x62d   : > { %2185 = vxpose.xlu0.b32.start.end [1/1] (short) (narrow) %v2055_v57, 8 }
 0x62e   : > { %v2012_v58 = vpop.f32.mrf.mxu0  ;;  %v10876_v59 = vpop.f32.mrf.mxu1 }
 0x62f   : > { %v11227_v58 = vld [vmem:[%s12886_s4 + $0x38] sm:$0xff]  }
 0x630   : > { %v10871_v60 = vpop.f32.mrf.mxu0  ;;  %v2058_v61 = vpop.f32.mrf.mxu1 }
 0x632   : > { %v2101_v62 = vpop.f32.mrf.mxu0  ;;  %v10877_v63 = vpop.f32.mrf.mxu1 }
 0x633   : > { %2217 = vxpose.xlu0.b32.start.end [1/1] (short) (narrow) %v2101_v62, 8  ;;  %v439_v62 = vld [vmem:[%s434_s15] sm:$0xff]  ;;  %v440_v63 = vld [vmem:[%s434_s15 + $0x8] sm:$0xff] }
 0x634   : > { %v10882_v0 = vpop.f32.mrf.mxu0  ;;  %v2147_v7 = vpop.f32.mrf.mxu1 }
 0x635   : > { %2249 = vxpose.xlu1.b32.start.end [1/1] (short) (narrow) %v2147_v7, 8 }
 0x636   : > { %v2104_v13 = vpop.f32.mrf.mxu0  ;;  %v10888_v2 = vpop.f32.mrf.mxu1 }
 0x637   : > { %v11228_v2 = vld [vmem:[%s12886_s4 + $0x30] sm:$0xff]  }
 0x638   : > { %v10883_v11 = vpop.f32.mrf.mxu0  ;;  %v2150_v12 = vpop.f32.mrf.mxu1 }
 0x639   : > { %v10507_v12 = vld [vmem:[%s12891_s9 + $0x1] ss:$0 sm:$0xff] }
 0x63a   : > { %v10889_v4 = vpop.f32.mrf.mxu1 }
 0x6a7   : > { %v2169_v8 = vpop.trf.xlu1 }
 0x6a9   : > { %v2201_v5 = vpop.trf.xlu0 }
 0x6af   : > { %v2233_v9 = vpop.trf.xlu0 }
 0x6b0   : > { %v2281_v10 = vcombine.low %v2169_v8, %v2233_v9  ;;  %v2282_v14 = vcombine.high %v2169_v8, %v2233_v9 }
 0x6b1   : > { %v2265_v15 = vpop.trf.xlu1 }
 0x6b2   : > { %v2297_v17 = vcombine.low %v2201_v5, %v2265_v15  ;;  %v2298_v19 = vcombine.high %v2201_v5, %v2265_v15  ;;  %v2289_v20 = vrot.slane %v2281_v10, %v11586_v26  ;;  %v2296_v22 = vrot.slane %v2282_v14, %v11586_v26 }
 0x6b4   : > { %v2305_v23 = vrot.slane %v2297_v17, %v11586_v26  ;;  %v2312_v24 = vrot.slane %v2298_v19, %v11586_v26 }
 0x6b6   : > { %v2313_v25 = vcombine.low %v2289_v20, %v2305_v23  ;;  %v2314_v27 = vcombine.high %v2289_v20, %v2305_v23  ;;  %v2329_v28 = vcombine.low %v2296_v22, %v2312_v24  ;;  %v2330_v29 = vcombine.high %v2296_v22, %v2312_v24  ;;  %v10525_v20 = vld [vmem:[%s12891_s9 + $0x3] ss:$0 sm:$0xff] }
 0x6b8   : > { %v2321_v33 = vrot.slane %v2313_v25, %v11592_v38  ;;  %v2328_v34 = vrot.slane %v2314_v27, %v11592_v38  ;;  %v2337_v35 = vrot.slane %v2329_v28, %v11592_v38  ;;  %v2344_v36 = vrot.slane %v2330_v29, %v11592_v38 }
 0x6ba   : > { %v2349_v37 = vcombine.low %v2321_v33, %v2328_v34  ;;  %v10501_v39 = vcombine.high %v2321_v33, %v2328_v34  ;;  %v2365_v40 = vcombine.low %v2337_v35, %v2344_v36  ;;  %v10502_v41 = vcombine.high %v2337_v35, %v2344_v36  ;;  %v11229_v33 = vld [vmem:[%s12886_s4 + $0x28] sm:$0xff]   ;;  %v11230_v34 = vld [vmem:[%s12886_s4 + $0x20] sm:$0xff]  }
 0x6bb   : > { %10899 = vmatpush3.bf16.msra.mxu1 %v11229_v33 }
 0x6bc   : > { %v2356_v3 = vrot.slane %v2349_v37, %v11586_v26  ;;  %v2364_v43 = vrot.slane %v10501_v39, %v11586_v26  ;;  %v2372_v44 = vrot.slane %v2365_v40, %v11586_v26  ;;  %v2380_v6 = vrot.slane %v10502_v41, %v11586_v26  ;;  %10900 = vmatprep.subr.bf16.mxu1 %v11404_v1 }
 0x6be   : > { %v2382_v30 = vcombine.high %v2356_v3, %v2364_v43  ;;  %v2398_v45 = vcombine.high %v2372_v44, %v2380_v6  ;;  %v2381_v46 = vcombine.low %v2356_v3, %v2364_v43  ;;  %v2397_v47 = vcombine.low %v2372_v44, %v2380_v6 }
 0x6bf   : > { %10901 = vmatpush3.bf16.msra.mxu1 %v11230_v34 }
 0x6c0   : > { %v2396_v48 = vrot.slane %v2382_v30, %v11592_v38  ;;  %v2412_v49 = vrot.slane %v2398_v45, %v11592_v38  ;;  %v2389_v18 = vrot.slane %v2381_v46, %v11592_v38  ;;  %v2405_v50 = vrot.slane %v2397_v47, %v11592_v38  ;;  %10914 = vmatprep.subr.bf16.mxu1 %v11404_v1 }
 0x6c2   : > { %v2415_v51 = vcombine.low %v2396_v48, %v2412_v49  ;;  %v2414_v52 = vcombine.high %v2389_v18, %v2405_v50  ;;  %v2413_v21 = vcombine.low %v2389_v18, %v2405_v50  ;;  %v2416_v31 = vcombine.high %v2396_v48, %v2412_v49 }
 0x6c4   : > { %2422 = vrot.lane.b32.xlu1 %v2415_v51, %s12899_s18  ;;  %2418 = vrot.lane.b32.xlu0 %v2414_v52, %s12903_s19  ;;  %s428_s18 = scalar_lea.vmem %s12919_s0, %s10479_s28  ;;  %s12921_s19 = smov 120  }
 0x6c5   : > { %v11804_v59 = vld [vmem:[%s428_s18] sm:$0xff]  ;;  %v11807_v61 = vld [vmem:[%s428_s18 + $0x8] sm:$0xff] }
 0x6c6   : > { %v443_v7 = vadd.f32 %v439_v62, %v11804_v59  ;;  %v444_v13 = vadd.f32 %v440_v63, %v11807_v61 }
 0x6c8   : > { %2426 = vrot.lane.b32.xlu1 %v2416_v31, %s12907_s20  ;;  %v11818_v11 = vpack.c.bf16 %v444_v13, %v443_v7  ;;  %s12922_s20 = smov 112  }
 0x736   : > { %v2423_v53 = vpop.permute.xlu1 %2422  ;;  %v2419_v54 = vpop.permute.xlu0 %2418 }
 0x737   : > { %v2429_v55 = vsel %vm1317_vm3, %v2413_v21, %v2419_v54 }
 0x738   : > { %v2431_v57 = vsel %vm2430_vm4, %v2429_v55, %v2423_v53 }
 0x73a   : > { %v2427_v56 = vpop.permute.xlu1 %2426 }
 0x73b   : > { %v2433_v60 = vsel %vm2432_vm5, %v2431_v57, %v2427_v56 }
 0x73c   : > { %v2434_v0 = vpack.c.bf16 %v2433_v60, %v2433_v60 }
 0x73e   : > { %10895 = vmatmul.mubr.msk.bf16.vlgmr.msra.gmra.mxu0 %vm469_vm1, %v2434_v0 }
 0x73f   : > { %10907 = vmatpush3.bf16.msra.mxu0 %v11227_v58  ;;  %10910 = vmatprep.mubr.msk.bf16.mxu0 %vm11405_vm0, %v11404_v1 }
 0x740   : > { %10908 = vmatprep.subr.bf16.mxu0 %v11404_v1 }
 0x743   : > { %10909 = vmatpush3.bf16.msra.mxu0 %v11228_v2 }
 0x744   : > { %10922 = vmatprep.subr.bf16.mxu0 %v11404_v1 }
 0x746   : > { %10911 = vmatmul.mubr.msk.bf16.vlgmr.msra.gmra.mxu0 %vm469_vm1, %v11818_v11 }
 0x747   : > { %10924 = vmatprep.mubr.msk.bf16.mxu0 %vm11405_vm0, %v11404_v1 }
 0x7fe   : > { %v2494_v4 = vpop.f32.mrf.mxu0 }
 0x7ff   : > { %v2495_v5 = vadd.f32 %v10507_v12, %v2494_v4 }
 0x800   : > { %v10896_v8 = vpop.f32.mrf.mxu0 }
 0x801   : > { %v2503_v9 = vsel %vm469_vm1, %v2495_v5, 0.0 }
 0x802   : > { %2504 = vadd.xlane.f32.xlu1 %v2503_v9  ;;  %v2497_v10 = vpop.f32.mrf.mxu0 }
 0x804   : > { %v10897_v14 = vpop.f32.mrf.mxu0 }
 0x806   : > { %v2653_v15 = vpop.f32.mrf.mxu0 }
 0x807   : > { %v2654_v24 = vadd.f32 %v10525_v20, %v2653_v15 }
 0x808   : > { %v10912_v17 = vpop.f32.mrf.mxu0 }
 0x809   : > { %v10512_v17 = vld [vmem:[%s12892_s10 + $0x1] ss:$0 sm:$0xff] }
 0x80a   : > { %v2656_v19 = vpop.f32.mrf.mxu0 }
 0x80b   : > { %v11832_v23 = vadd.f32 %v10525_v20, %v2656_v19 }
 0x80c   : > { %v10913_v22 = vpop.f32.mrf.mxu0 }
 0x813   : > { %2816 = vrot.lane.b32.xlu1 %v11832_v23, %s12921_s19 }
 0x817   : > { %2820 = vrot.lane.b32.xlu1 %v2654_v24, %s12922_s20 }
 0x81b   : > { %2826 = vrot.lane.b32.xlu1 %v2654_v24, %s12923_s26 }
 0x88b   : > { %v2505_v25 = vpop.xlane.xlu1 %2504 }
 0x88c   : > { %v2507_v27 = vmul.f32 0.03125, %v2505_v25 }
 0x88e   : > { %v2508_v28 = vsub.f32 %v2495_v5, %v2507_v27  ;;  %v10511_v5 = vld [vmem:[%s12892_s10] ss:$0 sm:$0xff] }
 0x88f   : > { %v2817_v35 = vpop.permute.xlu1 %2816 }
 0x890   : > { %v2509_v29 = vmul.f32 %v2508_v28, %v2508_v28 }
 0x892   : > { %v2510_v32 = vsel %vm469_vm1, %v2509_v29, 0.0  ;;  %v11339_v29 = vld [vmem:[%s12884_s2] sm:$0xff] }
 0x893   : > { %2511 = vadd.xlane.f32.xlu0 %v2510_v32  ;;  %v2821_v36 = vpop.permute.xlu1 %2820 }
 0x894   : > { %v2832_v41 = vcombine.low %v2654_v24, %v2821_v36  ;;  %v2833_v3 = vcombine.high %v2654_v24, %v2821_v36  ;;  %v11231_v36 = vld [vmem:[%s12886_s4 + $0x48] sm:$0xff]  }
 0x896   : > { %v2840_v30 = vrot.slane %v2832_v41, %v11586_v26  ;;  %v2847_v47 = vrot.slane %v2833_v3, %v11586_v26 }
 0x897   : > { %v2827_v40 = vpop.permute.xlu1 %2826 }
 0x8a9   : > { %2814 = vrot.lane.b32.xlu0 %v2654_v24, %s12921_s19 }
 0x8ad   : > { %2822 = vrot.lane.b32.xlu0 %v11832_v23, %s12922_s20 }
 0x8b1   : > { %2828 = vrot.lane.b32.xlu0 %v11832_v23, %s12923_s26 }
 0x91c   : > { %v2512_v37 = vpop.xlane.xlu0 %2511 }
 0x91d   : > { %v2513_v39 = vmul.f32 0.03125, %v2512_v37 }
 0x91f   : > { %v2514_v42 = vadd.f32 1e-05, %v2513_v39 }
 0x920   : > { %v2815_v43 = vpop.permute.xlu0 %2814 }
 0x921   : > { %11277 = vrsqrt.f32 %v2514_v42  ;;  %v2848_v44 = vcombine.low %v2815_v43, %v2827_v40  ;;  %v2849_v6 = vcombine.high %v2815_v43, %v2827_v40  ;;  %v11232_v43 = vld [vmem:[%s12886_s4 + $0x40] sm:$0xff]  }
 0x923   : > { %v2856_v45 = vrot.slane %v2848_v44, %v11586_v26  ;;  %v2863_v46 = vrot.slane %v2849_v6, %v11586_v26 }
 0x924   : > { %v2823_v48 = vpop.permute.xlu0 %2822 }
 0x925   : > { %v2864_v49 = vcombine.low %v2840_v30, %v2856_v45  ;;  %v2865_v18 = vcombine.high %v2840_v30, %v2856_v45  ;;  %v2880_v50 = vcombine.low %v2847_v47, %v2863_v46  ;;  %v2900_v51 = vcombine.low %v11832_v23, %v2823_v48 }
 0x926   : > { %v2881_v53 = vcombine.high %v2847_v47, %v2863_v46  ;;  %v2901_v9 = vcombine.high %v11832_v23, %v2823_v48  ;;  %v11901_v46 = vpack.c.bf16 %v11807_v61, %v11804_v59 }
 0x927   : > { %v2872_v52 = vrot.slane %v2864_v49, %v11592_v38  ;;  %v2879_v21 = vrot.slane %v2865_v18, %v11592_v38  ;;  %v2888_v57 = vrot.slane %v2880_v50, %v11592_v38  ;;  %v2908_v60 = vrot.slane %v2900_v51, %v11586_v26 }
 0x928   : > { %v2829_v31 = vpop.permute.xlu0 %2828  ;;  %v2895_v7 = vrot.slane %v2881_v53, %v11592_v38  ;;  %v2915_v25 = vrot.slane %v2901_v9, %v11586_v26 }
 0x929   : > { %v2916_v54 = vcombine.low %v2817_v35, %v2829_v31  ;;  %v2968_v55 = vpack.c.bf16 %v2872_v52, %v2872_v52  ;;  %v2896_v56 = vcombine.high %v2872_v52, %v11404_v1  ;;  %v2897_v58 = vcombine.high %v2879_v21, %v11404_v1 }
 0x92a   : > { %v2917_v0 = vcombine.high %v2817_v35, %v2829_v31  ;;  %v2898_v2 = vcombine.high %v2888_v57, %v11404_v1  ;;  %v2970_v10 = vpack.c.bf16 %v2879_v21, %v2879_v21  ;;  %v2899_v15 = vcombine.high %v2895_v7, %v11404_v1 }
 0x92b   : > { %v2924_v62 = vrot.slane %v2916_v54, %v11586_v26  ;;  %3218 = vxpose.xlu1.c.b16.start.end [1/1] (short) (narrow) %v2968_v55, 16  ;;  %v2969_v63 = vpack.c.bf16 %v2896_v56, %v2896_v56  ;;  %v2971_v13 = vpack.c.bf16 %v2897_v58, %v2897_v58  ;;  %v2972_v23 = vpack.c.bf16 %v2888_v57, %v2888_v57 }
 0x92c   : > { %v2931_v14 = vrot.slane %v2917_v0, %v11586_v26  ;;  %v2973_v19 = vpack.c.bf16 %v2898_v2, %v2898_v2  ;;  %v2974_v39 = vpack.c.bf16 %v2895_v7, %v2895_v7 }
 0x92d   : > { %3234 = vxpose.xlu0.c.b16.start.end [1/1] (short) (narrow) %v2969_v63, 16  ;;  %v2932_v12 = vcombine.low %v2908_v60, %v2924_v62  ;;  %v2933_v24 = vcombine.high %v2908_v60, %v2924_v62 }
 0x92e   : > { %v11278_v4 = vpop.eup %11277  ;;  %v2948_v35 = vcombine.low %v2915_v25, %v2931_v14  ;;  %v2949_v40 = vcombine.high %v2915_v25, %v2931_v14 }
 0x92f   : > { %v2516_v8 = vmul.f32 %v11278_v4, %v2508_v28  ;;  %3266 = vxpose.xlu1.c.b16.start.end [1/1] (short) (narrow) %v2971_v13, 16  ;;  %v2940_v22 = vrot.slane %v2932_v12, %v11592_v38  ;;  %v2975_v28 = vpack.c.bf16 %v2899_v15, %v2899_v15  ;;  %v2947_v34 = vrot.slane %v2933_v24, %v11592_v38 }
 0x930   : > { %v2956_v3 = vrot.slane %v2948_v35, %v11592_v38  ;;  %v2963_v45 = vrot.slane %v2949_v40, %v11592_v38 }
 0x931   : > { %3250 = vxpose.xlu0.c.b16.start.end [1/1] (short) (narrow) %v2970_v10, 16  ;;  %v2521_v20 = vmul.f32 %v10511_v5, %v2516_v8  ;;  %v2964_v33 = vcombine.high %v2940_v22, %v11404_v1  ;;  %v2965_v42 = vcombine.high %v2947_v34, %v11404_v1  ;;  %v2976_v44 = vpack.c.bf16 %v2940_v22, %v2940_v22 }
 0x932   : > { %v2966_v30 = vcombine.high %v2956_v3, %v11404_v1  ;;  %v2978_v47 = vpack.c.bf16 %v2947_v34, %v2947_v34  ;;  %v2967_v49 = vcombine.high %v2963_v45, %v11404_v1  ;;  %v2980_v18 = vpack.c.bf16 %v2956_v3, %v2956_v3 }
 0x933   : > { %3298 = vxpose.xlu1.c.b16.start.end [1/1] (short) (narrow) %v2973_v19, 16  ;;  %v11877_v27 = vadd.f32 %v10512_v17, %v2521_v20  ;;  %v2977_v41 = vpack.c.bf16 %v2964_v33, %v2964_v33  ;;  %v2979_v6 = vpack.c.bf16 %v2965_v42, %v2965_v42  ;;  %v2982_v61 = vpack.c.bf16 %v2963_v45, %v2963_v45 }
 0x934   : > { %v2981_v48 = vpack.c.bf16 %v2966_v30, %v2966_v30  ;;  %v2983_v59 = vpack.c.bf16 %v2967_v49, %v2967_v49 }
 0x935   : > { %3282 = vxpose.xlu0.c.b16.start.end [1/1] (short) (narrow) %v2972_v23, 16  ;;  %v2527_v32 = vadd.f32 %v11339_v29, %v11877_v27 }
 0x937   : > { %3330 = vxpose.xlu1.c.b16.start.end [1/1] (short) (narrow) %v2975_v28, 16  ;;  %v2528_v37 = vpack.c.bf16 %v2527_v32, %v2527_v32 }
 0x939   : > { %10903 = vmatmul.mubr.msk.bf16.vlgmr.msra.gmra.mxu1 %vm469_vm1, %v2528_v37  ;;  %3314 = vxpose.xlu0.c.b16.start.end [1/1] (short) (narrow) %v2974_v39, 16 }
 0x93a   : > { %10915 = vmatpush3.bf16.msra.mxu1 %v11231_v36  ;;  %10918 = vmatprep.mubr.msk.bf16.mxu1 %vm11405_vm0, %v11404_v1 }
 0x93b   : > { %3362 = vxpose.xlu1.c.b16.start.end [1/1] (short) (narrow) %v2977_v41, 16  ;;  %10916 = vmatprep.subr.bf16.mxu1 %v11404_v1 }
 0x93d   : > { %3346 = vxpose.xlu0.c.b16.start.end [1/1] (short) (narrow) %v2976_v44, 16 }
 0x93e   : > { %10917 = vmatpush3.bf16.msra.mxu1 %v11232_v43 }
 0x93f   : > { %3394 = vxpose.xlu1.c.b16.start.end [1/1] (short) (narrow) %v2979_v6, 16  ;;  %10928 = vmatprep.subr.bf16.mxu1 %v11404_v1 }
 0x941   : > { %3378 = vxpose.xlu0.c.b16.start.end [1/1] (short) (narrow) %v2978_v47, 16  ;;  %10919 = vmatmul.mubr.msk.bf16.vlgmr.msra.gmra.mxu1 %vm469_vm1, %v11901_v46 }
 0x942   : > { %10930 = vmatprep.mubr.msk.bf16.mxu1 %vm11405_vm0, %v11404_v1 }
 0x943   : > { %3426 = vxpose.xlu1.c.b16.start.end [1/1] (short) (narrow) %v2981_v48, 16 }
 0x945   : > { %3410 = vxpose.xlu0.c.b16.start.end [1/1] (short) (narrow) %v2980_v18, 16 }
 0x947   : > { %3458 = vxpose.xlu1.c.b16.start.end [1/1] (short) (narrow) %v2983_v59, 16 }
 0x949   : > { %3442 = vxpose.xlu0.c.b16.start.end [1/1] (short) (narrow) %v2982_v61, 16 }
 0x98d   : > { %v3226_v50 = vpop.trf.xlu1 }
 0x98f   : > { %v3242_v51 = vpop.trf.xlu0 }
 0x991   : > { %v3274_v52 = vpop.trf.xlu1 }
 0x993   : > { %v3258_v21 = vpop.trf.xlu0 }
 0x995   : > { %v3306_v31 = vpop.trf.xlu1 }
 0x996   : > { %v3542_v60 = vcombine.low %v3242_v51, %v3306_v31 }
 0x997   : > { %v3290_v53 = vpop.trf.xlu0 }
 0x998   : > { %v3474_v63 = vcombine.low %v3226_v50, %v3290_v53  ;;  %v3549_v2 = vrot.slane %v3542_v60, %v11586_v26 }
 0x999   : > { %v3338_v54 = vpop.trf.xlu1 }
 0x99a   : > { %v3550_v62 = vcombine.low %v3274_v52, %v3338_v54  ;;  %v3481_v5 = vrot.slane %v3474_v63, %v11586_v26 }
 0x99b   : > { %v3322_v55 = vpop.trf.xlu0 }
 0x99c   : > { %v3482_v0 = vcombine.low %v3258_v21, %v3322_v55  ;;  %v3557_v12 = vrot.slane %v3550_v62, %v11586_v26 }
 0x99d   : > { %v3370_v56 = vpop.trf.xlu1 }
 0x99e   : > { %v3489_v8 = vrot.slane %v3482_v0, %v11586_v26  ;;  %v3574_v15 = vcombine.low %v3549_v2, %v3557_v12  ;;  %v3575_v20 = vcombine.high %v3549_v2, %v3557_v12 }
 0x99f   : > { %v3354_v57 = vpop.trf.xlu0 }
 0x9a0   : > { %v3506_v22 = vcombine.low %v3481_v5, %v3489_v8  ;;  %v3507_v24 = vcombine.high %v3481_v5, %v3489_v8  ;;  %v3582_v35 = vrot.slane %v3574_v15, %v11592_v38  ;;  %v3589_v39 = vrot.slane %v3575_v20, %v11592_v38  ;;  %v10533_v15 = vld [vmem:[%s12891_s9 + $0x4] ss:$0 sm:$0xff] }
 0x9a1   : > { %v3402_v58 = vpop.trf.xlu1 }
 0x9a2   : > { %v3514_v36 = vrot.slane %v3506_v22, %v11592_v38  ;;  %v3521_v37 = vrot.slane %v3507_v24, %v11592_v38 }
 0x9a3   : > { %v3386_v7 = vpop.trf.xlu0 }
 0x9a5   : > { %v3434_v13 = vpop.trf.xlu1 }
 0x9a6   : > { %v3558_v4 = vcombine.low %v3370_v56, %v3434_v13 }
 0x9a7   : > { %v3418_v9 = vpop.trf.xlu0 }
 0x9a8   : > { %v3490_v10 = vcombine.low %v3354_v57, %v3418_v9  ;;  %v3565_v17 = vrot.slane %v3558_v4, %v11586_v26 }
 0x9a9   : > { %v3466_v14 = vpop.trf.xlu1 }
 0x9aa   : > { %v3566_v19 = vcombine.low %v3402_v58, %v3466_v14  ;;  %v3497_v23 = vrot.slane %v3490_v10, %v11586_v26 }
 0x9ab   : > { %v3450_v25 = vpop.trf.xlu0 }
 0x9ac   : > { %v3573_v28 = vrot.slane %v3566_v19, %v11586_v26  ;;  %v3498_v29 = vcombine.low %v3386_v7, %v3450_v25  ;;  %v10517_v7 = vld [vmem:[%s12891_s9 + $0x2] ss:$0 sm:$0xff] }
 0x9ae   : > { %v3590_v32 = vcombine.low %v3565_v17, %v3573_v28  ;;  %v3591_v33 = vcombine.high %v3565_v17, %v3573_v28  ;;  %v3505_v34 = vrot.slane %v3498_v29, %v11586_v26 }
 0x9b0   : > { %v3522_v40 = vcombine.low %v3497_v23, %v3505_v34  ;;  %v3523_v41 = vcombine.high %v3497_v23, %v3505_v34  ;;  %v3598_v42 = vrot.slane %v3590_v32, %v11592_v38  ;;  %v3605_v3 = vrot.slane %v3591_v33, %v11592_v38 }
 0x9b2   : > { %v3530_v43 = vrot.slane %v3522_v40, %v11592_v38  ;;  %v3606_v44 = vcombine.low %v3582_v35, %v3598_v42  ;;  %v3537_v6 = vrot.slane %v3523_v41, %v11592_v38  ;;  %v3607_v30 = vcombine.high %v3582_v35, %v3598_v42 }
 0x9b3   : > { %v3608_v45 = vcombine.low %v3589_v39, %v3605_v3  ;;  %v3609_v47 = vcombine.high %v3589_v39, %v3605_v3 }
 0x9b4   : > { %v3538_v48 = vcombine.low %v3514_v36, %v3530_v43  ;;  %v3539_v49 = vcombine.high %v3514_v36, %v3530_v43  ;;  %v3540_v18 = vcombine.low %v3521_v37, %v3537_v6  ;;  %v3541_v59 = vcombine.high %v3521_v37, %v3537_v6 }
 0x9b5   : > { %v3615_v61 = vshrl.u32 %v3606_v44, 16  ;;  %v3639_v50 = vshrl.u32 %v3609_v47, 16  ;;  %v3623_v56 = vshrl.u32 %v3607_v30, 16  ;;  %v3631_v63 = vshrl.u32 %v3608_v45, 16 }
 0x9b6   : > { %v3612_v51 = vpack.i.b16 %v3606_v44, %v3538_v48  ;;  %v3628_v52 = vpack.i.b16 %v3608_v45, %v3540_v18  ;;  %v3614_v21 = vshrl.u32 %v3538_v48, 16  ;;  %v3638_v31 = vshrl.u32 %v3541_v59, 16 }
 0x9b7   : > { %v3636_v53 = vpack.i.b16 %v3609_v47, %v3541_v59  ;;  %v3620_v54 = vpack.i.b16 %v3607_v30, %v3539_v49  ;;  %v3622_v55 = vshrl.u32 %v3539_v49, 16  ;;  %v3630_v62 = vshrl.u32 %v3540_v18, 16 }
 0x9b8   : > { %3642 = vxpose.xlu0.c.b16.start.end [1/1] (short) (narrow) %v3612_v51, 16  ;;  %3706 = vxpose.xlu1.c.b16.start.end [1/1] (short) (narrow) %v3628_v52, 16  ;;  %v3616_v57 = vpack.i.b16 %v3615_v61, %v3614_v21  ;;  %v3640_v58 = vpack.i.b16 %v3639_v50, %v3638_v31 }
 0x9b9   : > { %v3624_v60 = vpack.i.b16 %v3623_v56, %v3622_v55  ;;  %v3632_v0 = vpack.i.b16 %v3631_v63, %v3630_v62 }
 0x9bc   : > { %3674 = vxpose.xlu0.c.b16.start.end [1/1] (short) (narrow) %v3620_v54, 16  ;;  %3658 = vxpose.xlu1.c.b16.start.end [1/1] (short) (narrow) %v3616_v57, 16 }
 0x9c0   : > { %3690 = vxpose.xlu0.c.b16.start.end [1/1] (short) (narrow) %v3624_v60, 16 }
 0x9c4   : > { %3722 = vxpose.xlu0.c.b16.start.end [1/1] (short) (narrow) %v3632_v0, 16 }
 0x9f9   : > { %v2588_v13 = vpop.f32.mrf.mxu1 }
 0x9fa   : > { %v2589_v2 = vadd.f32 %v10517_v7, %v2588_v13 }
 0x9fb   : > { %v10904_v12 = vpop.f32.mrf.mxu1 }
 0x9fc   : > { %2730 = vrot.lane.b32.xlu1 %v2589_v2, %s12922_s20  ;;  %2727 = vrot.lane.b32.xlu0 %v2589_v2, %s12921_s19 }
 0x9fd   : > { %v2591_v4 = vpop.f32.mrf.mxu1 }
 0x9ff   : > { %v10905_v5 = vpop.f32.mrf.mxu1 }
 0xa00   : > { %2733 = vrot.lane.b32.xlu1 %v2589_v2, %s12923_s26 }
 0xa01   : > { %v2719_v8 = vpop.f32.mrf.mxu1 }
 0xa02   : > { %v11934_v17 = vadd.f32 %v10533_v15, %v2719_v8 }
 0xa03   : > { %v10920_v9 = vpop.f32.mrf.mxu1 }
 0xa05   : > { %v2722_v10 = vpop.f32.mrf.mxu1 }
 0xa06   : > { %v11938_v19 = vadd.f32 %v10533_v15, %v2722_v10 }
 0xa07   : > { %v10921_v14 = vpop.f32.mrf.mxu1 }
 0xa1a   : > { %3754 = vxpose.xlu0.c.b16.start.end [1/1] (short) (narrow) %v3640_v58, 16  ;;  %v3650_v20 = vpop.trf.xlu0  ;;  %v3714_v24 = vpop.trf.xlu1 }
 0xa1b   : > { %v3770_v62 = vcombine.low %v3650_v20, %v3714_v24 }
 0xa1d   : > { %v3777_v4 = vrot.slane %v3770_v62, %v11586_v26 }
 0xa1e   : > { %v3682_v22 = vpop.trf.xlu0  ;;  %v3666_v23 = vpop.trf.xlu1 }
 0xa22   : > { %v3698_v25 = vpop.trf.xlu0 }
 0xa23   : > { %3738 = vxpose.xlu1.c.b16.start.end [1/1] (short) (narrow) %v3636_v53, 16  ;;  %2998 = vrot.lane.b32.xlu0 %v11934_v17, %s12923_s26 }
 0xa26   : > { %v3730_v28 = vpop.trf.xlu0 }
 0xa27   : > { %2986 = vrot.lane.b32.xlu1 %v11934_v17, %s12921_s19  ;;  %2988 = vrot.lane.b32.xlu0 %v11938_v19, %s12921_s19  ;;  %v3795_v51 = vcombine.low %v3666_v23, %v3730_v28 }
 0xa29   : > { %v3802_v54 = vrot.slane %v3795_v51, %v11586_v26 }
 0xa2b   : > { %2992 = vrot.lane.b32.xlu1 %v11934_v17, %s12922_s20 }
 0xa2f   : > { %2994 = vrot.lane.b32.xlu1 %v11938_v19, %s12922_s20 }
 0xa6e   : > { %v2731_v29 = vpop.permute.xlu1 %2730  ;;  %v2728_v34 = vpop.permute.xlu0 %2727 }
 0xa6f   : > { %v2736_v32 = vcombine.low %v2589_v2, %v2731_v29  ;;  %v2737_v33 = vcombine.high %v2589_v2, %v2731_v29 }
 0xa71   : > { %v2744_v39 = vrot.slane %v2736_v32, %v11586_v26  ;;  %v2751_v40 = vrot.slane %v2737_v33, %v11586_v26 }
 0xa72   : > { %v2734_v35 = vpop.permute.xlu1 %2733 }
 0xa73   : > { %v2752_v36 = vcombine.low %v2728_v34, %v2734_v35  ;;  %v2753_v37 = vcombine.high %v2728_v34, %v2734_v35 }
 0xa75   : > { %v2760_v41 = vrot.slane %v2752_v36, %v11586_v26  ;;  %v2767_v42 = vrot.slane %v2753_v37, %v11586_v26 }
 0xa77   : > { %v2768_v3 = vcombine.low %v2744_v39, %v2760_v41  ;;  %v2769_v43 = vcombine.high %v2744_v39, %v2760_v41  ;;  %v2784_v44 = vcombine.low %v2751_v40, %v2767_v42  ;;  %v2785_v6 = vcombine.high %v2751_v40, %v2767_v42 }
 0xa79   : > { %v2776_v30 = vrot.slane %v2768_v3, %v11592_v38  ;;  %v2783_v45 = vrot.slane %v2769_v43, %v11592_v38  ;;  %v2792_v47 = vrot.slane %v2784_v44, %v11592_v38  ;;  %v2799_v48 = vrot.slane %v2785_v6, %v11592_v38 }
 0xa7b   : > { %v2800_v49 = vcombine.high %v2776_v30, %v11404_v1  ;;  %v2801_v18 = vcombine.high %v2783_v45, %v11404_v1  ;;  %v2802_v59 = vcombine.high %v2792_v47, %v11404_v1  ;;  %v2803_v61 = vcombine.high %v2799_v48, %v11404_v1 }
 0xa7c   : > { %v3762_v50 = vpop.trf.xlu0  ;;  %v10537_v55 = vpack.c.bf16 %v2792_v47, %v2776_v30  ;;  %v10538_v56 = vpack.c.bf16 %v2799_v48, %v2783_v45 }
 0xa7d   : > { %v3803_v52 = vcombine.low %v3698_v25, %v3762_v50  ;;  %v10539_v21 = vpack.c.bf16 %v2802_v59, %v2800_v49  ;;  %v10540_v31 = vpack.c.bf16 %v2803_v61, %v2801_v18 }
 0xa7e   : > { %v3163_v63 = vrot.slane %v10537_v55, %v11586_v26  ;;  %v3171_v0 = vrot.slane %v10538_v56, %v11586_v26 }
 0xa7f   : > { %v3810_v53 = vrot.slane %v3803_v52, %v11586_v26  ;;  %v3188_v57 = vrot.slane %v10539_v21, %v11586_v26  ;;  %v3196_v58 = vrot.slane %v10540_v31, %v11586_v26 }
 0xa80   : > { %v3172_v8 = vcombine.low %v3163_v63, %v3171_v0 }
 0xa81   : > { %v3811_v60 = vcombine.low %v3802_v54, %v3810_v53  ;;  %v3197_v2 = vcombine.low %v3188_v57, %v3196_v58 }
 0xa82   : > { %v3179_v20 = vrot.slane %v3172_v8, %v11592_v38 }
 0xa83   : > { %v3818_v12 = vrot.slane %v3811_v60, %v11592_v38  ;;  %v3204_v10 = vrot.slane %v3197_v2, %v11592_v38 }
 0xa84   : > { %v3209_v39 = vshrl.u32 %v3179_v20, 16  ;;  %v3180_v44 = vcombine.high %v3179_v20, %v11410_v16 }
 0xa85   : > { %v3746_v7 = vpop.trf.xlu1  ;;  %v3819_v14 = vcombine.high %v3818_v12, %v11410_v16  ;;  %v3210_v28 = vshrl.u32 %v3204_v10, 16  ;;  %v3208_v37 = vpack.i.b16 %v3204_v10, %v3179_v20  ;;  %v3205_v3 = vcombine.high %v3204_v10, %v11410_v16 }
 0xa86   : > { %v3778_v13 = vcombine.low %v3682_v22, %v3746_v7  ;;  %v3824_v22 = vshrl.u32 %v3818_v12, 16  ;;  %v3215_v48 = vshrl.u32 %v3180_v44, 16 }
 0xa87   : > { %v3830_v29 = vshrl.u32 %v3819_v14, 16  ;;  %v3211_v42 = vpack.i.b16 %v3210_v28, %v3209_v39  ;;  %v3216_v30 = vshrl.u32 %v3205_v3, 16  ;;  %v3214_v47 = vpack.i.b16 %v3205_v3, %v3180_v44 }
 0xa88   : > { %v3785_v5 = vrot.slane %v3778_v13, %v11586_v26 }
 0xa89   : > { %v3217_v59 = vpack.i.b16 %v3216_v30, %v3215_v48 }
 0xa8a   : > { %v3786_v9 = vcombine.low %v3777_v4, %v3785_v5 }
 0xa8c   : > { %v3793_v15 = vrot.slane %v3786_v9, %v11592_v38 }
 0xa8e   : > { %v3822_v24 = vpack.i.b16 %v3818_v12, %v3793_v15  ;;  %v3823_v25 = vshrl.u32 %v3793_v15, 16  ;;  %v3794_v23 = vcombine.high %v3793_v15, %v11410_v16 }
 0xa90   : > { %v3836_v32 = vsel %vm1321_vm2, %v3822_v24, 0  ;;  %v3825_v33 = vpack.i.b16 %v3824_v22, %v3823_v25  ;;  %v3828_v34 = vpack.i.b16 %v3819_v14, %v3794_v23  ;;  %v3829_v35 = vshrl.u32 %v3794_v23, 16 }
 0xa91   : > { %10923 = vmatpush3.bf16.msra.mxu0 %v3836_v32 }
 0xa92   : > { %v3882_v36 = vsel %vm1321_vm2, %v3825_v33, 0  ;;  %10934 = vmatprep.subr.bf16.mxu0 %v11404_v1  ;;  %v3831_v40 = vpack.i.b16 %v3830_v29, %v3829_v35  ;;  %v3928_v41 = vsel %vm1321_vm2, %v3828_v34, 0 }
 0xa93   : > { %10929 = vmatpush3.bf16.msra.mxu1 %v3882_v36 }
 0xa94   : > { %10925 = vmatmul.mubr.msk.bf16.vlgmr.msra.gmra.mxu0 %vm1317_vm3, %v3208_v37  ;;  %10940 = vmatprep.subr.bf16.mxu1 %v11404_v1  ;;  %v3974_v43 = vsel %vm1321_vm2, %v3831_v40, 0 }
 0xa95   : > { %10935 = vmatpush3.bf16.msra.mxu0 %v3928_v41  ;;  %10936 = vmatprep.mubr.msk.bf16.mxu0 %vm11405_vm0, %v11404_v1  ;;  %v2999_v6 = vpop.permute.xlu0 %2998 }
 0xa96   : > { %10931 = vmatmul.mubr.msk.bf16.vlgmr.msra.gmra.mxu1 %vm1317_vm3, %v3211_v42  ;;  %10946 = vmatprep.subr.bf16.mxu0 %v11404_v1 }
 0xa97   : > { %10941 = vmatpush3.bf16.msra.mxu1 %v3974_v43  ;;  %10942 = vmatprep.mubr.msk.bf16.mxu1 %vm11405_vm0, %v11404_v1 }
 0xa98   : > { %10952 = vmatprep.subr.bf16.mxu1 %v11404_v1 }
 0xa99   : > { %v2987_v45 = vpop.permute.xlu1 %2986 }
 0xa9a   : > { %v3020_v49 = vcombine.low %v2987_v45, %v2999_v6  ;;  %v3021_v18 = vcombine.high %v2987_v45, %v2999_v6 }
 0xa9c   : > { %10937 = vmatmul.mubr.msk.bf16.vlgmr.msra.gmra.mxu0 %vm1317_vm3, %v3214_v47  ;;  %v3028_v50 = vrot.slane %v3020_v49, %v11586_v26  ;;  %v3035_v51 = vrot.slane %v3021_v18, %v11586_v26  ;;  %v2989_v49 = vpop.permute.xlu0 %2988 }
 0xa9d   : > { %v2993_v61 = vpop.permute.xlu1 %2992  ;;  %10948 = vmatprep.mubr.msk.bf16.mxu0 %vm11405_vm0, %v11404_v1 }
 0xa9e   : > { %10943 = vmatmul.mubr.msk.bf16.vlgmr.msra.gmra.mxu1 %vm1317_vm3, %v3217_v59  ;;  %v3004_v52 = vcombine.low %v11934_v17, %v2993_v61  ;;  %v3005_v21 = vcombine.high %v11934_v17, %v2993_v61 }
 0xa9f   : > { %10954 = vmatprep.mubr.msk.bf16.mxu1 %vm11405_vm0, %v11404_v1 }
 0xaa0   : > { %v3012_v31 = vrot.slane %v3004_v52, %v11586_v26  ;;  %v3019_v53 = vrot.slane %v3005_v21, %v11586_v26 }
 0xaa1   : > { %v2995_v44 = vpop.permute.xlu1 %2994 }
 0xaa2   : > { %v3036_v54 = vcombine.low %v3012_v31, %v3028_v50  ;;  %v3037_v55 = vcombine.high %v3012_v31, %v3028_v50  ;;  %v3052_v56 = vcombine.low %v3019_v53, %v3035_v51  ;;  %v3053_v57 = vcombine.high %v3019_v53, %v3035_v51 }
 0xaa3   : > { %v3072_v48 = vcombine.low %v11938_v19, %v2995_v44  ;;  %v3073_v59 = vcombine.high %v11938_v19, %v2995_v44 }
 0xaa4   : > { %v3044_v58 = vrot.slane %v3036_v54, %v11592_v38  ;;  %v3060_v60 = vrot.slane %v3052_v56, %v11592_v38  ;;  %v3051_v62 = vrot.slane %v3037_v55, %v11592_v38  ;;  %v3067_v63 = vrot.slane %v3053_v57, %v11592_v38 }
 0xaa5   : > { %v3080_v51 = vrot.slane %v3072_v48, %v11586_v26  ;;  %v3087_v31 = vrot.slane %v3073_v59, %v11586_v26 }
 0xaa6   : > { %v3140_v17 = vpack.c.bf16 %v3044_v58, %v3044_v58  ;;  %v3144_v0 = vpack.c.bf16 %v3060_v60, %v3060_v60  ;;  %v3142_v7 = vpack.c.bf16 %v3051_v62, %v3051_v62  ;;  %v3146_v13 = vpack.c.bf16 %v3067_v63, %v3067_v63 }
 0xaa7   : > { %v3069_v2 = vcombine.high %v3051_v62, %v11404_v1  ;;  %v3068_v12 = vcombine.high %v3044_v58, %v11404_v1  ;;  %v3070_v8 = vcombine.high %v3060_v60, %v11404_v1  ;;  %v3071_v41 = vcombine.high %v3067_v63, %v11404_v1 }
 0xaa8   : > { %4064 = vxpose.xlu0.c.b16.start.end [1/1] (short) (narrow) %v3140_v17, 16  ;;  %4128 = vxpose.xlu1.c.b16.start.end [1/1] (short) (narrow) %v3144_v0, 16 }
 0xaa9   : > { %v3143_v4 = vpack.c.bf16 %v3069_v2, %v3069_v2  ;;  %v3141_v5 = vpack.c.bf16 %v3068_v12, %v3068_v12  ;;  %v3145_v9 = vpack.c.bf16 %v3070_v8, %v3070_v8  ;;  %v3147_v42 = vpack.c.bf16 %v3071_v41, %v3071_v41 }
 0xaac   : > { %4096 = vxpose.xlu0.c.b16.start.end [1/1] (short) (narrow) %v3142_v7, 16  ;;  %4160 = vxpose.xlu1.c.b16.start.end [1/1] (short) (narrow) %v3146_v13, 16 }
 0xab0   : > { %4112 = vxpose.xlu0.c.b16.start.end [1/1] (short) (narrow) %v3143_v4, 16  ;;  %4080 = vxpose.xlu1.c.b16.start.end [1/1] (short) (narrow) %v3141_v5, 16 }
 0xab4   : > { %4144 = vxpose.xlu0.c.b16.start.end [1/1] (short) (narrow) %v3145_v9, 16 }
 0xb0a   : > { %v4136_v6 = vpop.trf.xlu1 }
 0xb0e   : > { %v4168_v30 = vpop.trf.xlu1 }
 0xb12   : > { %v12028_v45 = vpop.trf.xlu1 }
 0xb54   : > { %v12009_v10 = vpop.f32.mrf.mxu0 }
 0xb55   : > { %v4016_v14 = vsel %vm2430_vm4, %v12009_v10, -inf }
 0xb56   : > { %v10926_v15 = vpop.f32.mrf.mxu0  ;;  %4017 = vmax.xlane.f32.xlu1 %v4016_v14  ;;  %v12013_v20 = vpop.f32.mrf.mxu1 }
 0xb57   : > { %v4019_v24 = vsel %vm2430_vm4, %v12013_v20, -inf  ;;  %v4072_v14 = vpop.trf.xlu0 }
 0xb58   : > { %v3875_v25 = vpop.f32.mrf.mxu0  ;;  %4020 = vmax.xlane.f32.xlu0 %v4019_v24  ;;  %v10932_v22 = vpop.f32.mrf.mxu1 }
 0xb5a   : > { %v10927_v23 = vpop.f32.mrf.mxu0  ;;  %v3921_v28 = vpop.f32.mrf.mxu1 }
 0xb5b   : > { %v4104_v15 = vpop.trf.xlu0 }
 0xb5c   : > { %v10933_v29 = vpop.f32.mrf.mxu1  ;;  %v12017_v32 = vpop.f32.mrf.mxu0 }
 0xb5d   : > { %v4022_v3 = vsel %vm2430_vm4, %v12017_v32, -inf }
 0xb5e   : > { %v10938_v33 = vpop.f32.mrf.mxu0  ;;  %v12019_v34 = vpop.f32.mrf.mxu1 }
 0xb5f   : > { %v4025_v43 = vsel %vm2430_vm4, %v12019_v34, -inf  ;;  %v4120_v24 = vpop.trf.xlu0 }
 0xb60   : > { %v3967_v35 = vpop.f32.mrf.mxu0  ;;  %v10944_v36 = vpop.f32.mrf.mxu1 }
 0xb62   : > { %v10939_v37 = vpop.f32.mrf.mxu0  ;;  %v4013_v39 = vpop.f32.mrf.mxu1 }
 0xb63   : > { %v4152_v25 = vpop.trf.xlu0  ;;  %v4320_v37 = vcombine.low %v4072_v14, %v4136_v6  ;;  %v4328_v39 = vcombine.low %v4104_v15, %v4168_v30 }
 0xb64   : > { %v10945_v40 = vpop.f32.mrf.mxu1  ;;  %v4388_v48 = vcombine.low %v12028_v45, %v4152_v25 }
 0xb66   : > { %v4395_v6 = vrot.slane %v4388_v48, %v11586_v26 }
 0xb67   : > { %3000 = vrot.lane.b32.xlu1 %v11938_v19, %s12923_s26 }
 0xb85   : > { %4176 = vxpose.xlu0.c.b16.start.end [1/1] (short) (narrow) %v3147_v42, 16 }
 0xb8b   : > { %4023 = vmax.xlane.f32.xlu1 %v4022_v3  ;;  %v4327_v3 = vrot.slane %v4320_v37, %v11586_v26 }
 0xb92   : > { %4026 = vmax.xlane.f32.xlu0 %v4025_v43  ;;  %v4335_v43 = vrot.slane %v4328_v39, %v11586_v26 }
 0xbdf   : > { %v12030_v47 = vpop.xlane.xlu1 %4017 }
 0xbe1   : > { %v4021_v22 = vpop.xlane.xlu0 %4020 }
 0xbe3   : > { %v3001_v18 = vpop.permute.xlu1 %3000 }
 0xbe4   : > { %v3088_v61 = vcombine.low %v2989_v49, %v3001_v18  ;;  %v3089_v50 = vcombine.high %v2989_v49, %v3001_v18 }
 0xbe6   : > { %v3096_v52 = vrot.slane %v3088_v61, %v11586_v26  ;;  %v3103_v21 = vrot.slane %v3089_v50, %v11586_v26 }
 0xbe7   : > { %v4184_v23 = vpop.trf.xlu0 }
 0xbe8   : > { %v3104_v53 = vcombine.low %v3080_v51, %v3096_v52  ;;  %v3105_v54 = vcombine.high %v3080_v51, %v3096_v52  ;;  %v3120_v55 = vcombine.low %v3087_v31, %v3103_v21  ;;  %v3121_v60 = vcombine.high %v3087_v31, %v3103_v21 }
 0xbe9   : > { %v4396_v42 = vcombine.low %v4120_v24, %v4184_v23  ;;  %v4352_v51 = vcombine.low %v4327_v3, %v4335_v43 }
 0xbea   : > { %v3112_v56 = vrot.slane %v3104_v53, %v11592_v38  ;;  %v3119_v57 = vrot.slane %v3105_v54, %v11592_v38  ;;  %v3128_v17 = vrot.slane %v3120_v55, %v11592_v38  ;;  %v3135_v2 = vrot.slane %v3121_v60, %v11592_v38 }
 0xbeb   : > { %v4403_v59 = vrot.slane %v4396_v42, %v11586_v26 }
 0xbec   : > { %v3148_v58 = vpack.c.bf16 %v3112_v56, %v3112_v56  ;;  %v3136_v19 = vcombine.high %v3112_v56, %v11404_v1  ;;  %v3137_v63 = vcombine.high %v3119_v57, %v11404_v1  ;;  %v3150_v0 = vpack.c.bf16 %v3119_v57, %v3119_v57 }
 0xbed   : > { %v3138_v13 = vcombine.high %v3128_v17, %v11404_v1  ;;  %v3152_v12 = vpack.c.bf16 %v3128_v17, %v3128_v17  ;;  %v3139_v5 = vcombine.high %v3135_v2, %v11404_v1  ;;  %v3154_v8 = vpack.c.bf16 %v3135_v2, %v3135_v2 }
 0xbee   : > { %4192 = vxpose.xlu1.c.b16.start.end [1/1] (short) (narrow) %v3148_v58, 16  ;;  %v3149_v62 = vpack.c.bf16 %v3136_v19, %v3136_v19  ;;  %v3151_v7 = vpack.c.bf16 %v3137_v63, %v3137_v63  ;;  %v4420_v53 = vcombine.low %v4395_v6, %v4403_v59  ;;  %v4360_v56 = vrot.slane %v4352_v51, %v11592_v38 }
 0xbef   : > { %v3153_v4 = vpack.c.bf16 %v3138_v13, %v3138_v13  ;;  %v3155_v9 = vpack.c.bf16 %v3139_v5, %v3139_v5  ;;  %v4421_v60 = vcombine.high %v4395_v6, %v4403_v59  ;;  %v4028_v13 = vsub.f32 %v12009_v10, %v12030_v47 }
 0xbf0   : > { %4208 = vxpose.xlu0.c.b16.start.end [1/1] (short) (narrow) %v3149_v62, 16  ;;  %v4428_v63 = vrot.slane %v4420_v53, %v11592_v38  ;;  %v4029_v5 = vsub.f32 %v12013_v20, %v4021_v22 }
 0xbf2   : > { %4224 = vxpose.xlu1.c.b16.start.end [1/1] (short) (narrow) %v3150_v0, 16  ;;  %v4034_v37 = vmul.f32 1.442695, %v4029_v5 }
 0xbf4   : > { %4240 = vxpose.xlu0.c.b16.start.end [1/1] (short) (narrow) %v3151_v7, 16  ;;  %v4353_v7 = vcombine.high %v4327_v3, %v4335_v43 }
 0xbf6   : > { %4256 = vxpose.xlu1.c.b16.start.end [1/1] (short) (narrow) %v3152_v12, 16  ;;  %v4367_v23 = vrot.slane %v4353_v7, %v11592_v38 }
 0xbf8   : > { %4272 = vxpose.xlu0.c.b16.start.end [1/1] (short) (narrow) %v3153_v4, 16 }
 0xbfa   : > { %4288 = vxpose.xlu1.c.b16.start.end [1/1] (short) (narrow) %v3154_v8, 16  ;;  %v4435_v8 = vrot.slane %v4421_v60, %v11592_v38 }
 0xbfc   : > { %4304 = vxpose.xlu0.c.b16.start.end [1/1] (short) (narrow) %v3155_v9, 16 }
 0xc14   : > { %v12046_v28 = vpop.xlane.xlu1 %4023 }
 0xc15   : > { %v4030_v10 = vsub.f32 %v12017_v32, %v12046_v28 }
 0xc1b   : > { %v12048_v29 = vpop.xlane.xlu0 %4026 }
 0xc1c   : > { %v4031_v20 = vsub.f32 %v12019_v34, %v12048_v29 }
 0xc1e   : > { %v4038_v43 = vmul.f32 1.442695, %v4031_v20 }
 0xc50   : > { %v4200_v33 = vpop.trf.xlu1 }
 0xc52   : > { %v4216_v35 = vpop.trf.xlu0 }
 0xc54   : > { %v4232_v36 = vpop.trf.xlu1 }
 0xc56   : > { %v4248_v40 = vpop.trf.xlu0 }
 0xc58   : > { %v4264_v41 = vpop.trf.xlu1 }
 0xc59   : > { %v4336_v49 = vcombine.low %v4200_v33, %v4264_v41  ;;  %v4032_v33 = vmul.f32 1.442695, %v4028_v13  ;;  %v4036_v41 = vmul.f32 1.442695, %v4030_v10 }
 0xc5a   : > { %v4280_v44 = vpop.trf.xlu0 }
 0xc5b   : > { %v4404_v61 = vcombine.low %v4216_v35, %v4280_v44  ;;  %v4343_v30 = vrot.slane %v4336_v49, %v11586_v26  ;;  %11279 = vpow2.f32 %v4032_v33 }
 0xc5c   : > { %v4296_v18 = vpop.trf.xlu1  ;;  %11281 = vpow2.f32 %v4034_v37 }
 0xc5d   : > { %v4344_v50 = vcombine.low %v4232_v36, %v4296_v18  ;;  %v4411_v54 = vrot.slane %v4404_v61, %v11586_v26  ;;  %11283 = vpow2.f32 %v4036_v41 }
 0xc5e   : > { %v4312_v52 = vpop.trf.xlu0  ;;  %11285 = vpow2.f32 %v4038_v43 }
 0xc5f   : > { %v4351_v21 = vrot.slane %v4344_v50, %v11586_v26  ;;  %v4412_v31 = vcombine.low %v4248_v40, %v4312_v52 }
 0xc61   : > { %v4368_v55 = vcombine.low %v4343_v30, %v4351_v21  ;;  %v4419_v45 = vrot.slane %v4412_v31, %v11586_v26  ;;  %v4369_v62 = vcombine.high %v4343_v30, %v4351_v21 }
 0xc63   : > { %v4376_v57 = vrot.slane %v4368_v55, %v11592_v38  ;;  %v4436_v58 = vcombine.low %v4411_v54, %v4419_v45  ;;  %v4437_v19 = vcombine.high %v4411_v54, %v4419_v45  ;;  %v4383_v9 = vrot.slane %v4369_v62, %v11592_v38 }
 0xc65   : > { %v4444_v17 = vrot.slane %v4436_v58, %v11592_v38  ;;  %v4384_v0 = vcombine.low %v4360_v56, %v4376_v57  ;;  %v4451_v2 = vrot.slane %v4437_v19, %v11592_v38  ;;  %v4385_v25 = vcombine.high %v4360_v56, %v4376_v57 }
 0xc66   : > { %v4386_v40 = vcombine.low %v4367_v23, %v4383_v9  ;;  %v4387_v52 = vcombine.high %v4367_v23, %v4383_v9 }
 0xc67   : > { %v4452_v12 = vcombine.low %v4428_v63, %v4444_v17  ;;  %v4453_v4 = vcombine.high %v4428_v63, %v4444_v17  ;;  %v4460_v15 = vshrl.u32 %v4384_v0, 16  ;;  %v4454_v36 = vcombine.low %v4435_v8, %v4451_v2 }
 0xc68   : > { %v4468_v39 = vshrl.u32 %v4385_v25, 16  ;;  %v4476_v28 = vshrl.u32 %v4386_v40, 16  ;;  %v11280_v34 = vpop.eup %11279  ;;  %v4455_v51 = vcombine.high %v4435_v8, %v4451_v2  ;;  %v4484_v21 = vshrl.u32 %v4387_v52, 16 }
 0xc69   : > { %v4458_v14 = vpack.i.b16 %v4452_v12, %v4384_v0  ;;  %v4461_v24 = vshrl.u32 %v4452_v12, 16  ;;  %v4469_v35 = vshrl.u32 %v4453_v4, 16  ;;  %v4466_v22 = vpack.i.b16 %v4453_v4, %v4385_v25  ;;  %v11282_v29 = vpop.eup %11281 }
 0xc6a   : > { %v4477_v3 = vshrl.u32 %v4454_v36, 16  ;;  %v4474_v32 = vpack.i.b16 %v4454_v36, %v4386_v40  ;;  %v4040_v48 = vsel %vm2430_vm4, %v11280_v34, 0.0  ;;  %v11284_v49 = vpop.eup %11283  ;;  %v4043_v18 = vsel %vm2430_vm4, %v11282_v29, 0.0 }
 0xc6b   : > { %4488 = vxpose.xlu1.c.b16.start.end [1/1] (short) (narrow) %v4458_v14, 16  ;;  %v4462_v47 = vpack.i.b16 %v4461_v24, %v4460_v15  ;;  %v4470_v42 = vpack.i.b16 %v4469_v35, %v4468_v39  ;;  %v11286_v59 = vpop.eup %11285  ;;  %v4046_v61 = vsel %vm2430_vm4, %v11284_v49, 0.0  ;;  %v4485_v6 = vshrl.u32 %v4455_v51, 16 }
 0xc6c   : > { %v4478_v44 = vpack.i.b16 %v4477_v3, %v4476_v28  ;;  %v4049_v50 = vsel %vm2430_vm4, %v11286_v59, 0.0  ;;  %v4482_v30 = vpack.i.b16 %v4455_v51, %v4387_v52 }
 0xc6d   : > { %4504 = vxpose.xlu0.c.b16.start.end [1/1] (short) (narrow) %v4462_v47, 16  ;;  %v4486_v31 = vpack.i.b16 %v4485_v6, %v4484_v21 }
 0xc6f   : > { %4520 = vxpose.xlu1.c.b16.start.end [1/1] (short) (narrow) %v4466_v22, 16 }
 0xc71   : > { %4536 = vxpose.xlu0.c.b16.start.end [1/1] (short) (narrow) %v4470_v42, 16 }
 0xc73   : > { %4552 = vxpose.xlu1.c.b16.start.end [1/1] (short) (narrow) %v4474_v32, 16 }
 0xc75   : > { %4568 = vxpose.xlu0.c.b16.start.end [1/1] (short) (narrow) %v4478_v44, 16 }
 0xc80   : > { %4041 = vadd.xlane.f32.xlu1 %v4040_v48 }
 0xc82   : > { %4044 = vadd.xlane.f32.xlu0 %v4043_v18 }
 0xc84   : > { %4047 = vadd.xlane.f32.xlu1 %v4046_v61 }
 0xc86   : > { %4050 = vadd.xlane.f32.xlu0 %v4049_v50 }
 0xcb1   : > { %4584 = vxpose.xlu1.c.b16.start.end [1/1] (short) (narrow) %v4482_v30, 16 }
 0xcb3   : > { %4600 = vxpose.xlu0.c.b16.start.end [1/1] (short) (narrow) %v4486_v31, 16 }
 0xccd   : > { %v4496_v53 = vpop.trf.xlu1 }
 0xccf   : > { %v4512_v54 = vpop.trf.xlu0 }
 0xcd1   : > { %v4528_v55 = vpop.trf.xlu1 }
 0xcd3   : > { %v4544_v45 = vpop.trf.xlu0 }
 0xcd5   : > { %v4560_v56 = vpop.trf.xlu1 }
 0xcd6   : > { %v4616_v7 = vcombine.low %v4496_v53, %v4560_v56 }
 0xcd7   : > { %v4576_v57 = vpop.trf.xlu0 }
 0xcd8   : > { %v4641_v17 = vcombine.low %v4512_v54, %v4576_v57  ;;  %v4623_v15 = vrot.slane %v4616_v7, %v11586_v26 }
 0xcda   : > { %v4648_v5 = vrot.slane %v4641_v17, %v11586_v26 }
 0xd09   : > { %v4042_v58 = vpop.xlane.xlu1 %4041 }
 0xd0a   : > { %11287 = vrcp.f32 %v4042_v58 }
 0xd0b   : > { %v4045_v19 = vpop.xlane.xlu0 %4044 }
 0xd0c   : > { %11289 = vrcp.f32 %v4045_v19 }
 0xd0d   : > { %v4048_v60 = vpop.xlane.xlu1 %4047 }
 0xd0e   : > { %11291 = vrcp.f32 %v4048_v60 }
 0xd0f   : > { %v4051_v62 = vpop.xlane.xlu0 %4050 }
 0xd10   : > { %11293 = vrcp.f32 %v4051_v62 }
 0xd13   : > { %v4592_v63 = vpop.trf.xlu1 }
 0xd14   : > { %v4624_v0 = vcombine.low %v4528_v55, %v4592_v63 }
 0xd15   : > { %v4608_v13 = vpop.trf.xlu0 }
 0xd16   : > { %v4649_v2 = vcombine.low %v4544_v45, %v4608_v13  ;;  %v4631_v4 = vrot.slane %v4624_v0, %v11586_v26 }
 0xd17   : > { %v11288_v12 = vpop.eup %11287 }
 0xd18   : > { %v4656_v8 = vrot.slane %v4649_v2, %v11586_v26  ;;  %v4053_v9 = vmul.f32 %v11288_v12, %v11280_v34  ;;  %v4632_v10 = vcombine.low %v4623_v15, %v4631_v4 }
 0xd19   : > { %v11290_v14 = vpop.eup %11289 }
 0xd1a   : > { %v4657_v24 = vcombine.low %v4648_v5, %v4656_v8  ;;  %v4060_v25 = vpack.c.bf16 %v4053_v9, %v4053_v9  ;;  %v4055_v23 = vmul.f32 %v11290_v14, %v11282_v29  ;;  %v4639_v22 = vrot.slane %v4632_v10, %v11592_v38 }
 0xd1b   : > { %v11292_v33 = vpop.eup %11291 }
 0xd1c   : > { %v4682_v47 = vsel %vm2430_vm4, %v4060_v25, 0  ;;  %v4664_v36 = vrot.slane %v4657_v24, %v11592_v38  ;;  %v4061_v37 = vpack.c.bf16 %v4055_v23, %v4055_v23  ;;  %v4057_v20 = vmul.f32 %v11292_v33, %v11284_v49  ;;  %v11233_v23 = vld [vmem:[%s12886_s4 + $0x58] sm:$0xff]  }
 0xd1d   : > { %v11294_v35 = vpop.eup %11293  ;;  %10947 = vmatpush3.bf16.xpose.msra.mxu0 %v4682_v47  ;;  %v4669_v43 = vshrl.u32 %v4639_v22, 16  ;;  %v4640_v29 = vcombine.high %v4639_v22, %v11410_v16 }
 0xd1e   : > { %10958 = vmatprep.subr.bf16.mxu0 %v11404_v1  ;;  %v4728_v39 = vsel %vm2430_vm4, %v4061_v37, 0  ;;  %v4059_v40 = vmul.f32 %v11294_v35, %v11286_v59  ;;  %v4062_v41 = vpack.c.bf16 %v4057_v20, %v4057_v20  ;;  %v4670_v42 = vshrl.u32 %v4664_v36, 16 }
 0xd1f   : > { %10953 = vmatpush3.bf16.xpose.msra.mxu1 %v4728_v39  ;;  %v4668_v3 = vpack.i.b16 %v4664_v36, %v4639_v22  ;;  %v4665_v44 = vcombine.high %v4664_v36, %v11410_v16  ;;  %v4675_v59 = vshrl.u32 %v4640_v29, 16  ;;  %v11234_v39 = vld [vmem:[%s12886_s4 + $0x50] sm:$0xff]  }
 0xd20   : > { %10964 = vmatprep.subr.bf16.mxu1 %v11404_v1  ;;  %v4063_v32 = vpack.c.bf16 %v4059_v40, %v4059_v40  ;;  %v4774_v28 = vsel %vm2430_vm4, %v4062_v41, 0  ;;  %v4671_v34 = vpack.i.b16 %v4670_v42, %v4669_v43 }
 0xd21   : > { %v4676_v49 = vshrl.u32 %v4665_v44, 16  ;;  %v4674_v18 = vpack.i.b16 %v4665_v44, %v4640_v29 }
 0xd22   : > { %v4820_v48 = vsel %vm2430_vm4, %v4063_v32, 0 }
 0xd23   : > { %v4677_v61 = vpack.i.b16 %v4676_v49, %v4675_v59 }
 0xd24   : > { %10949 = vmatmul.mubr.msk.bf16.vlgmr.msra.gmra.mxu0 %vm2430_vm4, %v4668_v3 }
 0xd25   : > { %10959 = vmatpush3.bf16.xpose.msra.mxu0 %v4774_v28  ;;  %10960 = vmatprep.mubr.msk.bf16.mxu0 %vm11405_vm0, %v11404_v1 }
 0xd26   : > { %10970 = vmatprep.subr.bf16.mxu0 %v11404_v1  ;;  %10955 = vmatmul.mubr.msk.bf16.vlgmr.msra.gmra.mxu1 %vm2430_vm4, %v4671_v34 }
 0xd27   : > { %10965 = vmatpush3.bf16.xpose.msra.mxu1 %v4820_v48  ;;  %10966 = vmatprep.mubr.msk.bf16.mxu1 %vm11405_vm0, %v11404_v1 }
 0xd28   : > { %10978 = vmatprep.subr.bf16.mxu1 %v11404_v1 }
 0xd2c   : > { %10961 = vmatmul.mubr.msk.bf16.vlgmr.msra.gmra.mxu0 %vm2430_vm4, %v4674_v18 }
 0xd2d   : > { %10974 = vmatprep.mubr.msk.bf16.mxu0 %vm11405_vm0, %v11404_v1  ;;  %10971 = vmatpush3.bf16.msra.mxu0 %v11233_v23 }
 0xd2e   : > { %10967 = vmatmul.mubr.msk.bf16.vlgmr.msra.gmra.mxu1 %vm2430_vm4, %v4677_v61  ;;  %10972 = vmatprep.subr.bf16.mxu0 %v11404_v1 }
 0xd2f   : > { %10982 = vmatprep.mubr.msk.bf16.mxu1 %vm11405_vm0, %v11404_v1 }
 0xd31   : > { %10973 = vmatpush3.bf16.msra.mxu0 %v11234_v39 }
 0xd32   : > { %10986 = vmatprep.subr.bf16.mxu0 %v11404_v1 }
 0xde4   : > { %v4718_v50 = vpop.f32.mrf.mxu0 }
 0xde5   : > { %4862 = vxpose.xlu1.b32.start.end [1/1] (short) (narrow) %v4718_v50, 8 }
 0xde6   : > { %v10950_v51 = vpop.f32.mrf.mxu0  ;;  %v4764_v52 = vpop.f32.mrf.mxu1 }
 0xde7   : > { %4894 = vxpose.xlu0.b32.start.end [1/1] (short) (narrow) %v4764_v52, 8 }
 0xde8   : > { %v4721_v6 = vpop.f32.mrf.mxu0  ;;  %v10956_v30 = vpop.f32.mrf.mxu1 }
 0xdea   : > { %v10951_v21 = vpop.f32.mrf.mxu0  ;;  %v4767_v31 = vpop.f32.mrf.mxu1 }
 0xdec   : > { %v4810_v53 = vpop.f32.mrf.mxu0  ;;  %v10957_v54 = vpop.f32.mrf.mxu1 }
 0xded   : > { %4926 = vxpose.xlu0.b32.start.end [1/1] (short) (narrow) %v4810_v53, 8  ;;  %v10555_v54 = vld [vmem:[%s12891_s9 + $0x5] ss:$0 sm:$0xff] }
 0xdee   : > { %v10962_v55 = vpop.f32.mrf.mxu0  ;;  %v4856_v45 = vpop.f32.mrf.mxu1 }
 0xdef   : > { %4958 = vxpose.xlu1.b32.start.end [1/1] (short) (narrow) %v4856_v45, 8 }
 0xdf0   : > { %v4813_v56 = vpop.f32.mrf.mxu0  ;;  %v10968_v57 = vpop.f32.mrf.mxu1 }
 0xdf2   : > { %v10963_v58 = vpop.f32.mrf.mxu0  ;;  %v4859_v19 = vpop.f32.mrf.mxu1 }
 0xdf4   : > { %v10969_v60 = vpop.f32.mrf.mxu1 }
 0xe61   : > { %v4878_v63 = vpop.trf.xlu1 }
 0xe63   : > { %v4910_v62 = vpop.trf.xlu0 }
 0xe69   : > { %v4942_v17 = vpop.trf.xlu0 }
 0xe6a   : > { %v4990_v0 = vcombine.low %v4878_v63, %v4942_v17  ;;  %v4991_v7 = vcombine.high %v4878_v63, %v4942_v17 }
 0xe6b   : > { %v4974_v13 = vpop.trf.xlu1 }
 0xe6c   : > { %v5006_v2 = vcombine.low %v4910_v62, %v4974_v13  ;;  %v5007_v12 = vcombine.high %v4910_v62, %v4974_v13  ;;  %v4998_v4 = vrot.slane %v4990_v0, %v11586_v26  ;;  %v5005_v5 = vrot.slane %v4991_v7, %v11586_v26  ;;  %v11235_v13 = vld [vmem:[%s12887_s5 + $0x8] sm:$0xff]  }
 0xe6d   : > { %10979 = vmatpush3.bf16.msra.mxu1 %v11235_v13 }
 0xe6e   : > { %v5014_v8 = vrot.slane %v5006_v2, %v11586_v26  ;;  %v5021_v9 = vrot.slane %v5007_v12, %v11586_v26  ;;  %10980 = vmatprep.subr.bf16.mxu1 %v11404_v1  ;;  %v11237_v2 = vld [vmem:[%s12888_s6 + $0x18] sm:$0xff]   ;;  %v11238_v12 = vld [vmem:[%s12888_s6 + $0x10] sm:$0xff]  }
 0xe70   : > { %v5022_v14 = vcombine.low %v4998_v4, %v5014_v8  ;;  %v5023_v15 = vcombine.high %v4998_v4, %v5014_v8  ;;  %v5038_v24 = vcombine.low %v5005_v5, %v5021_v9  ;;  %v5039_v25 = vcombine.high %v5005_v5, %v5021_v9 }
 0xe72   : > { %v5030_v33 = vrot.slane %v5022_v14, %v11592_v38  ;;  %v5037_v10 = vrot.slane %v5023_v15, %v11592_v38  ;;  %v5046_v47 = vrot.slane %v5038_v24, %v11592_v38  ;;  %v5053_v35 = vrot.slane %v5039_v25, %v11592_v38  ;;  %v10559_v14 = vld [vmem:[%s12892_s10 + $0x2] ss:$0 sm:$0xff]  ;;  %v10560_v24 = vld [vmem:[%s12892_s10 + $0x3] ss:$0 sm:$0xff] }
 0xe74   : > { %v5058_v36 = vcombine.low %v5030_v33, %v5037_v10  ;;  %v10549_v37 = vcombine.high %v5030_v33, %v5037_v10  ;;  %v5074_v20 = vcombine.low %v5046_v47, %v5053_v35  ;;  %v10550_v22 = vcombine.high %v5046_v47, %v5053_v35  ;;  %v11239_v10 = vld [vmem:[%s12888_s6 + $0x8] sm:$0xff]   ;;  %v11240_v47 = vld [vmem:[%s12888_s6] sm:$0xff]  }
 0xe75   : > { %v10561_v35 = vld [vmem:[%s12890_s8] ss:$0 sm:$0xff] }
 0xe76   : > { %v5065_v40 = vrot.slane %v5058_v36, %v11586_v26  ;;  %v5073_v41 = vrot.slane %v10549_v37, %v11586_v26  ;;  %v5081_v42 = vrot.slane %v5074_v20, %v11586_v26  ;;  %v5089_v3 = vrot.slane %v10550_v22, %v11586_v26 }
 0xe78   : > { %v5091_v43 = vcombine.high %v5065_v40, %v5073_v41  ;;  %v5107_v32 = vcombine.high %v5081_v42, %v5089_v3  ;;  %v5090_v28 = vcombine.low %v5065_v40, %v5073_v41  ;;  %v5106_v44 = vcombine.low %v5081_v42, %v5089_v3  ;;  %v10565_v42 = vld [vmem:[%s12891_s9 + $0x6] ss:$0 sm:$0xff] }
 0xe7a   : > { %v5105_v34 = vrot.slane %v5091_v43, %v11592_v38  ;;  %v5121_v29 = vrot.slane %v5107_v32, %v11592_v38  ;;  %v5098_v48 = vrot.slane %v5090_v28, %v11592_v38  ;;  %v5114_v49 = vrot.slane %v5106_v44, %v11592_v38 }
 0xe7c   : > { %v5124_v18 = vcombine.low %v5105_v34, %v5121_v29  ;;  %v5123_v59 = vcombine.high %v5098_v48, %v5114_v49  ;;  %v5122_v61 = vcombine.low %v5098_v48, %v5114_v49  ;;  %v5125_v50 = vcombine.high %v5105_v34, %v5121_v29 }
 0xe7e   : > { %5131 = vrot.lane.b32.xlu1 %v5124_v18, %s12924_s29  ;;  %5127 = vrot.lane.b32.xlu0 %v5123_v59, %s12925_s16 }
 0xe82   : > { %5135 = vrot.lane.b32.xlu1 %v5125_v50, %s12926_s30  ;;  %v11241_v50 = vld [vmem:[%s12885_s3 + $0x18] sm:$0xff]  }
 0xef0   : > { %v5132_v51 = vpop.permute.xlu1 %5131  ;;  %v5128_v52 = vpop.permute.xlu0 %5127 }
 0xef1   : > { %v5138_v6 = vsel %vm1317_vm3, %v5122_v61, %v5128_v52 }
 0xef2   : > { %v5139_v21 = vsel %vm2430_vm4, %v5138_v6, %v5132_v51  ;;  %v11242_v51 = vld [vmem:[%s12885_s3 + $0x10] sm:$0xff]  }
 0xef4   : > { %v5136_v30 = vpop.permute.xlu1 %5135 }
 0xef5   : > { %v5140_v31 = vsel %vm2432_vm5, %v5139_v21, %v5136_v30 }
 0xef6   : > { %v5141_v53 = vpack.c.bf16 %v5140_v31, %v5140_v31  ;;  %v10571_v31 = vld [vmem:[%s12892_s10 + $0x4] ss:$0 sm:$0xff] }
 0xef8   : > { %10975 = vmatmul.mubr.msk.bf16.vlgmr.msra.gmra.mxu0 %vm469_vm1, %v5141_v53 }
 0xef9   : > { %10994 = vmatprep.mubr.msk.bf16.mxu0 %vm11405_vm0, %v11404_v1  ;;  %10987 = vmatpush3.bf16.msra.mxu0 %v11237_v2 }
 0xefa   : > { %10988 = vmatprep.subr.bf16.mxu0 %v11404_v1 }
 0xefd   : > { %10989 = vmatpush3.bf16.msra.mxu0 %v11238_v12 }
 0xefe   : > { %10990 = vmatprep.subr.bf16.mxu0 %v11404_v1 }
 0xf01   : > { %10991 = vmatpush3.bf16.msra.mxu0 %v11239_v10 }
 0xf02   : > { %10992 = vmatprep.subr.bf16.mxu0 %v11404_v1 }
 0xf05   : > { %10993 = vmatpush3.bf16.msra.mxu0 %v11240_v47 }
 0xf06   : > { %11014 = vmatprep.subr.bf16.mxu0 %v11404_v1 }
 0xfb8   : > { %v5201_v55 = vpop.f32.mrf.mxu0 }
 0xfb9   : > { %v5202_v45 = vadd.f32 %v10555_v54, %v5201_v55  ;;  %v10572_v54 = vld [vmem:[%s12892_s10 + $0x5] ss:$0 sm:$0xff] }
 0xfba   : > { %v10976_v56 = vpop.f32.mrf.mxu0 }
 0xfbb   : > { %v5207_v57 = vadd.f32 %v5202_v45, %v11877_v27  ;;  %v11236_v27 = vld [vmem:[%s12887_s5] sm:$0xff]  }
 0xfbc   : > { %v5204_v58 = vpop.f32.mrf.mxu0  ;;  %10981 = vmatpush3.bf16.msra.mxu1 %v11236_v27  ;;  %v11340_v56 = vld [vmem:[%s12884_s2] sm:$0xff] }
 0xfbd   : > { %v5210_v19 = vsel %vm469_vm1, %v5207_v57, 0.0  ;;  %10998 = vmatprep.subr.bf16.mxu1 %v11404_v1  ;;  %v11243_v58 = vld [vmem:[%s12886_s4 + $0x68] sm:$0xff]  }
 0xfbe   : > { %5211 = vadd.xlane.f32.xlu1 %v5210_v19  ;;  %v10977_v60 = vpop.f32.mrf.mxu0 }
 0xfbf   : > { %v11244_v60 = vld [vmem:[%s12886_s4 + $0x60] sm:$0xff]  }
0x1047   : > { %v5212_v62 = vpop.xlane.xlu1 %5211 }
0x1048   : > { %v5213_v63 = vmul.f32 0.03125, %v5212_v62 }
0x104a   : > { %v5214_v17 = vsub.f32 %v5207_v57, %v5213_v63  ;;  %v10577_v63 = vld [vmem:[%s12889_s7 + $0x1] ss:$0 sm:$0xff] }
0x104c   : > { %v5215_v0 = vmul.f32 %v5214_v17, %v5214_v17 }
0x104e   : > { %v5216_v7 = vsel %vm469_vm1, %v5215_v0, 0.0 }
0x104f   : > { %5217 = vadd.xlane.f32.xlu0 %v5216_v7 }
0x10d8   : > { %v5218_v4 = vpop.xlane.xlu0 %5217 }
0x10d9   : > { %v5219_v5 = vmul.f32 0.03125, %v5218_v4 }
0x10db   : > { %v5220_v8 = vadd.f32 1e-05, %v5219_v5 }
0x10dd   : > { %11295 = vrsqrt.f32 %v5220_v8 }
0x10ea   : > { %v11296_v9 = vpop.eup %11295 }
0x10eb   : > { %v5222_v15 = vmul.f32 %v11296_v9, %v5214_v17 }
0x10ed   : > { %v5227_v25 = vmul.f32 %v10559_v14, %v5222_v15 }
0x10ef   : > { %v5232_v23 = vadd.f32 %v10560_v24, %v5227_v25 }
0x10f1   : > { %v5233_v33 = vpack.c.bf16 %v5232_v23, %v5232_v23 }
0x10f3   : > { %10983 = vmatmul.mubr.msk.bf16.vlgmr.msra.gmra.mxu1 %vm469_vm1, %v5233_v33 }
0x10f4   : > { %11002 = vmatprep.mubr.msk.bf16.mxu1 %vm11405_vm0, %v11404_v1  ;;  %10999 = vmatpush3.bf16.msra.mxu1 %v11241_v50 }
0x10f5   : > { %11000 = vmatprep.subr.bf16.mxu1 %v11404_v1 }
0x10f8   : > { %11001 = vmatpush3.bf16.msra.mxu1 %v11242_v51 }
0x10f9   : > { %11006 = vmatprep.subr.bf16.mxu1 %v11404_v1 }
0x11b3   : > { %v5292_v36 = vpop.f32.mrf.mxu1 }
0x11b4   : > { %v5293_v37 = vadd.f32 %v10561_v35, %v5292_v36 }
0x11b5   : > { %v10984_v20 = vpop.f32.mrf.mxu1 }
0x11b6   : > { %v5298_v22 = vmax.f32 %v5293_v37, 0.0 }
0x11b7   : > { %v5295_v39 = vpop.f32.mrf.mxu1 }
0x11b8   : > { %v5299_v40 = vpack.c.bf16 %v5298_v22, %v5298_v22 }
0x11b9   : > { %v10985_v41 = vpop.f32.mrf.mxu1 }
0x11ba   : > { %10995 = vmatmul.mubr.msk.bf16.vlgmr.msra.gmra.mxu0 %vm5337_vm6, %v5299_v40 }
0x11bb   : > { %11016 = vmatprep.mubr.msk.bf16.mxu0 %vm11405_vm0, %v11404_v1 }
0x127a   : > { %v5375_v3 = vpop.f32.mrf.mxu0 }
0x127b   : > { %v5376_v43 = vadd.f32 %v10565_v42, %v5375_v3 }
0x127c   : > { %v10996_v32 = vpop.f32.mrf.mxu0 }
0x127d   : > { %v5381_v28 = vadd.f32 %v5376_v43, %v5232_v23 }
0x127e   : > { %v5378_v44 = vpop.f32.mrf.mxu0 }
0x127f   : > { %v5384_v34 = vsel %vm469_vm1, %v5381_v28, 0.0 }
0x1280   : > { %5385 = vadd.xlane.f32.xlu0 %v5384_v34  ;;  %v10997_v29 = vpop.f32.mrf.mxu0 }
0x1309   : > { %v5386_v48 = vpop.xlane.xlu0 %5385 }
0x130a   : > { %v5387_v49 = vmul.f32 0.03125, %v5386_v48 }
0x130c   : > { %v5388_v18 = vsub.f32 %v5381_v28, %v5387_v49 }
0x130e   : > { %v5389_v59 = vmul.f32 %v5388_v18, %v5388_v18 }
0x1310   : > { %v5390_v61 = vsel %vm469_vm1, %v5389_v59, 0.0 }
0x1311   : > { %5391 = vadd.xlane.f32.xlu1 %v5390_v61 }
0x139a   : > { %v5392_v52 = vpop.xlane.xlu1 %5391 }
0x139b   : > { %v5393_v6 = vmul.f32 0.03125, %v5392_v52 }
0x139d   : > { %v5394_v30 = vadd.f32 1e-05, %v5393_v6 }
0x139f   : > { %11297 = vrsqrt.f32 %v5394_v30 }
0x13ac   : > { %v11298_v21 = vpop.eup %11297 }
0x13ad   : > { %v5396_v53 = vmul.f32 %v11298_v21, %v5388_v18 }
0x13af   : > { %v5401_v55 = vmul.f32 %v10571_v31, %v5396_v53 }
0x13b1   : > { %v12203_v45 = vadd.f32 %v10572_v54, %v5401_v55 }
0x13b3   : > { %v5407_v57 = vadd.f32 %v11340_v56, %v12203_v45  ;;  %v5474_v62 = vpack.c.bf16 %v12203_v45, %v12203_v45 }
0x13b5   : > { %v5408_v19 = vpack.c.bf16 %v5407_v57, %v5407_v57 }
0x13b7   : > { %11003 = vmatmul.mubr.msk.bf16.vlgmr.msra.gmra.mxu1 %vm469_vm1, %v5408_v19 }
0x13b8   : > { %11007 = vmatpush3.bf16.msra.mxu1 %v11243_v58  ;;  %11010 = vmatprep.mubr.msk.bf16.mxu1 %vm11405_vm0, %v11404_v1 }
0x13b9   : > { %11008 = vmatprep.subr.bf16.mxu1 %v11404_v1 }
0x13bc   : > { %11009 = vmatpush3.bf16.msra.mxu1 %v11244_v60 }
0x13bd   : > { %11020 = vmatprep.subr.bf16.mxu1 %v11404_v1 }
0x13bf   : > { %11011 = vmatmul.mubr.msk.bf16.vlgmr.msra.gmra.mxu1 %vm469_vm1, %v5474_v62 }
0x13c0   : > { %11022 = vmatprep.mubr.msk.bf16.mxu1 %vm11405_vm0, %v11404_v1 }
0x1477   : > { %v5468_v17 = vpop.f32.mrf.mxu1 }
0x1478   : > { %v12228_v0 = vadd.f32 %v10577_v63, %v5468_v17 }
0x1479   : > { %v11004_v7 = vpop.f32.mrf.mxu1 }
0x147a   : > { %5545 = vrot.lane.b32.xlu1 %v12228_v0, %s12922_s20  ;;  %5542 = vrot.lane.b32.xlu0 %v12228_v0, %s12921_s19 }
0x147b   : > { %v5471_v13 = vpop.f32.mrf.mxu1 }
0x147d   : > { %v11005_v27 = vpop.f32.mrf.mxu1 }
0x147e   : > { %5548 = vrot.lane.b32.xlu1 %v12228_v0, %s12923_s26  ;;  %5627 = vrot.lane.b32.xlu0 %v12228_v0, %s12927_s23 }
0x147f   : > { %v12238_v2 = vpop.f32.mrf.mxu1 }
0x1481   : > { %v11012_v12 = vpop.f32.mrf.mxu1 }
0x1483   : > { %v5538_v4 = vpop.f32.mrf.mxu1 }
0x1485   : > { %v11013_v5 = vpop.f32.mrf.mxu1 }
0x14ec   : > { %v12240_v8 = vpop.permute.xlu1 %5545  ;;  %v12242_v9 = vpop.permute.xlu0 %5542 }
0x14ed   : > { %5631 = vrot.lane.b32.xlu0 %v12240_v8, %s12927_s23  ;;  %5629 = vrot.lane.b32.xlu1 %v12242_v9, %s12927_s23 }
0x14f0   : > { %v12248_v14 = vpop.permute.xlu1 %5548  ;;  %v5628_v15 = vpop.permute.xlu0 %5627 }
0x14f1   : > { %5633 = vrot.lane.b32.xlu1 %v12248_v14, %s12927_s23  ;;  %s10400_s23 = scalar_lea.hbm %s12894_s12, %s10701_s17 }
0x155f   : > { %v5630_v24 = vpop.permute.xlu1 %5629  ;;  %v5632_v25 = vpop.permute.xlu0 %5631 }
0x1560   : > { %v5639_v23 = vcombine.low %v5628_v15, %v5632_v25  ;;  %v5640_v33 = vcombine.high %v5628_v15, %v5632_v25 }
0x1562   : > { %v5647_v36 = vrot.slane %v5639_v23, %v11586_v26  ;;  %v5654_v37 = vrot.slane %v5640_v33, %v11586_v26 }
0x1563   : > { %v5634_v10 = vpop.permute.xlu1 %5633 }
0x1564   : > { %v5655_v47 = vcombine.low %v5630_v24, %v5634_v10  ;;  %v5656_v35 = vcombine.high %v5630_v24, %v5634_v10 }
0x1566   : > { %v5663_v20 = vrot.slane %v5655_v47, %v11586_v26  ;;  %v5670_v22 = vrot.slane %v5656_v35, %v11586_v26 }
0x1568   : > { %v5671_v39 = vcombine.low %v5647_v36, %v5663_v20  ;;  %v5672_v40 = vcombine.high %v5647_v36, %v5663_v20  ;;  %v5687_v41 = vcombine.low %v5654_v37, %v5670_v22  ;;  %v5688_v43 = vcombine.high %v5654_v37, %v5670_v22 }
0x156a   : > { %v5695_v42 = vrot.slane %v5687_v41, %v11592_v38  ;;  %v5679_v3 = vrot.slane %v5671_v39, %v11592_v38  ;;  %v5686_v44 = vrot.slane %v5672_v40, %v11592_v38  ;;  %v5702_v18 = vrot.slane %v5688_v43, %v11592_v38 }
0x156c   : > { %v5711_v32 = vpack.c.bf16 %v5695_v42, %v5695_v42  ;;  %v5707_v28 = vpack.c.bf16 %v5679_v3, %v5679_v3  ;;  %v5703_v34 = vcombine.high %v5679_v3, %v11404_v1  ;;  %v5709_v29 = vpack.c.bf16 %v5686_v44, %v5686_v44 }
0x156d   : > { %v5704_v49 = vcombine.high %v5686_v44, %v11404_v1  ;;  %v5713_v61 = vpack.c.bf16 %v5702_v18, %v5702_v18  ;;  %v5705_v50 = vcombine.high %v5695_v42, %v11404_v1  ;;  %v5706_v52 = vcombine.high %v5702_v18, %v11404_v1 }
0x156e   : > { %5927 = vxpose.xlu1.c.b16.start.end [1/1] (short) (narrow) %v5711_v32, 16  ;;  %5863 = vxpose.xlu0.c.b16.start.end [1/1] (short) (narrow) %v5707_v28, 16  ;;  %v5708_v48 = vpack.c.bf16 %v5703_v34, %v5703_v34 }
0x156f   : > { %v5710_v59 = vpack.c.bf16 %v5704_v49, %v5704_v49  ;;  %v5712_v51 = vpack.c.bf16 %v5705_v50, %v5705_v50  ;;  %v5714_v6 = vpack.c.bf16 %v5706_v52, %v5706_v52  ;;  %v5551_v50 = vcombine.low %v12228_v0, %v12240_v8 }
0x1572   : > { %5895 = vxpose.xlu0.c.b16.start.end [1/1] (short) (narrow) %v5709_v29, 16  ;;  %5879 = vxpose.xlu1.c.b16.start.end [1/1] (short) (narrow) %v5708_v48, 16  ;;  %v10586_v48 = vld [vmem:[%s12891_s9 + $0x8] ss:$0 sm:$0xff] }
0x1573   : > { %v12280_v18 = vadd.f32 %v10586_v48, %v12238_v2 }
0x1576   : > { %5911 = vxpose.xlu0.c.b16.start.end [1/1] (short) (narrow) %v5710_v59, 16  ;;  %5959 = vxpose.xlu1.c.b16.start.end [1/1] (short) (narrow) %v5713_v61, 16  ;;  %v5567_v59 = vcombine.low %v12242_v9, %v12248_v14  ;;  %v5568_v61 = vcombine.high %v12242_v9, %v12248_v14 }
0x1578   : > { %v5575_v52 = vrot.slane %v5567_v59, %v11586_v26  ;;  %v5582_v2 = vrot.slane %v5568_v61, %v11586_v26 }
0x157a   : > { %5943 = vxpose.xlu0.c.b16.start.end [1/1] (short) (narrow) %v5712_v51, 16  ;;  %v5552_v51 = vcombine.high %v12228_v0, %v12240_v8 }
0x157e   : > { %5975 = vxpose.xlu0.c.b16.start.end [1/1] (short) (narrow) %v5714_v6, 16  ;;  %v5559_v6 = vrot.slane %v5551_v50, %v11586_v26 }
0x15d0   : > { %v5935_v30 = vpop.trf.xlu1  ;;  %v5871_v21 = vpop.trf.xlu0 }
0x15d1   : > { %v5991_v57 = vcombine.low %v5871_v21, %v5935_v30  ;;  %v5566_v30 = vrot.slane %v5552_v51, %v11586_v26  ;;  %v5583_v21 = vcombine.low %v5559_v6, %v5575_v52 }
0x15d3   : > { %v5998_v60 = vrot.slane %v5991_v57, %v11586_v26  ;;  %v5591_v9 = vrot.slane %v5583_v21, %v11592_v38 }
0x15d4   : > { %v5903_v31 = vpop.trf.xlu0  ;;  %v5887_v53 = vpop.trf.xlu1 }
0x15d5   : > { %v5615_v57 = vcombine.high %v5591_v9, %v11404_v1 }
0x15d8   : > { %v5919_v54 = vpop.trf.xlu0  ;;  %v5967_v55 = vpop.trf.xlu1 }
0x15d9   : > { %v5999_v56 = vcombine.low %v5903_v31, %v5967_v55  ;;  %v5584_v31 = vcombine.high %v5559_v6, %v5575_v52 }
0x15db   : > { %v6006_v19 = vrot.slane %v5999_v56, %v11586_v26  ;;  %v5598_v14 = vrot.slane %v5584_v31, %v11592_v38 }
0x15dc   : > { %v5951_v58 = vpop.trf.xlu0 }
0x15dd   : > { %v6025_v62 = vcombine.low %v5887_v53, %v5951_v58  ;;  %v6007_v17 = vcombine.low %v5998_v60, %v6006_v19  ;;  %v6008_v12 = vcombine.high %v5998_v60, %v6006_v19  ;;  %v5599_v53 = vcombine.low %v5566_v30, %v5582_v2 }
0x15de   : > { %v5616_v58 = vcombine.high %v5598_v14, %v11404_v1 }
0x15df   : > { %v6032_v13 = vrot.slane %v6025_v62, %v11586_v26  ;;  %v6015_v4 = vrot.slane %v6007_v17, %v11592_v38  ;;  %v6022_v23 = vrot.slane %v6008_v12, %v11592_v38  ;;  %v5607_v55 = vrot.slane %v5599_v53, %v11592_v38 }
0x15e0   : > { %v5983_v63 = vpop.trf.xlu0 }
0x15e1   : > { %v6033_v7 = vcombine.low %v5919_v54, %v5983_v63  ;;  %v6063_v10 = vshrl.u32 %v6015_v4, 16  ;;  %v6079_v22 = vshrl.u32 %v6022_v23, 16  ;;  %v6023_v39 = vcombine.high %v6015_v4, %v11410_v16 }
0x15e2   : > { %v6024_v32 = vcombine.high %v6022_v23, %v11410_v16  ;;  %v5600_v54 = vcombine.high %v5566_v30, %v5582_v2  ;;  %v5617_v19 = vcombine.high %v5607_v55, %v11404_v1 }
0x15e3   : > { %v6040_v27 = vrot.slane %v6033_v7, %v11586_v26  ;;  %v6071_v43 = vshrl.u32 %v6023_v39, 16 }
0x15e4   : > { %v6087_v29 = vshrl.u32 %v6024_v32, 16  ;;  %v5614_v0 = vrot.slane %v5600_v54, %v11592_v38  ;;  %v10592_v17 = vpack.c.bf16 %v5617_v19, %v5615_v57 }
0x15e5   : > { %v6041_v5 = vcombine.low %v6032_v13, %v6040_v27  ;;  %v6042_v15 = vcombine.high %v6032_v13, %v6040_v27  ;;  %v10590_v27 = vpack.c.bf16 %v5607_v55, %v5591_v9 }
0x15e6   : > { %v5618_v60 = vcombine.high %v5614_v0, %v11404_v1  ;;  %v10591_v12 = vpack.c.bf16 %v5614_v0, %v5598_v14 }
0x15e7   : > { %v6049_v24 = vrot.slane %v6041_v5, %v11592_v38  ;;  %v6056_v25 = vrot.slane %v6042_v15, %v11592_v38  ;;  %v5833_v15 = vrot.slane %v10592_v17, %v11586_v26 }
0x15e8   : > { %v10593_v7 = vpack.c.bf16 %v5618_v60, %v5616_v58 }
0x15e9   : > { %v6061_v33 = vpack.i.b16 %v6049_v24, %v6015_v4  ;;  %v6064_v47 = vshrl.u32 %v6049_v24, 16  ;;  %v6080_v36 = vshrl.u32 %v6056_v25, 16  ;;  %v6057_v37 = vcombine.high %v6049_v24, %v11410_v16 }
0x15ea   : > { %v6077_v20 = vpack.i.b16 %v6056_v25, %v6022_v23  ;;  %v6058_v42 = vcombine.high %v6056_v25, %v11410_v16  ;;  %v5841_v24 = vrot.slane %v10593_v7, %v11586_v26 }
0x15eb   : > { %6091 = vxpose.xlu1.c.b16.start.end [1/1] (short) (narrow) %v6061_v33, 16  ;;  %v6065_v35 = vpack.i.b16 %v6064_v47, %v6063_v10  ;;  %v6081_v40 = vpack.i.b16 %v6080_v36, %v6079_v22  ;;  %v6072_v41 = vshrl.u32 %v6057_v37, 16  ;;  %v6069_v3 = vpack.i.b16 %v6057_v37, %v6023_v39 }
0x15ec   : > { %v6088_v44 = vshrl.u32 %v6058_v42, 16  ;;  %v6085_v34 = vpack.i.b16 %v6058_v42, %v6024_v32  ;;  %v5808_v10 = vrot.slane %v10590_v27, %v11586_v26  ;;  %v5816_v47 = vrot.slane %v10591_v12, %v11586_v26 }
0x15ed   : > { %6107 = vxpose.xlu0.c.b16.start.end [1/1] (short) (narrow) %v6065_v35, 16  ;;  %v6073_v28 = vpack.i.b16 %v6072_v41, %v6071_v43  ;;  %v5842_v22 = vcombine.low %v5833_v15, %v5841_v24 }
0x15ee   : > { %v6089_v49 = vpack.i.b16 %v6088_v44, %v6087_v29  ;;  %v5817_v42 = vcombine.low %v5808_v10, %v5816_v47 }
0x15ef   : > { %6155 = vxpose.xlu1.c.b16.start.end [1/1] (short) (narrow) %v6077_v20, 16  ;;  %v5849_v32 = vrot.slane %v5842_v22, %v11592_v38 }
0x15f1   : > { %6171 = vxpose.xlu0.c.b16.start.end [1/1] (short) (narrow) %v6081_v40, 16  ;;  %v5855_v61 = vshrl.u32 %v5849_v32, 16  ;;  %v5850_v14 = vcombine.high %v5849_v32, %v11410_v16 }
0x15f3   : > { %6123 = vxpose.xlu1.c.b16.start.end [1/1] (short) (narrow) %v6069_v3, 16 }
0x15f5   : > { %6139 = vxpose.xlu0.c.b16.start.end [1/1] (short) (narrow) %v6073_v28, 16 }
0x15f7   : > { %6187 = vxpose.xlu1.c.b16.start.end [1/1] (short) (narrow) %v6085_v34, 16  ;;  %v5824_v34 = vrot.slane %v5817_v42, %v11592_v38 }
0x15f9   : > { %6203 = vxpose.xlu0.c.b16.start.end [1/1] (short) (narrow) %v6089_v49, 16  ;;  %v5853_v21 = vpack.i.b16 %v5849_v32, %v5824_v34  ;;  %v5854_v31 = vshrl.u32 %v5824_v34, 16  ;;  %v5825_v0 = vcombine.high %v5824_v34, %v11410_v16 }
0x15fb   : > { %5716 = vrot.lane.b32.xlu1 %v12280_v18, %s12921_s19  ;;  %v5856_v9 = vpack.i.b16 %v5855_v61, %v5854_v31  ;;  %v5860_v57 = vshrl.u32 %v5825_v0, 16 }
0x164d   : > { %v6099_v8 = vpop.trf.xlu1 }
0x164f   : > { %v6115_v56 = vpop.trf.xlu0 }
0x1651   : > { %v6163_v62 = vpop.trf.xlu1 }
0x1652   : > { %v6219_v5 = vcombine.low %v6099_v8, %v6163_v62  ;;  %v5861_v8 = vshrl.u32 %v5850_v14, 16 }
0x1653   : > { %v6179_v63 = vpop.trf.xlu0 }
0x1654   : > { %v6244_v23 = vcombine.low %v6115_v56, %v6179_v63  ;;  %v6226_v36 = vrot.slane %v6219_v5, %v11586_v26  ;;  %v5859_v56 = vpack.i.b16 %v5850_v14, %v5825_v0  ;;  %v5862_v58 = vpack.i.b16 %v5861_v8, %v5860_v57 }
0x1655   : > { %v6131_v13 = vpop.trf.xlu1 }
0x1656   : > { %v6251_v39 = vrot.slane %v6244_v23, %v11586_v26 }
0x1657   : > { %v6147_v4 = vpop.trf.xlu0 }
0x1659   : > { %v6195_v25 = vpop.trf.xlu1 }
0x165a   : > { %v6227_v33 = vcombine.low %v6131_v13, %v6195_v25 }
0x165b   : > { %v6211_v35 = vpop.trf.xlu0 }
0x165c   : > { %v6234_v37 = vrot.slane %v6227_v33, %v11586_v26  ;;  %v6252_v20 = vcombine.low %v6147_v4, %v6211_v35 }
0x165e   : > { %v6235_v40 = vcombine.low %v6226_v36, %v6234_v37  ;;  %v6259_v41 = vrot.slane %v6252_v20, %v11586_v26 }
0x1660   : > { %v6242_v3 = vrot.slane %v6235_v40, %v11592_v38  ;;  %v6260_v43 = vcombine.low %v6251_v39, %v6259_v41 }
0x1662   : > { %v6267_v28 = vrot.slane %v6260_v43, %v11592_v38  ;;  %v6243_v44 = vcombine.high %v6242_v3, %v11410_v16  ;;  %v6272_v48 = vshrl.u32 %v6242_v3, 16 }
0x1664   : > { %v6271_v29 = vpack.i.b16 %v6267_v28, %v6242_v3  ;;  %v6273_v49 = vshrl.u32 %v6267_v28, 16  ;;  %v6268_v59 = vcombine.high %v6267_v28, %v11410_v16  ;;  %v6278_v50 = vshrl.u32 %v6243_v44, 16 }
0x1666   : > { %v6285_v51 = vsel %vm1321_vm2, %v6271_v29, 0  ;;  %v6274_v52 = vpack.i.b16 %v6273_v49, %v6272_v48  ;;  %v6277_v2 = vpack.i.b16 %v6268_v59, %v6243_v44  ;;  %v6279_v6 = vshrl.u32 %v6268_v59, 16 }
0x1667   : > { %11015 = vmatpush3.bf16.msra.mxu0 %v6285_v51 }
0x1668   : > { %v6331_v30 = vsel %vm1321_vm2, %v6274_v52, 0  ;;  %11026 = vmatprep.subr.bf16.mxu0 %v11404_v1  ;;  %v6280_v53 = vpack.i.b16 %v6279_v6, %v6278_v50  ;;  %v6377_v54 = vsel %vm1321_vm2, %v6277_v2, 0 }
0x1669   : > { %11021 = vmatpush3.bf16.msra.mxu1 %v6331_v30 }
0x166a   : > { %11017 = vmatmul.mubr.msk.bf16.vlgmr.msra.gmra.mxu0 %vm1317_vm3, %v5853_v21  ;;  %11032 = vmatprep.subr.bf16.mxu1 %v11404_v1  ;;  %v6423_v55 = vsel %vm1321_vm2, %v6280_v53, 0 }
0x166b   : > { %11027 = vmatpush3.bf16.msra.mxu0 %v6377_v54  ;;  %11028 = vmatprep.mubr.msk.bf16.mxu0 %vm11405_vm0, %v11404_v1 }
0x166c   : > { %11023 = vmatmul.mubr.msk.bf16.vlgmr.msra.gmra.mxu1 %vm1317_vm3, %v5856_v9  ;;  %11038 = vmatprep.subr.bf16.mxu0 %v11404_v1 }
0x166d   : > { %11033 = vmatpush3.bf16.msra.mxu1 %v6423_v55  ;;  %11034 = vmatprep.mubr.msk.bf16.mxu1 %vm11405_vm0, %v11404_v1  ;;  %v5717_v37 = vpop.permute.xlu1 %5716 }
0x166e   : > { %11044 = vmatprep.subr.bf16.mxu1 %v11404_v1 }
0x1672   : > { %11029 = vmatmul.mubr.msk.bf16.vlgmr.msra.gmra.mxu0 %vm1317_vm3, %v5859_v56 }
0x1673   : > { %11040 = vmatprep.mubr.msk.bf16.mxu0 %vm11405_vm0, %v11404_v1 }
0x1674   : > { %11035 = vmatmul.mubr.msk.bf16.vlgmr.msra.gmra.mxu1 %vm1317_vm3, %v5862_v58 }
0x1675   : > { %11046 = vmatprep.mubr.msk.bf16.mxu1 %vm11405_vm0, %v11404_v1 }
0x172a   : > { %v12340_v19 = vpop.f32.mrf.mxu0 }
0x172b   : > { %v6465_v60 = vsel %vm1317_vm3, %v12340_v19, -inf }
0x172c   : > { %v11018_v62 = vpop.f32.mrf.mxu0  ;;  %6466 = vmax.xlane.f32.xlu1 %v6465_v60  ;;  %v12344_v63 = vpop.f32.mrf.mxu1 }
0x172d   : > { %v6468_v17 = vsel %vm1317_vm3, %v12344_v63, -inf }
0x172e   : > { %v6324_v7 = vpop.f32.mrf.mxu0  ;;  %6469 = vmax.xlane.f32.xlu0 %v6468_v17  ;;  %v11024_v13 = vpop.f32.mrf.mxu1 }
0x1730   : > { %v11019_v27 = vpop.f32.mrf.mxu0  ;;  %v6370_v12 = vpop.f32.mrf.mxu1 }
0x1732   : > { %v11025_v4 = vpop.f32.mrf.mxu1  ;;  %v12348_v5 = vpop.f32.mrf.mxu0 }
0x1733   : > { %v6471_v35 = vsel %vm1317_vm3, %v12348_v5, -inf }
0x1734   : > { %v11030_v15 = vpop.f32.mrf.mxu0  ;;  %v12350_v24 = vpop.f32.mrf.mxu1 }
0x1735   : > { %v6474_v36 = vsel %vm1317_vm3, %v12350_v24, -inf }
0x1736   : > { %v6416_v25 = vpop.f32.mrf.mxu0  ;;  %v11036_v23 = vpop.f32.mrf.mxu1 }
0x1738   : > { %v11031_v33 = vpop.f32.mrf.mxu0  ;;  %v6462_v10 = vpop.f32.mrf.mxu1 }
0x173a   : > { %v11037_v47 = vpop.f32.mrf.mxu1 }
0x173d   : > { %5722 = vrot.lane.b32.xlu1 %v12280_v18, %s12923_s26 }
0x1744   : > { %5719 = vrot.lane.b32.xlu0 %v12280_v18, %s12922_s20 }
0x1761   : > { %6472 = vmax.xlane.f32.xlu1 %v6471_v35 }
0x1763   : > { %6475 = vmax.xlane.f32.xlu0 %v6474_v36 }
0x17b5   : > { %v12360_v20 = vpop.xlane.xlu1 %6466 }
0x17b7   : > { %v12362_v22 = vpop.xlane.xlu0 %6469 }
0x17b9   : > { %v5723_v39 = vpop.permute.xlu1 %5722 }
0x17ba   : > { %v5741_v40 = vcombine.low %v5717_v37, %v5723_v39  ;;  %v5742_v41 = vcombine.high %v5717_v37, %v5723_v39  ;;  %v6477_v39 = vsub.f32 %v12340_v19, %v12360_v20 }
0x17bb   : > { %v5720_v42 = vpop.permute.xlu0 %5719 }
0x17bc   : > { %v5725_v3 = vcombine.low %v12280_v18, %v5720_v42  ;;  %v5726_v43 = vcombine.high %v12280_v18, %v5720_v42  ;;  %v5749_v32 = vrot.slane %v5741_v40, %v11586_v26  ;;  %v5756_v44 = vrot.slane %v5742_v41, %v11586_v26 }
0x17bd   : > { %v6478_v42 = vsub.f32 %v12344_v63, %v12362_v22 }
0x17be   : > { %v5733_v28 = vrot.slane %v5725_v3, %v11586_v26  ;;  %v5740_v34 = vrot.slane %v5726_v43, %v11586_v26 }
0x17c0   : > { %v5757_v29 = vcombine.low %v5733_v28, %v5749_v32  ;;  %v5758_v48 = vcombine.high %v5733_v28, %v5749_v32  ;;  %v5773_v49 = vcombine.low %v5740_v34, %v5756_v44  ;;  %v5774_v50 = vcombine.high %v5740_v34, %v5756_v44 }
0x17c2   : > { %v5765_v59 = vrot.slane %v5757_v29, %v11592_v38  ;;  %v5772_v61 = vrot.slane %v5758_v48, %v11592_v38  ;;  %v5781_v2 = vrot.slane %v5773_v49, %v11592_v38  ;;  %v5788_v31 = vrot.slane %v5774_v50, %v11592_v38 }
0x17c3   : > { %v6481_v29 = vmul.f32 1.442695, %v6477_v39 }
0x17c4   : > { %v5793_v51 = vpack.c.bf16 %v5765_v59, %v5765_v59  ;;  %v5789_v52 = vcombine.high %v5765_v59, %v11404_v1  ;;  %v5790_v18 = vcombine.high %v5772_v61, %v11404_v1  ;;  %v5791_v21 = vcombine.high %v5781_v2, %v11404_v1 }
0x17c5   : > { %v5795_v53 = vpack.c.bf16 %v5772_v61, %v5772_v61  ;;  %v5792_v9 = vcombine.high %v5788_v31, %v11404_v1  ;;  %v5797_v14 = vpack.c.bf16 %v5781_v2, %v5781_v2  ;;  %v5799_v0 = vpack.c.bf16 %v5788_v31, %v5788_v31 }
0x17c6   : > { %6513 = vxpose.xlu1.c.b16.start.end [1/1] (short) (narrow) %v5793_v51, 16  ;;  %v5794_v6 = vpack.c.bf16 %v5789_v52, %v5789_v52  ;;  %v5796_v30 = vpack.c.bf16 %v5790_v18, %v5790_v18  ;;  %v5798_v54 = vpack.c.bf16 %v5791_v21, %v5791_v21  ;;  %v6483_v59 = vmul.f32 1.442695, %v6478_v42 }
0x17c7   : > { %v5800_v55 = vpack.c.bf16 %v5792_v9, %v5792_v9  ;;  %11299 = vpow2.f32 %v6481_v29 }
0x17c8   : > { %6529 = vxpose.xlu0.c.b16.start.end [1/1] (short) (narrow) %v5794_v6, 16  ;;  %11301 = vpow2.f32 %v6483_v59 }
0x17ca   : > { %6561 = vxpose.xlu1.c.b16.start.end [1/1] (short) (narrow) %v5796_v30, 16 }
0x17cc   : > { %6545 = vxpose.xlu0.c.b16.start.end [1/1] (short) (narrow) %v5795_v53, 16 }
0x17ce   : > { %6593 = vxpose.xlu1.c.b16.start.end [1/1] (short) (narrow) %v5798_v54, 16 }
0x17d0   : > { %6577 = vxpose.xlu0.c.b16.start.end [1/1] (short) (narrow) %v5797_v14, 16 }
0x17d2   : > { %6625 = vxpose.xlu1.c.b16.start.end [1/1] (short) (narrow) %v5800_v55, 16 }
0x17d4   : > { %6609 = vxpose.xlu0.c.b16.start.end [1/1] (short) (narrow) %v5799_v0, 16 }
0x17ea   : > { %v6473_v8 = vpop.xlane.xlu1 %6472 }
0x17eb   : > { %v6479_v48 = vsub.f32 %v12348_v5, %v6473_v8 }
0x17ec   : > { %v6476_v56 = vpop.xlane.xlu0 %6475 }
0x17ed   : > { %v6480_v61 = vsub.f32 %v12350_v24, %v6476_v56  ;;  %v6485_v51 = vmul.f32 1.442695, %v6479_v48  ;;  %v11300_v24 = vpop.eup %11299 }
0x17ee   : > { %v11302_v21 = vpop.eup %11301  ;;  %v6489_v31 = vsel %vm1317_vm3, %v11300_v24, 0.0 }
0x17ef   : > { %v6487_v5 = vmul.f32 1.442695, %v6480_v61  ;;  %11303 = vpow2.f32 %v6485_v51  ;;  %v6492_v54 = vsel %vm1317_vm3, %v11302_v21, 0.0 }
0x17f1   : > { %11305 = vpow2.f32 %v6487_v5 }
0x17fc   : > { %v11304_v53 = vpop.eup %11303 }
0x17fd   : > { %v6495_v14 = vsel %vm1317_vm3, %v11304_v53, 0.0 }
0x17fe   : > { %v11306_v9 = vpop.eup %11305 }
0x17ff   : > { %v6498_v55 = vsel %vm1317_vm3, %v11306_v9, 0.0 }
0x1828   : > { %v6521_v57 = vpop.trf.xlu1 }
0x182a   : > { %v6537_v58 = vpop.trf.xlu0 }
0x182c   : > { %v6569_v60 = vpop.trf.xlu1 }
0x182e   : > { %v6553_v62 = vpop.trf.xlu0 }
0x1830   : > { %v6601_v17 = vpop.trf.xlu1 }
0x1831   : > { %v6675_v13 = vcombine.low %v6537_v58, %v6601_v17 }
0x1832   : > { %v6585_v7 = vpop.trf.xlu0 }
0x1833   : > { %v6641_v12 = vcombine.low %v6521_v57, %v6585_v7  ;;  %v6682_v25 = vrot.slane %v6675_v13, %v11586_v26 }
0x1834   : > { %v6633_v27 = vpop.trf.xlu1 }
0x1835   : > { %v6683_v4 = vcombine.low %v6569_v60, %v6633_v27  ;;  %v6648_v10 = vrot.slane %v6641_v12, %v11586_v26 }
0x1836   : > { %v6617_v15 = vpop.trf.xlu0 }
0x1837   : > { %v6690_v23 = vrot.slane %v6683_v4, %v11586_v26  ;;  %v6649_v33 = vcombine.low %v6553_v62, %v6617_v15 }
0x1839   : > { %v6691_v47 = vcombine.low %v6682_v25, %v6690_v23  ;;  %v6656_v35 = vrot.slane %v6649_v33, %v11586_v26  ;;  %v6692_v3 = vcombine.high %v6682_v25, %v6690_v23 }
0x183b   : > { %v6699_v36 = vrot.slane %v6691_v47, %v11592_v38  ;;  %v6657_v37 = vcombine.low %v6648_v10, %v6656_v35  ;;  %v6658_v40 = vcombine.high %v6648_v10, %v6656_v35  ;;  %v6706_v63 = vrot.slane %v6692_v3, %v11592_v38 }
0x183d   : > { %v6665_v41 = vrot.slane %v6657_v37, %v11592_v38  ;;  %v6714_v43 = vshrl.u32 %v6699_v36, 16  ;;  %v6707_v34 = vcombine.high %v6699_v36, %v11410_v16  ;;  %v6672_v49 = vrot.slane %v6658_v40, %v11592_v38 }
0x183e   : > { %v6730_v6 = vshrl.u32 %v6706_v63, 16  ;;  %v6708_v8 = vcombine.high %v6706_v63, %v11410_v16 }
0x183f   : > { %v6711_v32 = vpack.i.b16 %v6699_v36, %v6665_v41  ;;  %v6713_v28 = vshrl.u32 %v6665_v41, 16  ;;  %v6673_v44 = vcombine.high %v6665_v41, %v11410_v16  ;;  %v6722_v50 = vshrl.u32 %v6707_v34, 16 }
0x1840   : > { %v6729_v18 = vshrl.u32 %v6672_v49, 16  ;;  %v6727_v2 = vpack.i.b16 %v6706_v63, %v6672_v49  ;;  %v6674_v0 = vcombine.high %v6672_v49, %v11410_v16  ;;  %v6738_v58 = vshrl.u32 %v6708_v8, 16 }
0x1841   : > { %6741 = vxpose.xlu0.c.b16.start.end [1/1] (short) (narrow) %v6711_v32, 16  ;;  %v6715_v19 = vpack.i.b16 %v6714_v43, %v6713_v28  ;;  %v6721_v20 = vshrl.u32 %v6673_v44, 16  ;;  %v6719_v22 = vpack.i.b16 %v6707_v34, %v6673_v44 }
0x1842   : > { %v6731_v30 = vpack.i.b16 %v6730_v6, %v6729_v18  ;;  %v6737_v56 = vshrl.u32 %v6674_v0, 16  ;;  %v6735_v57 = vpack.i.b16 %v6708_v8, %v6674_v0 }
0x1843   : > { %6757 = vxpose.xlu1.c.b16.start.end [1/1] (short) (narrow) %v6715_v19, 16  ;;  %v6723_v52 = vpack.i.b16 %v6722_v50, %v6721_v20 }
0x1844   : > { %v6739_v60 = vpack.i.b16 %v6738_v58, %v6737_v56 }
0x1845   : > { %6773 = vxpose.xlu0.c.b16.start.end [1/1] (short) (narrow) %v6719_v22, 16 }
0x1847   : > { %6789 = vxpose.xlu1.c.b16.start.end [1/1] (short) (narrow) %v6723_v52, 16 }
0x1849   : > { %6805 = vxpose.xlu0.c.b16.start.end [1/1] (short) (narrow) %v6727_v2, 16 }
0x184b   : > { %6821 = vxpose.xlu1.c.b16.start.end [1/1] (short) (narrow) %v6731_v30, 16 }
0x1856   : > { %6490 = vadd.xlane.f32.xlu0 %v6489_v31 }
0x1858   : > { %6493 = vadd.xlane.f32.xlu1 %v6492_v54 }
0x185a   : > { %6496 = vadd.xlane.f32.xlu0 %v6495_v14 }
0x185c   : > { %6499 = vadd.xlane.f32.xlu1 %v6498_v55 }
0x1887   : > { %6837 = vxpose.xlu0.c.b16.start.end [1/1] (short) (narrow) %v6735_v57, 16 }
0x1889   : > { %6853 = vxpose.xlu1.c.b16.start.end [1/1] (short) (narrow) %v6739_v60, 16 }
0x18a3   : > { %v6749_v62 = vpop.trf.xlu0 }
0x18a5   : > { %v6765_v17 = vpop.trf.xlu1 }
0x18a7   : > { %v6781_v7 = vpop.trf.xlu0 }
0x18a9   : > { %v6797_v13 = vpop.trf.xlu1 }
0x18ab   : > { %v6813_v27 = vpop.trf.xlu0 }
0x18ac   : > { %v6869_v35 = vcombine.low %v6749_v62, %v6813_v27 }
0x18ad   : > { %v6829_v12 = vpop.trf.xlu1 }
0x18ae   : > { %v6894_v10 = vcombine.low %v6765_v17, %v6829_v12  ;;  %v6876_v32 = vrot.slane %v6869_v35, %v11586_v26 }
0x18b0   : > { %v6901_v41 = vrot.slane %v6894_v10, %v11586_v26 }
0x18df   : > { %v6491_v4 = vpop.xlane.xlu0 %6490 }
0x18e0   : > { %11307 = vrcp.f32 %v6491_v4 }
0x18e1   : > { %v6494_v15 = vpop.xlane.xlu1 %6493 }
0x18e2   : > { %11309 = vrcp.f32 %v6494_v15 }
0x18e3   : > { %v6497_v25 = vpop.xlane.xlu0 %6496 }
0x18e4   : > { %11311 = vrcp.f32 %v6497_v25 }
0x18e5   : > { %v6500_v23 = vpop.xlane.xlu1 %6499 }
0x18e6   : > { %11313 = vrcp.f32 %v6500_v23 }
0x18e9   : > { %v6845_v33 = vpop.trf.xlu0 }
0x18ea   : > { %v6877_v47 = vcombine.low %v6781_v7, %v6845_v33 }
0x18eb   : > { %v6861_v36 = vpop.trf.xlu1 }
0x18ec   : > { %v6902_v37 = vcombine.low %v6797_v13, %v6861_v36  ;;  %v6884_v40 = vrot.slane %v6877_v47, %v11586_v26 }
0x18ed   : > { %v11308_v39 = vpop.eup %11307 }
0x18ee   : > { %v6909_v42 = vrot.slane %v6902_v37, %v11586_v26  ;;  %v6502_v3 = vmul.f32 %v11308_v39, %v11300_v24  ;;  %v6885_v48 = vcombine.low %v6876_v32, %v6884_v40 }
0x18ef   : > { %v11310_v43 = vpop.eup %11309 }
0x18f0   : > { %v6910_v28 = vcombine.low %v6901_v41, %v6909_v42  ;;  %v6509_v44 = vpack.c.bf16 %v6502_v3, %v6502_v3  ;;  %v6504_v34 = vmul.f32 %v11310_v43, %v11302_v21  ;;  %v6892_v63 = vrot.slane %v6885_v48, %v11592_v38 }
0x18f1   : > { %v11312_v29 = vpop.eup %11311 }
0x18f2   : > { %v6935_v49 = vsel %vm1317_vm3, %v6509_v44, 0  ;;  %v6917_v20 = vrot.slane %v6910_v28, %v11592_v38  ;;  %v6510_v59 = vpack.c.bf16 %v6504_v34, %v6504_v34  ;;  %v6506_v61 = vmul.f32 %v11312_v29, %v11304_v53  ;;  %v11245_v34 = vld [vmem:[%s12886_s4 + $0x78] sm:$0xff]  }
0x18f3   : > { %v11314_v19 = vpop.eup %11313  ;;  %11039 = vmatpush3.bf16.xpose.msra.mxu0 %v6935_v49  ;;  %v6922_v5 = vshrl.u32 %v6892_v63, 16  ;;  %v6893_v21 = vcombine.high %v6892_v63, %v11410_v16 }
0x18f4   : > { %11050 = vmatprep.subr.bf16.mxu0 %v11404_v1  ;;  %v6981_v22 = vsel %vm1317_vm3, %v6510_v59, 0  ;;  %v6508_v50 = vmul.f32 %v11314_v19, %v11306_v9  ;;  %v6511_v51 = vpack.c.bf16 %v6506_v61, %v6506_v61  ;;  %v6923_v52 = vshrl.u32 %v6917_v20, 16 }
0x18f5   : > { %11045 = vmatpush3.bf16.xpose.msra.mxu1 %v6981_v22  ;;  %v6921_v18 = vpack.i.b16 %v6917_v20, %v6892_v63  ;;  %v6918_v30 = vcombine.high %v6917_v20, %v11410_v16  ;;  %v6928_v9 = vshrl.u32 %v6893_v21, 16  ;;  %v11246_v22 = vld [vmem:[%s12886_s4 + $0x70] sm:$0xff]  }
0x18f6   : > { %11056 = vmatprep.subr.bf16.mxu1 %v11404_v1  ;;  %v6512_v2 = vpack.c.bf16 %v6508_v50, %v6508_v50  ;;  %v7027_v6 = vsel %vm1317_vm3, %v6511_v51, 0  ;;  %v6924_v24 = vpack.i.b16 %v6923_v52, %v6922_v5 }
0x18f7   : > { %v6929_v53 = vshrl.u32 %v6918_v30, 16  ;;  %v6927_v54 = vpack.i.b16 %v6918_v30, %v6893_v21 }
0x18f8   : > { %v7073_v31 = vsel %vm1317_vm3, %v6512_v2, 0 }
0x18f9   : > { %v6930_v14 = vpack.i.b16 %v6929_v53, %v6928_v9 }
0x18fa   : > { %11041 = vmatmul.mubr.msk.bf16.vlgmr.msra.gmra.mxu0 %vm1317_vm3, %v6921_v18 }
0x18fb   : > { %11051 = vmatpush3.bf16.xpose.msra.mxu0 %v7027_v6  ;;  %11052 = vmatprep.mubr.msk.bf16.mxu0 %vm11405_vm0, %v11404_v1 }
0x18fc   : > { %11062 = vmatprep.subr.bf16.mxu0 %v11404_v1  ;;  %11047 = vmatmul.mubr.msk.bf16.vlgmr.msra.gmra.mxu1 %vm1317_vm3, %v6924_v24 }
0x18fd   : > { %11057 = vmatpush3.bf16.xpose.msra.mxu1 %v7073_v31  ;;  %11058 = vmatprep.mubr.msk.bf16.mxu1 %vm11405_vm0, %v11404_v1 }
0x18fe   : > { %11070 = vmatprep.subr.bf16.mxu1 %v11404_v1 }
0x1902   : > { %11053 = vmatmul.mubr.msk.bf16.vlgmr.msra.gmra.mxu0 %vm1317_vm3, %v6927_v54 }
0x1903   : > { %11066 = vmatprep.mubr.msk.bf16.mxu0 %vm11405_vm0, %v11404_v1  ;;  %11063 = vmatpush3.bf16.msra.mxu0 %v11245_v34 }
0x1904   : > { %11059 = vmatmul.mubr.msk.bf16.vlgmr.msra.gmra.mxu1 %vm1317_vm3, %v6930_v14  ;;  %11064 = vmatprep.subr.bf16.mxu0 %v11404_v1 }
0x1905   : > { %11074 = vmatprep.mubr.msk.bf16.mxu1 %vm11405_vm0, %v11404_v1 }
0x1907   : > { %11065 = vmatpush3.bf16.msra.mxu0 %v11246_v22 }
0x1908   : > { %11078 = vmatprep.subr.bf16.mxu0 %v11404_v1 }
0x19ba   : > { %v6971_v55 = vpop.f32.mrf.mxu0 }
0x19bb   : > { %7115 = vxpose.xlu0.b32.start.end [1/1] (short) (narrow) %v6971_v55, 8 }
0x19bc   : > { %v11042_v0 = vpop.f32.mrf.mxu0  ;;  %v7017_v8 = vpop.f32.mrf.mxu1 }
0x19bd   : > { %7147 = vxpose.xlu1.b32.start.end [1/1] (short) (narrow) %v7017_v8, 8 }
0x19be   : > { %v6974_v56 = vpop.f32.mrf.mxu0  ;;  %v11048_v57 = vpop.f32.mrf.mxu1 }
0x19c0   : > { %v11043_v58 = vpop.f32.mrf.mxu0  ;;  %v7020_v60 = vpop.f32.mrf.mxu1 }
0x19c2   : > { %v7063_v62 = vpop.f32.mrf.mxu0  ;;  %v11049_v17 = vpop.f32.mrf.mxu1 }
0x19c3   : > { %7179 = vxpose.xlu0.b32.start.end [1/1] (short) (narrow) %v7063_v62, 8  ;;  %v11247_v62 = vld [vmem:[%s12886_s4 + $0x98] sm:$0xff]  }
0x19c4   : > { %v11054_v7 = vpop.f32.mrf.mxu0  ;;  %v7109_v13 = vpop.f32.mrf.mxu1 }
0x19c5   : > { %v11248_v7 = vld [vmem:[%s12886_s4 + $0x90] sm:$0xff]  }
0x19c6   : > { %v7066_v27 = vpop.f32.mrf.mxu0  ;;  %v11060_v12 = vpop.f32.mrf.mxu1 }
0x19c7   : > { %7211 = vxpose.xlu0.b32.start.end [1/1] (short) (narrow) %v7109_v13, 8  ;;  %v10609_v13 = vld [vmem:[%s12891_s9 + $0x9] ss:$0 sm:$0xff] }
0x19c8   : > { %v11055_v4 = vpop.f32.mrf.mxu0  ;;  %v7112_v15 = vpop.f32.mrf.mxu1 }
0x19ca   : > { %v11061_v25 = vpop.f32.mrf.mxu1 }
0x1a37   : > { %v7131_v23 = vpop.trf.xlu0 }
0x1a39   : > { %v7163_v10 = vpop.trf.xlu1 }
0x1a3f   : > { %v7195_v33 = vpop.trf.xlu0 }
0x1a40   : > { %v7243_v47 = vcombine.low %v7131_v23, %v7195_v33  ;;  %v7244_v35 = vcombine.high %v7131_v23, %v7195_v33 }
0x1a42   : > { %v7251_v40 = vrot.slane %v7243_v47, %v11586_v26  ;;  %v7258_v41 = vrot.slane %v7244_v35, %v11586_v26 }
0x1a43   : > { %v7227_v36 = vpop.trf.xlu0 }
0x1a44   : > { %v7259_v37 = vcombine.low %v7163_v10, %v7227_v36  ;;  %v7260_v39 = vcombine.high %v7163_v10, %v7227_v36  ;;  %v10631_v36 = vld [vmem:[%s12891_s9 + $0xb] ss:$0 sm:$0xff] }
0x1a46   : > { %v7267_v42 = vrot.slane %v7259_v37, %v11586_v26  ;;  %v7274_v3 = vrot.slane %v7260_v39, %v11586_v26 }
0x1a48   : > { %v7275_v43 = vcombine.low %v7251_v40, %v7267_v42  ;;  %v7276_v32 = vcombine.high %v7251_v40, %v7267_v42  ;;  %v7291_v28 = vcombine.low %v7258_v41, %v7274_v3  ;;  %v7292_v44 = vcombine.high %v7258_v41, %v7274_v3 }
0x1a4a   : > { %v7283_v29 = vrot.slane %v7275_v43, %v11592_v38  ;;  %v7290_v48 = vrot.slane %v7276_v32, %v11592_v38  ;;  %v7299_v49 = vrot.slane %v7291_v28, %v11592_v38  ;;  %v7306_v19 = vrot.slane %v7292_v44, %v11592_v38  ;;  %v11249_v43 = vld [vmem:[%s12886_s4 + $0x88] sm:$0xff]   ;;  %v11250_v32 = vld [vmem:[%s12886_s4 + $0x80] sm:$0xff]  }
0x1a4b   : > { %11071 = vmatpush3.bf16.msra.mxu1 %v11249_v43  ;;  %v11252_v43 = vld [vmem:[%s12886_s4 + $0xa0] sm:$0xff]  }
0x1a4c   : > { %v7311_v20 = vcombine.low %v7283_v29, %v7290_v48  ;;  %v10602_v59 = vcombine.high %v7283_v29, %v7290_v48  ;;  %v7327_v61 = vcombine.low %v7299_v49, %v7306_v19  ;;  %v10603_v63 = vcombine.high %v7299_v49, %v7306_v19  ;;  %11072 = vmatprep.subr.bf16.mxu1 %v11404_v1 }
0x1a4e   : > { %v7318_v50 = vrot.slane %v7311_v20, %v11586_v26  ;;  %v7326_v51 = vrot.slane %v10602_v59, %v11586_v26  ;;  %v7334_v52 = vrot.slane %v7327_v61, %v11586_v26  ;;  %v7342_v18 = vrot.slane %v10603_v63, %v11586_v26 }
0x1a4f   : > { %11073 = vmatpush3.bf16.msra.mxu1 %v11250_v32 }
0x1a50   : > { %v7344_v5 = vcombine.high %v7318_v50, %v7326_v51  ;;  %v7360_v2 = vcombine.high %v7334_v52, %v7342_v18  ;;  %v7343_v6 = vcombine.low %v7318_v50, %v7326_v51  ;;  %v7359_v30 = vcombine.low %v7334_v52, %v7342_v18  ;;  %11086 = vmatprep.subr.bf16.mxu1 %v11404_v1 }
0x1a52   : > { %v7358_v24 = vrot.slane %v7344_v5, %v11592_v38  ;;  %v7374_v21 = vrot.slane %v7360_v2, %v11592_v38  ;;  %v7351_v31 = vrot.slane %v7343_v6, %v11592_v38  ;;  %v7367_v53 = vrot.slane %v7359_v30, %v11592_v38 }
0x1a54   : > { %v7377_v54 = vcombine.low %v7358_v24, %v7374_v21  ;;  %v7376_v9 = vcombine.high %v7351_v31, %v7367_v53  ;;  %v7375_v14 = vcombine.low %v7351_v31, %v7367_v53  ;;  %v7378_v55 = vcombine.high %v7358_v24, %v7374_v21 }
0x1a56   : > { %7384 = vrot.lane.b32.xlu0 %v7377_v54, %s12924_s29  ;;  %7380 = vrot.lane.b32.xlu1 %v7376_v9, %s12925_s16 }
0x1a5a   : > { %7388 = vrot.lane.b32.xlu1 %v7378_v55, %s12926_s30  ;;  %v10615_v55 = vld [vmem:[%s12892_s10 + $0x8] ss:$0 sm:$0xff] }
0x1ac8   : > { %v7381_v0 = vpop.permute.xlu1 %7380  ;;  %v7385_v8 = vpop.permute.xlu0 %7384 }
0x1ac9   : > { %v7391_v56 = vsel %vm1317_vm3, %v7375_v14, %v7381_v0 }
0x1aca   : > { %v7392_v58 = vsel %vm2430_vm4, %v7391_v56, %v7385_v8 }
0x1acc   : > { %v7389_v57 = vpop.permute.xlu1 %7388 }
0x1acd   : > { %v7393_v60 = vsel %vm2432_vm5, %v7392_v58, %v7389_v57 }
0x1ace   : > { %v7394_v17 = vpack.c.bf16 %v7393_v60, %v7393_v60  ;;  %v10616_v60 = vld [vmem:[%s12892_s10 + $0x9] ss:$0 sm:$0xff] }
0x1ad0   : > { %11067 = vmatmul.mubr.msk.bf16.vlgmr.msra.gmra.mxu0 %vm469_vm1, %v7394_v17 }
0x1ad1   : > { %11079 = vmatpush3.bf16.msra.mxu0 %v11247_v62  ;;  %11082 = vmatprep.mubr.msk.bf16.mxu0 %vm11405_vm0, %v11404_v1 }
0x1ad2   : > { %11080 = vmatprep.subr.bf16.mxu0 %v11404_v1 }
0x1ad5   : > { %11081 = vmatpush3.bf16.msra.mxu0 %v11248_v7 }
0x1ad6   : > { %11094 = vmatprep.subr.bf16.mxu0 %v11404_v1 }
0x1ad8   : > { %11083 = vmatmul.mubr.msk.bf16.vlgmr.msra.gmra.mxu0 %vm469_vm1, %v11818_v11 }
0x1ad9   : > { %11096 = vmatprep.mubr.msk.bf16.mxu0 %vm11405_vm0, %v11404_v1 }
0x1b90   : > { %v7454_v27 = vpop.f32.mrf.mxu0 }
0x1b91   : > { %v7455_v12 = vadd.f32 %v10609_v13, %v7454_v27 }
0x1b92   : > { %v11068_v4 = vpop.f32.mrf.mxu0 }
0x1b93   : > { %v7460_v15 = vadd.f32 %v7455_v12, %v12203_v45 }
0x1b94   : > { %v7457_v25 = vpop.f32.mrf.mxu0 }
0x1b95   : > { %v7464_v23 = vsel %vm469_vm1, %v7460_v15, 0.0 }
0x1b96   : > { %7465 = vadd.xlane.f32.xlu1 %v7464_v23  ;;  %v11069_v33 = vpop.f32.mrf.mxu0  ;;  %v11341_v23 = vld [vmem:[%s12884_s2] sm:$0xff] }
0x1b98   : > { %v7610_v10 = vpop.f32.mrf.mxu0 }
0x1b99   : > { %v7611_v37 = vadd.f32 %v10631_v36, %v7610_v10 }
0x1b9a   : > { %v11084_v47 = vpop.f32.mrf.mxu0 }
0x1b9c   : > { %v7613_v11 = vpop.f32.mrf.mxu0 }
0x1b9d   : > { %v12483_v39 = vadd.f32 %v10631_v36, %v7613_v11 }
0x1b9e   : > { %v11085_v35 = vpop.f32.mrf.mxu0 }
0x1b9f   : > { %v11251_v35 = vld [vmem:[%s12886_s4 + $0xa8] sm:$0xff]  }
0x1ba7   : > { %7768 = vrot.lane.b32.xlu1 %v7611_v37, %s12921_s19 }
0x1bab   : > { %7774 = vrot.lane.b32.xlu1 %v7611_v37, %s12922_s20 }
0x1baf   : > { %7776 = vrot.lane.b32.xlu1 %v12483_v39, %s12922_s20 }
0x1bb3   : > { %7782 = vrot.lane.b32.xlu1 %v12483_v39, %s12923_s26 }
0x1c1f   : > { %v7466_v45 = vpop.xlane.xlu1 %7465 }
0x1c20   : > { %v7467_v40 = vmul.f32 0.03125, %v7466_v45 }
0x1c22   : > { %v7468_v41 = vsub.f32 %v7460_v15, %v7467_v40 }
0x1c23   : > { %v7769_v28 = vpop.permute.xlu1 %7768 }
0x1c24   : > { %v7469_v42 = vmul.f32 %v7468_v41, %v7468_v41 }
0x1c26   : > { %v7470_v3 = vsel %vm469_vm1, %v7469_v42, 0.0 }
0x1c27   : > { %7471 = vadd.xlane.f32.xlu0 %v7470_v3  ;;  %v7775_v29 = vpop.permute.xlu1 %7774 }
0x1c28   : > { %v7786_v19 = vcombine.low %v7611_v37, %v7775_v29  ;;  %v7787_v61 = vcombine.high %v7611_v37, %v7775_v29 }
0x1c2a   : > { %v7794_v50 = vrot.slane %v7786_v19, %v11586_v26  ;;  %v7801_v5 = vrot.slane %v7787_v61, %v11586_v26 }
0x1c2b   : > { %v7777_v59 = vpop.permute.xlu1 %7776 }
0x1c2c   : > { %v7854_v53 = vcombine.low %v12483_v39, %v7777_v59  ;;  %v7855_v10 = vcombine.high %v12483_v39, %v7777_v59 }
0x1c2e   : > { %v7862_v17 = vrot.slane %v7854_v53, %v11586_v26 }
0x1c2f   : > { %v7783_v18 = vpop.permute.xlu1 %7782 }
0x1c3d   : > { %7770 = vrot.lane.b32.xlu0 %v12483_v39, %s12921_s19  ;;  %v7869_v39 = vrot.slane %v7855_v10, %v11586_v26 }
0x1c41   : > { %7780 = vrot.lane.b32.xlu0 %v7611_v37, %s12923_s26 }
0x1cb0   : > { %v7472_v44 = vpop.xlane.xlu0 %7471 }
0x1cb1   : > { %v7473_v34 = vmul.f32 0.03125, %v7472_v44 }
0x1cb3   : > { %v7474_v48 = vadd.f32 1e-05, %v7473_v34 }
0x1cb4   : > { %v7771_v49 = vpop.permute.xlu0 %7770 }
0x1cb5   : > { %11315 = vrsqrt.f32 %v7474_v48  ;;  %v7870_v30 = vcombine.low %v7771_v49, %v7783_v18  ;;  %v7871_v12 = vcombine.high %v7771_v49, %v7783_v18 }
0x1cb7   : > { %v7878_v8 = vrot.slane %v7870_v30, %v11586_v26  ;;  %v7885_v37 = vrot.slane %v7871_v12, %v11586_v26 }
0x1cb8   : > { %v7781_v20 = vpop.permute.xlu0 %7780 }
0x1cb9   : > { %v7802_v63 = vcombine.low %v7769_v28, %v7781_v20  ;;  %v7803_v22 = vcombine.high %v7769_v28, %v7781_v20  ;;  %v7886_v4 = vcombine.low %v7862_v17, %v7878_v8  ;;  %v7887_v45 = vcombine.high %v7862_v17, %v7878_v8 }
0x1cba   : > { %v7902_v32 = vcombine.low %v7869_v39, %v7885_v37  ;;  %v7903_v48 = vcombine.high %v7869_v39, %v7885_v37 }
0x1cbb   : > { %v7810_v51 = vrot.slane %v7802_v63, %v11586_v26  ;;  %v7817_v52 = vrot.slane %v7803_v22, %v11586_v26  ;;  %v7901_v44 = vrot.slane %v7887_v45, %v11592_v38 }
0x1cbc   : > { %v7910_v19 = vrot.slane %v7902_v32, %v11592_v38  ;;  %v7917_v63 = vrot.slane %v7903_v48, %v11592_v38 }
0x1cbd   : > { %v7818_v2 = vcombine.low %v7794_v50, %v7810_v51  ;;  %v7819_v6 = vcombine.high %v7794_v50, %v7810_v51  ;;  %v7834_v21 = vcombine.low %v7801_v5, %v7817_v52  ;;  %v7835_v56 = vcombine.high %v7801_v5, %v7817_v52 }
0x1cbe   : > { %v7932_v49 = vpack.c.bf16 %v7901_v44, %v7901_v44  ;;  %v7919_v59 = vcombine.high %v7901_v44, %v11404_v1  ;;  %v7934_v61 = vpack.c.bf16 %v7910_v19, %v7910_v19  ;;  %v7920_v50 = vcombine.high %v7910_v19, %v11404_v1 }
0x1cbf   : > { %v7826_v24 = vrot.slane %v7818_v2, %v11592_v38  ;;  %v7833_v14 = vrot.slane %v7819_v6, %v11592_v38  ;;  %v7842_v58 = vrot.slane %v7834_v21, %v11592_v38  ;;  %v7849_v25 = vrot.slane %v7835_v56, %v11592_v38 }
0x1cc0   : > { %v7933_v22 = vpack.c.bf16 %v7919_v59, %v7919_v59  ;;  %v7936_v51 = vpack.c.bf16 %v7917_v63, %v7917_v63  ;;  %v7935_v52 = vpack.c.bf16 %v7920_v50, %v7920_v50 }
0x1cc1   : > { %v7922_v54 = vpack.c.bf16 %v7826_v24, %v7826_v24  ;;  %v7850_v9 = vcombine.high %v7826_v24, %v11404_v1  ;;  %v7924_v7 = vpack.c.bf16 %v7833_v14, %v7833_v14  ;;  %v7851_v13 = vcombine.high %v7833_v14, %v11404_v1 }
0x1cc2   : > { %v11316_v31 = vpop.eup %11315  ;;  %v7926_v15 = vpack.c.bf16 %v7842_v58, %v7842_v58  ;;  %v7852_v11 = vcombine.high %v7842_v58, %v11404_v1  ;;  %v7928_v40 = vpack.c.bf16 %v7849_v25, %v7849_v25  ;;  %v7853_v3 = vcombine.high %v7849_v25, %v11404_v1 }
0x1cc3   : > { %v7476_v0 = vmul.f32 %v11316_v31, %v7468_v41  ;;  %8172 = vxpose.xlu0.c.b16.start.end [1/1] (short) (narrow) %v7922_v54, 16  ;;  %v7923_v57 = vpack.c.bf16 %v7850_v9, %v7850_v9  ;;  %v7925_v47 = vpack.c.bf16 %v7851_v13, %v7851_v13  ;;  %v7894_v41 = vrot.slane %v7886_v4, %v11592_v38 }
0x1cc4   : > { %v7927_v42 = vpack.c.bf16 %v7852_v11, %v7852_v11  ;;  %v7929_v34 = vpack.c.bf16 %v7853_v3, %v7853_v3 }
0x1cc5   : > { %v7481_v62 = vmul.f32 %v10615_v55, %v7476_v0  ;;  %8188 = vxpose.xlu1.c.b16.start.end [1/1] (short) (narrow) %v7923_v57, 16  ;;  %v7930_v28 = vpack.c.bf16 %v7894_v41, %v7894_v41  ;;  %v7918_v29 = vcombine.high %v7894_v41, %v11404_v1 }
0x1cc7   : > { %v12519_v27 = vadd.f32 %v10616_v60, %v7481_v62  ;;  %8204 = vxpose.xlu0.c.b16.start.end [1/1] (short) (narrow) %v7924_v7, 16  ;;  %v7931_v20 = vpack.c.bf16 %v7918_v29, %v7918_v29 }
0x1cc9   : > { %v7487_v33 = vadd.f32 %v11341_v23, %v12519_v27  ;;  %8236 = vxpose.xlu1.c.b16.start.end [1/1] (short) (narrow) %v7926_v15, 16 }
0x1ccb   : > { %v7488_v36 = vpack.c.bf16 %v7487_v33, %v7487_v33  ;;  %8220 = vxpose.xlu0.c.b16.start.end [1/1] (short) (narrow) %v7925_v47, 16 }
0x1ccd   : > { %11075 = vmatmul.mubr.msk.bf16.vlgmr.msra.gmra.mxu1 %vm469_vm1, %v7488_v36  ;;  %8268 = vxpose.xlu1.c.b16.start.end [1/1] (short) (narrow) %v7928_v40, 16 }
0x1cce   : > { %11087 = vmatpush3.bf16.msra.mxu1 %v11251_v35  ;;  %11090 = vmatprep.mubr.msk.bf16.mxu1 %vm11405_vm0, %v11404_v1 }
0x1ccf   : > { %11088 = vmatprep.subr.bf16.mxu1 %v11404_v1  ;;  %8252 = vxpose.xlu0.c.b16.start.end [1/1] (short) (narrow) %v7927_v42, 16 }
0x1cd1   : > { %8300 = vxpose.xlu1.c.b16.start.end [1/1] (short) (narrow) %v7930_v28, 16 }
0x1cd2   : > { %11089 = vmatpush3.bf16.msra.mxu1 %v11252_v43 }
0x1cd3   : > { %11100 = vmatprep.subr.bf16.mxu1 %v11404_v1  ;;  %8284 = vxpose.xlu0.c.b16.start.end [1/1] (short) (narrow) %v7929_v34, 16 }
0x1cd5   : > { %11091 = vmatmul.mubr.msk.bf16.vlgmr.msra.gmra.mxu1 %vm469_vm1, %v11901_v46  ;;  %8332 = vxpose.xlu1.c.b16.start.end [1/1] (short) (narrow) %v7932_v49, 16  ;;  %v7921_v46 = vcombine.high %v7917_v63, %v11404_v1 }
0x1cd6   : > { %11102 = vmatprep.mubr.msk.bf16.mxu1 %vm11405_vm0, %v11404_v1 }
0x1cd7   : > { %8316 = vxpose.xlu0.c.b16.start.end [1/1] (short) (narrow) %v7931_v20, 16  ;;  %v7937_v18 = vpack.c.bf16 %v7921_v46, %v7921_v46 }
0x1cd9   : > { %8364 = vxpose.xlu1.c.b16.start.end [1/1] (short) (narrow) %v7934_v61, 16 }
0x1cdb   : > { %8348 = vxpose.xlu0.c.b16.start.end [1/1] (short) (narrow) %v7933_v22, 16 }
0x1cdd   : > { %8396 = vxpose.xlu1.c.b16.start.end [1/1] (short) (narrow) %v7936_v51, 16 }
0x1cdf   : > { %8380 = vxpose.xlu0.c.b16.start.end [1/1] (short) (narrow) %v7935_v52, 16 }
0x1ce3   : > { %8412 = vxpose.xlu0.c.b16.start.end [1/1] (short) (narrow) %v7937_v18, 16 }
0x1d25   : > { %v8180_v5 = vpop.trf.xlu0 }
0x1d27   : > { %v8196_v2 = vpop.trf.xlu1 }
0x1d29   : > { %v8212_v6 = vpop.trf.xlu0 }
0x1d2b   : > { %v8244_v30 = vpop.trf.xlu1 }
0x1d2c   : > { %v8428_v55 = vcombine.low %v8180_v5, %v8244_v30 }
0x1d2d   : > { %v8228_v24 = vpop.trf.xlu0 }
0x1d2e   : > { %v8435_v62 = vrot.slane %v8428_v55, %v11586_v26 }
0x1d2f   : > { %v8276_v21 = vpop.trf.xlu1 }
0x1d30   : > { %v8436_v0 = vcombine.low %v8212_v6, %v8276_v21 }
0x1d31   : > { %v8260_v31 = vpop.trf.xlu0 }
0x1d32   : > { %v8496_v57 = vcombine.low %v8196_v2, %v8260_v31  ;;  %v8443_v17 = vrot.slane %v8436_v0, %v11586_v26 }
0x1d33   : > { %v8308_v53 = vpop.trf.xlu1 }
0x1d34   : > { %v8503_v4 = vrot.slane %v8496_v57, %v11586_v26  ;;  %v8461_v25 = vcombine.high %v8435_v62, %v8443_v17  ;;  %v8460_v47 = vcombine.low %v8435_v62, %v8443_v17 }
0x1d35   : > { %v8292_v54 = vpop.trf.xlu0 }
0x1d36   : > { %v8504_v58 = vcombine.low %v8228_v24, %v8292_v54  ;;  %v8475_v37 = vrot.slane %v8461_v25, %v11592_v38  ;;  %v8468_v3 = vrot.slane %v8460_v47, %v11592_v38 }
0x1d37   : > { %v8340_v9 = vpop.trf.xlu1 }
0x1d38   : > { %v8511_v15 = vrot.slane %v8504_v58, %v11586_v26 }
0x1d39   : > { %v8324_v14 = vpop.trf.xlu0 }
0x1d3a   : > { %v8528_v36 = vcombine.low %v8503_v4, %v8511_v15  ;;  %v8529_v40 = vcombine.high %v8503_v4, %v8511_v15  ;;  %v10640_v4 = vld [vmem:[%s12891_s9 + $0xc] ss:$0 sm:$0xff] }
0x1d3b   : > { %v8372_v8 = vpop.trf.xlu1 }
0x1d3c   : > { %v8444_v56 = vcombine.low %v8308_v53, %v8372_v8  ;;  %v8536_v44 = vrot.slane %v8528_v36, %v11592_v38  ;;  %v8543_v34 = vrot.slane %v8529_v40, %v11592_v38  ;;  %v10622_v8 = vld [vmem:[%s12891_s9 + $0xa] ss:$0 sm:$0xff] }
0x1d3d   : > { %v8356_v60 = vpop.trf.xlu0 }
0x1d3e   : > { %v8451_v13 = vrot.slane %v8444_v56, %v11586_v26 }
0x1d3f   : > { %v8404_v7 = vpop.trf.xlu1 }
0x1d40   : > { %v8452_v12 = vcombine.low %v8340_v9, %v8404_v7 }
0x1d41   : > { %v8388_v23 = vpop.trf.xlu0 }
0x1d42   : > { %v8512_v33 = vcombine.low %v8324_v14, %v8388_v23  ;;  %v8459_v10 = vrot.slane %v8452_v12, %v11586_v26 }
0x1d44   : > { %v8476_v11 = vcombine.low %v8451_v13, %v8459_v10  ;;  %v8477_v35 = vcombine.high %v8451_v13, %v8459_v10  ;;  %v8519_v41 = vrot.slane %v8512_v33, %v11586_v26 }
0x1d45   : > { %v8420_v45 = vpop.trf.xlu0 }
0x1d46   : > { %v8520_v39 = vcombine.low %v8356_v60, %v8420_v45  ;;  %v8491_v42 = vrot.slane %v8477_v35, %v11592_v38  ;;  %v8484_v43 = vrot.slane %v8476_v11, %v11592_v38 }
0x1d48   : > { %v8527_v32 = vrot.slane %v8520_v39, %v11586_v26  ;;  %v8495_v28 = vcombine.high %v8475_v37, %v8491_v42  ;;  %v8493_v49 = vcombine.high %v8468_v3, %v8484_v43  ;;  %v8492_v59 = vcombine.low %v8468_v3, %v8484_v43 }
0x1d49   : > { %v8494_v61 = vcombine.low %v8475_v37, %v8491_v42 }
0x1d4a   : > { %v8544_v29 = vcombine.low %v8519_v41, %v8527_v32  ;;  %v8545_v48 = vcombine.high %v8519_v41, %v8527_v32  ;;  %v8576_v63 = vshrl.u32 %v8493_v49, 16  ;;  %v8592_v46 = vshrl.u32 %v8495_v28, 16 }
0x1d4b   : > { %v8568_v6 = vshrl.u32 %v8492_v59, 16  ;;  %v8584_v30 = vshrl.u32 %v8494_v61, 16 }
0x1d4c   : > { %v8552_v19 = vrot.slane %v8544_v29, %v11592_v38  ;;  %v8559_v20 = vrot.slane %v8545_v48, %v11592_v38 }
0x1d4e   : > { %v8563_v22 = vcombine.high %v8543_v34, %v8559_v20  ;;  %v8561_v50 = vcombine.high %v8536_v44, %v8552_v19  ;;  %v8560_v51 = vcombine.low %v8536_v44, %v8552_v19  ;;  %v8562_v52 = vcombine.low %v8543_v34, %v8559_v20 }
0x1d50   : > { %v8574_v18 = vpack.i.b16 %v8561_v50, %v8493_v49  ;;  %v8566_v5 = vpack.i.b16 %v8560_v51, %v8492_v59  ;;  %v8577_v2 = vshrl.u32 %v8561_v50, 16  ;;  %v8590_v24 = vpack.i.b16 %v8563_v22, %v8495_v28 }
0x1d51   : > { %v8593_v21 = vshrl.u32 %v8563_v22, 16  ;;  %v8582_v31 = vpack.i.b16 %v8562_v52, %v8494_v61  ;;  %v8569_v54 = vshrl.u32 %v8560_v51, 16  ;;  %v8585_v9 = vshrl.u32 %v8562_v52, 16 }
0x1d52   : > { %8628 = vxpose.xlu0.c.b16.start.end [1/1] (short) (narrow) %v8574_v18, 16  ;;  %8596 = vxpose.xlu1.c.b16.start.end [1/1] (short) (narrow) %v8566_v5, 16  ;;  %v8578_v53 = vpack.i.b16 %v8577_v2, %v8576_v63 }
0x1d53   : > { %v8594_v14 = vpack.i.b16 %v8593_v21, %v8592_v46  ;;  %v8570_v55 = vpack.i.b16 %v8569_v54, %v8568_v6  ;;  %v8586_v0 = vpack.i.b16 %v8585_v9, %v8584_v30 }
0x1d56   : > { %8660 = vxpose.xlu0.c.b16.start.end [1/1] (short) (narrow) %v8582_v31, 16  ;;  %8644 = vxpose.xlu1.c.b16.start.end [1/1] (short) (narrow) %v8578_v53, 16 }
0x1d5a   : > { %8612 = vxpose.xlu0.c.b16.start.end [1/1] (short) (narrow) %v8570_v55, 16  ;;  %8676 = vxpose.xlu1.c.b16.start.end [1/1] (short) (narrow) %v8586_v0, 16 }
0x1d8d   : > { %v7548_v56 = vpop.f32.mrf.mxu1 }
0x1d8e   : > { %v7549_v57 = vadd.f32 %v10622_v8, %v7548_v56 }
0x1d8f   : > { %v11076_v58 = vpop.f32.mrf.mxu1 }
0x1d90   : > { %7684 = vrot.lane.b32.xlu0 %v7549_v57, %s12922_s20  ;;  %7681 = vrot.lane.b32.xlu1 %v7549_v57, %s12921_s19 }
0x1d91   : > { %v7551_v60 = vpop.f32.mrf.mxu1 }
0x1d93   : > { %v11077_v62 = vpop.f32.mrf.mxu1 }
0x1d94   : > { %7687 = vrot.lane.b32.xlu1 %v7549_v57, %s12923_s26 }
0x1d95   : > { %v7673_v17 = vpop.f32.mrf.mxu1 }
0x1d96   : > { %v12579_v15 = vadd.f32 %v10640_v4, %v7673_v17 }
0x1d97   : > { %v11092_v7 = vpop.f32.mrf.mxu1 }
0x1d99   : > { %v7676_v13 = vpop.f32.mrf.mxu1 }
0x1d9a   : > { %v12583_v25 = vadd.f32 %v10640_v4, %v7676_v13 }
0x1d9b   : > { %v11093_v12 = vpop.f32.mrf.mxu1 }
0x1dae   : > { %8692 = vxpose.xlu0.c.b16.start.end [1/1] (short) (narrow) %v8590_v24, 16 }
0x1db4   : > { %v8636_v23 = vpop.trf.xlu0  ;;  %v8604_v33 = vpop.trf.xlu1 }
0x1db7   : > { %8708 = vxpose.xlu1.c.b16.start.end [1/1] (short) (narrow) %v8594_v14, 16  ;;  %7940 = vrot.lane.b32.xlu0 %v12579_v15, %s12921_s19 }
0x1db8   : > { %v8668_v10 = vpop.trf.xlu0  ;;  %v8652_v47 = vpop.trf.xlu1 }
0x1db9   : > { %v8724_v52 = vcombine.low %v8604_v33, %v8668_v10 }
0x1dbb   : > { %7946 = vrot.lane.b32.xlu1 %v12579_v15, %s12922_s20  ;;  %7948 = vrot.lane.b32.xlu0 %v12583_v25, %s12922_s20  ;;  %v8731_v6 = vrot.slane %v8724_v52, %v11586_v26 }
0x1dbc   : > { %v8620_v11 = vpop.trf.xlu0  ;;  %v8684_v35 = vpop.trf.xlu1 }
0x1dbd   : > { %v8749_v54 = vcombine.low %v8620_v11, %v8684_v35 }
0x1dbf   : > { %7952 = vrot.lane.b32.xlu1 %v12579_v15, %s12923_s26 }
0x1dc3   : > { %7942 = vrot.lane.b32.xlu1 %v12583_v25, %s12921_s19 }
0x1e02   : > { %v7685_v36 = vpop.permute.xlu0 %7684  ;;  %v7682_v37 = vpop.permute.xlu1 %7681 }
0x1e03   : > { %v7690_v45 = vcombine.low %v7549_v57, %v7685_v36  ;;  %v7691_v40 = vcombine.high %v7549_v57, %v7685_v36  ;;  %v8756_v57 = vrot.slane %v8749_v54, %v11586_v26 }
0x1e05   : > { %v7698_v3 = vrot.slane %v7690_v45, %v11586_v26  ;;  %v7705_v43 = vrot.slane %v7691_v40, %v11586_v26 }
0x1e06   : > { %v7688_v41 = vpop.permute.xlu1 %7687 }
0x1e07   : > { %v7706_v39 = vcombine.low %v7682_v37, %v7688_v41  ;;  %v7707_v42 = vcombine.high %v7682_v37, %v7688_v41 }
0x1e09   : > { %v7714_v32 = vrot.slane %v7706_v39, %v11586_v26  ;;  %v7721_v28 = vrot.slane %v7707_v42, %v11586_v26 }
0x1e0b   : > { %v7722_v44 = vcombine.low %v7698_v3, %v7714_v32  ;;  %v7723_v34 = vcombine.high %v7698_v3, %v7714_v32  ;;  %v7738_v29 = vcombine.low %v7705_v43, %v7721_v28  ;;  %v7739_v48 = vcombine.high %v7705_v43, %v7721_v28 }
0x1e0d   : > { %v7730_v49 = vrot.slane %v7722_v44, %v11592_v38  ;;  %v7737_v19 = vrot.slane %v7723_v34, %v11592_v38  ;;  %v7746_v20 = vrot.slane %v7738_v29, %v11592_v38  ;;  %v7753_v59 = vrot.slane %v7739_v48, %v11592_v38 }
0x1e0f   : > { %v7754_v61 = vcombine.high %v7730_v49, %v11404_v1  ;;  %v7755_v63 = vcombine.high %v7737_v19, %v11404_v1  ;;  %v7756_v22 = vcombine.high %v7746_v20, %v11404_v1  ;;  %v7757_v50 = vcombine.high %v7753_v59, %v11404_v1 }
0x1e10   : > { %v8700_v51 = vpop.trf.xlu0  ;;  %v10644_v30 = vpack.c.bf16 %v7746_v20, %v7730_v49  ;;  %v10645_v24 = vpack.c.bf16 %v7753_v59, %v7737_v19 }
0x1e11   : > { %v8732_v46 = vcombine.low %v8636_v23, %v8700_v51  ;;  %v10646_v18 = vpack.c.bf16 %v7756_v22, %v7754_v61  ;;  %v10647_v5 = vpack.c.bf16 %v7757_v50, %v7755_v63 }
0x1e12   : > { %v8117_v9 = vrot.slane %v10644_v30, %v11586_v26  ;;  %v8125_v14 = vrot.slane %v10645_v24, %v11586_v26 }
0x1e13   : > { %v8739_v2 = vrot.slane %v8732_v46, %v11586_v26  ;;  %v8142_v21 = vrot.slane %v10646_v18, %v11586_v26  ;;  %v8150_v31 = vrot.slane %v10647_v5, %v11586_v26 }
0x1e14   : > { %v8126_v60 = vcombine.low %v8117_v9, %v8125_v14 }
0x1e15   : > { %v8740_v53 = vcombine.low %v8731_v6, %v8739_v2  ;;  %v8151_v8 = vcombine.low %v8142_v21, %v8150_v31 }
0x1e16   : > { %v8133_v12 = vrot.slane %v8126_v60, %v11592_v38 }
0x1e17   : > { %v8747_v56 = vrot.slane %v8740_v53, %v11592_v38  ;;  %v8158_v17 = vrot.slane %v8151_v8, %v11592_v38 }
0x1e18   : > { %v8163_v39 = vshrl.u32 %v8133_v12, 16  ;;  %v8134_v44 = vcombine.high %v8133_v12, %v11410_v16 }
0x1e19   : > { %v8716_v55 = vpop.trf.xlu1  ;;  %v8748_v7 = vcombine.high %v8747_v56, %v11410_v16  ;;  %v8777_v23 = vshrl.u32 %v8747_v56, 16  ;;  %v8162_v41 = vpack.i.b16 %v8158_v17, %v8133_v12  ;;  %v8159_v32 = vcombine.high %v8158_v17, %v11410_v16 }
0x1e1a   : > { %v8757_v0 = vcombine.low %v8652_v47, %v8716_v55  ;;  %v8164_v47 = vshrl.u32 %v8158_v17, 16  ;;  %v8169_v49 = vshrl.u32 %v8134_v44, 16 }
0x1e1b   : > { %v8783_v11 = vshrl.u32 %v8748_v7, 16  ;;  %v8170_v34 = vshrl.u32 %v8159_v32, 16  ;;  %v8168_v48 = vpack.i.b16 %v8159_v32, %v8134_v44 }
0x1e1c   : > { %v8764_v58 = vrot.slane %v8757_v0, %v11586_v26  ;;  %v8165_v43 = vpack.i.b16 %v8164_v47, %v8163_v39 }
0x1e1d   : > { %v8171_v61 = vpack.i.b16 %v8170_v34, %v8169_v49 }
0x1e1e   : > { %v8765_v62 = vcombine.low %v8756_v57, %v8764_v58 }
0x1e20   : > { %v8772_v13 = vrot.slane %v8765_v62, %v11592_v38 }
0x1e22   : > { %v8776_v4 = vpack.i.b16 %v8772_v13, %v8747_v56  ;;  %v8778_v33 = vshrl.u32 %v8772_v13, 16  ;;  %v8773_v10 = vcombine.high %v8772_v13, %v11410_v16 }
0x1e24   : > { %v8790_v35 = vsel %vm1321_vm2, %v8776_v4, 0  ;;  %v8779_v36 = vpack.i.b16 %v8778_v33, %v8777_v23  ;;  %v8782_v37 = vpack.i.b16 %v8773_v10, %v8748_v7  ;;  %v8784_v45 = vshrl.u32 %v8773_v10, 16 }
0x1e25   : > { %11095 = vmatpush3.bf16.msra.mxu0 %v8790_v35 }
0x1e26   : > { %v8836_v40 = vsel %vm1321_vm2, %v8779_v36, 0  ;;  %11106 = vmatprep.subr.bf16.mxu0 %v11404_v1  ;;  %v8785_v42 = vpack.i.b16 %v8784_v45, %v8783_v11  ;;  %v8882_v3 = vsel %vm1321_vm2, %v8782_v37, 0 }
0x1e27   : > { %11101 = vmatpush3.bf16.msra.mxu1 %v8836_v40 }
0x1e28   : > { %11097 = vmatmul.mubr.msk.bf16.vlgmr.msra.gmra.mxu0 %vm1317_vm3, %v8162_v41  ;;  %11112 = vmatprep.subr.bf16.mxu1 %v11404_v1  ;;  %v8928_v28 = vsel %vm1321_vm2, %v8785_v42, 0 }
0x1e29   : > { %11107 = vmatpush3.bf16.msra.mxu0 %v8882_v3  ;;  %11108 = vmatprep.mubr.msk.bf16.mxu0 %vm11405_vm0, %v11404_v1  ;;  %v7941_v59 = vpop.permute.xlu0 %7940 }
0x1e2a   : > { %11103 = vmatmul.mubr.msk.bf16.vlgmr.msra.gmra.mxu1 %vm1317_vm3, %v8165_v43  ;;  %11118 = vmatprep.subr.bf16.mxu0 %v11404_v1 }
0x1e2b   : > { %11113 = vmatpush3.bf16.msra.mxu1 %v8928_v28  ;;  %11114 = vmatprep.mubr.msk.bf16.mxu1 %vm11405_vm0, %v11404_v1 }
0x1e2c   : > { %11124 = vmatprep.subr.bf16.mxu1 %v11404_v1 }
0x1e2d   : > { %v7947_v29 = vpop.permute.xlu1 %7946  ;;  %v7949_v60 = vpop.permute.xlu0 %7948 }
0x1e2e   : > { %v7958_v19 = vcombine.low %v12579_v15, %v7947_v29  ;;  %v7959_v20 = vcombine.high %v12579_v15, %v7947_v29 }
0x1e30   : > { %11109 = vmatmul.mubr.msk.bf16.vlgmr.msra.gmra.mxu0 %vm1317_vm3, %v8168_v48  ;;  %v7966_v22 = vrot.slane %v7958_v19, %v11586_v26  ;;  %v7973_v50 = vrot.slane %v7959_v20, %v11586_v26 }
0x1e31   : > { %v7953_v63 = vpop.permute.xlu1 %7952  ;;  %11120 = vmatprep.mubr.msk.bf16.mxu0 %vm11405_vm0, %v11404_v1 }
0x1e32   : > { %11115 = vmatmul.mubr.msk.bf16.vlgmr.msra.gmra.mxu1 %vm1317_vm3, %v8171_v61  ;;  %v7974_v51 = vcombine.low %v7941_v59, %v7953_v63  ;;  %v7975_v52 = vcombine.high %v7941_v59, %v7953_v63 }
0x1e33   : > { %11126 = vmatprep.mubr.msk.bf16.mxu1 %vm11405_vm0, %v11404_v1 }
0x1e34   : > { %v7982_v15 = vrot.slane %v7974_v51, %v11586_v26  ;;  %v7989_v46 = vrot.slane %v7975_v52, %v11586_v26  ;;  %v8026_v51 = vcombine.low %v12583_v25, %v7949_v60 }
0x1e35   : > { %v7943_v62 = vpop.permute.xlu1 %7942 }
0x1e36   : > { %v7990_v18 = vcombine.low %v7966_v22, %v7982_v15  ;;  %v7991_v5 = vcombine.high %v7966_v22, %v7982_v15  ;;  %v8006_v2 = vcombine.low %v7973_v50, %v7989_v46  ;;  %v8007_v24 = vcombine.high %v7973_v50, %v7989_v46 }
0x1e37   : > { %v8027_v15 = vcombine.high %v12583_v25, %v7949_v60 }
0x1e38   : > { %v7998_v6 = vrot.slane %v7990_v18, %v11592_v38  ;;  %v8005_v30 = vrot.slane %v7991_v5, %v11592_v38  ;;  %v8014_v21 = vrot.slane %v8006_v2, %v11592_v38  ;;  %v8021_v14 = vrot.slane %v8007_v24, %v11592_v38 }
0x1e39   : > { %v8034_v5 = vrot.slane %v8026_v51, %v11586_v26 }
0x1e3a   : > { %v8096_v31 = vpack.c.bf16 %v8005_v30, %v8005_v30  ;;  %v8094_v53 = vpack.c.bf16 %v7998_v6, %v7998_v6  ;;  %v8023_v54 = vcombine.high %v8005_v30, %v11404_v1  ;;  %v8098_v9 = vpack.c.bf16 %v8014_v21, %v8014_v21 }
0x1e3b   : > { %v8024_v55 = vcombine.high %v8014_v21, %v11404_v1  ;;  %v8100_v8 = vpack.c.bf16 %v8021_v14, %v8021_v14  ;;  %v8022_v56 = vcombine.high %v7998_v6, %v11404_v1  ;;  %v8025_v20 = vcombine.high %v8021_v14, %v11404_v1 }
0x1e3c   : > { %9050 = vxpose.xlu0.c.b16.start.end [1/1] (short) (narrow) %v8096_v31, 16  ;;  %9018 = vxpose.xlu1.c.b16.start.end [1/1] (short) (narrow) %v8094_v53, 16  ;;  %v8097_v0 = vpack.c.bf16 %v8023_v54, %v8023_v54  ;;  %v8041_v30 = vrot.slane %v8027_v15, %v11586_v26 }
0x1e3d   : > { %v8099_v57 = vpack.c.bf16 %v8024_v55, %v8024_v55  ;;  %v8095_v58 = vpack.c.bf16 %v8022_v56, %v8022_v56  ;;  %v8101_v59 = vpack.c.bf16 %v8025_v20, %v8025_v20 }
0x1e40   : > { %9082 = vxpose.xlu0.c.b16.start.end [1/1] (short) (narrow) %v8098_v9, 16  ;;  %9066 = vxpose.xlu1.c.b16.start.end [1/1] (short) (narrow) %v8097_v0, 16 }
0x1e44   : > { %9114 = vxpose.xlu0.c.b16.start.end [1/1] (short) (narrow) %v8100_v8, 16  ;;  %9098 = vxpose.xlu1.c.b16.start.end [1/1] (short) (narrow) %v8099_v57, 16 }
0x1e48   : > { %9034 = vxpose.xlu0.c.b16.start.end [1/1] (short) (narrow) %v8095_v58, 16 }
0x1e9e   : > { %v9058_v17 = vpop.trf.xlu0  ;;  %v9026_v7 = vpop.trf.xlu1 }
0x1ea2   : > { %v9090_v13 = vpop.trf.xlu0 }
0x1ea3   : > { %v9274_v12 = vcombine.low %v9026_v7, %v9090_v13 }
0x1ea5   : > { %v12655_v33 = vrot.slane %v9274_v12, %v11586_v26 }
0x1ea6   : > { %v9122_v4 = vpop.trf.xlu0 }
0x1ea7   : > { %v9282_v23 = vcombine.low %v9058_v17, %v9122_v4  ;;  %v9074_v4 = vpop.trf.xlu1 }
0x1ea9   : > { %v12658_v10 = vrot.slane %v9282_v23, %v11586_v26 }
0x1eaa   : > { %v9042_v22 = vpop.trf.xlu0 }
0x1eab   : > { %v9306_v47 = vcombine.low %v12655_v33, %v12658_v10  ;;  %v9307_v11 = vcombine.high %v12655_v33, %v12658_v10  ;;  %v9106_v23 = vpop.trf.xlu1 }
0x1ee8   : > { %v12664_v35 = vpop.f32.mrf.mxu0 }
0x1ee9   : > { %v8970_v36 = vsel %vm2430_vm4, %v12664_v35, -inf }
0x1eea   : > { %v11098_v37 = vpop.f32.mrf.mxu0  ;;  %8971 = vmax.xlane.f32.xlu0 %v8970_v36  ;;  %v12668_v45 = vpop.f32.mrf.mxu1 }
0x1eeb   : > { %v8973_v40 = vsel %vm2430_vm4, %v12668_v45, -inf }
0x1eec   : > { %v8829_v41 = vpop.f32.mrf.mxu0  ;;  %8974 = vmax.xlane.f32.xlu1 %v8973_v40  ;;  %v11104_v39 = vpop.f32.mrf.mxu1 }
0x1eee   : > { %v11099_v42 = vpop.f32.mrf.mxu0  ;;  %v8875_v3 = vpop.f32.mrf.mxu1 }
0x1ef0   : > { %v11105_v43 = vpop.f32.mrf.mxu1  ;;  %v12672_v32 = vpop.f32.mrf.mxu0 }
0x1ef1   : > { %v8976_v61 = vsel %vm2430_vm4, %v12672_v32, -inf }
0x1ef2   : > { %v11110_v28 = vpop.f32.mrf.mxu0  ;;  %v12674_v44 = vpop.f32.mrf.mxu1 }
0x1ef3   : > { %v8979_v63 = vsel %vm2430_vm4, %v12674_v44, -inf }
0x1ef4   : > { %v8921_v34 = vpop.f32.mrf.mxu0  ;;  %v11116_v29 = vpop.f32.mrf.mxu1 }
0x1ef6   : > { %v11111_v48 = vpop.f32.mrf.mxu0  ;;  %v8967_v49 = vpop.f32.mrf.mxu1 }
0x1ef7   : > { %v9342_v48 = vcombine.low %v9042_v22, %v9106_v23 }
0x1ef8   : > { %v11117_v19 = vpop.f32.mrf.mxu1 }
0x1ef9   : > { %v9349_v51 = vrot.slane %v9342_v48, %v11586_v26 }
0x1f00   : > { %7954 = vrot.lane.b32.xlu0 %v12583_v25, %s12923_s26  ;;  %s421_s26 = sand.u32 1, %s11394_s22  }
0x1f01   : > { %s10477_s27 = sshll.u32 %s421_s26, 3  ;;  %s10389_s19 = scalar_lea.sflag [#allocation3], %s421_s26 }
0x1f02   : > { %s423_s18 = scalar_lea.vmem [#allocation2], %s10477_s27 }
0x1f03   : > { %s10402_s28 = sshll.u32 %s423_s18, 4  ;;  %s10403_s28 = int_to_ptr.vmem [resolvable:$true] %s10402_s28 }
0x1f04   : > { %s11342_s20 = scalar_lea.vmem %s10403_s28, 128 }
0x1f05   : > { %p11343_p11 = scmp.ne.s32.totalorder %s10403_s28, %s11342_s20 }
0x1f07   : > { %p11344_p12 = pnand %p11343_p11, %p11520_p5 }
0x1f09   : > { %p11345_p13 = pneg %p11344_p12 }
0x1f19   : > { %9130 = vxpose.xlu1.c.b16.start.end [1/1] (short) (narrow) %v8101_v59, 16 }
0x1f1f   : > { %8977 = vmax.xlane.f32.xlu0 %v8976_v61 }
0x1f26   : > { %8980 = vmax.xlane.f32.xlu1 %v8979_v63 }
0x1f73   : > { %v12683_v50 = vpop.xlane.xlu0 %8971 }
0x1f75   : > { %v8975_v36 = vpop.xlane.xlu1 %8974 }
0x1f77   : > { %v7955_v52 = vpop.permute.xlu0 %7954 }
0x1f78   : > { %v8042_v46 = vcombine.low %v7943_v62, %v7955_v52  ;;  %v8043_v18 = vcombine.high %v7943_v62, %v7955_v52 }
0x1f7a   : > { %v8050_v2 = vrot.slane %v8042_v46, %v11586_v26  ;;  %v8057_v6 = vrot.slane %v8043_v18, %v11586_v26 }
0x1f7b   : > { %v9138_v37 = vpop.trf.xlu1 }
0x1f7c   : > { %v8058_v24 = vcombine.low %v8034_v5, %v8050_v2  ;;  %v8059_v21 = vcombine.high %v8034_v5, %v8050_v2  ;;  %v8074_v53 = vcombine.low %v8041_v30, %v8057_v6  ;;  %v8075_v14 = vcombine.high %v8041_v30, %v8057_v6 }
0x1f7d   : > { %v9350_v34 = vcombine.low %v9074_v4, %v9138_v37  ;;  %v9314_v6 = vrot.slane %v9306_v47, %v11592_v38  ;;  %v8983_v47 = vsub.f32 %v12668_v45, %v8975_v36 }
0x1f7e   : > { %v8066_v31 = vrot.slane %v8058_v24, %v11592_v38  ;;  %v8073_v54 = vrot.slane %v8059_v21, %v11592_v38  ;;  %v8082_v8 = vrot.slane %v8074_v53, %v11592_v38  ;;  %v8089_v60 = vrot.slane %v8075_v14, %v11592_v38 }
0x1f7f   : > { %v9357_v20 = vrot.slane %v9350_v34, %v11586_v26  ;;  %v8982_v14 = vsub.f32 %v12664_v35, %v12683_v50  ;;  %v8988_v4 = vmul.f32 1.442695, %v8983_v47 }
0x1f80   : > { %v8102_v9 = vpack.c.bf16 %v8066_v31, %v8066_v31  ;;  %v8090_v25 = vcombine.high %v8066_v31, %v11404_v1  ;;  %v8091_v0 = vcombine.high %v8073_v54, %v11404_v1  ;;  %v8104_v56 = vpack.c.bf16 %v8073_v54, %v8073_v54 }
0x1f81   : > { %v8092_v58 = vcombine.high %v8082_v8, %v11404_v1  ;;  %v8106_v62 = vpack.c.bf16 %v8082_v8, %v8082_v8  ;;  %v8093_v7 = vcombine.high %v8089_v60, %v11404_v1  ;;  %v8108_v13 = vpack.c.bf16 %v8089_v60, %v8089_v60 }
0x1f82   : > { %9146 = vxpose.xlu0.c.b16.start.end [1/1] (short) (narrow) %v8102_v9, 16  ;;  %v8103_v55 = vpack.c.bf16 %v8090_v25, %v8090_v25  ;;  %v8105_v57 = vpack.c.bf16 %v8091_v0, %v8091_v0  ;;  %v9374_v18 = vcombine.low %v9349_v51, %v9357_v20  ;;  %v9375_v31 = vcombine.high %v9349_v51, %v9357_v20 }
0x1f83   : > { %v8107_v17 = vpack.c.bf16 %v8092_v58, %v8092_v58  ;;  %v8109_v12 = vpack.c.bf16 %v8093_v7, %v8093_v7  ;;  %v9321_v7 = vrot.slane %v9307_v11, %v11592_v38  ;;  %v8986_v35 = vmul.f32 1.442695, %v8982_v14 }
0x1f84   : > { %9162 = vxpose.xlu1.c.b16.start.end [1/1] (short) (narrow) %v8103_v55, 16  ;;  %v9382_v54 = vrot.slane %v9374_v18, %v11592_v38 }
0x1f85   : > { %11317 = vpow2.f32 %v8986_v35 }
0x1f86   : > { %9178 = vxpose.xlu0.c.b16.start.end [1/1] (short) (narrow) %v8104_v56, 16  ;;  %v9389_v56 = vrot.slane %v9375_v31, %v11592_v38  ;;  %11319 = vpow2.f32 %v8988_v4 }
0x1f88   : > { %9194 = vxpose.xlu1.c.b16.start.end [1/1] (short) (narrow) %v8105_v57, 16 }
0x1f8a   : > { %9210 = vxpose.xlu0.c.b16.start.end [1/1] (short) (narrow) %v8106_v62, 16 }
0x1f8c   : > { %9226 = vxpose.xlu1.c.b16.start.end [1/1] (short) (narrow) %v8107_v17, 16 }
0x1f8e   : > { %9242 = vxpose.xlu0.c.b16.start.end [1/1] (short) (narrow) %v8108_v13, 16 }
0x1f90   : > { %9258 = vxpose.xlu1.c.b16.start.end [1/1] (short) (narrow) %v8109_v12, 16 }
0x1fa8   : > { %v8978_v40 = vpop.xlane.xlu0 %8977 }
0x1fa9   : > { %v8984_v50 = vsub.f32 %v12672_v32, %v8978_v40 }
0x1faf   : > { %v8981_v41 = vpop.xlane.xlu1 %8980 }
0x1fb0   : > { %v8985_v23 = vsub.f32 %v12674_v44, %v8981_v41  ;;  %v11318_v44 = vpop.eup %11317 }
0x1fb1   : > { %v11320_v41 = vpop.eup %11319 }
0x1fb2   : > { %v8992_v10 = vmul.f32 1.442695, %v8985_v23  ;;  %v8997_v34 = vsel %vm2430_vm4, %v11320_v41, 0.0 }
0x1fe4   : > { %v9154_v39 = vpop.trf.xlu0 }
0x1fe6   : > { %v9170_v42 = vpop.trf.xlu1 }
0x1fe8   : > { %v9186_v3 = vpop.trf.xlu0 }
0x1fea   : > { %v9202_v43 = vpop.trf.xlu1 }
0x1fec   : > { %v9218_v28 = vpop.trf.xlu0 }
0x1fed   : > { %v9290_v49 = vcombine.low %v9154_v39, %v9218_v28 }
0x1fee   : > { %v9234_v29 = vpop.trf.xlu1 }
0x1fef   : > { %v9358_v59 = vcombine.low %v9170_v42, %v9234_v29  ;;  %v9297_v52 = vrot.slane %v9290_v49, %v11586_v26  ;;  %v8990_v42 = vmul.f32 1.442695, %v8984_v50 }
0x1ff0   : > { %v9250_v19 = vpop.trf.xlu0 }
0x1ff1   : > { %v9298_v61 = vcombine.low %v9186_v3, %v9250_v19  ;;  %v9365_v5 = vrot.slane %v9358_v59, %v11586_v26  ;;  %11321 = vpow2.f32 %v8990_v42 }
0x1ff2   : > { %v9266_v63 = vpop.trf.xlu1  ;;  %11323 = vpow2.f32 %v8992_v10 }
0x1ff3   : > { %v9305_v15 = vrot.slane %v9298_v61, %v11586_v26  ;;  %v9366_v46 = vcombine.low %v9202_v43, %v9266_v63  ;;  %v8994_v43 = vsel %vm2430_vm4, %v11318_v44, 0.0 }
0x1ff5   : > { %v9322_v2 = vcombine.low %v9297_v52, %v9305_v15  ;;  %v9373_v22 = vrot.slane %v9366_v46, %v11586_v26  ;;  %v9323_v53 = vcombine.high %v9297_v52, %v9305_v15 }
0x1ff7   : > { %v9330_v30 = vrot.slane %v9322_v2, %v11592_v38  ;;  %v9390_v24 = vcombine.low %v9365_v5, %v9373_v22  ;;  %v9391_v21 = vcombine.high %v9365_v5, %v9373_v22  ;;  %v9337_v57 = vrot.slane %v9323_v53, %v11592_v38 }
0x1ff9   : > { %v9398_v9 = vrot.slane %v9390_v24, %v11592_v38  ;;  %v9338_v25 = vcombine.low %v9314_v6, %v9330_v30  ;;  %v9405_v55 = vrot.slane %v9391_v21, %v11592_v38  ;;  %v9339_v17 = vcombine.high %v9314_v6, %v9330_v30 }
0x1ffa   : > { %v9340_v39 = vcombine.low %v9321_v7, %v9337_v57  ;;  %v9341_v20 = vcombine.high %v9321_v7, %v9337_v57 }
0x1ffb   : > { %v9406_v0 = vcombine.low %v9382_v54, %v9398_v9  ;;  %v9407_v8 = vcombine.high %v9382_v54, %v9398_v9  ;;  %v9414_v60 = vshrl.u32 %v9338_v25, 16  ;;  %v9408_v45 = vcombine.low %v9389_v56, %v9405_v55 }
0x1ffc   : > { %v9422_v37 = vshrl.u32 %v9339_v17, 16  ;;  %v9430_v32 = vshrl.u32 %v9340_v39, 16  ;;  %v9409_v19 = vcombine.high %v9389_v56, %v9405_v55  ;;  %v9438_v63 = vshrl.u32 %v9341_v20, 16 }
0x1ffd   : > { %v9412_v58 = vpack.i.b16 %v9406_v0, %v9338_v25  ;;  %v9415_v62 = vshrl.u32 %v9406_v0, 16  ;;  %v9423_v12 = vshrl.u32 %v9407_v8, 16  ;;  %v9420_v36 = vpack.i.b16 %v9407_v8, %v9339_v17 }
0x1ffe   : > { %v9431_v33 = vshrl.u32 %v9408_v45, 16  ;;  %v9428_v11 = vpack.i.b16 %v9408_v45, %v9340_v39  ;;  %v11322_v28 = vpop.eup %11321  ;;  %v9439_v59 = vshrl.u32 %v9409_v19, 16  ;;  %v9436_v61 = vpack.i.b16 %v9409_v19, %v9341_v20 }
0x1fff   : > { %9442 = vxpose.xlu0.c.b16.start.end [1/1] (short) (narrow) %v9412_v58, 16  ;;  %v9416_v13 = vpack.i.b16 %v9415_v62, %v9414_v60  ;;  %v9424_v3 = vpack.i.b16 %v9423_v12, %v9422_v37  ;;  %v11324_v29 = vpop.eup %11323  ;;  %v9000_v48 = vsel %vm2430_vm4, %v11322_v28, 0.0 }
0x2000   : > { %v9432_v40 = vpack.i.b16 %v9431_v33, %v9430_v32  ;;  %v9003_v49 = vsel %vm2430_vm4, %v11324_v29, 0.0  ;;  %v9440_v51 = vpack.i.b16 %v9439_v59, %v9438_v63 }
0x2001   : > { %9458 = vxpose.xlu1.c.b16.start.end [1/1] (short) (narrow) %v9416_v13, 16 }
0x2003   : > { %9474 = vxpose.xlu0.c.b16.start.end [1/1] (short) (narrow) %v9420_v36, 16 }
0x2005   : > { %9490 = vxpose.xlu1.c.b16.start.end [1/1] (short) (narrow) %v9424_v3, 16 }
0x2007   : > { %9506 = vxpose.xlu0.c.b16.start.end [1/1] (short) (narrow) %v9428_v11, 16 }
0x2009   : > { %9522 = vxpose.xlu1.c.b16.start.end [1/1] (short) (narrow) %v9432_v40, 16 }
0x2014   : > { %8995 = vadd.xlane.f32.xlu0 %v8994_v43 }
0x2016   : > { %8998 = vadd.xlane.f32.xlu1 %v8997_v34 }
0x2018   : > { %9001 = vadd.xlane.f32.xlu0 %v9000_v48 }
0x201a   : > { %9004 = vadd.xlane.f32.xlu1 %v9003_v49 }
0x2045   : > { %9538 = vxpose.xlu0.c.b16.start.end [1/1] (short) (narrow) %v9436_v61, 16 }
0x2047   : > { %9554 = vxpose.xlu1.c.b16.start.end [1/1] (short) (narrow) %v9440_v51, 16 }
0x2061   : > { %v9450_v52 = vpop.trf.xlu0 }
0x2063   : > { %v9466_v15 = vpop.trf.xlu1 }
0x2065   : > { %v9482_v46 = vpop.trf.xlu0 }
0x2067   : > { %v9498_v18 = vpop.trf.xlu1 }
0x2069   : > { %v9514_v5 = vpop.trf.xlu0 }
0x206a   : > { %v9570_v54 = vcombine.low %v9450_v52, %v9514_v5 }
0x206b   : > { %v9530_v2 = vpop.trf.xlu1 }
0x206c   : > { %v9595_v31 = vcombine.low %v9466_v15, %v9530_v2  ;;  %v9577_v57 = vrot.slane %v9570_v54, %v11586_v26 }
0x206e   : > { %v9602_v0 = vrot.slane %v9595_v31, %v11586_v26 }
0x209d   : > { %v8996_v22 = vpop.xlane.xlu0 %8995 }
0x209e   : > { %11325 = vrcp.f32 %v8996_v22 }
0x209f   : > { %v8999_v6 = vpop.xlane.xlu1 %8998 }
0x20a0   : > { %11327 = vrcp.f32 %v8999_v6 }
0x20a1   : > { %v9002_v30 = vpop.xlane.xlu0 %9001 }
0x20a2   : > { %11329 = vrcp.f32 %v9002_v30 }
0x20a3   : > { %v9005_v24 = vpop.xlane.xlu1 %9004 }
0x20a4   : > { %11331 = vrcp.f32 %v9005_v24 }
0x20a7   : > { %v9546_v21 = vpop.trf.xlu0 }
0x20a8   : > { %v9578_v53 = vcombine.low %v9482_v46, %v9546_v21 }
0x20a9   : > { %v9562_v9 = vpop.trf.xlu1 }
0x20aa   : > { %v9603_v25 = vcombine.low %v9498_v18, %v9562_v9  ;;  %v9585_v55 = vrot.slane %v9578_v53, %v11586_v26 }
0x20ab   : > { %v11326_v14 = vpop.eup %11325 }
0x20ac   : > { %v9610_v8 = vrot.slane %v9603_v25, %v11586_v26  ;;  %v9007_v47 = vmul.f32 %v11326_v14, %v11318_v44  ;;  %v9586_v7 = vcombine.low %v9577_v57, %v9585_v55  ;;  %v11253_v57 = vld [vmem:[%s12886_s4 + $0xb8] sm:$0xff]  }
0x20ad   : > { %v11328_v56 = vpop.eup %11327 }
0x20ae   : > { %v9611_v58 = vcombine.low %v9602_v0, %v9610_v8  ;;  %v9014_v60 = vpack.c.bf16 %v9007_v47, %v9007_v47  ;;  %v9009_v62 = vmul.f32 %v11328_v56, %v11320_v41  ;;  %v9593_v4 = vrot.slane %v9586_v7, %v11592_v38 }
0x20af   : > { %v11330_v17 = vpop.eup %11329 }
0x20b0   : > { %v9636_v35 = vsel %vm2430_vm4, %v9014_v60, 0  ;;  %v9618_v13 = vrot.slane %v9611_v58, %v11592_v38  ;;  %v9015_v12 = vpack.c.bf16 %v9009_v62, %v9009_v62  ;;  %v9011_v45 = vmul.f32 %v11330_v17, %v11322_v28 }
0x20b1   : > { %v11332_v50 = vpop.eup %11331  ;;  %11119 = vmatpush3.bf16.xpose.msra.mxu0 %v9636_v35  ;;  %v9623_v3 = vshrl.u32 %v9593_v4, 16  ;;  %v9594_v40 = vcombine.high %v9593_v4, %v11410_v16 }
0x20b2   : > { %11130 = vmatprep.subr.bf16.mxu0 %v11404_v1  ;;  %v9682_v23 = vsel %vm2430_vm4, %v9015_v12, 0  ;;  %v9013_v36 = vmul.f32 %v11332_v50, %v11324_v29  ;;  %v9016_v37 = vpack.c.bf16 %v9011_v45, %v9011_v45  ;;  %v9624_v39 = vshrl.u32 %v9618_v13, 16 }
0x20b3   : > { %11125 = vmatpush3.bf16.xpose.msra.mxu1 %v9682_v23  ;;  %v9622_v42 = vpack.i.b16 %v9618_v13, %v9593_v4  ;;  %v9619_v11 = vcombine.high %v9618_v13, %v11410_v16  ;;  %v9629_v28 = vshrl.u32 %v9594_v40, 16 }
0x20b4   : > { %11136 = vmatprep.subr.bf16.mxu1 %v11404_v1  ;;  %v9017_v33 = vpack.c.bf16 %v9013_v36, %v9013_v36  ;;  %v9728_v10 = vsel %vm2430_vm4, %v9016_v37, 0  ;;  %v9625_v32 = vpack.i.b16 %v9624_v39, %v9623_v3  ;;  %v11254_v36 = vld [vmem:[%s12886_s4 + $0xb0] sm:$0xff]  }
0x20b5   : > { %v9630_v41 = vshrl.u32 %v9619_v11, 16  ;;  %v9628_v43 = vpack.i.b16 %v9619_v11, %v9594_v40 }
0x20b6   : > { %v9774_v44 = vsel %vm2430_vm4, %v9017_v33, 0 }
0x20b7   : > { %v9631_v34 = vpack.i.b16 %v9630_v41, %v9629_v28 }
0x20b8   : > { %11121 = vmatmul.mubr.msk.bf16.vlgmr.msra.gmra.mxu0 %vm2430_vm4, %v9622_v42 }
0x20b9   : > { %11131 = vmatpush3.bf16.xpose.msra.mxu0 %v9728_v10  ;;  %11132 = vmatprep.mubr.msk.bf16.mxu0 %vm11405_vm0, %v11404_v1 }
0x20ba   : > { %11142 = vmatprep.subr.bf16.mxu0 %v11404_v1  ;;  %11127 = vmatmul.mubr.msk.bf16.vlgmr.msra.gmra.mxu1 %vm2430_vm4, %v9625_v32 }
0x20bb   : > { %11137 = vmatpush3.bf16.xpose.msra.mxu1 %v9774_v44  ;;  %11138 = vmatprep.mubr.msk.bf16.mxu1 %vm11405_vm0, %v11404_v1 }
0x20bc   : > { %11150 = vmatprep.subr.bf16.mxu1 %v11404_v1 }
0x20c0   : > { %11133 = vmatmul.mubr.msk.bf16.vlgmr.msra.gmra.mxu0 %vm2430_vm4, %v9628_v43 }
0x20c1   : > { %11146 = vmatprep.mubr.msk.bf16.mxu0 %vm11405_vm0, %v11404_v1  ;;  %11143 = vmatpush3.bf16.msra.mxu0 %v11253_v57 }
0x20c2   : > { %11139 = vmatmul.mubr.msk.bf16.vlgmr.msra.gmra.mxu1 %vm2430_vm4, %v9631_v34  ;;  %11144 = vmatprep.subr.bf16.mxu0 %v11404_v1 }
0x20c3   : > { %11154 = vmatprep.mubr.msk.bf16.mxu1 %vm11405_vm0, %v11404_v1 }
0x20c5   : > { %11145 = vmatpush3.bf16.msra.mxu0 %v11254_v36 }
0x20c6   : > { %11158 = vmatprep.subr.bf16.mxu0 %v11404_v1 }
0x2178   : > { %v9672_v16 = vpop.f32.mrf.mxu0 }
0x2179   : > { %9816 = vxpose.xlu0.b32.start.end [1/1] (short) (narrow) %v9672_v16, 8 }
0x217a   : > { %v11122_v29 = vpop.f32.mrf.mxu0  ;;  %v9718_v48 = vpop.f32.mrf.mxu1 }
0x217b   : > { %9848 = vxpose.xlu1.b32.start.end [1/1] (short) (narrow) %v9718_v48, 8 }
0x217c   : > { %v9675_v49 = vpop.f32.mrf.mxu0  ;;  %v11128_v19 = vpop.f32.mrf.mxu1 }
0x217d   : > { %v10663_v49 = vld [vmem:[%s12891_s9 + $0xd] ss:$0 sm:$0xff] }
0x217e   : > { %v11123_v20 = vpop.f32.mrf.mxu0  ;;  %v9721_v59 = vpop.f32.mrf.mxu1 }
0x2180   : > { %v9764_v61 = vpop.f32.mrf.mxu0  ;;  %v11129_v63 = vpop.f32.mrf.mxu1 }
0x2181   : > { %9880 = vxpose.xlu0.b32.start.end [1/1] (short) (narrow) %v9764_v61, 8 }
0x2182   : > { %v11134_v51 = vpop.f32.mrf.mxu0  ;;  %v9810_v52 = vpop.f32.mrf.mxu1 }
0x2184   : > { %v9767_v15 = vpop.f32.mrf.mxu0  ;;  %v11140_v46 = vpop.f32.mrf.mxu1 }
0x2185   : > { %9912 = vxpose.xlu0.b32.start.end [1/1] (short) (narrow) %v9810_v52, 8 }
0x2186   : > { %v11135_v18 = vpop.f32.mrf.mxu0  ;;  %v9813_v5 = vpop.f32.mrf.mxu1 }
0x2188   : > { %v11141_v2 = vpop.f32.mrf.mxu1 }
0x21f5   : > { %v9832_v22 = vpop.trf.xlu0 }
0x21f7   : > { %v9864_v30 = vpop.trf.xlu1 }
0x21fd   : > { %v9896_v6 = vpop.trf.xlu0 }
0x21fe   : > { %v9944_v24 = vcombine.low %v9832_v22, %v9896_v6  ;;  %v9945_v21 = vcombine.high %v9832_v22, %v9896_v6  ;;  %v11255_v22 = vld [vmem:[%s12887_s5 + $0x18] sm:$0xff]  }
0x21ff   : > { %11151 = vmatpush3.bf16.msra.mxu1 %v11255_v22  ;;  %v11257_v6 = vld [vmem:[%s12888_s6 + $0x38] sm:$0xff]  }
0x2200   : > { %v9952_v9 = vrot.slane %v9944_v24, %v11586_v26  ;;  %v9959_v25 = vrot.slane %v9945_v21, %v11586_v26  ;;  %11152 = vmatprep.subr.bf16.mxu1 %v11404_v1 }
0x2201   : > { %v9928_v31 = vpop.trf.xlu0 }
0x2202   : > { %v9960_v53 = vcombine.low %v9864_v30, %v9928_v31  ;;  %v9961_v54 = vcombine.high %v9864_v30, %v9928_v31  ;;  %v11258_v30 = vld [vmem:[%s12888_s6 + $0x30] sm:$0xff]  }
0x2204   : > { %v9968_v14 = vrot.slane %v9960_v53, %v11586_v26  ;;  %v9975_v55 = vrot.slane %v9961_v54, %v11586_v26  ;;  %v10669_v54 = vld [vmem:[%s12892_s10 + $0xa] ss:$0 sm:$0xff] }
0x2206   : > { %v9976_v0 = vcombine.low %v9952_v9, %v9968_v14  ;;  %v9977_v8 = vcombine.high %v9952_v9, %v9968_v14  ;;  %v9992_v47 = vcombine.low %v9959_v25, %v9975_v55  ;;  %v9993_v56 = vcombine.high %v9959_v25, %v9975_v55  ;;  %v10670_v25 = vld [vmem:[%s12892_s10 + $0xb] ss:$0 sm:$0xff] }
0x2208   : > { %v9984_v58 = vrot.slane %v9976_v0, %v11592_v38  ;;  %v9991_v60 = vrot.slane %v9977_v8, %v11592_v38  ;;  %v10000_v62 = vrot.slane %v9992_v47, %v11592_v38  ;;  %v10007_v17 = vrot.slane %v9993_v56, %v11592_v38  ;;  %v11259_v8 = vld [vmem:[%s12888_s6 + $0x28] sm:$0xff]   ;;  %v11260_v47 = vld [vmem:[%s12888_s6 + $0x20] sm:$0xff]  }
0x2209   : > { %v10675_v56 = vld [vmem:[%s12890_s8 + $0x1] ss:$0 sm:$0xff] }
0x220a   : > { %v10012_v7 = vcombine.low %v9984_v58, %v9991_v60  ;;  %v10656_v35 = vcombine.high %v9984_v58, %v9991_v60  ;;  %v10028_v50 = vcombine.low %v10000_v62, %v10007_v17  ;;  %v10657_v13 = vcombine.high %v10000_v62, %v10007_v17 }
0x220c   : > { %v10019_v12 = vrot.slane %v10012_v7, %v11586_v26  ;;  %v10027_v45 = vrot.slane %v10656_v35, %v11586_v26  ;;  %v10035_v4 = vrot.slane %v10028_v50, %v11586_v26  ;;  %v10043_v23 = vrot.slane %v10657_v13, %v11586_v26  ;;  %v10688_v50 = vld [vmem:[%s12891_s9 + $0xe] ss:$0 sm:$0xff] }
0x220e   : > { %v10045_v37 = vcombine.high %v10019_v12, %v10027_v45  ;;  %v10061_v39 = vcombine.high %v10035_v4, %v10043_v23  ;;  %v10044_v42 = vcombine.low %v10019_v12, %v10027_v45  ;;  %v10060_v3 = vcombine.low %v10035_v4, %v10043_v23 }
0x2210   : > { %v10059_v33 = vrot.slane %v10045_v37, %v11592_v38  ;;  %v10075_v10 = vrot.slane %v10061_v39, %v11592_v38  ;;  %v10052_v11 = vrot.slane %v10044_v42, %v11592_v38  ;;  %v10068_v32 = vrot.slane %v10060_v3, %v11592_v38 }
0x2212   : > { %v10078_v26 = vcombine.low %v10059_v33, %v10075_v10  ;;  %v10077_v40 = vcombine.high %v10052_v11, %v10068_v32  ;;  %v10076_v44 = vcombine.low %v10052_v11, %v10068_v32  ;;  %v10079_v41 = vcombine.high %v10059_v33, %v10075_v10 }
0x2214   : > { %10085 = vrot.lane.b32.xlu0 %v10078_v26, %s12924_s29  ;;  %10081 = vrot.lane.b32.xlu1 %v10077_v40, %s12925_s16  ;;  %v10696_v40 = vld [vmem:[%s12892_s10 + $0xc] ss:$0 sm:$0xff]  ;;  %s11416_s29 = smov [#allocation2]  }
0x2215   : > { %s11346_s16 = sshll.u32 %s11416_s29, 4  ;;  %s11347_s16 = int_to_ptr.vmem [resolvable:$false] %s11346_s16 }
0x2216   : > { %s11348_s25 = scalar_lea.vmem %s11347_s16, 256  ;;  %p11349_p0 = scmp.lt.s32.totalorder %s10403_s28, %s11347_s16 }
0x2217   : > { %p11350_p1 = scmp.lt.s32.totalorder %s11348_s25, %s11342_s20 }
0x2218   : > { %10089 = vrot.lane.b32.xlu1 %v10079_v41, %s12926_s30  ;;  %v10697_v41 = vld [vmem:[%s12892_s10 + $0xd] ss:$0 sm:$0xff] }
0x2219   : > { %p11351_p2 = por %p11350_p1, %p11349_p0 }
0x221b   : > { %p11352_p3 = pnand %p11351_p2, %p11345_p13 }
0x2286   : > { %v10082_v43 = vpop.permute.xlu1 %10081  ;;  %v10086_v28 = vpop.permute.xlu0 %10085 }
0x2287   : > { %v10092_v34 = vsel %vm1317_vm3, %v10076_v44, %v10082_v43 }
0x2288   : > { %v10093_v29 = vsel %vm2430_vm4, %v10092_v34, %v10086_v28 }
0x228a   : > { %v10090_v16 = vpop.permute.xlu1 %10089 }
0x228b   : > { %v10094_v48 = vsel %vm2432_vm5, %v10093_v29, %v10090_v16 }
0x228c   : > { %v10095_v38 = vpack.c.bf16 %v10094_v48, %v10094_v48 }
0x228e   : > { %11147 = vmatmul.mubr.msk.bf16.vlgmr.msra.gmra.mxu0 %vm469_vm1, %v10095_v38 }
0x228f   : > { %11166 = vmatprep.mubr.msk.bf16.mxu0 %vm11405_vm0, %v11404_v1  ;;  %11159 = vmatpush3.bf16.msra.mxu0 %v11257_v6 }
0x2290   : > { %11160 = vmatprep.subr.bf16.mxu0 %v11404_v1 }
0x2293   : > { %11161 = vmatpush3.bf16.msra.mxu0 %v11258_v30 }
0x2294   : > { %11162 = vmatprep.subr.bf16.mxu0 %v11404_v1 }
0x2297   : > { %11163 = vmatpush3.bf16.msra.mxu0 %v11259_v8 }
0x2298   : > { %11164 = vmatprep.subr.bf16.mxu0 %v11404_v1 }
0x229b   : > { %11165 = vmatpush3.bf16.msra.mxu0 %v11260_v47 }
0x234e   : > { %v10155_v19 = vpop.f32.mrf.mxu0 }
0x234f   : > { %v10156_v20 = vadd.f32 %v10663_v49, %v10155_v19 }
0x2350   : > { %v11148_v59 = vpop.f32.mrf.mxu0 }
0x2351   : > { %v10161_v61 = vadd.f32 %v10156_v20, %v12519_v27  ;;  %v11256_v27 = vld [vmem:[%s12887_s5 + $0x10] sm:$0xff]  }
0x2352   : > { %v10158_v63 = vpop.f32.mrf.mxu0  ;;  %11153 = vmatpush3.bf16.msra.mxu1 %v11256_v27 }
0x2353   : > { %v10164_v51 = vsel %vm469_vm1, %v10161_v61, 0.0  ;;  %v10698_v63 = vld [vmem:[%s12893_s11] ss:$0 sm:$0xff] }
0x2354   : > { %10165 = vadd.xlane.f32.xlu1 %v10164_v51  ;;  %v11149_v52 = vpop.f32.mrf.mxu0 }
0x2355   : > { %v10699_v52 = vld [vmem:[%s12893_s11 + $0x1] ss:$0 sm:$0xff] }
0x23dd   : > { %v10166_v15 = vpop.xlane.xlu1 %10165 }
0x23de   : > { %v10167_v46 = vmul.f32 0.03125, %v10166_v15 }
0x23e0   : > { %v10168_v18 = vsub.f32 %v10161_v61, %v10167_v46 }
0x23e2   : > { %v10169_v5 = vmul.f32 %v10168_v18, %v10168_v18 }
0x23e4   : > { %v10170_v2 = vsel %vm469_vm1, %v10169_v5, 0.0 }
0x23e5   : > { %10171 = vadd.xlane.f32.xlu0 %v10170_v2 }
0x246e   : > { %v10172_v24 = vpop.xlane.xlu0 %10171 }
0x246f   : > { %v10173_v21 = vmul.f32 0.03125, %v10172_v24 }
0x2471   : > { %v10174_v31 = vadd.f32 1e-05, %v10173_v21 }
0x2473   : > { %11333 = vrsqrt.f32 %v10174_v31 }
0x2480   : > { %v11334_v53 = vpop.eup %11333 }
0x2481   : > { %v10176_v9 = vmul.f32 %v11334_v53, %v10168_v18 }
0x2483   : > { %v10181_v14 = vmul.f32 %v10669_v54, %v10176_v9 }
0x2485   : > { %v10186_v55 = vadd.f32 %v10670_v25, %v10181_v14 }
0x2487   : > { %v10187_v0 = vpack.c.bf16 %v10186_v55, %v10186_v55 }
0x2489   : > { %11155 = vmatmul.mubr.msk.bf16.vlgmr.msra.gmra.mxu1 %vm469_vm1, %v10187_v0 }
0x2549   : > { %v10247_v57 = vpop.f32.mrf.mxu1 }
0x254a   : > { %v10248_v58 = vadd.f32 %v10675_v56, %v10247_v57 }
0x254b   : > { %v11156_v60 = vpop.f32.mrf.mxu1 }
0x254c   : > { %v10253_v62 = vmax.f32 %v10248_v58, 0.0 }
0x254d   : > { %v10250_v17 = vpop.f32.mrf.mxu1 }
0x254e   : > { %v10254_v7 = vpack.c.bf16 %v10253_v62, %v10253_v62 }
0x254f   : > { %v11157_v35 = vpop.f32.mrf.mxu1 }
0x2550   : > { %11167 = vmatmul.mubr.msk.bf16.vlgmr.msra.gmra.mxu0 %vm5337_vm6, %v10254_v7 }
0x2610   : > { %v10330_v13 = vpop.f32.mrf.mxu0 }
0x2611   : > { %v10331_v1 = vadd.f32 %v10688_v50, %v10330_v13 }
0x2612   : > { %v11168_v12 = vpop.f32.mrf.mxu0 }
0x2613   : > { %v10336_v45 = vadd.f32 %v10331_v1, %v10186_v55 }
0x2614   : > { %v10333_v4 = vpop.f32.mrf.mxu0 }
0x2615   : > { %v10339_v23 = vsel %vm469_vm1, %v10336_v45, 0.0 }
0x2616   : > { %10340 = vadd.xlane.f32.xlu1 %v10339_v23  ;;  %v11169_v36 = vpop.f32.mrf.mxu0 }
0x269f   : > { %v10341_v37 = vpop.xlane.xlu1 %10340 }
0x26a0   : > { %v10342_v39 = vmul.f32 0.03125, %v10341_v37 }
0x26a2   : > { %v10343_v42 = vsub.f32 %v10336_v45, %v10342_v39 }
0x26a4   : > { %v10344_v3 = vmul.f32 %v10343_v42, %v10343_v42 }
0x26a6   : > { %v10345_v33 = vsel %vm469_vm1, %v10344_v3, 0.0 }
0x26a7   : > { %10346 = vadd.xlane.f32.xlu0 %v10345_v33 }
0x2730   : > { %v10347_v10 = vpop.xlane.xlu0 %10346 }
0x2731   : > { %v10348_v11 = vmul.f32 0.03125, %v10347_v10 }
0x2733   : > { %v10349_v32 = vadd.f32 1e-05, %v10348_v11 }
0x2735   : > { %11335 = vrsqrt.f32 %v10349_v32 }
0x2742   : > { %v11336_v26 = vpop.eup %11335 }
0x2743   : > { %v10351_v44 = vmul.f32 %v11336_v26, %v10343_v42 }
0x2745   : > { %v10356_v43 = vmul.f32 %v10696_v40, %v10351_v44 }
0x2747   : > { %v10361_v28 = vadd.f32 %v10697_v41, %v10356_v43 }
0x2749   : > { %v10364_v34 = vsel %vm469_vm1, %v10361_v28, 0.0 }
0x274a   : > { %10365 = vadd.xlane.f32.xlu1 %v10364_v34 }
0x27d3   : > { %v10366_v16 = vpop.xlane.xlu1 %10365 }
0x27d4   : > { %v10367_v29 = vmul.f32 0.03125, %v10366_v16 }
0x27d6   : > { %v10368_v48 = vsub.f32 %v10361_v28, %v10367_v29 }
0x27d8   : > { %v10369_v38 = vmul.f32 %v10368_v48, %v10368_v48 }
0x27da   : > { %v10370_v49 = vsel %vm469_vm1, %v10369_v38, 0.0 }
0x27db   : > { %10371 = vadd.xlane.f32.xlu0 %v10370_v49 }
0x2864   : > { %v10372_v19 = vpop.xlane.xlu0 %10371 }
0x2865   : > { %v10373_v20 = vmul.f32 0.03125, %v10372_v19 }
0x2867   : > { %v10374_v59 = vadd.f32 1e-05, %v10373_v20 }
0x2869   : > { %11337 = vrsqrt.f32 %v10374_v59 }
0x2876   : > { %v11338_v61 = vpop.eup %11337 }
0x2877   : > { %v10376_v51 = vmul.f32 %v11338_v61, %v10368_v48 }
0x2879   : > { %v10381_v15 = vmul.f32 %v10698_v63, %v10376_v51 }
0x287b   : > { %v10386_v46 = vadd.f32 %v10699_v52, %v10381_v15 }
0x287d   : > { %10387 = vst.msk [vmem:[%s423_s18] sm:$0xff] %vm469_vm1, %v10386_v46 }
0x287e   : > { %11355 = shalt.err (!%p11352_p3)
}
0x287f   : > { %s11356_s27 = scalar_lea.hbm %s10400_s23, 128  ;;  %s11360_s15 = scalar_lea.hbm %s12894_s12, 256 }
0x2880   : > { %p11357_p4 = scmp.ne.s32.totalorder %s10400_s23, %s11356_s27  ;;  %p11361_p9 = scmp.lt.s32.totalorder %s10400_s23, %s12894_s12 }
0x2881   : > { %p11362_p10 = scmp.lt.s32.totalorder %s11360_s15, %s11356_s27 }
0x2882   : > { %p11358_p7 = pnand %p11357_p4, %p11520_p5 }
0x2883   : > { %p11363_p11 = por %p11362_p10, %p11361_p9 }
0x2884   : > { %p11359_p8 = pneg %p11358_p7 }
0x2886   : > { %p11364_p12 = pnand %p11363_p11, %p11359_p8 }
0x2888   : > { %11367 = shalt.err (!%p11364_p12)
}
0x2889   : > { %11170 = dma.vmem_to_hbm [thread:$0]  (%p11520_p5), %s10403_s28, 128, %s10400_s23, %s10389_s19  }
0x288a PF: > { %p11176_p13 = scmp.ge.s32.totalorder %s11402_s24, 2  ;;  %s10414_s0 = sand.u32 1, %s11390_s21  }
0x288b   : > { %s10415_s1 = scalar_lea.sflag [#allocation3], %s10414_s0 }
0x288c   : > { %p11173_p0 = pnand %p11176_p13, %p11524_p6 }
0x288e   : > { %p11174_p1 = pneg %p11173_p0 }
0x2890   : > { %11385 = dma.done.wait (%p11174_p1), %s10415_s1, 128  }
0x2891   : > { %11387 = vsyncadd (%p11174_p1), %s10415_s1, 4294967168  ;;  %s12928_s24 = sld [smem:[#allocation6_spill]]  ;;  %s12931_s21 = smov %s11394_s22 }
0x2892   : > { %s12929_s20 = sld [smem:[#allocation5_spill]] }
0x2893   : > { %s12930_s23 = sld [smem:[#allocation7_spill]] }
0x2897   : > { %p22_p2 = scmp.ge.s32.totalorder %s12928_s24, 4  }
0x2898   : > { %s12932_s22 = smov %s12929_s20 }
0x2899   :  { %24 = sbr.rel (!%p22_p2) target bundleno = 6 (0x6), region = 122 }
0x289e   :  { %10420 = vsyncpa [#allocation3], 1 }
0x289f   :  { %10422 = vsyncpa [#allocation3 + $0x1], 1 }

</bundles_post_ra>
